<compile_context>
chip_gen: v7x
topology: tpu7x:2x2x1
jax: 0.10.0
libtpu: 0.0.40
codegen_flags: <defaults>
</compile_context>

<pallas_src>
import jax
import jax.numpy as jnp
import numpy as np
from jax.experimental import pallas as pl
from jax.experimental.pallas import tpu as pltpu

NUM_POINTS = 2048     # fixed by the architecture: MaxPool1d(2048), 6144 = 3*2048
NUM_PT_TILES = 2      # encoder point-axis split (both tiles "parallel")
PT = NUM_POINTS // NUM_PT_TILES
TNO = 3072            # decoder output tile width (6144 / 3072 = 2 tiles)
EPS = 1e-5


def _full_spec(arr):
    """BlockSpec covering the whole (small) array, independent of grid index."""
    nd = arr.ndim
    return pl.BlockSpec(arr.shape, lambda *_, _nd=nd: (0,) * _nd)


# ---------------------------------------------------------------------------
# Encoder kernel: channels-first per-point MLP (1x1 convs, BN folded) + a
# partial max over this point tile.  grid = (B, NUM_PT_TILES), both parallel.
# ---------------------------------------------------------------------------
def _encoder_kernel(x_ref, w1_ref, b1, w2, b2, w3, b3, w4, b4, pmax_ref):
    x = x_ref[0]                                   # (3, PT) f32, points on lanes

    # conv1 (Cin=3): VPU broadcast-MACs; an MXU dot would pad K=3 wastefully.
    h = w1_ref[0] * x[0:1, :]                      # (64,1)*(1,PT) -> (64,PT)
    h = h + w1_ref[1] * x[1:2, :]
    h = h + w1_ref[2] * x[2:3, :]
    h = jnp.maximum(h + b1[...], 0.0).astype(jnp.bfloat16)       # conv1+BN+ReLU

    # conv2/3/4: MXU; channels on sublanes, points on lanes, bf16 operands.
    h = jnp.dot(w2[...], h, preferred_element_type=jnp.float32)
    h = jnp.maximum(h + b2[...], 0.0).astype(jnp.bfloat16)       # conv2+BN+ReLU
    h = jnp.dot(w3[...], h, preferred_element_type=jnp.float32)
    h = jnp.maximum(h + b3[...], 0.0).astype(jnp.bfloat16)       # conv3+BN+ReLU
    h = jnp.dot(w4[...], h, preferred_element_type=jnp.float32)
    h = h + b4[...]                                # conv4+BN (no ReLU)

    # Partial MaxPool over this point tile; tiles combined in plain JAX.
    pmax_ref[0, 0] = jnp.max(h, axis=1, keepdims=True)           # (128, 1)


def encoder_pallas(x, enc_params):
    """x: (B, 3, NUM_POINTS) float32 (NCL, like torch)  ->  gfv (B, 128) f32."""
    B = x.shape[0]

    in_specs = [pl.BlockSpec((1, 3, PT), lambda b, t: (b, 0, t))]
    in_specs += [_full_spec(p) for p in enc_params]

    pmax = pl.pallas_call(
        _encoder_kernel,
        out_shape=jax.ShapeDtypeStruct((B, NUM_PT_TILES, 128, 1), jnp.float32),
        grid_spec=pltpu.PrefetchScalarGridSpec(
            num_scalar_prefetch=0,
            grid=(B, NUM_PT_TILES),
            in_specs=in_specs,
            out_specs=pl.BlockSpec((1, 1, 128, 1), lambda b, t: (b, t, 0, 0))),
        compiler_params=pltpu.CompilerParams(
            dimension_semantics=("parallel", "parallel"),
            vmem_limit_bytes=32 * 1024 * 1024),
    )(x, *enc_params)

    # Combine the per-tile partial maxima (tiny: B x 2 x 128 values).
    return jnp.max(pmax, axis=1)[..., 0]           # (B, 128)


# ---------------------------------------------------------------------------
# Decoder kernel: h1/h2 (BN folded) are recomputed per output tile (cheap) so
# there is no carried scratch and the tile axis can be "parallel"; linear3 is
# tiled over the 6144 output dim so the big w3 stream is pipelined.
# ---------------------------------------------------------------------------
def _decoder_kernel(gfv_ref, w1, b1, w2, b2, w3_ref, b3_ref, out_ref):
    h = jnp.dot(gfv_ref[...].astype(jnp.bfloat16), w1[...],
                preferred_element_type=jnp.float32) + b1[...]
    h = jnp.maximum(h, 0.0).astype(jnp.bfloat16)                 # linear1+BN+ReLU
    h = jnp.dot(h, w2[...], preferred_element_type=jnp.float32) + b2[...]
    h = jnp.maximum(h, 0.0).astype(jnp.bfloat16)                 # linear2+BN+ReLU
    o = jnp.dot(h, w3_ref[...], preferred_element_type=jnp.float32) + b3_ref[...]
    out_ref[...] = jnp.maximum(o, 0.0)                           # linear3+ReLU


def decoder_pallas(gfv, dec_params):
    """gfv: (B, 128) -> (B, 3, NUM_POINTS)."""
    B = gfv.shape[0]
    w1, b1, w2, b2, w3, b3 = dec_params
    n_tiles = 6144 // TNO

    in_specs = [_full_spec(gfv),
                _full_spec(w1), _full_spec(b1),
                _full_spec(w2), _full_spec(b2),
                pl.BlockSpec((w3.shape[0], TNO), lambda j: (0, j)),
                pl.BlockSpec((1, TNO), lambda j: (0, j))]

    out = pl.pallas_call(
        _decoder_kernel,
        out_shape=jax.ShapeDtypeStruct((B, 6144), jnp.float32),
        grid_spec=pltpu.PrefetchScalarGridSpec(
            num_scalar_prefetch=0,
            grid=(n_tiles,),
            in_specs=in_specs,
            out_specs=pl.BlockSpec((B, TNO), lambda j: (0, j))),
        compiler_params=pltpu.CompilerParams(
            # No carried state -> tiles are independent; megacore-friendly.
            dimension_semantics=("parallel",),
            vmem_limit_bytes=32 * 1024 * 1024),
    )(gfv, *dec_params)
    return out.reshape(B, 3, NUM_POINTS)


# ---------------------------------------------------------------------------
# Full autoencoder forward
# ---------------------------------------------------------------------------
def autoencoder_forward(x, enc_params, dec_params):
    """x: (B, 3, NUM_POINTS) NCL, like the PyTorch module. Returns (out, gfv)."""
    gfv = encoder_pallas(x, enc_params)
    out = decoder_pallas(gfv, dec_params)
    return out, gfv


# ---------------------------------------------------------------------------
# Deterministic parameter construction; eval-mode BN folded into w/b in glue.
# Encoder weights channels-first (Cout, Cin) with bias (Cout, 1); decoder
# weights (Cin, Cout) with bias (1, Cout).  MXU weights in bf16, biases f32.
# ---------------------------------------------------------------------------
def _conv_init(key, cin, cout):
    kw, kb = jax.random.split(key)
    w = jax.random.normal(kw, (cout, cin), jnp.float32) / jnp.sqrt(float(cin))
    b = 0.01 * jax.random.normal(kb, (cout, 1), jnp.float32)
    return w, b


def _linear_init(key, cin, cout):
    kw, kb = jax.random.split(key)
    w = jax.random.normal(kw, (cin, cout), jnp.float32) / jnp.sqrt(float(cin))
    b = 0.01 * jax.random.normal(kb, (1, cout), jnp.float32)
    return w, b


def _bn_init(key, c, col):
    shape = (c, 1) if col else (1, c)
    kg, kb, km, kv = jax.random.split(key, 4)
    gamma = 1.0 + 0.1 * jax.random.normal(kg, shape, jnp.float32)
    beta = 0.1 * jax.random.normal(kb, shape, jnp.float32)
    mean = 0.1 * jax.random.normal(km, shape, jnp.float32)
    var = 0.5 + jax.random.uniform(kv, shape, jnp.float32)        # positive
    return gamma, beta, mean, var


def _fold_bn(w, b, bn):
    """(x*w + b)*scale + shift == x*(w*scale) + (b*scale + shift) per channel."""
    if bn is None:
        return w, b
    gamma, beta, mean, var = bn
    scale = gamma / jnp.sqrt(var + EPS)
    shift = beta - mean * scale
    return w * scale, b * scale + shift


def init_all_params(key):
    enc_dims = [(3, 64), (64, 128), (128, 256), (256, 128)]
    dec_dims = [(128, 256), (256, 256), (256, 6144)]
    enc_params, dec_params = [], []
    for li, (cin, cout) in enumerate(enc_dims):
        key, k1, k2 = jax.random.split(key, 3)
        w, b = _conv_init(k1, cin, cout)                          # (cout,cin),(cout,1)
        wf, bf = _fold_bn(w, b, _bn_init(k2, cout, col=True))
        if li == 0:
            # Layer 1 is VPU work: store as (Cin, Cout, 1) f32 so the kernel
            # indexes one input channel at a time (no lane slicing).
            enc_params += [jnp.transpose(wf, (1, 0))[:, :, None], bf]
        else:
            enc_params += [wf.astype(jnp.bfloat16), bf]
    for i, (cin, cout) in enumerate(dec_dims):
        key, k1, k2 = jax.random.split(key, 3)
        w, b = _linear_init(k1, cin, cout)                        # (cin,cout),(1,cout)
        bn = _bn_init(k2, cout, col=False) if i < 2 else None     # linear3 has no BN
        wf, bf = _fold_bn(w, b, bn)
        dec_params += [wf.astype(jnp.bfloat16), bf]
    return enc_params, dec_params


# ---------------------------------------------------------------------------
# Pure-JAX reference (same math, same bf16 casts) for a correctness check.
# ---------------------------------------------------------------------------
def ref_forward(x, enc_params, dec_params):
    B = x.shape[0]
    w1e, b1, w2, b2, w3, b3, w4, b4 = enc_params
    w1 = jnp.transpose(w1e[:, :, 0], (1, 0))                      # (64, 3) f32

    def cmm(w, h):   # channels-first bf16 matmul, f32 accumulate
        return jnp.einsum('oi,bip->bop', w, h.astype(jnp.bfloat16),
                          preferred_element_type=jnp.float32)

    h = jnp.einsum('oi,bip->bop', w1, x,
                   precision=jax.lax.Precision.HIGHEST) + b1      # f32 layer 1
    h = jnp.maximum(h, 0.0)
    h = jnp.maximum(cmm(w2, h) + b2, 0.0)
    h = jnp.maximum(cmm(w3, h) + b3, 0.0)
    h = cmm(w4, h) + b4
    gfv = jnp.max(h, axis=-1)                                     # (B, 128)

    dw1, db1, dw2, db2, dw3, db3 = dec_params

    def mm(h, w):
        return jnp.dot(h.astype(jnp.bfloat16), w,
                       preferred_element_type=jnp.float32)

    g = jnp.maximum(mm(gfv, dw1) + db1, 0.0)
    g = jnp.maximum(mm(g, dw2) + db2, 0.0)
    g = jnp.maximum(mm(g, dw3) + db3, 0.0)
    return g.reshape(B, 3, NUM_POINTS), gfv


if __name__ == "__main__":
    key = jax.random.PRNGKey(0)
    kx, kp = jax.random.split(key)

    B = 2
    x = jax.random.normal(kx, (B, 3, NUM_POINTS), jnp.float32)    # NCL, like torch
    enc_params, dec_params = init_all_params(kp)

    out, gfv = jax.jit(autoencoder_forward)(x, enc_params, dec_params)
    out = jax.block_until_ready(out)
    gfv = jax.block_until_ready(gfv)

    assert out.shape == (B, 3, NUM_POINTS) and gfv.shape == (B, 128)

    ref_out, ref_gfv = ref_forward(x, enc_params, dec_params)
    np.testing.assert_allclose(np.asarray(gfv), np.asarray(ref_gfv),
                               rtol=1e-2, atol=1e-2)
    np.testing.assert_allclose(np.asarray(out), np.asarray(ref_out),
                               rtol=1e-2, atol=1e-2)

    print("KERNEL_OK")
</pallas_src>

<mosaic_0001>
module attributes {stable_mosaic.version = 11 : i64} {
  func.func @_decoder_kernel(%arg0: i32, %arg1: memref<2x128xf32, #tpu.memory_space<vmem>>, %arg2: memref<128x256xbf16, #tpu.memory_space<vmem>>, %arg3: memref<1x256xf32, #tpu.memory_space<vmem>>, %arg4: memref<256x256xbf16, #tpu.memory_space<vmem>>, %arg5: memref<1x256xf32, #tpu.memory_space<vmem>>, %arg6: memref<256x3072xbf16, #tpu.memory_space<vmem>>, %arg7: memref<1x3072xf32, #tpu.memory_space<vmem>>, %arg8: memref<2x3072xf32, #tpu.memory_space<vmem>>) attributes {dimension_semantics = [#tpu.dimension_semantics<parallel>], iteration_bounds = array<i64: 2>, scalar_prefetch = 0 : i64, scratch_operands = 0 : i64, tpu.core_type = #tpu.core_type<tc>, window_params = [{pipeline_mode = #tpu.pipeline_mode<synchronous>, transform_indices = @transform_0, window_bounds = array<i64: 2, 128>}, {pipeline_mode = #tpu.pipeline_mode<synchronous>, transform_indices = @transform_1, window_bounds = array<i64: 128, 256>}, {pipeline_mode = #tpu.pipeline_mode<synchronous>, transform_indices = @transform_2, window_bounds = array<i64: 1, 256>}, {pipeline_mode = #tpu.pipeline_mode<synchronous>, transform_indices = @transform_3, window_bounds = array<i64: 256, 256>}, {pipeline_mode = #tpu.pipeline_mode<synchronous>, transform_indices = @transform_4, window_bounds = array<i64: 1, 256>}, {transform_indices = @transform_5, window_bounds = array<i64: 256, 3072>}, {transform_indices = @transform_6, window_bounds = array<i64: 1, 3072>}, {transform_indices = @transform_7, window_bounds = array<i64: 2, 3072>}]} {
    %c0 = arith.constant 0 : index
    %c0_0 = arith.constant 0 : index
    %0 = vector.load %arg1[%c0, %c0_0] : memref<2x128xf32, #tpu.memory_space<vmem>>, vector<2x128xf32>
    %1 = arith.truncf %0 : vector<2x128xf32> to vector<2x128xbf16>
    %c0_1 = arith.constant 0 : index
    %c0_2 = arith.constant 0 : index
    %2 = vector.load %arg2[%c0_1, %c0_2] : memref<128x256xbf16, #tpu.memory_space<vmem>>, vector<128x256xbf16>
    %cst = arith.constant dense<0.000000e+00> : vector<2x256xf32>
    %3 = tpu.matmul %1, %2, %cst {dimension_numbers = #tpu.dot_dimension_numbers<[1], [0], [0], [1], [0, 0, 1, 1], [], []>} : vector<2x128xbf16>, vector<128x256xbf16>, vector<2x256xf32> -> vector<2x256xf32>
    %c0_3 = arith.constant 0 : index
    %c0_4 = arith.constant 0 : index
    %4 = vector.load %arg3[%c0_3, %c0_4] : memref<1x256xf32, #tpu.memory_space<vmem>>, vector<1x256xf32>
    %5 = vector.broadcast %4 : vector<1x256xf32> to vector<2x256xf32>
    %6 = arith.addf %3, %5 : vector<2x256xf32>
    %cst_5 = arith.constant 0.000000e+00 : f32
    %7 = vector.broadcast %cst_5 : f32 to vector<2x256xf32>
    %8 = arith.maximumf %6, %7 : vector<2x256xf32>
    %9 = arith.truncf %8 : vector<2x256xf32> to vector<2x256xbf16>
    %c0_6 = arith.constant 0 : index
    %c0_7 = arith.constant 0 : index
    %10 = vector.load %arg4[%c0_6, %c0_7] : memref<256x256xbf16, #tpu.memory_space<vmem>>, vector<256x256xbf16>
    %cst_8 = arith.constant dense<0.000000e+00> : vector<2x256xf32>
    %11 = tpu.matmul %9, %10, %cst_8 {dimension_numbers = #tpu.dot_dimension_numbers<[1], [0], [0], [1], [0, 0, 1, 1], [], []>} : vector<2x256xbf16>, vector<256x256xbf16>, vector<2x256xf32> -> vector<2x256xf32>
    %c0_9 = arith.constant 0 : index
    %c0_10 = arith.constant 0 : index
    %12 = vector.load %arg5[%c0_9, %c0_10] : memref<1x256xf32, #tpu.memory_space<vmem>>, vector<1x256xf32>
    %13 = vector.broadcast %12 : vector<1x256xf32> to vector<2x256xf32>
    %14 = arith.addf %11, %13 : vector<2x256xf32>
    %cst_11 = arith.constant 0.000000e+00 : f32
    %15 = vector.broadcast %cst_11 : f32 to vector<2x256xf32>
    %16 = arith.maximumf %14, %15 : vector<2x256xf32>
    %17 = arith.truncf %16 : vector<2x256xf32> to vector<2x256xbf16>
    %c0_12 = arith.constant 0 : index
    %c0_13 = arith.constant 0 : index
    %18 = vector.load %arg6[%c0_12, %c0_13] : memref<256x3072xbf16, #tpu.memory_space<vmem>>, vector<256x3072xbf16>
    %cst_14 = arith.constant dense<0.000000e+00> : vector<2x3072xf32>
    %19 = tpu.matmul %17, %18, %cst_14 {dimension_numbers = #tpu.dot_dimension_numbers<[1], [0], [0], [1], [0, 0, 1, 1], [], []>} : vector<2x256xbf16>, vector<256x3072xbf16>, vector<2x3072xf32> -> vector<2x3072xf32>
    %c0_15 = arith.constant 0 : index
    %c0_16 = arith.constant 0 : index
    %20 = vector.load %arg7[%c0_15, %c0_16] : memref<1x3072xf32, #tpu.memory_space<vmem>>, vector<1x3072xf32>
    %21 = vector.broadcast %20 : vector<1x3072xf32> to vector<2x3072xf32>
    %22 = arith.addf %19, %21 : vector<2x3072xf32>
    %cst_17 = arith.constant 0.000000e+00 : f32
    %23 = vector.broadcast %cst_17 : f32 to vector<2x3072xf32>
    %24 = arith.maximumf %22, %23 : vector<2x3072xf32>
    %c0_18 = arith.constant 0 : index
    %c0_19 = arith.constant 0 : index
    %25 = vector.load %arg8[%c0_18, %c0_19] : memref<2x3072xf32, #tpu.memory_space<vmem>>, vector<2x3072xf32>
    tpu.vector_store %arg8[%c0_18, %c0_19], %24 {strides = array<i32>} : memref<2x3072xf32, #tpu.memory_space<vmem>>, vector<2x3072xf32>,
    return
  }
  func.func @transform_0(%arg0: i32) -> (i32, i32) {
    %c0_i32 = arith.constant 0 : i32
    %c0_i32_0 = arith.constant 0 : i32
    %c0_i32_1 = arith.constant 0 : i32
    return %c0_i32, %c0_i32_0 : i32, i32
  }
  func.func @transform_1(%arg0: i32) -> (i32, i32) {
    %c0_i32 = arith.constant 0 : i32
    %c0_i32_0 = arith.constant 0 : i32
    %c0_i32_1 = arith.constant 0 : i32
    return %c0_i32, %c0_i32_0 : i32, i32
  }
  func.func @transform_2(%arg0: i32) -> (i32, i32) {
    %c0_i32 = arith.constant 0 : i32
    %c0_i32_0 = arith.constant 0 : i32
    %c0_i32_1 = arith.constant 0 : i32
    return %c0_i32, %c0_i32_0 : i32, i32
  }
  func.func @transform_3(%arg0: i32) -> (i32, i32) {
    %c0_i32 = arith.constant 0 : i32
    %c0_i32_0 = arith.constant 0 : i32
    %c0_i32_1 = arith.constant 0 : i32
    return %c0_i32, %c0_i32_0 : i32, i32
  }
  func.func @transform_4(%arg0: i32) -> (i32, i32) {
    %c0_i32 = arith.constant 0 : i32
    %c0_i32_0 = arith.constant 0 : i32
    %c0_i32_1 = arith.constant 0 : i32
    return %c0_i32, %c0_i32_0 : i32, i32
  }
  func.func @transform_5(%arg0: i32) -> (i32, i32) {
    %c0_i32 = arith.constant 0 : i32
    %c0_i32_0 = arith.constant 0 : i32
    return %c0_i32, %arg0 : i32, i32
  }
  func.func @transform_6(%arg0: i32) -> (i32, i32) {
    %c0_i32 = arith.constant 0 : i32
    %c0_i32_0 = arith.constant 0 : i32
    return %c0_i32, %arg0 : i32, i32
  }
  func.func @transform_7(%arg0: i32) -> (i32, i32) {
    %c0_i32 = arith.constant 0 : i32
    %c0_i32_0 = arith.constant 0 : i32
    return %c0_i32, %arg0 : i32, i32
  }
}

module attributes {stable_mosaic.version = 11 : i64} {
  func.func @_encoder_kernel(%arg0: i32, %arg1: i32, %arg2: memref<1x3x1024xf32, #tpu.memory_space<vmem>>, %arg3: memref<3x64x1xf32, #tpu.memory_space<vmem>>, %arg4: memref<64x1xf32, #tpu.memory_space<vmem>>, %arg5: memref<128x64xbf16, #tpu.memory_space<vmem>>, %arg6: memref<128x1xf32, #tpu.memory_space<vmem>>, %arg7: memref<256x128xbf16, #tpu.memory_space<vmem>>, %arg8: memref<256x1xf32, #tpu.memory_space<vmem>>, %arg9: memref<128x256xbf16, #tpu.memory_space<vmem>>, %arg10: memref<128x1xf32, #tpu.memory_space<vmem>>, %arg11: memref<1x1x128x1xf32, #tpu.memory_space<vmem>>) attributes {dimension_semantics = [#tpu.dimension_semantics<parallel>, #tpu.dimension_semantics<parallel>], iteration_bounds = array<i64: 2, 2>, scalar_prefetch = 0 : i64, scratch_operands = 0 : i64, tpu.core_type = #tpu.core_type<tc>, window_params = [{transform_indices = @transform_0, window_bounds = array<i64: 1, 3, 1024>}, {pipeline_mode = #tpu.pipeline_mode<synchronous>, transform_indices = @transform_1, window_bounds = array<i64: 3, 64, 1>}, {pipeline_mode = #tpu.pipeline_mode<synchronous>, transform_indices = @transform_2, window_bounds = array<i64: 64, 1>}, {pipeline_mode = #tpu.pipeline_mode<synchronous>, transform_indices = @transform_3, window_bounds = array<i64: 128, 64>}, {pipeline_mode = #tpu.pipeline_mode<synchronous>, transform_indices = @transform_4, window_bounds = array<i64: 128, 1>}, {pipeline_mode = #tpu.pipeline_mode<synchronous>, transform_indices = @transform_5, window_bounds = array<i64: 256, 128>}, {pipeline_mode = #tpu.pipeline_mode<synchronous>, transform_indices = @transform_6, window_bounds = array<i64: 256, 1>}, {pipeline_mode = #tpu.pipeline_mode<synchronous>, transform_indices = @transform_7, window_bounds = array<i64: 128, 256>}, {pipeline_mode = #tpu.pipeline_mode<synchronous>, transform_indices = @transform_8, window_bounds = array<i64: 128, 1>}, {transform_indices = @transform_9, window_bounds = array<i64: 1, 1, 128, 1>}]} {
    %c0 = arith.constant 0 : index
    %c0_0 = arith.constant 0 : index
    %c0_1 = arith.constant 0 : index
    %0 = vector.load %arg2[%c0, %c0_0, %c0_1] : memref<1x3x1024xf32, #tpu.memory_space<vmem>>, vector<1x3x1024xf32>
    %1 = vector.shape_cast %0 : vector<1x3x1024xf32> to vector<3x1024xf32>
    %c0_2 = arith.constant 0 : index
    %c0_3 = arith.constant 0 : index
    %c0_4 = arith.constant 0 : index
    %2 = vector.load %arg3[%c0_2, %c0_3, %c0_4] : memref<3x64x1xf32, #tpu.memory_space<vmem>>, vector<1x64x1xf32>
    %3 = vector.shape_cast %2 : vector<1x64x1xf32> to vector<64x1xf32>
    %4 = vector.extract_strided_slice %1 {offsets = [0, 0], sizes = [1, 1024], strides = [1, 1]} : vector<3x1024xf32> to vector<1x1024xf32>
    %5 = vector.broadcast %3 : vector<64x1xf32> to vector<64x1024xf32>
    %6 = vector.broadcast %4 : vector<1x1024xf32> to vector<64x1024xf32>
    %7 = arith.mulf %5, %6 : vector<64x1024xf32>
    %c1 = arith.constant 1 : index
    %c0_5 = arith.constant 0 : index
    %c0_6 = arith.constant 0 : index
    %8 = vector.load %arg3[%c1, %c0_5, %c0_6] : memref<3x64x1xf32, #tpu.memory_space<vmem>>, vector<1x64x1xf32>
    %9 = vector.shape_cast %8 : vector<1x64x1xf32> to vector<64x1xf32>
    %10 = vector.extract_strided_slice %1 {offsets = [1, 0], sizes = [1, 1024], strides = [1, 1]} : vector<3x1024xf32> to vector<1x1024xf32>
    %11 = vector.broadcast %9 : vector<64x1xf32> to vector<64x1024xf32>
    %12 = vector.broadcast %10 : vector<1x1024xf32> to vector<64x1024xf32>
    %13 = arith.mulf %11, %12 : vector<64x1024xf32>
    %14 = arith.addf %7, %13 : vector<64x1024xf32>
    %c2 = arith.constant 2 : index
    %c0_7 = arith.constant 0 : index
    %c0_8 = arith.constant 0 : index
    %15 = vector.load %arg3[%c2, %c0_7, %c0_8] : memref<3x64x1xf32, #tpu.memory_space<vmem>>, vector<1x64x1xf32>
    %16 = vector.shape_cast %15 : vector<1x64x1xf32> to vector<64x1xf32>
    %17 = vector.extract_strided_slice %1 {offsets = [2, 0], sizes = [1, 1024], strides = [1, 1]} : vector<3x1024xf32> to vector<1x1024xf32>
    %18 = vector.broadcast %16 : vector<64x1xf32> to vector<64x1024xf32>
    %19 = vector.broadcast %17 : vector<1x1024xf32> to vector<64x1024xf32>
    %20 = arith.mulf %18, %19 : vector<64x1024xf32>
    %21 = arith.addf %14, %20 : vector<64x1024xf32>
    %c0_9 = arith.constant 0 : index
    %c0_10 = arith.constant 0 : index
    %22 = vector.load %arg4[%c0_9, %c0_10] : memref<64x1xf32, #tpu.memory_space<vmem>>, vector<64x1xf32>
    %23 = vector.broadcast %22 : vector<64x1xf32> to vector<64x1024xf32>
    %24 = arith.addf %21, %23 : vector<64x1024xf32>
    %cst = arith.constant 0.000000e+00 : f32
    %25 = vector.broadcast %cst : f32 to vector<64x1024xf32>
    %26 = arith.maximumf %24, %25 : vector<64x1024xf32>
    %27 = arith.truncf %26 : vector<64x1024xf32> to vector<64x1024xbf16>
    %c0_11 = arith.constant 0 : index
    %c0_12 = arith.constant 0 : index
    %28 = vector.load %arg5[%c0_11, %c0_12] : memref<128x64xbf16, #tpu.memory_space<vmem>>, vector<128x64xbf16>
    %cst_13 = arith.constant dense<0.000000e+00> : vector<128x1024xf32>
    %29 = tpu.matmul %28, %27, %cst_13 {dimension_numbers = #tpu.dot_dimension_numbers<[1], [0], [0], [1], [0, 0, 1, 1], [], []>} : vector<128x64xbf16>, vector<64x1024xbf16>, vector<128x1024xf32> -> vector<128x1024xf32>
    %c0_14 = arith.constant 0 : index
    %c0_15 = arith.constant 0 : index
    %30 = vector.load %arg6[%c0_14, %c0_15] : memref<128x1xf32, #tpu.memory_space<vmem>>, vector<128x1xf32>
    %31 = vector.broadcast %30 : vector<128x1xf32> to vector<128x1024xf32>
    %32 = arith.addf %29, %31 : vector<128x1024xf32>
    %cst_16 = arith.constant 0.000000e+00 : f32
    %33 = vector.broadcast %cst_16 : f32 to vector<128x1024xf32>
    %34 = arith.maximumf %32, %33 : vector<128x1024xf32>
    %35 = arith.truncf %34 : vector<128x1024xf32> to vector<128x1024xbf16>
    %c0_17 = arith.constant 0 : index
    %c0_18 = arith.constant 0 : index
    %36 = vector.load %arg7[%c0_17, %c0_18] : memref<256x128xbf16, #tpu.memory_space<vmem>>, vector<256x128xbf16>
    %cst_19 = arith.constant dense<0.000000e+00> : vector<256x1024xf32>
    %37 = tpu.matmul %36, %35, %cst_19 {dimension_numbers = #tpu.dot_dimension_numbers<[1], [0], [0], [1], [0, 0, 1, 1], [], []>} : vector<256x128xbf16>, vector<128x1024xbf16>, vector<256x1024xf32> -> vector<256x1024xf32>
    %c0_20 = arith.constant 0 : index
    %c0_21 = arith.constant 0 : index
    %38 = vector.load %arg8[%c0_20, %c0_21] : memref<256x1xf32, #tpu.memory_space<vmem>>, vector<256x1xf32>
    %39 = vector.broadcast %38 : vector<256x1xf32> to vector<256x1024xf32>
    %40 = arith.addf %37, %39 : vector<256x1024xf32>
    %cst_22 = arith.constant 0.000000e+00 : f32
    %41 = vector.broadcast %cst_22 : f32 to vector<256x1024xf32>
    %42 = arith.maximumf %40, %41 : vector<256x1024xf32>
    %43 = arith.truncf %42 : vector<256x1024xf32> to vector<256x1024xbf16>
    %c0_23 = arith.constant 0 : index
    %c0_24 = arith.constant 0 : index
    %44 = vector.load %arg9[%c0_23, %c0_24] : memref<128x256xbf16, #tpu.memory_space<vmem>>, vector<128x256xbf16>
    %cst_25 = arith.constant dense<0.000000e+00> : vector<128x1024xf32>
    %45 = tpu.matmul %44, %43, %cst_25 {dimension_numbers = #tpu.dot_dimension_numbers<[1], [0], [0], [1], [0, 0, 1, 1], [], []>} : vector<128x256xbf16>, vector<256x1024xbf16>, vector<128x1024xf32> -> vector<128x1024xf32>
    %c0_26 = arith.constant 0 : index
    %c0_27 = arith.constant 0 : index
    %46 = vector.load %arg10[%c0_26, %c0_27] : memref<128x1xf32, #tpu.memory_space<vmem>>, vector<128x1xf32>
    %47 = vector.broadcast %46 : vector<128x1xf32> to vector<128x1024xf32>
    %48 = arith.addf %45, %47 : vector<128x1024xf32>
    %cst_28 = arith.constant dense<0xFF800000> : vector<128xf32>
    %49 = vector.multi_reduction <maximumf>, %48, %cst_28 [1] : vector<128x1024xf32> to vector<128xf32>
    %50 = vector.shape_cast %49 : vector<128xf32> to vector<128x1xf32>
    %c0_29 = arith.constant 0 : index
    %c0_30 = arith.constant 0 : index
    %c0_31 = arith.constant 0 : index
    %c0_32 = arith.constant 0 : index
    %51 = vector.load %arg11[%c0_29, %c0_30, %c0_31, %c0_32] : memref<1x1x128x1xf32, #tpu.memory_space<vmem>>, vector<1x1x128x1xf32>
    %52 = vector.shape_cast %51 : vector<1x1x128x1xf32> to vector<128x1xf32>
    %53 = vector.shape_cast %50 : vector<128x1xf32> to vector<1x1x128x1xf32>
    tpu.vector_store %arg11[%c0_29, %c0_30, %c0_31, %c0_32], %53 {strides = array<i32>} : memref<1x1x128x1xf32, #tpu.memory_space<vmem>>, vector<1x1x128x1xf32>,
    return
  }
  func.func @transform_0(%arg0: i32, %arg1: i32) -> (i32, i32, i32) {
    %c0_i32 = arith.constant 0 : i32
    %c0_i32_0 = arith.constant 0 : i32
    return %arg0, %c0_i32, %arg1 : i32, i32, i32
  }
  func.func @transform_1(%arg0: i32, %arg1: i32) -> (i32, i32, i32) {
    %c0_i32 = arith.constant 0 : i32
    %c0_i32_0 = arith.constant 0 : i32
    %c0_i32_1 = arith.constant 0 : i32
    %c0_i32_2 = arith.constant 0 : i32
    return %c0_i32, %c0_i32_0, %c0_i32_1 : i32, i32, i32
  }
  func.func @transform_2(%arg0: i32, %arg1: i32) -> (i32, i32) {
    %c0_i32 = arith.constant 0 : i32
    %c0_i32_0 = arith.constant 0 : i32
    %c0_i32_1 = arith.constant 0 : i32
    return %c0_i32, %c0_i32_0 : i32, i32
  }
  func.func @transform_3(%arg0: i32, %arg1: i32) -> (i32, i32) {
    %c0_i32 = arith.constant 0 : i32
    %c0_i32_0 = arith.constant 0 : i32
    %c0_i32_1 = arith.constant 0 : i32
    return %c0_i32, %c0_i32_0 : i32, i32
  }
  func.func @transform_4(%arg0: i32, %arg1: i32) -> (i32, i32) {
    %c0_i32 = arith.constant 0 : i32
    %c0_i32_0 = arith.constant 0 : i32
    %c0_i32_1 = arith.constant 0 : i32
    return %c0_i32, %c0_i32_0 : i32, i32
  }
  func.func @transform_5(%arg0: i32, %arg1: i32) -> (i32, i32) {
    %c0_i32 = arith.constant 0 : i32
    %c0_i32_0 = arith.constant 0 : i32
    %c0_i32_1 = arith.constant 0 : i32
    return %c0_i32, %c0_i32_0 : i32, i32
  }
  func.func @transform_6(%arg0: i32, %arg1: i32) -> (i32, i32) {
    %c0_i32 = arith.constant 0 : i32
    %c0_i32_0 = arith.constant 0 : i32
    %c0_i32_1 = arith.constant 0 : i32
    return %c0_i32, %c0_i32_0 : i32, i32
  }
  func.func @transform_7(%arg0: i32, %arg1: i32) -> (i32, i32) {
    %c0_i32 = arith.constant 0 : i32
    %c0_i32_0 = arith.constant 0 : i32
    %c0_i32_1 = arith.constant 0 : i32
    return %c0_i32, %c0_i32_0 : i32, i32
  }
  func.func @transform_8(%arg0: i32, %arg1: i32) -> (i32, i32) {
    %c0_i32 = arith.constant 0 : i32
    %c0_i32_0 = arith.constant 0 : i32
    %c0_i32_1 = arith.constant 0 : i32
    return %c0_i32, %c0_i32_0 : i32, i32
  }
  func.func @transform_9(%arg0: i32, %arg1: i32) -> (i32, i32, i32, i32) {
    %c0_i32 = arith.constant 0 : i32
    %c0_i32_0 = arith.constant 0 : i32
    %c0_i32_1 = arith.constant 0 : i32
    return %arg0, %arg1, %c0_i32, %c0_i32_0 : i32, i32, i32, i32
  }
}

</mosaic_0001>

<bundles_post_ra>
// kernel: autoencoder_forward.2
= control target key start
LH: loop header
LB: loop body
LE: loop exit
PB: predicated region body
PF: predicated region fallthrough
CT: control target
= control target key end

     0   :  { %14 = vsyncpa [#allocation3], 0  ;;  %s7226_s0 = inlined_call_operand.vmem [shape: f32[2,3,2048], index: 0, kind: input, shape index: {}]   ;;  %s7227_s1 = inlined_call_operand.vmem [shape: f32[3,64,1], index: 1, kind: input, shape index: {}]   ;;  %s7228_s2 = inlined_call_operand.vmem [shape: f32[64,1], index: 2, kind: input, shape index: {}]   ;;  %s7229_s3 = inlined_call_operand.vmem [shape: bf16[128,64], index: 3, kind: input, shape index: {}]   ;;  %s7230_s4 = inlined_call_operand.vmem [shape: f32[128,1], index: 4, kind: input, shape index: {}]   ;;  %s7231_s5 = inlined_call_operand.hbm [shape: bf16[256,128], index: 5, kind: input, shape index: {}]   ;;  %s7232_s6 = inlined_call_operand.vmem [shape: f32[256,1], index: 6, kind: input, shape index: {}]   ;;  %s7233_s7 = inlined_call_operand.hbm [shape: bf16[128,256], index: 7, kind: input, shape index: {}]   ;;  %s7234_s8 = inlined_call_operand.vmem [shape: f32[128,1], index: 8, kind: input, shape index: {}]   ;;  %s7235_s9 = inlined_call_operand.vmem [shape: f32[2,2,128,1], index: 9, kind: output, shape index: {}]  }
   0x1   :  { %15 = vsyncpa [#allocation5], 0  ;;  %s4904_s30 = smov 0   ;;  %s4906_s10 = smov 0  }
   0x2   :  { %s4908_s11 = smov 0   ;;  %s4910_s12 = smov 0  }
   0x3   :  { %s4912_s13 = smov 0  }
   0x4 LB: > { %7288 = sst [smem:[#allocation8_spill]] %s4841_s12  ;;  %s4517_s14 = sadd.s32 4294967295, %s4845_s13   ;;  %s4845_s13 = sphi %s4912_s13, %s21_s13   ;;  %s4841_s12 = sphi %s4910_s12, %s7367_s12   ;;  %s4837_s11 = sphi %s4908_s11, %s7369_s11   ;;  %s4833_s10 = sphi %s4906_s10, %s7365_s10   ;;  %s4829_s30 = sphi %s4904_s30, %s7368_s30  }
   0x5   : > { %s30_s15 = sadd.s32 1, %s4837_s11  ;;  %s33_s16 = sadd.s32 1, %s4841_s12 }
   0x6   : > { %p31_p0 = scmp.ge.s32.totalorder %s30_s15, 2  ;;  %p4519_p1 = scmp.ge.s32.totalorder %s4845_s13, 1 }
   0x7   : > { %p262_p2 = scmp.lt.s32.totalorder %s4845_s13, 5  ;;  %p4941_p5 = scmp.eq.s32.totalorder %s4517_s14, 0 }
   0x8   : > { %s7371_s15 = smov (%p31_p0, %s30_s15), 0  ;;  %s7373_s16 = smov (!%p31_p0, %s33_s16), %s4841_s12 }
   0x9   : > { %7289 = sst [smem:[#allocation9_spill]] %s7371_s15  ;;  %p4937_p3 = pnand %p4519_p1, %p262_p2 }
   0xa   : > { %p35_p4 = scmp.ge.s32.totalorder %s7373_s16, 2  ;;  %s4847_s19 = smov [#allocation2]  }
   0xb   : > { %s7290_s17 = scalar_select %p4937_p3, 1, 0 }
   0xc   : > { %s7291_s18 = scalar_select %p4941_p5, 1, 0 }
   0xd   : > { %p4630_p6 = pneg %p4937_p3  ;;  %s7375_s16 = smov (%p35_p4, %s7373_s16), 0 }
   0xe   : > { %7292 = sst [smem:[#allocation10_spill]] %s7375_s16  ;;  %s286_s20 = sshll.u32 %s4847_s19, 4  ;;  %s287_s20 = int_to_ptr.vmem [resolvable:$true] %s286_s20 }
   0xf   : > { %p4951_p7 = pnand %p4941_p5, %p4630_p6  ;;  %s4743_s24 = scalar_lea.hbm %s7231_s5, 2048 }
  0x10   : > { %p4744_p8 = scmp.ne.s32.totalorder %s7231_s5, %s4743_s24  ;;  %p4750_p12 = scmp.lt.u32.totalorder %s4743_s24, %s7231_s5 }
  0x11   : > { %p4745_p9 = pneg %p4951_p7 }
  0x13   : > { %p4746_p10 = pnand %p4745_p9, %p4744_p8 }
  0x15   : > { %p4747_p11 = pneg %p4746_p10 }
  0x17   : > { %p4752_p13 = pnand %p4750_p12, %p4747_p11 }
  0x19   : > { %4755 = shalt.err (!%p4752_p13)
}
  0x1a   : > { %s4756_s29 = scalar_lea.vmem %s287_s20, 2048  ;;  %p4764_p4 = scmp.lt.s32.totalorder %s287_s20, %s287_s20 }
  0x1b   : > { %p4757_p0 = scmp.ne.s32.totalorder %s287_s20, %s4756_s29  ;;  %p4765_p6 = scmp.lt.s32.totalorder %s4756_s29, %s4756_s29 }
  0x1d   : > { %p4759_p1 = pnand %p4757_p0, %p4745_p9  ;;  %p4766_p5 = por %p4765_p6, %p4764_p4 }
  0x1f   : > { %p4760_p2 = pneg %p4759_p1 }
  0x21   : > { %p4767_p3 = pnand %p4766_p5, %p4760_p2 }
  0x23   : > { %4770 = shalt.err (!%p4767_p3)
}
  0x24   : > { %s4848_s14 = smov 64   ;;  %s4849_s19 = smov 4  }
  0x25   : > { %4633 = dma.hbm_to_vmem [thread:$0]  (!%p4951_p7), %s7231_s5, 2048, %s287_s20, [#allocation3], %s4848_s14, %s4848_s14, %s4849_s19  }
  0x26   : > { %s4850_s24 = smov [#allocation4]   ;;  %s4771_s28 = scalar_lea.hbm %s7233_s7, 2048 }
  0x27   : > { %s302_s25 = sshll.u32 %s4850_s24, 4  ;;  %p4772_p3 = scmp.ne.s32.totalorder %s7233_s7, %s4771_s28  ;;  %s303_s25 = int_to_ptr.vmem [resolvable:$true] %s302_s25 }
  0x28   : > { %p4778_p10 = scmp.lt.u32.totalorder %s4771_s28, %s7233_s7 }
  0x29   : > { %p4774_p5 = pnand %p4772_p3, %p4745_p9 }
  0x2b   : > { %p4775_p8 = pneg %p4774_p5 }
  0x2d   : > { %p4780_p11 = pnand %p4778_p10, %p4775_p8 }
  0x2f   : > { %4783 = shalt.err (!%p4780_p11)
}
  0x30   : > { %s4784_s20 = scalar_lea.vmem %s303_s25, 2048  ;;  %p4792_p1 = scmp.lt.s32.totalorder %s303_s25, %s303_s25 }
  0x31   : > { %p4785_p12 = scmp.ne.s32.totalorder %s303_s25, %s4784_s20  ;;  %p4793_p2 = scmp.lt.s32.totalorder %s4784_s20, %s4784_s20 }
  0x33   : > { %p4787_p13 = pnand %p4785_p12, %p4745_p9  ;;  %p4794_p4 = por %p4793_p2, %p4792_p1 }
  0x35   : > { %p4788_p0 = pneg %p4787_p13 }
  0x37   : > { %p4795_p6 = pnand %p4794_p4, %p4788_p0 }
  0x39   : > { %4798 = shalt.err (!%p4795_p6)
}
  0x3a   : > { %s4851_s16 = smov 128   ;;  %s4852_s14 = smov 8  }
  0x3b   : > { %4636 = dma.hbm_to_vmem [thread:$0]  (!%p4951_p7), %s7233_s7, 2048, %s303_s25, [#allocation5], %s4851_s16, %s4851_s16, %s4852_s14  }
  0x3c   : > { %p7294_p3 = scmp.ne.s32.totalorder %s7290_s17, 0 }
  0x3e   : > { %334 = sbr.rel (%p7294_p3) target bundleno = 1455 (0x5af), region = 56 }
  0x45   : > { %p7295_p5 = scmp.ne.s32.totalorder %s7291_s18, 0 }
  0x47   : > { %4820 = dma.done.wait (%p7295_p5), [#allocation3], 2048  }
  0x48   : > { %4822 = vsyncadd (%p7295_p5), [#allocation3], 4294965248 }
  0x49   : > { %4824 = dma.done.wait (%p7295_p5), [#allocation5], 2048  }
  0x4a   : > { %4826 = vsyncadd (%p7295_p5), [#allocation5], 4294965248  ;;  %v7240_v0 = vmov 0   ;;  %v4532_v1 = vld [vmem:[%s7227_s1 + $0x40] sm:$0xff]  ;;  %v4533_v3 = vld [vmem:[%s7227_s1 + $0x48] sm:$0xff]  ;;  %s4526_s29 = sshll.u32 %s4829_s30, 3  ;;  %v458_v55 = vlaneseq }
  0x4b   : > { %4689 = vset.pattern.permute.xlu1 %v7240_v0  ;;  %4688 = vset.pattern.permute.xlu0 %v7240_v0  ;;  %v406_v2 = vld [vmem:[%s7227_s1] sm:$0xff]  ;;  %v407_v4 = vld [vmem:[%s7227_s1 + $0x8] sm:$0xff]  ;;  %v409_v7 = vld [vmem:[%s7227_s1 + $0x18] sm:$0xff]  ;;  %p383_p7 = scmp.lt.s32.totalorder %s4833_s10, 1  ;;  %p385_p9 = scmp.lt.s32.totalorder %s4526_s29, 15  ;;  %vm1452_vm0 = vcmask 523264  }
  0x4c   : > { %1509 = vmatprep.mubr.bf16.mxu0 %v7240_v0  ;;  %1622 = vmatprep.mubr.bf16.mxu1 %v7240_v0  ;;  %v4541_v5 = vld [vmem:[%s7227_s1 + $0x88] sm:$0xff]  ;;  %v4540_v6 = vld [vmem:[%s7227_s1 + $0x80] sm:$0xff]  ;;  %v408_v8 = vld [vmem:[%s7227_s1 + $0x10] sm:$0xff]  ;;  %v459_v58 = vshrl.u32 %v458_v55, 7  ;;  %p394_p8 = scmp.lt.s32.totalorder %s4829_s30, 1  ;;  %vm4385_vm1 = vcmask 7168  }
  0x4d   : > { %605 = vperm.xlu1 %4689, %v4532_v1   ;;  %416 = vperm.xlu0 %4688, %v406_v2   ;;  %v4535_v9 = vld [vmem:[%s7227_s1 + $0x58] sm:$0xff]  ;;  %v4534_v10 = vld [vmem:[%s7227_s1 + $0x50] sm:$0xff]  ;;  %v1093_v13 = vld [vmem:[%s7228_s2 + $0x8] sm:$0xff]  ;;  %s7377_s10 = smov (!%p383_p7, %s4833_s10), 1  ;;  %s7379_s29 = smov (!%p385_p9, %s4526_s29), 15 }
  0x4e   : > { %v4543_v11 = vld [vmem:[%s7227_s1 + $0x98] sm:$0xff]  ;;  %v4542_v12 = vld [vmem:[%s7227_s1 + $0x90] sm:$0xff]  ;;  %v1092_v14 = vld [vmem:[%s7228_s2] sm:$0xff]  ;;  %s4527_s22 = sshll.u32 %s7377_s10, 4  ;;  %v5196_v61 = vsub.s32 4, %v459_v58  ;;  %v5199_v63 = vsub.s32 5, %v459_v58 }
  0x4f   : > { %v411_v15 = vld [vmem:[%s7227_s1 + $0x28] sm:$0xff]  ;;  %v410_v16 = vld [vmem:[%s7227_s1 + $0x20] sm:$0xff]  ;;  %v1095_v21 = vld [vmem:[%s7228_s2 + $0x18] sm:$0xff]  ;;  %s388_s26 = sadd.s32 %s4527_s22, %s7379_s29  ;;  %v5201_v1 = vsub.s32 6, %v459_v58  ;;  %v5203_v2 = vsub.s32 0, %v459_v58  ;;  %s7381_s30 = smov (!%p394_p8, %s4829_s30), 1 }
  0x50   : > { %v4537_v17 = vld [vmem:[%s7227_s1 + $0x68] sm:$0xff]  ;;  %v4536_v18 = vld [vmem:[%s7227_s1 + $0x60] sm:$0xff]  ;;  %v1094_v22 = vld [vmem:[%s7228_s2 + $0x10] sm:$0xff]  ;;  %s4528_s27 = sshll.u32 %s388_s26, 2  ;;  %s4529_s20 = sshll.u32 %s7381_s30, 4 }
  0x51   : > { %610 = vperm.xlu1 %4689, %v4533_v3   ;;  %421 = vperm.xlu0 %4688, %v407_v4   ;;  %v4545_v19 = vld [vmem:[%s7227_s1 + $0xa8] sm:$0xff]  ;;  %v4544_v20 = vld [vmem:[%s7227_s1 + $0xa0] sm:$0xff]  ;;  %v413_v23 = vld [vmem:[%s7227_s1 + $0x38] sm:$0xff]  ;;  %s5188_s17 = scalar_lea.vmem %s7226_s0, %s4528_s27  ;;  %v5205_v3 = vsub.s32 1, %v459_v58  ;;  %s4530_s16 = sshll.u32 %s7377_s10, 5 }
  0x52   : > { %v412_v24 = vld [vmem:[%s7227_s1 + $0x30] sm:$0xff]  ;;  %v4539_v25 = vld [vmem:[%s7227_s1 + $0x78] sm:$0xff]  ;;  %v1097_v29 = vld [vmem:[%s7228_s2 + $0x28] sm:$0xff]  ;;  %s398_s14 = sadd.s32 %s4530_s16, %s4529_s20 }
  0x53   : > { %v4538_v26 = vld [vmem:[%s7227_s1 + $0x70] sm:$0xff]  ;;  %v4547_v27 = vld [vmem:[%s7227_s1 + $0xb8] sm:$0xff]  ;;  %v1096_v30 = vld [vmem:[%s7228_s2 + $0x20] sm:$0xff]  ;;  %s4531_s12 = sshll.u32 %s398_s14, 3 }
  0x54   : > { %v4546_v28 = vld [vmem:[%s7227_s1 + $0xb0] sm:$0xff]  ;;  %v1099_v31 = vld [vmem:[%s7228_s2 + $0x38] sm:$0xff]  ;;  %v1317_v33 = vld [vmem:[%s7230_s4 + $0x8] sm:$0xff]  ;;  %s7177_s29 = scalar_lea.vmem %s7235_s9, %s4531_s12 }
  0x55   : > { %859 = vperm.xlu1 %4689, %v4541_v5   ;;  %854 = vperm.xlu0 %4688, %v4540_v6   ;;  %v1098_v32 = vld [vmem:[%s7228_s2 + $0x30] sm:$0xff]  ;;  %v1316_v34 = vld [vmem:[%s7230_s4] sm:$0xff]  ;;  %v1319_v35 = vld [vmem:[%s7230_s4 + $0x18] sm:$0xff] }
  0x56   : > { %v1318_v36 = vld [vmem:[%s7230_s4 + $0x10] sm:$0xff]  ;;  %v1321_v37 = vld [vmem:[%s7230_s4 + $0x28] sm:$0xff]  ;;  %v1320_v38 = vld [vmem:[%s7230_s4 + $0x20] sm:$0xff] }
  0x57   : > { %v1323_v39 = vld [vmem:[%s7230_s4 + $0x38] sm:$0xff]  ;;  %v1322_v40 = vld [vmem:[%s7230_s4 + $0x30] sm:$0xff]  ;;  %v1325_v41 = vld [vmem:[%s7230_s4 + $0x48] sm:$0xff] }
  0x58   : > { %v1324_v42 = vld [vmem:[%s7230_s4 + $0x40] sm:$0xff]  ;;  %v1327_v43 = vld [vmem:[%s7230_s4 + $0x58] sm:$0xff]  ;;  %v1326_v44 = vld [vmem:[%s7230_s4 + $0x50] sm:$0xff] }
  0x59   : > { %431 = vperm.xlu1 %4689, %v409_v7   ;;  %426 = vperm.xlu0 %4688, %v408_v8   ;;  %v1329_v45 = vld [vmem:[%s7230_s4 + $0x68] sm:$0xff]  ;;  %v1328_v46 = vld [vmem:[%s7230_s4 + $0x60] sm:$0xff]  ;;  %v1331_v47 = vld [vmem:[%s7230_s4 + $0x78] sm:$0xff]  ;;  %v5215_v8 = vsub.s32 2, %v459_v58 }
  0x5a   : > { %v1330_v48 = vld [vmem:[%s7230_s4 + $0x70] sm:$0xff]  ;;  %v2154_v49 = vld [vmem:[%s7232_s6 + $0x8] sm:$0xff]  ;;  %v2153_v50 = vld [vmem:[%s7232_s6] sm:$0xff] }
  0x5b   : > { %v2156_v51 = vld [vmem:[%s7232_s6 + $0x18] sm:$0xff]  ;;  %v2155_v52 = vld [vmem:[%s7232_s6 + $0x10] sm:$0xff]  ;;  %v2158_v53 = vld [vmem:[%s7232_s6 + $0x28] sm:$0xff] }
  0x5c   : > { %v2157_v54 = vld [vmem:[%s7232_s6 + $0x20] sm:$0xff]  ;;  %v2160_v56 = vld [vmem:[%s7232_s6 + $0x38] sm:$0xff]  ;;  %v2159_v57 = vld [vmem:[%s7232_s6 + $0x30] sm:$0xff] }
  0x5d   : > { %620 = vperm.xlu1 %4689, %v4535_v9   ;;  %615 = vperm.xlu0 %4688, %v4534_v10   ;;  %v2162_v59 = vld [vmem:[%s7232_s6 + $0x48] sm:$0xff]  ;;  %v2161_v60 = vld [vmem:[%s7232_s6 + $0x40] sm:$0xff]  ;;  %v2164_v5 = vld [vmem:[%s7232_s6 + $0x58] sm:$0xff] }
  0x5e   : > { %v402_v62 = vld [vmem:[%s5188_s17] sm:$0x77]  ;;  %v403_v4 = vld [vmem:[%s5188_s17 + $0x8] sm:$0x77]  ;;  %v2163_v6 = vld [vmem:[%s7232_s6 + $0x50] sm:$0xff] }
  0x5f   : > { %v465_v7 = vrot.slane %v402_v62, %v5196_v61  ;;  %v650_v9 = vrot.slane %v402_v62, %v5199_v63  ;;  %v899_v10 = vrot.slane %v402_v62, %v5201_v1  ;;  %v2180_v0 = vld [vmem:[%s7232_s6 + $0xd8] sm:$0xff] }
  0x61   : > { %869 = vperm.xlu1 %4689, %v4543_v11   ;;  %864 = vperm.xlu0 %4688, %v4542_v12   ;;  %v473_v11 = vrot.slane %v403_v4, %v5196_v61  ;;  %v658_v12 = vrot.slane %v403_v4, %v5199_v63 }
  0x65   : > { %1107 = vperm.xlu1 %4689, %v1093_v13   ;;  %1102 = vperm.xlu0 %4688, %v1092_v14   ;;  %v907_v13 = vrot.slane %v403_v4, %v5201_v1  ;;  %v461_v14 = vrot.slane %v402_v62, %v5203_v2 }
  0x69   : > { %441 = vperm.xlu1 %4689, %v411_v15   ;;  %436 = vperm.xlu0 %4688, %v410_v16   ;;  %v646_v15 = vrot.slane %v402_v62, %v5205_v3  ;;  %v2166_v16 = vld [vmem:[%s7232_s6 + $0x68] sm:$0xff] }
  0x6d   : > { %630 = vperm.xlu1 %4689, %v4537_v17   ;;  %625 = vperm.xlu0 %4688, %v4536_v18   ;;  %v2165_v17 = vld [vmem:[%s7232_s6 + $0x60] sm:$0xff]  ;;  %v5231_v18 = vrot.slane %v465_v7, %v5203_v2  ;;  %v2172_v7 = vld [vmem:[%s7232_s6 + $0x98] sm:$0xff] }
  0x71   : > { %879 = vperm.xlu1 %4689, %v4545_v19   ;;  %874 = vperm.xlu0 %4688, %v4544_v20   ;;  %v895_v19 = vrot.slane %v402_v62, %v5215_v8  ;;  %v404_v20 = vld [vmem:[%s5188_s17 + $0x10] sm:$0x77] }
  0x75   : > { %1117 = vperm.xlu1 %4689, %v1095_v21   ;;  %1112 = vperm.xlu0 %4688, %v1094_v22   ;;  %v5236_v21 = vrot.slane %v650_v9, %v5205_v3  ;;  %v5239_v22 = vrot.slane %v899_v10, %v5215_v8 }
  0x79   : > { %451 = vperm.xlu1 %4689, %v413_v23   ;;  %446 = vperm.xlu0 %4688, %v412_v24   ;;  %v5242_v23 = vrot.slane %v473_v11, %v5203_v2  ;;  %v5245_v24 = vrot.slane %v658_v12, %v5205_v3 }
  0x7d   : > { %640 = vperm.xlu1 %4689, %v4539_v25   ;;  %635 = vperm.xlu0 %4688, %v4538_v26   ;;  %v405_v25 = vld [vmem:[%s5188_s17 + $0x18] sm:$0x77]  ;;  %v5249_v26 = vrot.slane %v907_v13, %v5215_v8 }
  0x81   : > { %889 = vperm.xlu1 %4689, %v4547_v27   ;;  %884 = vperm.xlu0 %4688, %v4546_v28   ;;  %v5252_v27 = vrot.slane %v461_v14, %v5203_v2  ;;  %v5255_v28 = vrot.slane %v646_v15, %v5205_v3 }
  0x85   : > { %1127 = vperm.xlu1 %4689, %v1097_v29   ;;  %1122 = vperm.xlu0 %4688, %v1096_v30   ;;  %v469_v29 = vrot.slane %v403_v4, %v5203_v2  ;;  %v654_v30 = vrot.slane %v403_v4, %v5205_v3 }
  0x89   : > { %1137 = vperm.xlu1 %4689, %v1099_v31   ;;  %1132 = vperm.xlu0 %4688, %v1098_v32   ;;  %v903_v31 = vrot.slane %v403_v4, %v5215_v8  ;;  %v481_v32 = vrot.slane %v404_v20, %v5196_v61 }
  0x8d   : > { %1339 = vperm.xlu1 %4689, %v1317_v33   ;;  %1334 = vperm.xlu0 %4688, %v1316_v34   ;;  %v2168_v33 = vld [vmem:[%s7232_s6 + $0x78] sm:$0xff]  ;;  %v2167_v34 = vld [vmem:[%s7232_s6 + $0x70] sm:$0xff] }
  0x91   : > { %1349 = vperm.xlu1 %4689, %v1319_v35   ;;  %1344 = vperm.xlu0 %4688, %v1318_v36   ;;  %v5268_v35 = vrot.slane %v895_v19, %v5215_v8  ;;  %v666_v36 = vrot.slane %v404_v20, %v5199_v63 }
  0x95   : > { %1359 = vperm.xlu1 %4689, %v1321_v37   ;;  %1354 = vperm.xlu0 %4688, %v1320_v38   ;;  %v915_v37 = vrot.slane %v404_v20, %v5201_v1  ;;  %v489_v38 = vrot.slane %v405_v25, %v5196_v61 }
  0x97   : > { %v5306_v55 = vrot.slane %v489_v38, %v5203_v2 }
  0x99   : > { %1369 = vperm.xlu1 %4689, %v1323_v39   ;;  %1364 = vperm.xlu0 %4688, %v1322_v40   ;;  %v674_v39 = vrot.slane %v405_v25, %v5199_v63  ;;  %v477_v40 = vrot.slane %v404_v20, %v5203_v2  ;;  %7299 = vst [vmem:[#allocation14_spill] sm:$0xff] %v5306_v55 }
  0x9d   : > { %1379 = vperm.xlu1 %4689, %v1325_v41   ;;  %1374 = vperm.xlu0 %4688, %v1324_v42   ;;  %v662_v41 = vrot.slane %v404_v20, %v5205_v3  ;;  %v485_v42 = vrot.slane %v405_v25, %v5203_v2 }
  0x9f   : > { %v5315_v58 = vrot.slane %v662_v41, %v5205_v3 }
  0xa1   : > { %1389 = vperm.xlu1 %4689, %v1327_v43   ;;  %1384 = vperm.xlu0 %4688, %v1326_v44   ;;  %v923_v43 = vrot.slane %v405_v25, %v5201_v1  ;;  %v911_v44 = vrot.slane %v404_v20, %v5215_v8  ;;  %7301 = vst [vmem:[#allocation16_spill] sm:$0xff] %v5315_v58 }
  0xa3   : > { %v5325_v62 = vrot.slane %v923_v43, %v5215_v8  ;;  %v5328_v63 = vrot.slane %v911_v44, %v5215_v8 }
  0xa5   : > { %1399 = vperm.xlu1 %4689, %v1329_v45   ;;  %1394 = vperm.xlu0 %4688, %v1328_v46   ;;  %v670_v45 = vrot.slane %v405_v25, %v5205_v3  ;;  %v919_v46 = vrot.slane %v405_v25, %v5215_v8  ;;  %7304 = vst [vmem:[#allocation19_spill] sm:$0xff] %v5328_v63 }
  0xa7   : > { %v5331_v1 = vrot.slane %v670_v45, %v5205_v3  ;;  %v5334_v4 = vrot.slane %v919_v46, %v5215_v8 }
  0xa9   : > { %1409 = vperm.xlu1 %4689, %v1331_v47   ;;  %1404 = vperm.xlu0 %4688, %v1330_v48   ;;  %v5282_v47 = vrot.slane %v469_v29, %v5203_v2  ;;  %v5285_v48 = vrot.slane %v654_v30, %v5205_v3  ;;  %7305 = vst [vmem:[#allocation20_spill] sm:$0xff] %v5331_v1  ;;  %7306 = vst [vmem:[#allocation21_spill] sm:$0xff] %v5334_v4 }
  0xad   : > { %2192 = vperm.xlu1 %4689, %v2154_v49   ;;  %2187 = vperm.xlu0 %4688, %v2153_v50   ;;  %v5288_v49 = vrot.slane %v903_v31, %v5215_v8  ;;  %v2170_v50 = vld [vmem:[%s7232_s6 + $0x88] sm:$0xff] }
  0xb1   : > { %2202 = vperm.xlu1 %4689, %v2156_v51   ;;  %2197 = vperm.xlu0 %4688, %v2155_v52   ;;  %v2169_v51 = vld [vmem:[%s7232_s6 + $0x80] sm:$0xff]  ;;  %v5297_v52 = vrot.slane %v481_v32, %v5203_v2 }
  0xb3   : > { %7296 = vst [vmem:[#allocation11_spill] sm:$0xff] %v5297_v52 }
  0xb5   : > { %2212 = vperm.xlu1 %4689, %v2158_v53   ;;  %2207 = vperm.xlu0 %4688, %v2157_v54   ;;  %v5300_v53 = vrot.slane %v666_v36, %v5205_v3  ;;  %v5303_v54 = vrot.slane %v915_v37, %v5215_v8 }
  0xb7   : > { %7297 = vst [vmem:[#allocation12_spill] sm:$0xff] %v5300_v53  ;;  %7298 = vst [vmem:[#allocation13_spill] sm:$0xff] %v5303_v54 }
  0xb9   : > { %2222 = vperm.xlu1 %4689, %v2160_v56   ;;  %2217 = vperm.xlu0 %4688, %v2159_v57   ;;  %v5309_v56 = vrot.slane %v674_v39, %v5205_v3  ;;  %v5312_v57 = vrot.slane %v477_v40, %v5203_v2  ;;  %v2171_v3 = vld [vmem:[%s7232_s6 + $0x90] sm:$0xff] }
  0xbb   : > { %7300 = vst [vmem:[#allocation15_spill] sm:$0xff] %v5309_v56 }
  0xbd   : > { %2232 = vperm.xlu1 %4689, %v2162_v59   ;;  %2227 = vperm.xlu0 %4688, %v2161_v60   ;;  %v5318_v59 = vrot.slane %v485_v42, %v5203_v2 }
  0xbf   : > { %7302 = vst [vmem:[#allocation17_spill] sm:$0xff] %v5318_v59 }
  0xc1   : > { %2242 = vperm.xlu1 %4689, %v2164_v5   ;;  %2237 = vperm.xlu0 %4688, %v2163_v6  }
  0xc5   : > { %2252 = vperm.xlu1 %4689, %v2166_v16   ;;  %2247 = vperm.xlu0 %4688, %v2165_v17  }
  0xc9   : > { %2262 = vperm.xlu1 %4689, %v2168_v33   ;;  %2257 = vperm.xlu0 %4688, %v2167_v34   ;;  %v2174_v33 = vld [vmem:[%s7232_s6 + $0xa8] sm:$0xff]  ;;  %v2173_v34 = vld [vmem:[%s7232_s6 + $0xa0] sm:$0xff] }
  0xcc   : > { %v5320_v60 = vpop.permute.xlu1 %605  ;;  %v5322_v61 = vpop.permute.xlu0 %416 }
  0xcd   : > { %7303 = vst [vmem:[#allocation18_spill] sm:$0xff] %v5320_v60  ;;  %2272 = vperm.xlu1 %4689, %v2170_v50   ;;  %2267 = vperm.xlu0 %4688, %v2169_v51   ;;  %v531_v2 = vmul.f32 %v5231_v18, %v5322_v61  ;;  %v716_v5 = vmul.f32 %v5236_v21, %v5320_v60 }
  0xce   : > { %v533_v6 = vmul.f32 %v5242_v23, %v5322_v61  ;;  %v718_v8 = vmul.f32 %v5245_v24, %v5320_v60  ;;  %v530_v9 = vmul.f32 %v5252_v27, %v5322_v61  ;;  %v715_v10 = vmul.f32 %v5255_v28, %v5320_v60 }
  0xcf   : > { %v532_v11 = vmul.f32 %v5282_v47, %v5322_v61  ;;  %v780_v12 = vadd.f32 %v716_v5, %v531_v2  ;;  %v717_v13 = vmul.f32 %v5285_v48, %v5320_v60  ;;  %v535_v14 = vmul.f32 %v5297_v52, %v5322_v61 }
  0xd0   : > { %v720_v15 = vmul.f32 %v5300_v53, %v5320_v60  ;;  %v5362_v16 = vpop.permute.xlu1 %610  ;;  %v5364_v17 = vpop.permute.xlu0 %421  ;;  %v782_v19 = vadd.f32 %v718_v8, %v533_v6  ;;  %v779_v20 = vadd.f32 %v715_v10, %v530_v9  ;;  %v5368_v25 = vmul.f32 %v5306_v55, %v5322_v61  ;;  %v2175_v8 = vld [vmem:[%s7232_s6 + $0xb0] sm:$0xff] }
  0xd1   : > { %7307 = vst [vmem:[#allocation22_spill] sm:$0xff] %v5362_v16  ;;  %7308 = vst [vmem:[#allocation23_spill] sm:$0xff] %v5364_v17  ;;  %v5372_v29 = vmul.f32 %v5309_v56, %v5320_v60  ;;  %2282 = vperm.xlu1 %4689, %v2172_v7   ;;  %2277 = vperm.xlu0 %4688, %v2171_v3   ;;  %v539_v30 = vmul.f32 %v5231_v18, %v5364_v17  ;;  %v2176_v3 = vld [vmem:[%s7232_s6 + $0xb8] sm:$0xff] }
  0xd2   : > { %v724_v31 = vmul.f32 %v5236_v21, %v5362_v16  ;;  %v541_v32 = vmul.f32 %v5242_v23, %v5364_v17  ;;  %v726_v36 = vmul.f32 %v5245_v24, %v5362_v16  ;;  %v538_v37 = vmul.f32 %v5252_v27, %v5364_v17 }
  0xd3   : > { %v723_v38 = vmul.f32 %v5255_v28, %v5362_v16  ;;  %v540_v39 = vmul.f32 %v5282_v47, %v5364_v17  ;;  %v725_v41 = vmul.f32 %v5285_v48, %v5362_v16  ;;  %v781_v42 = vadd.f32 %v717_v13, %v532_v11 }
  0xd4   : > { %v788_v40 = vadd.f32 %v724_v31, %v539_v30  ;;  %v543_v43 = vmul.f32 %v5297_v52, %v5364_v17  ;;  %v5398_v44 = vpop.permute.xlu1 %859  ;;  %v5400_v45 = vpop.permute.xlu0 %854  ;;  %v790_v46 = vadd.f32 %v726_v36, %v541_v32  ;;  %v728_v51 = vmul.f32 %v5300_v53, %v5362_v16 }
  0xd5   : > { %v787_v50 = vadd.f32 %v723_v38, %v538_v37  ;;  %v5404_v2 = vadd.f32 %v720_v15, %v535_v14  ;;  %2292 = vperm.xlu1 %4689, %v2174_v33   ;;  %2287 = vperm.xlu0 %4688, %v2173_v34   ;;  %v965_v5 = vmul.f32 %v5239_v22, %v5400_v45 }
  0xd6   : > { %v973_v6 = vmul.f32 %v5239_v22, %v5398_v44  ;;  %v967_v7 = vmul.f32 %v5249_v26, %v5400_v45  ;;  %v975_v9 = vmul.f32 %v5249_v26, %v5398_v44  ;;  %v964_v10 = vmul.f32 %v5268_v35, %v5400_v45 }
  0xd7   : > { %v972_v11 = vmul.f32 %v5268_v35, %v5398_v44  ;;  %v789_v13 = vadd.f32 %v725_v41, %v540_v39  ;;  %v5424_v14 = vadd.f32 %v965_v5, %v780_v12  ;;  %v966_v31 = vmul.f32 %v5288_v49, %v5400_v45 }
  0xd8   : > { %v5426_v15 = vadd.f32 %v973_v6, %v788_v40  ;;  %v5428_v30 = vadd.f32 %v967_v7, %v782_v19  ;;  %v5432_v32 = vpop.permute.xlu1 %431  ;;  %v5434_v33 = vpop.permute.xlu0 %426  ;;  %v5436_v34 = vadd.f32 %v975_v9, %v790_v46  ;;  %v5438_v36 = vadd.f32 %v964_v10, %v779_v20  ;;  %v2178_v20 = vld [vmem:[%s7232_s6 + $0xc8] sm:$0xff]  ;;  %v2177_v40 = vld [vmem:[%s7232_s6 + $0xc0] sm:$0xff] }
  0xd9   : > { %7309 = vst [vmem:[#allocation24_spill] sm:$0xff] %v5432_v32  ;;  %7310 = vst [vmem:[#allocation25_spill] sm:$0xff] %v5434_v33  ;;  %v5440_v37 = vadd.f32 %v972_v11, %v787_v50  ;;  %v974_v12 = vmul.f32 %v5288_v49, %v5398_v44  ;;  %2302 = vperm.xlu1 %4689, %v2176_v3   ;;  %2297 = vperm.xlu0 %4688, %v2175_v8  }
  0xda   : > { %v5444_v19 = vadd.f32 %v966_v31, %v781_v42  ;;  %v547_v38 = vmul.f32 %v5231_v18, %v5434_v33  ;;  %v555_v39 = vmul.f32 %v5231_v18, %v5432_v32  ;;  %v549_v42 = vmul.f32 %v5242_v23, %v5434_v33 }
  0xdb   : > { %v5456_v41 = vadd.f32 %v974_v12, %v789_v13  ;;  %v557_v46 = vmul.f32 %v5242_v23, %v5432_v32  ;;  %v546_v50 = vmul.f32 %v5252_v27, %v5434_v33  ;;  %v554_v5 = vmul.f32 %v5252_v27, %v5432_v32 }
  0xdc   : > { %v548_v6 = vmul.f32 %v5282_v47, %v5434_v33  ;;  %v556_v7 = vmul.f32 %v5282_v47, %v5432_v32  ;;  %v5470_v3 = vadd.f32 %v728_v51, %v543_v43  ;;  %v5472_v8 = vpop.permute.xlu1 %620  ;;  %v5474_v9 = vpop.permute.xlu0 %615  ;;  %v5478_v10 = vmul.f32 %v5303_v54, %v5400_v45 }
  0xdd   : > { %7311 = vst [vmem:[#allocation26_spill] sm:$0xff] %v5472_v8  ;;  %7312 = vst [vmem:[#allocation27_spill] sm:$0xff] %v5474_v9  ;;  %v5482_v11 = vmul.f32 %v5303_v54, %v5398_v44  ;;  %v5486_v13 = vmul.f32 %v5306_v55, %v5364_v17  ;;  %v5490_v43 = vmul.f32 %v5309_v56, %v5362_v16  ;;  %2312 = vperm.xlu1 %4689, %v2178_v20   ;;  %v2179_v56 = vld [vmem:[%s7232_s6 + $0xd0] sm:$0xff] }
  0xde   : > { %2307 = vperm.xlu0 %4688, %v2177_v40   ;;  %v732_v51 = vmul.f32 %v5236_v21, %v5474_v9  ;;  %v740_v31 = vmul.f32 %v5236_v21, %v5472_v8  ;;  %v734_v12 = vmul.f32 %v5245_v24, %v5474_v9  ;;  %v742_v20 = vmul.f32 %v5245_v24, %v5472_v8 }
  0xdf   : > { %v731_v40 = vmul.f32 %v5255_v28, %v5474_v9  ;;  %v739_v55 = vmul.f32 %v5255_v28, %v5472_v8  ;;  %v733_v54 = vmul.f32 %v5285_v48, %v5474_v9  ;;  %v741_v33 = vmul.f32 %v5285_v48, %v5472_v8 }
  0xe0   : > { %v796_v53 = vadd.f32 %v732_v51, %v547_v38  ;;  %v804_v32 = vadd.f32 %v740_v31, %v555_v39  ;;  %v798_v52 = vadd.f32 %v734_v12, %v549_v42  ;;  %v5514_v4 = vpop.permute.xlu1 %869  ;;  %v5516_v1 = vpop.permute.xlu0 %864  ;;  %v806_v59 = vadd.f32 %v742_v20, %v557_v46  ;;  %v2182_v42 = vld [vmem:[%s7232_s6 + $0xe8] sm:$0xff] }
  0xe1   : > { %7313 = vst [vmem:[#allocation28_spill] sm:$0xff] %v5514_v4  ;;  %7314 = vst [vmem:[#allocation29_spill] sm:$0xff] %v5516_v1  ;;  %v795_v63 = vadd.f32 %v731_v40, %v546_v50  ;;  %v803_v16 = vadd.f32 %v739_v55, %v554_v5  ;;  %v797_v58 = vadd.f32 %v733_v54, %v548_v6  ;;  %2322 = vperm.xlu1 %4689, %v2180_v0   ;;  %v2181_v55 = vld [vmem:[%s7232_s6 + $0xe0] sm:$0xff] }
  0xe2   : > { %2317 = vperm.xlu0 %4688, %v2179_v56   ;;  %v981_v60 = vmul.f32 %v5239_v22, %v5516_v1  ;;  %v989_v38 = vmul.f32 %v5239_v22, %v5514_v4  ;;  %v983_v39 = vmul.f32 %v5249_v26, %v5516_v1  ;;  %v991_v0 = vmul.f32 %v5249_v26, %v5514_v4 }
  0xe3   : > { %v980_v54 = vmul.f32 %v5268_v35, %v5516_v1  ;;  %v988_v56 = vmul.f32 %v5268_v35, %v5514_v4  ;;  %v805_v46 = vadd.f32 %v741_v33, %v556_v7  ;;  %v982_v51 = vmul.f32 %v5288_v49, %v5516_v1 }
  0xe4   : > { %v5536_v50 = vadd.f32 %v981_v60, %v796_v53  ;;  %v5538_v5 = vadd.f32 %v989_v38, %v804_v32  ;;  %v5540_v6 = vadd.f32 %v983_v39, %v798_v52  ;;  %v5544_v31 = vpop.permute.xlu1 %1107  ;;  %v5546_v12 = vpop.permute.xlu0 %1102  ;;  %v5548_v20 = vadd.f32 %v991_v0, %v806_v59  ;;  %v2184_v59 = vld [vmem:[%s7232_s6 + $0xf8] sm:$0xff] }
  0xe5   : > { %v5550_v40 = vadd.f32 %v980_v54, %v795_v63  ;;  %v5552_v8 = vadd.f32 %v988_v56, %v803_v16  ;;  %v990_v53 = vmul.f32 %v5288_v49, %v5514_v4  ;;  %2332 = vperm.xlu1 %4689, %v2182_v42   ;;  %v1141_v52 = vadd.f32 %v5546_v12, %v5424_v14  ;;  %v2183_v63 = vld [vmem:[%s7232_s6 + $0xf0] sm:$0xff] }
  0xe6   : > { %2327 = vperm.xlu0 %4688, %v2181_v55   ;;  %v1149_v60 = vadd.f32 %v5544_v31, %v5426_v15  ;;  %v1143_v32 = vadd.f32 %v5546_v12, %v5428_v30  ;;  %v1151_v16 = vadd.f32 %v5544_v31, %v5436_v34  ;;  %v1140_v14 = vadd.f32 %v5546_v12, %v5438_v36 }
  0xe7   : > { %v1148_v15 = vadd.f32 %v5544_v31, %v5440_v37  ;;  %v1142_v30 = vadd.f32 %v5546_v12, %v5444_v19  ;;  %v1205_v33 = vmax.f32 %v1141_v52, 0.0  ;;  %v1150_v39 = vadd.f32 %v5544_v31, %v5456_v41  ;;  %v3614_v41 = vld [vmem:[%s7234_s8 + $0x8] sm:$0xff] }
  0xe8   : > { %v1213_v7 = vmax.f32 %v1149_v60, 0.0  ;;  %v1207_v38 = vmax.f32 %v1143_v32, 0.0  ;;  %v5578_v42 = vpop.permute.xlu1 %441  ;;  %v5580_v55 = vpop.permute.xlu0 %436  ;;  %v1215_v34 = vmax.f32 %v1151_v16, 0.0  ;;  %v1204_v0 = vmax.f32 %v1140_v14, 0.0 }
  0xe9   : > { %7315 = vst [vmem:[#allocation30_spill] sm:$0xff] %v5578_v42  ;;  %7316 = vst [vmem:[#allocation31_spill] sm:$0xff] %v5580_v55  ;;  %v1212_v54 = vmax.f32 %v1148_v15, 0.0  ;;  %v1206_v36 = vmax.f32 %v1142_v30, 0.0  ;;  %2342 = vperm.xlu1 %4689, %v2184_v59   ;;  %v1214_v56 = vmax.f32 %v1150_v39, 0.0  ;;  %v5582_v4 = vadd.f32 %v982_v51, %v797_v58  ;;  %v3613_v58 = vld [vmem:[%s7234_s8] sm:$0xff] }
  0xea   : > { %2337 = vperm.xlu0 %4688, %v2183_v63   ;;  %v1269_v37 = vpack.c.bf16 %v1213_v7, %v1205_v33  ;;  %v5584_v19 = vadd.f32 %v990_v53, %v805_v46  ;;  %v1271_v52 = vpack.c.bf16 %v1215_v34, %v1207_v38  ;;  %v563_v32 = vmul.f32 %v5231_v18, %v5580_v55  ;;  %v3616_v34 = vld [vmem:[%s7234_s8 + $0x18] sm:$0xff] }
  0xeb   : > { %v1268_v60 = vpack.c.bf16 %v1212_v54, %v1204_v0  ;;  %v571_v16 = vmul.f32 %v5231_v18, %v5578_v42  ;;  %v1270_v59 = vpack.c.bf16 %v1214_v56, %v1206_v36  ;;  %v565_v46 = vmul.f32 %v5242_v23, %v5580_v55  ;;  %v3615_v56 = vld [vmem:[%s7234_s8 + $0x10] sm:$0xff] }
  0xec   : > { %1477 = vmatprep.subr.bf16.mxu0 %v1269_v37  ;;  %v573_v51 = vmul.f32 %v5242_v23, %v5578_v42  ;;  %v562_v53 = vmul.f32 %v5252_v27, %v5580_v55  ;;  %1590 = vmatprep.subr.bf16.mxu1 %v1271_v52  ;;  %v5602_v63 = vpop.permute.xlu1 %630  ;;  %v5604_v14 = vpop.permute.xlu0 %625  ;;  %v570_v15 = vmul.f32 %v5252_v27, %v5578_v42 }
  0xed   : > { %7317 = vst [vmem:[#allocation32_spill] sm:$0xff] %v5604_v14  ;;  %1478 = vmatpush1.bf16.msra.mxu0 %v1268_v60  ;;  %v564_v30 = vmul.f32 %v5282_v47, %v5580_v55  ;;  %v572_v33 = vmul.f32 %v5282_v47, %v5578_v42  ;;  %1591 = vmatpush1.bf16.msra.mxu1 %v1270_v59 }
  0xee   : > { %3636 = vperm.xlu1 %4689, %v3614_v41   ;;  %v748_v7 = vmul.f32 %v5236_v21, %v5604_v14  ;;  %v756_v38 = vmul.f32 %v5236_v21, %v5602_v63  ;;  %v750_v39 = vmul.f32 %v5245_v24, %v5604_v14  ;;  %3631 = vperm.xlu0 %4688, %v3613_v58  }
  0xef   : > { %v758_v0 = vmul.f32 %v5245_v24, %v5602_v63  ;;  %v747_v54 = vmul.f32 %v5255_v28, %v5604_v14  ;;  %v755_v36 = vmul.f32 %v5255_v28, %v5602_v63  ;;  %v749_v37 = vmul.f32 %v5285_v48, %v5604_v14 }
  0xf0   : > { %v812_v52 = vadd.f32 %v748_v7, %v563_v32  ;;  %v820_v60 = vadd.f32 %v756_v38, %v571_v16  ;;  %v814_v41 = vadd.f32 %v750_v39, %v565_v46  ;;  %v757_v59 = vmul.f32 %v5285_v48, %v5602_v63  ;;  %v5634_v58 = vpop.permute.xlu1 %879  ;;  %v5636_v42 = vpop.permute.xlu0 %874  ;;  %v3617_v38 = vld [vmem:[%s7234_s8 + $0x20] sm:$0xff] }
  0xf1   : > { %7318 = vst [vmem:[#allocation33_spill] sm:$0xff] %v5636_v42  ;;  %v822_v55 = vadd.f32 %v758_v0, %v573_v51  ;;  %v811_v1 = vadd.f32 %v747_v54, %v562_v53  ;;  %v819_v9 = vadd.f32 %v755_v36, %v570_v15  ;;  %v813_v17 = vadd.f32 %v749_v37, %v564_v30  ;;  %v3618_v51 = vld [vmem:[%s7234_s8 + $0x28] sm:$0xff] }
  0xf2   : > { %3646 = vperm.xlu1 %4689, %v3616_v34   ;;  %v997_v14 = vmul.f32 %v5239_v22, %v5636_v42  ;;  %v1005_v32 = vmul.f32 %v5239_v22, %v5634_v58  ;;  %v999_v16 = vmul.f32 %v5249_v26, %v5636_v42  ;;  %v1007_v46 = vmul.f32 %v5249_v26, %v5634_v58 }
  0xf3   : > { %3641 = vperm.xlu0 %4688, %v3615_v56   ;;  %v996_v53 = vmul.f32 %v5268_v35, %v5636_v42  ;;  %v1004_v15 = vmul.f32 %v5268_v35, %v5634_v58  ;;  %v821_v30 = vadd.f32 %v757_v59, %v572_v33  ;;  %v998_v7 = vmul.f32 %v5288_v49, %v5636_v42 }
  0xf4   : > { %v5658_v39 = vadd.f32 %v997_v14, %v812_v52  ;;  %v5660_v34 = vadd.f32 %v1005_v32, %v820_v60  ;;  %v5662_v0 = vadd.f32 %v999_v16, %v814_v41  ;;  %v5664_v54 = vadd.f32 %v1007_v46, %v822_v55  ;;  %v5666_v36 = vpop.permute.xlu1 %1117  ;;  %v5668_v37 = vpop.permute.xlu0 %1112 }
  0xf5   : > { %v5670_v33 = vadd.f32 %v996_v53, %v811_v1  ;;  %v5672_v56 = vadd.f32 %v1004_v15, %v819_v9  ;;  %v1006_v59 = vmul.f32 %v5288_v49, %v5634_v58  ;;  %v5676_v42 = vadd.f32 %v998_v7, %v813_v17  ;;  %v3620_v9 = vld [vmem:[%s7234_s8 + $0x38] sm:$0xff] }
  0xf6   : > { %3656 = vperm.xlu1 %4689, %v3618_v51   ;;  %v1157_v14 = vadd.f32 %v5668_v37, %v5536_v50  ;;  %v1165_v55 = vadd.f32 %v5666_v36, %v5538_v5  ;;  %v1159_v52 = vadd.f32 %v5668_v37, %v5540_v6  ;;  %v1167_v1 = vadd.f32 %v5666_v36, %v5548_v20  ;;  %v3619_v20 = vld [vmem:[%s7234_s8 + $0x30] sm:$0xff] }
  0xf7   : > { %3651 = vperm.xlu0 %4688, %v3617_v38   ;;  %v1156_v17 = vadd.f32 %v5668_v37, %v5550_v40  ;;  %v1164_v50 = vadd.f32 %v5666_v36, %v5552_v8  ;;  %v1158_v5 = vadd.f32 %v5668_v37, %v5582_v4  ;;  %v1166_v6 = vadd.f32 %v5666_v36, %v5584_v19 }
  0xf8   : > { %v1221_v60 = vmax.f32 %v1157_v14, 0.0  ;;  %v1229_v41 = vmax.f32 %v1165_v55, 0.0  ;;  %v1223_v32 = vmax.f32 %v1159_v52, 0.0  ;;  %v1231_v16 = vmax.f32 %v1167_v1, 0.0  ;;  %v5700_v46 = vpop.permute.xlu1 %451  ;;  %v5702_v40 = vpop.permute.xlu0 %446  ;;  %v3622_v52 = vld [vmem:[%s7234_s8 + $0x48] sm:$0xff] }
  0xf9   : > { %v1220_v51 = vmax.f32 %v1156_v17, 0.0  ;;  %v1228_v8 = vmax.f32 %v1164_v50, 0.0  ;;  %v1222_v53 = vmax.f32 %v1158_v5, 0.0  ;;  %v1230_v15 = vmax.f32 %v1166_v6, 0.0 }
  0xfa   : > { %3666 = vperm.xlu1 %4689, %v3620_v9   ;;  %v1277_v4 = vpack.c.bf16 %v1229_v41, %v1221_v60  ;;  %v1279_v7 = vpack.c.bf16 %v1231_v16, %v1223_v32  ;;  %v5704_v19 = vadd.f32 %v1006_v59, %v821_v30  ;;  %v579_v38 = vmul.f32 %v5231_v18, %v5702_v40  ;;  %v3621_v30 = vld [vmem:[%s7234_s8 + $0x40] sm:$0xff] }
  0xfb   : > { %3661 = vperm.xlu0 %4688, %v3619_v20   ;;  %v1276_v14 = vpack.c.bf16 %v1228_v8, %v1220_v51  ;;  %v1278_v55 = vpack.c.bf16 %v1230_v15, %v1222_v53  ;;  %v587_v1 = vmul.f32 %v5231_v18, %v5700_v46  ;;  %v581_v9 = vmul.f32 %v5242_v23, %v5702_v40 }
  0xfc   : > { %1479 = vmatprep.subr.bf16.mxu0 %v1277_v4  ;;  %1592 = vmatprep.subr.bf16.mxu1 %v1279_v7  ;;  %v589_v59 = vmul.f32 %v5242_v23, %v5700_v46  ;;  %v578_v17 = vmul.f32 %v5252_v27, %v5702_v40  ;;  %v586_v50 = vmul.f32 %v5252_v27, %v5700_v46  ;;  %v5724_v5 = vpop.permute.xlu1 %640  ;;  %v5726_v18 = vpop.permute.xlu0 %635 }
  0xfd   : > { %1480 = vmatpush1.bf16.msra.mxu0 %v1276_v14  ;;  %1593 = vmatpush1.bf16.msra.mxu1 %v1278_v55  ;;  %v580_v6 = vmul.f32 %v5282_v47, %v5702_v40  ;;  %v588_v20 = vmul.f32 %v5282_v47, %v5700_v46  ;;  %v5734_v23 = vadd.f32 %v5478_v10, %v5404_v2  ;;  %v3624_v47 = vld [vmem:[%s7234_s8 + $0x58] sm:$0xff] }
  0xfe   : > { %3676 = vperm.xlu1 %4689, %v3622_v52   ;;  %v764_v27 = vmul.f32 %v5236_v21, %v5726_v18  ;;  %v772_v60 = vmul.f32 %v5236_v21, %v5724_v5  ;;  %v766_v41 = vmul.f32 %v5245_v24, %v5726_v18  ;;  %v774_v32 = vmul.f32 %v5245_v24, %v5724_v5  ;;  %v3623_v24 = vld [vmem:[%s7234_s8 + $0x50] sm:$0xff] }
  0xff   : > { %3671 = vperm.xlu0 %4688, %v3621_v30   ;;  %v763_v2 = vmul.f32 %v5255_v28, %v5726_v18  ;;  %v771_v10 = vmul.f32 %v5255_v28, %v5724_v5  ;;  %v765_v21 = vmul.f32 %v5285_v48, %v5726_v18  ;;  %v773_v16 = vmul.f32 %v5285_v48, %v5724_v5 }
 0x100   : > { %v828_v51 = vadd.f32 %v764_v27, %v579_v38  ;;  %v836_v8 = vadd.f32 %v772_v60, %v587_v1  ;;  %v830_v53 = vadd.f32 %v766_v41, %v581_v9  ;;  %v838_v15 = vadd.f32 %v774_v32, %v589_v59  ;;  %v5758_v4 = vpop.permute.xlu1 %889  ;;  %v5760_v7 = vpop.permute.xlu0 %884  ;;  %v3626_v9 = vld [vmem:[%s7234_s8 + $0x68] sm:$0xff] }
 0x101   : > { %v827_v14 = vadd.f32 %v763_v2, %v578_v17  ;;  %v835_v28 = vadd.f32 %v771_v10, %v586_v50  ;;  %v829_v55 = vadd.f32 %v765_v21, %v580_v6  ;;  %v837_v52 = vadd.f32 %v773_v16, %v588_v20 }
 0x102   : > { %3686 = vperm.xlu1 %4689, %v3624_v47   ;;  %v1013_v48 = vmul.f32 %v5239_v22, %v5760_v7  ;;  %v1021_v30 = vmul.f32 %v5239_v22, %v5758_v4  ;;  %v1015_v38 = vmul.f32 %v5249_v26, %v5760_v7  ;;  %v1023_v1 = vmul.f32 %v5249_v26, %v5758_v4  ;;  %v3625_v26 = vld [vmem:[%s7234_s8 + $0x60] sm:$0xff] }
 0x103   : > { %3681 = vperm.xlu0 %4688, %v3623_v24   ;;  %v1012_v59 = vmul.f32 %v5268_v35, %v5760_v7  ;;  %v1020_v17 = vmul.f32 %v5268_v35, %v5758_v4  ;;  %v1014_v22 = vmul.f32 %v5288_v49, %v5760_v7  ;;  %v1022_v50 = vmul.f32 %v5288_v49, %v5758_v4 }
 0x104   : > { %v1077_v6 = vadd.f32 %v1013_v48, %v828_v51  ;;  %v1085_v20 = vadd.f32 %v1021_v30, %v836_v8  ;;  %v1079_v27 = vadd.f32 %v1015_v38, %v830_v53  ;;  %v1087_v60 = vadd.f32 %v1023_v1, %v838_v15  ;;  %v5784_v41 = vpop.permute.xlu1 %1127  ;;  %v5786_v32 = vpop.permute.xlu0 %1122  ;;  %v3628_v51 = vld [vmem:[%s7234_s8 + $0x78] sm:$0xff] }
 0x105   : > { %v1076_v47 = vadd.f32 %v1012_v59, %v827_v14  ;;  %v1084_v35 = vadd.f32 %v1020_v17, %v835_v28  ;;  %v1078_v2 = vadd.f32 %v1014_v22, %v829_v55  ;;  %v1086_v10 = vadd.f32 %v1022_v50, %v837_v52 }
 0x106   : > { %3696 = vperm.xlu1 %4689, %v3626_v9   ;;  %v1173_v49 = vadd.f32 %v5786_v32, %v5658_v39  ;;  %v1181_v21 = vadd.f32 %v5784_v41, %v5660_v34  ;;  %v1175_v16 = vadd.f32 %v5786_v32, %v5662_v0  ;;  %v1183_v24 = vadd.f32 %v5784_v41, %v5664_v54  ;;  %v3627_v54 = vld [vmem:[%s7234_s8 + $0x70] sm:$0xff] }
 0x107   : > { %3691 = vperm.xlu0 %4688, %v3625_v26   ;;  %v1172_v8 = vadd.f32 %v5786_v32, %v5670_v33  ;;  %v1180_v39 = vadd.f32 %v5784_v41, %v5672_v56  ;;  %v1174_v34 = vadd.f32 %v5786_v32, %v5676_v42  ;;  %v1182_v0 = vadd.f32 %v5784_v41, %v5704_v19 }
 0x108   : > { %v1237_v53 = vmax.f32 %v1173_v49, 0.0  ;;  %v1245_v15 = vmax.f32 %v1181_v21, 0.0  ;;  %v1239_v14 = vmax.f32 %v1175_v16, 0.0  ;;  %v1247_v28 = vmax.f32 %v1183_v24, 0.0  ;;  %v5810_v55 = vpop.permute.xlu1 %1137  ;;  %v5812_v33 = vpop.permute.xlu0 %1132 }
 0x109   : > { %v1236_v52 = vmax.f32 %v1172_v8, 0.0  ;;  %v1244_v56 = vmax.f32 %v1180_v39, 0.0  ;;  %v1238_v48 = vmax.f32 %v1174_v34, 0.0  ;;  %v1246_v30 = vmax.f32 %v1182_v0, 0.0 }
 0x10a   : > { %3706 = vperm.xlu1 %4689, %v3628_v51   ;;  %v1285_v42 = vpack.c.bf16 %v1245_v15, %v1237_v53  ;;  %v1287_v38 = vpack.c.bf16 %v1247_v28, %v1239_v14  ;;  %v1189_v19 = vadd.f32 %v5812_v33, %v1077_v6  ;;  %v1197_v1 = vadd.f32 %v5810_v55, %v1085_v20  ;;  %v7321_v28 = vld [vmem:[#allocation16_spill] sm:$0xff] }
 0x10b   : > { %3701 = vperm.xlu0 %4688, %v3627_v54   ;;  %v1284_v9 = vpack.c.bf16 %v1244_v56, %v1236_v52  ;;  %v1286_v59 = vpack.c.bf16 %v1246_v30, %v1238_v48  ;;  %v1191_v17 = vadd.f32 %v5812_v33, %v1079_v27  ;;  %v1199_v22 = vadd.f32 %v5810_v55, %v1087_v60  ;;  %v7322_v30 = vld [vmem:[#allocation22_spill] sm:$0xff] }
 0x10c   : > { %1481 = vmatprep.subr.bf16.mxu0 %v1285_v42  ;;  %1594 = vmatprep.subr.bf16.mxu1 %v1287_v38  ;;  %v1253_v50 = vmax.f32 %v1189_v19, 0.0  ;;  %v1261_v26 = vmax.f32 %v1197_v1, 0.0  ;;  %v1188_v49 = vadd.f32 %v5812_v33, %v1076_v47  ;;  %v1196_v21 = vadd.f32 %v5810_v55, %v1084_v35  ;;  %v7323_v38 = vld [vmem:[#allocation19_spill] sm:$0xff] }
 0x10d   : > { %1482 = vmatpush1.bf16.msra.mxu0 %v1284_v9  ;;  %1595 = vmatpush1.bf16.msra.mxu1 %v1286_v59  ;;  %v1255_v6 = vmax.f32 %v1191_v17, 0.0  ;;  %v1263_v20 = vmax.f32 %v1199_v22, 0.0  ;;  %v1190_v16 = vadd.f32 %v5812_v33, %v1078_v2  ;;  %v1198_v24 = vadd.f32 %v5810_v55, %v1086_v10  ;;  %v7324_v17 = vld [vmem:[#allocation17_spill] sm:$0xff] }
 0x10e   : > { %v1293_v51 = vpack.c.bf16 %v1261_v26, %v1253_v50  ;;  %v1252_v27 = vmax.f32 %v1188_v49, 0.0  ;;  %v1260_v8 = vmax.f32 %v1196_v21, 0.0  ;;  %v1041_v60 = vadd.f32 %v5482_v11, %v5470_v3 }
 0x10f   : > { %v1295_v39 = vpack.c.bf16 %v1263_v20, %v1255_v6  ;;  %v1254_v34 = vmax.f32 %v1190_v16, 0.0  ;;  %v1262_v0 = vmax.f32 %v1198_v24, 0.0  ;;  %v1145_v47 = vadd.f32 %v5546_v12, %v5734_v23  ;;  %v5838_v23 = vld [vmem:[%s7229_s3] sm:$0xff]   ;;  %v7325_v20 = vld [vmem:[#allocation20_spill] sm:$0xff] }
 0x110   : > { %1483 = vmatprep.subr.bf16.mxu0 %v1293_v51  ;;  %v1292_v35 = vpack.c.bf16 %v1260_v8, %v1252_v27  ;;  %v1153_v54 = vadd.f32 %v5544_v31, %v1041_v60  ;;  %v786_v2 = vadd.f32 %v5372_v29, %v5368_v25  ;;  %v794_v10 = vadd.f32 %v5490_v43, %v5486_v13  ;;  %v7319_v29 = vld [vmem:[#allocation23_spill] sm:$0xff]  ;;  %v7320_v43 = vld [vmem:[#allocation18_spill] sm:$0xff]  ;;  %v7326_v8 = vld [vmem:[#allocation21_spill] sm:$0xff] }
 0x111   : > { %1596 = vmatprep.subr.bf16.mxu1 %v1295_v39  ;;  %v1294_v53 = vpack.c.bf16 %v1262_v0, %v1254_v34  ;;  %v1209_v15 = vmax.f32 %v1145_v47, 0.0  ;;  %v971_v3 = vmul.f32 %v5325_v62, %v5400_v45  ;;  %v979_v11 = vmul.f32 %v5325_v62, %v5398_v44 }
 0x112   : > { %1484 = vmatpush1.bf16.msra.mxu0 %v1292_v35  ;;  %v1217_v14 = vmax.f32 %v1153_v54, 0.0  ;;  %v534_v25 = vmul.f32 %v5312_v57, %v5322_v61  ;;  %v542_v13 = vmul.f32 %v5312_v57, %v7319_v29  ;;  %v719_v52 = vmul.f32 %v7321_v28, %v7320_v43 }
 0x113   : > { %1597 = vmatpush1.bf16.msra.mxu1 %v1294_v53  ;;  %v1035_v56 = vadd.f32 %v971_v3, %v786_v2  ;;  %v1043_v48 = vadd.f32 %v979_v11, %v794_v10  ;;  %v727_v42 = vmul.f32 %v7321_v28, %v7322_v30  ;;  %v968_v19 = vmul.f32 %v7323_v38, %v5400_v45  ;;  %v7328_v10 = vld [vmem:[#allocation25_spill] sm:$0xff]  ;;  %v7329_v53 = vld [vmem:[#allocation11_spill] sm:$0xff]  ;;  %v7330_v3 = vld [vmem:[#allocation24_spill] sm:$0xff] }
 0x114   : > { %v1273_v1 = vpack.c.bf16 %v1217_v14, %v1209_v15  ;;  %v783_v9 = vadd.f32 %v719_v52, %v534_v25  ;;  %v976_v59 = vmul.f32 %v7323_v38, %v5398_v44  ;;  %v536_v22 = vmul.f32 %v7324_v17, %v5322_v61  ;;  %v5881_v11 = vld [vmem:[%s7229_s3 + $0x8] sm:$0xff]  }
 0x115   : > { %v1147_v50 = vadd.f32 %v5546_v12, %v1035_v56  ;;  %v1155_v26 = vadd.f32 %v5544_v31, %v1043_v48  ;;  %4556 = vmatmul.mubr.msk.bf16.vlgmr.msra.gmra.mrb[0].mxu0 %vm1452_vm0, %v5838_v23  ;;  %v791_v49 = vadd.f32 %v727_v42, %v542_v13  ;;  %v544_v21 = vmul.f32 %v7324_v17, %v7319_v29  ;;  %v7331_v13 = vld [vmem:[#allocation27_spill] sm:$0xff]  ;;  %v7333_v56 = vld [vmem:[#allocation26_spill] sm:$0xff]  ;;  %v7335_v42 = vld [vmem:[#allocation13_spill] sm:$0xff] }
 0x116   : > { %1703 = vmatprep.subr.bf16.mxu0 %v1273_v1  ;;  %4564 = vmatmul.mubr.msk.bf16.vlgmr.msra.gmra.mrb[0].mxu1 %vm1452_vm0, %v5838_v23  ;;  %v1032_v6 = vadd.f32 %v968_v19, %v783_v9  ;;  %v721_v16 = vmul.f32 %v7325_v20, %v7320_v43  ;;  %v729_v61 = vmul.f32 %v7325_v20, %v7322_v30  ;;  %v7327_v39 = vmov 0   ;;  %v7332_v43 = vld [vmem:[#allocation12_spill] sm:$0xff]  ;;  %v7334_v30 = vld [vmem:[#allocation29_spill] sm:$0xff] }
 0x117   : > { %v1211_v24 = vmax.f32 %v1147_v50, 0.0  ;;  %v1219_v51 = vmax.f32 %v1155_v26, 0.0  ;;  %v1040_v27 = vadd.f32 %v976_v59, %v791_v49  ;;  %v970_v60 = vmul.f32 %v7326_v8, %v5400_v45  ;;  %1519 = vmatprep.mubr.bf16.mxu0 %v7327_v39  ;;  %1632 = vmatprep.mubr.bf16.mxu1 %v7327_v39  ;;  %v7336_v1 = vld [vmem:[#allocation28_spill] sm:$0xff]  ;;  %v7337_v26 = vld [vmem:[#allocation14_spill] sm:$0xff] }
 0x118   : > { %v1144_v34 = vadd.f32 %v5546_v12, %v1032_v6  ;;  %v785_v0 = vadd.f32 %v721_v16, %v536_v22  ;;  %v793_v47 = vadd.f32 %v729_v61, %v544_v21  ;;  %v978_v35 = vmul.f32 %v7326_v8, %v5398_v44  ;;  %v7338_v61 = vld [vmem:[#allocation15_spill] sm:$0xff] }
 0x119   : > { %v1275_v54 = vpack.c.bf16 %v1219_v51, %v1211_v24  ;;  %v1152_v2 = vadd.f32 %v5544_v31, %v1040_v27  ;;  %v551_v15 = vmul.f32 %v7329_v53, %v7328_v10  ;;  %v559_v45 = vmul.f32 %v7329_v53, %v7330_v3 }
 0x11a   : > { %v1208_v14 = vmax.f32 %v1144_v34, 0.0  ;;  %v1034_v25 = vadd.f32 %v970_v60, %v785_v0  ;;  %v1042_v29 = vadd.f32 %v978_v35, %v793_v47  ;;  %v736_v44 = vmul.f32 %v7332_v43, %v7331_v13 }
 0x11b   : > { %1816 = vmatprep.subr.bf16.mxu1 %v1275_v54  ;;  %v1216_v52 = vmax.f32 %v1152_v2, 0.0  ;;  %v744_v48 = vmul.f32 %v7332_v43, %v7333_v56  ;;  %v985_v19 = vmul.f32 %v7335_v42, %v7334_v30  ;;  %v993_v9 = vmul.f32 %v7335_v42, %v7336_v1 }
 0x11c   : > { %v1146_v59 = vadd.f32 %v5546_v12, %v1034_v25  ;;  %v1154_v22 = vadd.f32 %v5544_v31, %v1042_v29  ;;  %v800_v50 = vadd.f32 %v736_v44, %v551_v15  ;;  %v553_v49 = vmul.f32 %v7337_v26, %v7328_v10  ;;  %v5922_v44 = vld [vmem:[%s7229_s3 + $0x10] sm:$0xff]  }
 0x11d   : > { %v1272_v21 = vpack.c.bf16 %v1216_v52, %v1208_v14  ;;  %v808_v6 = vadd.f32 %v744_v48, %v559_v45  ;;  %v561_v16 = vmul.f32 %v7337_v26, %v7330_v3  ;;  %v738_v24 = vmul.f32 %v7338_v61, %v7331_v13  ;;  %4557 = vmatmul.mubr.msk.bf16.gmra.mrb[4].mxu0 %vm1452_vm0, %v5881_v11 }
 0x11e   : > { %v1210_v51 = vmax.f32 %v1146_v59, 0.0  ;;  %v1218_v27 = vmax.f32 %v1154_v22, 0.0  ;;  %v1049_v12 = vadd.f32 %v985_v19, %v800_v50  ;;  %v746_v31 = vmul.f32 %v7338_v61, %v7333_v56  ;;  %4565 = vmatmul.mubr.msk.bf16.gmra.mrb[4].mxu1 %vm1452_vm0, %v5881_v11  ;;  %1529 = vmatprep.mubr.bf16.mxu0 %v7327_v39 }
 0x11f   : > { %1704 = vmatpush1.bf16.msra.mxu0 %v1272_v21  ;;  %v1057_v60 = vadd.f32 %v993_v9, %v808_v6  ;;  %v802_v34 = vadd.f32 %v738_v24, %v553_v49  ;;  %v987_v0 = vmul.f32 %v5325_v62, %v7334_v30  ;;  %v995_v47 = vmul.f32 %v5325_v62, %v7336_v1 }
 0x120   : > { %v1274_v35 = vpack.c.bf16 %v1218_v27, %v1210_v51  ;;  %v1161_v54 = vadd.f32 %v5668_v37, %v1049_v12  ;;  %v810_v2 = vadd.f32 %v746_v31, %v561_v16  ;;  %v550_v15 = vmul.f32 %v5312_v57, %v7328_v10  ;;  %1642 = vmatprep.mubr.bf16.mxu1 %v7327_v39 }
 0x121   : > { %v1169_v45 = vadd.f32 %v5666_v36, %v1057_v60  ;;  %v1051_v14 = vadd.f32 %v987_v0, %v802_v34  ;;  %v558_v25 = vmul.f32 %v5312_v57, %v7330_v3  ;;  %v735_v29 = vmul.f32 %v7321_v28, %v7331_v13 }
 0x122   : > { %1817 = vmatpush1.bf16.msra.mxu1 %v1274_v35  ;;  %v1225_v52 = vmax.f32 %v1161_v54, 0.0  ;;  %v1059_v48 = vadd.f32 %v995_v47, %v810_v2  ;;  %v743_v19 = vmul.f32 %v7321_v28, %v7333_v56  ;;  %v984_v9 = vmul.f32 %v7323_v38, %v7334_v30  ;;  %v7339_v35 = vld [vmem:[#allocation31_spill] sm:$0xff] }
 0x123   : > { %v1233_v59 = vmax.f32 %v1169_v45, 0.0  ;;  %v1163_v22 = vadd.f32 %v5668_v37, %v1051_v14  ;;  %v799_v50 = vadd.f32 %v735_v29, %v550_v15  ;;  %v992_v49 = vmul.f32 %v7323_v38, %v7336_v1  ;;  %v7341_v29 = vld [vmem:[#allocation32_spill] sm:$0xff] }
 0x124   : > { %v1171_v21 = vadd.f32 %v5666_v36, %v1059_v48  ;;  %v807_v6 = vadd.f32 %v743_v19, %v558_v25  ;;  %v552_v16 = vmul.f32 %v7324_v17, %v7328_v10  ;;  %v560_v24 = vmul.f32 %v7324_v17, %v7330_v3  ;;  %v5963_v48 = vld [vmem:[%s7229_s3 + $0x18] sm:$0xff]  }
 0x125   : > { %v1281_v51 = vpack.c.bf16 %v1233_v59, %v1225_v52  ;;  %v1227_v27 = vmax.f32 %v1163_v22, 0.0  ;;  %v1048_v12 = vadd.f32 %v984_v9, %v799_v50  ;;  %v737_v31 = vmul.f32 %v7325_v20, %v7331_v13  ;;  %4558 = vmatmul.mubr.msk.bf16.gmra.mrb[8].mxu0 %vm1452_vm0, %v5922_v44  ;;  %v7342_v59 = vld [vmem:[#allocation33_spill] sm:$0xff] }
 0x126   : > { %v1235_v60 = vmax.f32 %v1171_v21, 0.0  ;;  %v1056_v34 = vadd.f32 %v992_v49, %v807_v6  ;;  %v745_v0 = vmul.f32 %v7325_v20, %v7333_v56  ;;  %v986_v10 = vmul.f32 %v7326_v8, %v7334_v30  ;;  %4566 = vmatmul.mubr.msk.bf16.gmra.mrb[8].mxu1 %vm1452_vm0, %v5922_v44  ;;  %1539 = vmatprep.mubr.bf16.mxu0 %v7327_v39  ;;  %v7340_v30 = vld [vmem:[#allocation30_spill] sm:$0xff] }
 0x127   : > { %1705 = vmatprep.subr.bf16.mxu0 %v1281_v51  ;;  %v1160_v3 = vadd.f32 %v5668_v37, %v1048_v12  ;;  %v801_v13 = vadd.f32 %v737_v31, %v552_v16  ;;  %v994_v47 = vmul.f32 %v7326_v8, %v7336_v1  ;;  %v567_v54 = vmul.f32 %v7329_v53, %v7339_v35 }
 0x128   : > { %v1283_v2 = vpack.c.bf16 %v1235_v60, %v1227_v27  ;;  %v1168_v56 = vadd.f32 %v5666_v36, %v1056_v34  ;;  %v809_v15 = vadd.f32 %v745_v0, %v560_v24  ;;  %v575_v45 = vmul.f32 %v7329_v53, %v7340_v30  ;;  %1652 = vmatprep.mubr.bf16.mxu1 %v7327_v39 }
 0x129   : > { %v1224_v14 = vmax.f32 %v1160_v3, 0.0  ;;  %v1050_v25 = vadd.f32 %v986_v10, %v801_v13  ;;  %v752_v52 = vmul.f32 %v7332_v43, %v7341_v29  ;;  %v760_v1 = vmul.f32 %v7332_v43, %v5602_v63 }
 0x12a   : > { %1818 = vmatprep.subr.bf16.mxu1 %v1283_v2  ;;  %v1232_v19 = vmax.f32 %v1168_v56, 0.0  ;;  %v1058_v9 = vadd.f32 %v994_v47, %v809_v15  ;;  %v1001_v22 = vmul.f32 %v7335_v42, %v7342_v59  ;;  %v1009_v50 = vmul.f32 %v7335_v42, %v5634_v58 }
 0x12b   : > { %v1162_v49 = vadd.f32 %v5668_v37, %v1050_v25  ;;  %v816_v21 = vadd.f32 %v752_v52, %v567_v54  ;;  %v824_v6 = vadd.f32 %v760_v1, %v575_v45  ;;  %v569_v16 = vmul.f32 %v7337_v26, %v7339_v35 }
 0x12c   : > { %v1280_v24 = vpack.c.bf16 %v1232_v19, %v1224_v14  ;;  %v1170_v51 = vadd.f32 %v5666_v36, %v1058_v9  ;;  %v577_v27 = vmul.f32 %v7337_v26, %v7340_v30  ;;  %v754_v12 = vmul.f32 %v7338_v61, %v7341_v29  ;;  %v6002_v9 = vld [vmem:[%s7229_s3 + $0x20] sm:$0xff]  }
 0x12d   : > { %v1226_v31 = vmax.f32 %v1162_v49, 0.0  ;;  %v1065_v60 = vadd.f32 %v1001_v22, %v816_v21  ;;  %v1073_v34 = vadd.f32 %v1009_v50, %v824_v6  ;;  %v762_v37 = vmul.f32 %v7338_v61, %v5602_v63  ;;  %4559 = vmatmul.mubr.msk.bf16.gmra.mrb[12].mxu0 %vm1452_vm0, %v5963_v48 }
 0x12e   : > { %1706 = vmatpush1.bf16.msra.mxu0 %v1280_v24  ;;  %v1234_v0 = vmax.f32 %v1170_v51, 0.0  ;;  %v818_v10 = vadd.f32 %v754_v12, %v569_v16  ;;  %v1003_v36 = vmul.f32 %v5325_v62, %v7342_v59  ;;  %v1011_v3 = vmul.f32 %v5325_v62, %v5634_v58  ;;  %4567 = vmatmul.mubr.msk.bf16.gmra.mrb[12].mxu1 %vm1452_vm0, %v5963_v48 }
 0x12f   : > { %v1177_v13 = vadd.f32 %v5786_v32, %v1065_v60  ;;  %v1185_v47 = vadd.f32 %v5784_v41, %v1073_v34  ;;  %v826_v54 = vadd.f32 %v762_v37, %v577_v27  ;;  %v566_v2 = vmul.f32 %v5312_v57, %v7339_v35  ;;  %1549 = vmatprep.mubr.bf16.mxu0 %v7327_v39 }
 0x130   : > { %v1282_v56 = vpack.c.bf16 %v1234_v0, %v1226_v31  ;;  %v1067_v15 = vadd.f32 %v1003_v36, %v818_v10  ;;  %v574_v45 = vmul.f32 %v5312_v57, %v7340_v30  ;;  %v751_v14 = vmul.f32 %v7321_v28, %v7341_v29  ;;  %1662 = vmatprep.mubr.bf16.mxu1 %v7327_v39 }
 0x131   : > { %v1241_v25 = vmax.f32 %v1177_v13, 0.0  ;;  %v1249_v52 = vmax.f32 %v1185_v47, 0.0  ;;  %v1075_v1 = vadd.f32 %v1011_v3, %v826_v54  ;;  %v759_v19 = vmul.f32 %v7321_v28, %v5602_v63 }
 0x132   : > { %1819 = vmatpush1.bf16.msra.mxu1 %v1282_v56  ;;  %v1179_v22 = vadd.f32 %v5786_v32, %v1067_v15  ;;  %v815_v50 = vadd.f32 %v751_v14, %v566_v2  ;;  %v1000_v49 = vmul.f32 %v7323_v38, %v7342_v59  ;;  %v1008_v21 = vmul.f32 %v7323_v38, %v5634_v58 }
 0x133   : > { %v1289_v6 = vpack.c.bf16 %v1249_v52, %v1241_v25  ;;  %v1187_v16 = vadd.f32 %v5784_v41, %v1075_v1  ;;  %v823_v24 = vadd.f32 %v759_v19, %v574_v45  ;;  %v568_v51 = vmul.f32 %v7324_v17, %v7339_v35 }
 0x134   : > { %v1243_v27 = vmax.f32 %v1179_v22, 0.0  ;;  %v1064_v12 = vadd.f32 %v1000_v49, %v815_v50  ;;  %v576_v31 = vmul.f32 %v7324_v17, %v7340_v30  ;;  %v753_v60 = vmul.f32 %v7325_v20, %v7341_v29 }
 0x135   : > { %1707 = vmatprep.subr.bf16.mxu0 %v1289_v6  ;;  %v1251_v34 = vmax.f32 %v1187_v16, 0.0  ;;  %v1072_v37 = vadd.f32 %v1008_v21, %v823_v24  ;;  %v761_v0 = vmul.f32 %v7325_v20, %v5602_v63  ;;  %v1002_v10 = vmul.f32 %v7326_v8, %v7342_v59  ;;  %4560 = vmatmul.mubr.msk.bf16.gmra.mrb[16].mxu0 %vm1452_vm0, %v6002_v9 }
 0x136   : > { %v1176_v35 = vadd.f32 %v5786_v32, %v1064_v12  ;;  %v817_v36 = vadd.f32 %v753_v60, %v568_v51  ;;  %v1010_v30 = vmul.f32 %v7326_v8, %v5634_v58  ;;  %v583_v29 = vmul.f32 %v7329_v53, %v5702_v40  ;;  %4568 = vmatmul.mubr.msk.bf16.gmra.mrb[16].mxu1 %vm1452_vm0, %v6002_v9 }
 0x137   : > { %v1291_v3 = vpack.c.bf16 %v1251_v34, %v1243_v27  ;;  %v1184_v63 = vadd.f32 %v5784_v41, %v1072_v37  ;;  %v825_v13 = vadd.f32 %v761_v0, %v576_v31  ;;  %v591_v59 = vmul.f32 %v7329_v53, %v5700_v46  ;;  %1559 = vmatprep.mubr.bf16.mxu0 %v7327_v39 }
 0x138   : > { %v1240_v47 = vmax.f32 %v1176_v35, 0.0  ;;  %v1066_v54 = vadd.f32 %v1002_v10, %v817_v36  ;;  %v768_v58 = vmul.f32 %v7332_v43, %v5726_v18  ;;  %v776_v2 = vmul.f32 %v7332_v43, %v5724_v5  ;;  %1672 = vmatprep.mubr.bf16.mxu1 %v7327_v39  ;;  %v6048_v43 = vld [vmem:[%s7229_s3 + $0x28] sm:$0xff]  }
 0x139   : > { %1820 = vmatprep.subr.bf16.mxu1 %v1291_v3  ;;  %v1248_v56 = vmax.f32 %v1184_v63, 0.0  ;;  %v1074_v15 = vadd.f32 %v1010_v30, %v825_v13  ;;  %v1017_v45 = vmul.f32 %v7335_v42, %v5760_v7  ;;  %v1025_v53 = vmul.f32 %v7335_v42, %v5758_v4 }
 0x13a   : > { %v1178_v14 = vadd.f32 %v5786_v32, %v1066_v54  ;;  %v832_v25 = vadd.f32 %v768_v58, %v583_v29  ;;  %v840_v52 = vadd.f32 %v776_v2, %v591_v59  ;;  %v585_v1 = vmul.f32 %v7337_v26, %v5702_v40  ;;  %v6088_v59 = vld [vmem:[%s7229_s3 + $0x30] sm:$0xff]  }
 0x13b   : > { %v1288_v19 = vpack.c.bf16 %v1248_v56, %v1240_v47  ;;  %v1186_v22 = vadd.f32 %v5784_v41, %v1074_v15  ;;  %v593_v50 = vmul.f32 %v7337_v26, %v5700_v46  ;;  %v770_v42 = vmul.f32 %v7338_v61, %v5726_v18 }
 0x13c   : > { %v1242_v32 = vmax.f32 %v1178_v14, 0.0  ;;  %v1081_v49 = vadd.f32 %v1017_v45, %v832_v25  ;;  %v1089_v21 = vadd.f32 %v1025_v53, %v840_v52  ;;  %v778_v6 = vmul.f32 %v7338_v61, %v5724_v5 }
 0x13d   : > { %1708 = vmatpush1.bf16.msra.mxu0 %v1288_v19  ;;  %v1250_v16 = vmax.f32 %v1186_v22, 0.0  ;;  %v834_v24 = vadd.f32 %v770_v42, %v585_v1  ;;  %v1019_v51 = vmul.f32 %v5325_v62, %v5760_v7  ;;  %v1027_v41 = vmul.f32 %v5325_v62, %v5758_v4  ;;  %v4697_v1 = vld [vmem:[%s7229_s3 + $0x38] sm:$0xff]  }
 0x13e   : > { %v1193_v26 = vadd.f32 %v5812_v33, %v1081_v49  ;;  %v1201_v27 = vadd.f32 %v5810_v55, %v1089_v21  ;;  %v842_v12 = vadd.f32 %v778_v6, %v593_v50  ;;  %v582_v31 = vmul.f32 %v5312_v57, %v5702_v40  ;;  %4561 = vmatmul.mubr.msk.bf16.gmra.mrb[20].mxu0 %vm1452_vm0, %v6048_v43 }
 0x13f   : > { %v1290_v61 = vpack.c.bf16 %v1250_v16, %v1242_v32  ;;  %v1083_v60 = vadd.f32 %v1019_v51, %v834_v24  ;;  %v590_v34 = vmul.f32 %v5312_v57, %v5700_v46  ;;  %v767_v37 = vmul.f32 %v7321_v28, %v5726_v18  ;;  %4569 = vmatmul.mubr.msk.bf16.gmra.mrb[20].mxu1 %vm1452_vm0, %v6048_v43 }
 0x140   : > { %v1257_v62 = vmax.f32 %v1193_v26, 0.0  ;;  %v1265_v0 = vmax.f32 %v1201_v27, 0.0  ;;  %v1091_v10 = vadd.f32 %v1027_v41, %v842_v12  ;;  %v775_v35 = vmul.f32 %v7321_v28, %v5724_v5  ;;  %1569 = vmatprep.mubr.bf16.mxu0 %v7327_v39  ;;  %1682 = vmatprep.mubr.bf16.mxu1 %v7327_v39 }
 0x141   : > { %1821 = vmatpush1.bf16.msra.mxu1 %v1290_v61  ;;  %v1195_v36 = vadd.f32 %v5812_v33, %v1083_v60  ;;  %v831_v57 = vadd.f32 %v767_v37, %v582_v31  ;;  %v1016_v30 = vmul.f32 %v7323_v38, %v5760_v7  ;;  %v1024_v29 = vmul.f32 %v7323_v38, %v5758_v4 }
 0x142   : > { %v1297_v3 = vpack.c.bf16 %v1265_v0, %v1257_v62  ;;  %v1203_v63 = vadd.f32 %v5810_v55, %v1091_v10  ;;  %v839_v13 = vadd.f32 %v775_v35, %v590_v34  ;;  %v584_v28 = vmul.f32 %v7324_v17, %v5702_v40 }
 0x143   : > { %v1259_v47 = vmax.f32 %v1195_v36, 0.0  ;;  %v1080_v54 = vadd.f32 %v1016_v30, %v831_v57  ;;  %v592_v58 = vmul.f32 %v7324_v17, %v5700_v46  ;;  %v769_v38 = vmul.f32 %v7325_v20, %v5726_v18 }
 0x144   : > { %1709 = vmatprep.subr.bf16.mxu0 %v1297_v3  ;;  %v1267_v2 = vmax.f32 %v1203_v63, 0.0  ;;  %v1088_v56 = vadd.f32 %v1024_v29, %v839_v13  ;;  %v777_v15 = vmul.f32 %v7325_v20, %v5724_v5  ;;  %v1018_v40 = vmul.f32 %v7326_v8, %v5760_v7 }
 0x145   : > { %v1192_v45 = vadd.f32 %v5812_v33, %v1080_v54  ;;  %v833_v53 = vadd.f32 %v769_v38, %v584_v28  ;;  %v1026_v14 = vmul.f32 %v7326_v8, %v5758_v4 }
 0x146   : > { %v1299_v25 = vpack.c.bf16 %v1267_v2, %v1259_v47  ;;  %v1200_v46 = vadd.f32 %v5810_v55, %v1088_v56  ;;  %v841_v17 = vadd.f32 %v777_v15, %v592_v58  ;;  %4562 = vmatmul.mubr.msk.bf16.gmra.mrb[24].mxu0 %vm1452_vm0, %v6088_v59 }
 0x147   : > { %v1256_v18 = vmax.f32 %v1192_v45, 0.0  ;;  %v1082_v52 = vadd.f32 %v1018_v40, %v833_v53  ;;  %4570 = vmatmul.mubr.msk.bf16.gmra.mrb[24].mxu1 %vm1452_vm0, %v6088_v59  ;;  %1579 = vmatprep.mubr.bf16.mxu0 %v7327_v39 }
 0x148   : > { %1822 = vmatprep.subr.bf16.mxu1 %v1299_v25  ;;  %v1264_v5 = vmax.f32 %v1200_v46, 0.0  ;;  %v1090_v7 = vadd.f32 %v1026_v14, %v841_v17  ;;  %1692 = vmatprep.mubr.bf16.mxu1 %v7327_v39 }
 0x149   : > { %v1194_v4 = vadd.f32 %v5812_v33, %v1082_v52  ;;  %v6165_v33 = vpop.permute.xlu0 %1334 }
 0x14a   : > { %v1296_v20 = vpack.c.bf16 %v1264_v5, %v1256_v18  ;;  %v1202_v8 = vadd.f32 %v5810_v55, %v1090_v7  ;;  %v6163_v55 = vpop.permute.xlu1 %1339 }
 0x14b   : > { %v1258_v19 = vmax.f32 %v1194_v4, 0.0 }
 0x14c   : > { %1710 = vmatpush1.bf16.msra.mxu0 %v1296_v20  ;;  %v1266_v22 = vmax.f32 %v1202_v8, 0.0 }
 0x14d   : > { %v6177_v35 = vpop.permute.xlu0 %1344 }
 0x14e   : > { %v1298_v50 = vpack.c.bf16 %v1266_v22, %v1258_v19  ;;  %4563 = vmatmul.mubr.msk.bf16.gmra.mrb[28].mxu0 %vm1452_vm0, %v4697_v1  ;;  %v6175_v37 = vpop.permute.xlu1 %1349 }
 0x14f   : > { %4571 = vmatmul.mubr.msk.bf16.gmra.mrb[28].mxu1 %vm1452_vm0, %v4697_v1  ;;  %1735 = vmatprep.mubr.bf16.mxu0 %v7327_v39 }
 0x150   : > { %1823 = vmatpush1.bf16.msra.mxu1 %v1298_v50  ;;  %1848 = vmatprep.mubr.bf16.mxu1 %v7327_v39 }
 0x151   : > { %v6189_v8 = vpop.permute.xlu0 %1354 }
 0x152   : > { %v6187_v5 = vpop.permute.xlu1 %1359 }
 0x156   : > { %4572 = vmatmul.mubr.msk.bf16.vlgmr.msra.gmra.mrb[32].mxu0 %vm1452_vm0, %v5838_v23 }
 0x157   : > { %4580 = vmatmul.mubr.msk.bf16.vlgmr.msra.gmra.mrb[32].mxu1 %vm1452_vm0, %v5838_v23  ;;  %1745 = vmatprep.mubr.bf16.mxu0 %v7327_v39 }
 0x158   : > { %1858 = vmatprep.mubr.bf16.mxu1 %v7327_v39 }
 0x15e   : > { %4573 = vmatmul.mubr.msk.bf16.gmra.mrb[36].mxu0 %vm1452_vm0, %v5881_v11 }
 0x15f   : > { %4581 = vmatmul.mubr.msk.bf16.gmra.mrb[36].mxu1 %vm1452_vm0, %v5881_v11  ;;  %1755 = vmatprep.mubr.bf16.mxu0 %v7327_v39 }
 0x160   : > { %1868 = vmatprep.mubr.bf16.mxu1 %v7327_v39 }
 0x166   : > { %4574 = vmatmul.mubr.msk.bf16.gmra.mrb[40].mxu0 %vm1452_vm0, %v5922_v44 }
 0x167   : > { %4582 = vmatmul.mubr.msk.bf16.gmra.mrb[40].mxu1 %vm1452_vm0, %v5922_v44  ;;  %1765 = vmatprep.mubr.bf16.mxu0 %v7327_v39 }
 0x168   : > { %1878 = vmatprep.mubr.bf16.mxu1 %v7327_v39 }
 0x16e   : > { %4575 = vmatmul.mubr.msk.bf16.gmra.mrb[44].mxu0 %vm1452_vm0, %v5963_v48 }
 0x16f   : > { %4583 = vmatmul.mubr.msk.bf16.gmra.mrb[44].mxu1 %vm1452_vm0, %v5963_v48  ;;  %1775 = vmatprep.mubr.bf16.mxu0 %v7327_v39 }
 0x170   : > { %1888 = vmatprep.mubr.bf16.mxu1 %v7327_v39 }
 0x176   : > { %4576 = vmatmul.mubr.msk.bf16.gmra.mrb[48].mxu0 %vm1452_vm0, %v6002_v9 }
 0x177   : > { %4584 = vmatmul.mubr.msk.bf16.gmra.mrb[48].mxu1 %vm1452_vm0, %v6002_v9  ;;  %1785 = vmatprep.mubr.bf16.mxu0 %v7327_v39 }
 0x178   : > { %1898 = vmatprep.mubr.bf16.mxu1 %v7327_v39 }
 0x17e   : > { %4577 = vmatmul.mubr.msk.bf16.gmra.mrb[52].mxu0 %vm1452_vm0, %v6048_v43 }
 0x17f   : > { %4585 = vmatmul.mubr.msk.bf16.gmra.mrb[52].mxu1 %vm1452_vm0, %v6048_v43  ;;  %1795 = vmatprep.mubr.bf16.mxu0 %v7327_v39 }
 0x180   : > { %1908 = vmatprep.mubr.bf16.mxu1 %v7327_v39 }
 0x186   : > { %4578 = vmatmul.mubr.msk.bf16.gmra.mrb[56].mxu0 %vm1452_vm0, %v6088_v59 }
 0x187   : > { %4586 = vmatmul.mubr.msk.bf16.gmra.mrb[56].mxu1 %vm1452_vm0, %v6088_v59  ;;  %1805 = vmatprep.mubr.bf16.mxu0 %v7327_v39 }
 0x188   : > { %1918 = vmatprep.mubr.bf16.mxu1 %v7327_v39 }
 0x18e   : > { %4579 = vmatmul.mubr.msk.bf16.gmra.mrb[60].mxu0 %vm1452_vm0, %v4697_v1 }
 0x18f   : > { %4587 = vmatmul.mubr.msk.bf16.gmra.mrb[60].mxu1 %vm1452_vm0, %v4697_v1  ;;  %2473 = vmatprep.mubr.bf16.mxu0 %v7327_v39 }
 0x190   : > { %2666 = vmatprep.mubr.bf16.mxu1 %v7327_v39 }
 0x1e8   : > { %v1511_v23 = vpop.f32.mrb[0].mxu0 }
 0x1e9   : > { %v1512_v11 = vadd.f32 %v1511_v23, %v6165_v33  ;;  %v1624_v44 = vpop.f32.mrb[0].mxu1  ;;  %v1513_v48 = vpop.f32.mrb[1].mxu0 }
 0x1ea   : > { %v1625_v9 = vadd.f32 %v1624_v44, %v6165_v33  ;;  %v1514_v43 = vadd.f32 %v1513_v48, %v6165_v33  ;;  %v1626_v42 = vpop.f32.mrb[1].mxu1  ;;  %v1515_v32 = vpop.f32.mrb[2].mxu0 }
 0x1eb   : > { %v1627_v49 = vadd.f32 %v1626_v42, %v6165_v33  ;;  %v1516_v21 = vadd.f32 %v1515_v32, %v6163_v55  ;;  %v1628_v6 = vpop.f32.mrb[2].mxu1  ;;  %v1517_v16 = vpop.f32.mrb[3].mxu0  ;;  %v1929_v26 = vmax.f32 %v1512_v11, 0.0 }
 0x1ec   : > { %v1629_v24 = vadd.f32 %v1628_v6, %v6163_v55  ;;  %v1518_v51 = vadd.f32 %v1517_v16, %v6163_v55  ;;  %v1630_v41 = vpop.f32.mrb[3].mxu1  ;;  %v1931_v31 = vmax.f32 %v1625_v9, 0.0  ;;  %v1930_v61 = vmax.f32 %v1514_v43, 0.0 }
 0x1ed   : > { %v1937_v27 = vmax.f32 %v1516_v21, 0.0  ;;  %v1631_v12 = vadd.f32 %v1630_v41, %v6163_v55  ;;  %v1932_v62 = vmax.f32 %v1627_v49, 0.0 }
 0x1ee   : > { %v1939_v60 = vmax.f32 %v1629_v24, 0.0  ;;  %v1938_v34 = vmax.f32 %v1518_v51, 0.0 }
 0x1ef   : > { %v2057_v0 = vpack.c.bf16 %v1937_v27, %v1929_v26  ;;  %v1940_v10 = vmax.f32 %v1631_v12, 0.0 }
 0x1f0   : > { %v2059_v36 = vpack.c.bf16 %v1939_v60, %v1931_v31  ;;  %v2058_v57 = vpack.c.bf16 %v1938_v34, %v1930_v61  ;;  %v1521_v30 = vpop.f32.mrb[4].mxu0  ;;  %v6199_v34 = vpop.permute.xlu1 %1369 }
 0x1f1   : > { %v2060_v29 = vpack.c.bf16 %v1940_v10, %v1932_v62  ;;  %v1522_v3 = vadd.f32 %v1521_v30, %v6177_v35  ;;  %v1634_v63 = vpop.f32.mrb[4].mxu1  ;;  %v1523_v13 = vpop.f32.mrb[5].mxu0 }
 0x1f2   : > { %v1635_v28 = vadd.f32 %v1634_v63, %v6177_v35  ;;  %v1524_v59 = vadd.f32 %v1523_v13, %v6177_v35  ;;  %v1636_v47 = vpop.f32.mrb[5].mxu1  ;;  %v1525_v54 = vpop.f32.mrb[6].mxu0  ;;  %2441 = vmatprep.subr.bf16.mxu0 %v2058_v57 }
 0x1f3   : > { %v1637_v58 = vadd.f32 %v1636_v47, %v6177_v35  ;;  %v1526_v38 = vadd.f32 %v1525_v54, %v6175_v37  ;;  %v1638_v2 = vpop.f32.mrb[6].mxu1  ;;  %2634 = vmatprep.subr.bf16.mxu1 %v2060_v29  ;;  %v1527_v56 = vpop.f32.mrb[7].mxu0  ;;  %2442 = vmatpush1.bf16.msra.mxu0 %v2057_v0  ;;  %v1945_v53 = vmax.f32 %v1522_v3, 0.0 }
 0x1f4   : > { %v1639_v15 = vadd.f32 %v1638_v2, %v6175_v37  ;;  %v1528_v40 = vadd.f32 %v1527_v56, %v6175_v37  ;;  %v1640_v45 = vpop.f32.mrb[7].mxu1  ;;  %2635 = vmatpush1.bf16.msra.mxu1 %v2059_v36  ;;  %v1947_v46 = vmax.f32 %v1635_v28, 0.0  ;;  %v1946_v17 = vmax.f32 %v1524_v59, 0.0  ;;  %v6201_v36 = vpop.permute.xlu0 %1364 }
 0x1f5   : > { %v1953_v14 = vmax.f32 %v1526_v38, 0.0  ;;  %v1641_v25 = vadd.f32 %v1640_v45, %v6175_v37  ;;  %v1948_v7 = vmax.f32 %v1637_v58, 0.0 }
 0x1f6   : > { %v1955_v18 = vmax.f32 %v1639_v15, 0.0  ;;  %v1954_v52 = vmax.f32 %v1528_v40, 0.0 }
 0x1f7   : > { %v2065_v4 = vpack.c.bf16 %v1953_v14, %v1945_v53  ;;  %v1956_v20 = vmax.f32 %v1641_v25, 0.0 }
 0x1f8   : > { %v2067_v1 = vpack.c.bf16 %v1955_v18, %v1947_v46  ;;  %v2066_v19 = vpack.c.bf16 %v1954_v52, %v1946_v17  ;;  %v1531_v22 = vpop.f32.mrb[8].mxu0 }
 0x1f9   : > { %v2068_v50 = vpack.c.bf16 %v1956_v20, %v1948_v7  ;;  %v1532_v23 = vadd.f32 %v1531_v22, %v6189_v8  ;;  %v1644_v11 = vpop.f32.mrb[8].mxu1  ;;  %v1533_v44 = vpop.f32.mrb[9].mxu0 }
 0x1fa   : > { %v1645_v48 = vadd.f32 %v1644_v11, %v6189_v8  ;;  %v1534_v9 = vadd.f32 %v1533_v44, %v6189_v8  ;;  %v1646_v43 = vpop.f32.mrb[9].mxu1  ;;  %v1535_v42 = vpop.f32.mrb[10].mxu0  ;;  %2443 = vmatprep.subr.bf16.mxu0 %v2066_v19 }
 0x1fb   : > { %v1647_v32 = vadd.f32 %v1646_v43, %v6189_v8  ;;  %v1536_v49 = vadd.f32 %v1535_v42, %v6187_v5  ;;  %v1648_v21 = vpop.f32.mrb[10].mxu1  ;;  %2636 = vmatprep.subr.bf16.mxu1 %v2068_v50  ;;  %v1537_v6 = vpop.f32.mrb[11].mxu0  ;;  %2444 = vmatpush1.bf16.msra.mxu0 %v2065_v4  ;;  %v1961_v41 = vmax.f32 %v1532_v23, 0.0 }
 0x1fc   : > { %v1649_v16 = vadd.f32 %v1648_v21, %v6187_v5  ;;  %v1538_v24 = vadd.f32 %v1537_v6, %v6187_v5  ;;  %v1650_v51 = vpop.f32.mrb[11].mxu1  ;;  %2637 = vmatpush1.bf16.msra.mxu1 %v2067_v1  ;;  %v1963_v12 = vmax.f32 %v1645_v48, 0.0  ;;  %v1962_v31 = vmax.f32 %v1534_v9, 0.0  ;;  %v6211_v4 = vpop.permute.xlu1 %1379 }
 0x1fd   : > { %v1969_v26 = vmax.f32 %v1536_v49, 0.0  ;;  %v1651_v27 = vadd.f32 %v1650_v51, %v6187_v5  ;;  %v1964_v62 = vmax.f32 %v1647_v32, 0.0  ;;  %v6213_v22 = vpop.permute.xlu0 %1374 }
 0x1fe   : > { %v1971_v61 = vmax.f32 %v1649_v16, 0.0  ;;  %v1970_v60 = vmax.f32 %v1538_v24, 0.0 }
 0x1ff   : > { %v2073_v0 = vpack.c.bf16 %v1969_v26, %v1961_v41  ;;  %v1972_v10 = vmax.f32 %v1651_v27, 0.0 }
 0x200   : > { %v2075_v57 = vpack.c.bf16 %v1971_v61, %v1963_v12  ;;  %v2074_v30 = vpack.c.bf16 %v1970_v60, %v1962_v31  ;;  %v1541_v29 = vpop.f32.mrb[12].mxu0 }
 0x201   : > { %v2076_v3 = vpack.c.bf16 %v1972_v10, %v1964_v62  ;;  %v1542_v63 = vadd.f32 %v1541_v29, %v6201_v36  ;;  %v1654_v13 = vpop.f32.mrb[12].mxu1  ;;  %v1543_v28 = vpop.f32.mrb[13].mxu0 }
 0x202   : > { %v1655_v59 = vadd.f32 %v1654_v13, %v6201_v36  ;;  %v1544_v47 = vadd.f32 %v1543_v28, %v6201_v36  ;;  %v1656_v54 = vpop.f32.mrb[13].mxu1  ;;  %v1545_v58 = vpop.f32.mrb[14].mxu0  ;;  %2445 = vmatprep.subr.bf16.mxu0 %v2074_v30 }
 0x203   : > { %v1657_v38 = vadd.f32 %v1656_v54, %v6201_v36  ;;  %v1546_v2 = vadd.f32 %v1545_v58, %v6199_v34  ;;  %v1658_v56 = vpop.f32.mrb[14].mxu1  ;;  %2638 = vmatprep.subr.bf16.mxu1 %v2076_v3  ;;  %v1547_v15 = vpop.f32.mrb[15].mxu0  ;;  %2446 = vmatpush1.bf16.msra.mxu0 %v2073_v0  ;;  %v1977_v14 = vmax.f32 %v1542_v63, 0.0 }
 0x204   : > { %v1659_v40 = vadd.f32 %v1658_v56, %v6199_v34  ;;  %v1548_v45 = vadd.f32 %v1547_v15, %v6199_v34  ;;  %v1660_v53 = vpop.f32.mrb[15].mxu1  ;;  %2639 = vmatpush1.bf16.msra.mxu1 %v2075_v57  ;;  %v1979_v17 = vmax.f32 %v1655_v59, 0.0  ;;  %v1978_v18 = vmax.f32 %v1544_v47, 0.0  ;;  %v6223_v3 = vpop.permute.xlu1 %1389 }
 0x205   : > { %v1985_v25 = vmax.f32 %v1546_v2, 0.0  ;;  %v1661_v46 = vadd.f32 %v1660_v53, %v6199_v34  ;;  %v1980_v20 = vmax.f32 %v1657_v38, 0.0  ;;  %v6225_v28 = vpop.permute.xlu0 %1384 }
 0x206   : > { %v1987_v52 = vmax.f32 %v1659_v40, 0.0  ;;  %v1986_v7 = vmax.f32 %v1548_v45, 0.0 }
 0x207   : > { %v2081_v1 = vpack.c.bf16 %v1985_v25, %v1977_v14  ;;  %v1988_v19 = vmax.f32 %v1661_v46, 0.0 }
 0x208   : > { %v2083_v50 = vpack.c.bf16 %v1987_v52, %v1979_v17  ;;  %v2082_v23 = vpack.c.bf16 %v1986_v7, %v1978_v18  ;;  %v1551_v11 = vpop.f32.mrb[16].mxu0 }
 0x209   : > { %v2084_v44 = vpack.c.bf16 %v1988_v19, %v1980_v20  ;;  %v1552_v48 = vadd.f32 %v1551_v11, %v6213_v22  ;;  %v1664_v9 = vpop.f32.mrb[16].mxu1  ;;  %v1553_v43 = vpop.f32.mrb[17].mxu0 }
 0x20a   : > { %v1665_v42 = vadd.f32 %v1664_v9, %v6213_v22  ;;  %v1554_v32 = vadd.f32 %v1553_v43, %v6213_v22  ;;  %v1666_v49 = vpop.f32.mrb[17].mxu1  ;;  %v1555_v21 = vpop.f32.mrb[18].mxu0  ;;  %2447 = vmatprep.subr.bf16.mxu0 %v2082_v23 }
 0x20b   : > { %v1667_v6 = vadd.f32 %v1666_v49, %v6213_v22  ;;  %v1556_v16 = vadd.f32 %v1555_v21, %v6211_v4  ;;  %v1668_v24 = vpop.f32.mrb[18].mxu1  ;;  %2640 = vmatprep.subr.bf16.mxu1 %v2084_v44  ;;  %v1557_v51 = vpop.f32.mrb[19].mxu0  ;;  %2448 = vmatpush1.bf16.msra.mxu0 %v2081_v1  ;;  %v1993_v12 = vmax.f32 %v1552_v48, 0.0 }
 0x20c   : > { %v1669_v41 = vadd.f32 %v1668_v24, %v6211_v4  ;;  %v1558_v26 = vadd.f32 %v1557_v51, %v6211_v4  ;;  %v1670_v27 = vpop.f32.mrb[19].mxu1  ;;  %2641 = vmatpush1.bf16.msra.mxu1 %v2083_v50  ;;  %v1995_v60 = vmax.f32 %v1665_v42, 0.0  ;;  %v1994_v62 = vmax.f32 %v1554_v32, 0.0  ;;  %v6235_v11 = vpop.permute.xlu1 %1399 }
 0x20d   : > { %v2001_v31 = vmax.f32 %v1556_v16, 0.0  ;;  %v1671_v61 = vadd.f32 %v1670_v27, %v6211_v4  ;;  %v1996_v57 = vmax.f32 %v1667_v6, 0.0  ;;  %v6237_v43 = vpop.permute.xlu0 %1394 }
 0x20e   : > { %v2003_v0 = vmax.f32 %v1669_v41, 0.0  ;;  %v2002_v10 = vmax.f32 %v1558_v26, 0.0 }
 0x20f   : > { %v2089_v30 = vpack.c.bf16 %v2001_v31, %v1993_v12  ;;  %v2004_v29 = vmax.f32 %v1671_v61, 0.0 }
 0x210   : > { %v2091_v63 = vpack.c.bf16 %v2003_v0, %v1995_v60  ;;  %v2090_v13 = vpack.c.bf16 %v2002_v10, %v1994_v62 }
 0x211   : > { %v2092_v59 = vpack.c.bf16 %v2004_v29, %v1996_v57  ;;  %v1561_v47 = vpop.f32.mrb[20].mxu0 }
 0x212   : > { %v1562_v54 = vadd.f32 %v1561_v47, %v6225_v28  ;;  %v1674_v58 = vpop.f32.mrb[20].mxu1  ;;  %v1563_v38 = vpop.f32.mrb[21].mxu0  ;;  %2449 = vmatprep.subr.bf16.mxu0 %v2090_v13 }
 0x213   : > { %v1675_v2 = vadd.f32 %v1674_v58, %v6225_v28  ;;  %v1564_v56 = vadd.f32 %v1563_v38, %v6225_v28  ;;  %v1676_v15 = vpop.f32.mrb[21].mxu1  ;;  %v1565_v40 = vpop.f32.mrb[22].mxu0  ;;  %2642 = vmatprep.subr.bf16.mxu1 %v2092_v59  ;;  %2450 = vmatpush1.bf16.msra.mxu0 %v2089_v30 }
 0x214   : > { %v1677_v45 = vadd.f32 %v1676_v15, %v6225_v28  ;;  %v1566_v53 = vadd.f32 %v1565_v40, %v6223_v3  ;;  %v1678_v14 = vpop.f32.mrb[22].mxu1  ;;  %v1567_v25 = vpop.f32.mrb[23].mxu0  ;;  %2643 = vmatpush1.bf16.msra.mxu1 %v2091_v63  ;;  %v2009_v52 = vmax.f32 %v1562_v54, 0.0 }
 0x215   : > { %v1679_v46 = vadd.f32 %v1678_v14, %v6223_v3  ;;  %v1568_v17 = vadd.f32 %v1567_v25, %v6223_v3  ;;  %v1680_v18 = vpop.f32.mrb[23].mxu1  ;;  %v2011_v1 = vmax.f32 %v1675_v2, 0.0  ;;  %v2010_v19 = vmax.f32 %v1564_v56, 0.0  ;;  %v6247_v54 = vpop.permute.xlu1 %1409 }
 0x216   : > { %v2017_v7 = vmax.f32 %v1566_v53, 0.0  ;;  %v1681_v20 = vadd.f32 %v1680_v18, %v6223_v3  ;;  %v2012_v44 = vmax.f32 %v1677_v45, 0.0  ;;  %v6249_v56 = vpop.permute.xlu0 %1404 }
 0x217   : > { %v2019_v50 = vmax.f32 %v1679_v46, 0.0  ;;  %v2018_v23 = vmax.f32 %v1568_v17, 0.0 }
 0x218   : > { %v2097_v48 = vpack.c.bf16 %v2017_v7, %v2009_v52  ;;  %v2020_v9 = vmax.f32 %v1681_v20, 0.0 }
 0x219   : > { %v2099_v42 = vpack.c.bf16 %v2019_v50, %v2011_v1  ;;  %v2098_v32 = vpack.c.bf16 %v2018_v23, %v2010_v19  ;;  %v1571_v49 = vpop.f32.mrb[24].mxu0 }
 0x21a   : > { %v2100_v21 = vpack.c.bf16 %v2020_v9, %v2012_v44  ;;  %v1572_v6 = vadd.f32 %v1571_v49, %v6237_v43  ;;  %v1684_v16 = vpop.f32.mrb[24].mxu1  ;;  %v1573_v24 = vpop.f32.mrb[25].mxu0 }
 0x21b   : > { %v1685_v51 = vadd.f32 %v1684_v16, %v6237_v43  ;;  %v1574_v41 = vadd.f32 %v1573_v24, %v6237_v43  ;;  %v1686_v26 = vpop.f32.mrb[25].mxu1  ;;  %v1575_v27 = vpop.f32.mrb[26].mxu0  ;;  %2451 = vmatprep.subr.bf16.mxu0 %v2098_v32 }
 0x21c   : > { %v1687_v12 = vadd.f32 %v1686_v26, %v6237_v43  ;;  %v1576_v31 = vadd.f32 %v1575_v27, %v6235_v11  ;;  %v1688_v61 = vpop.f32.mrb[26].mxu1  ;;  %2644 = vmatprep.subr.bf16.mxu1 %v2100_v21  ;;  %v1577_v60 = vpop.f32.mrb[27].mxu0  ;;  %2452 = vmatpush1.bf16.msra.mxu0 %v2097_v48  ;;  %v2025_v57 = vmax.f32 %v1572_v6, 0.0 }
 0x21d   : > { %v1689_v62 = vadd.f32 %v1688_v61, %v6235_v11  ;;  %v1578_v0 = vadd.f32 %v1577_v60, %v6235_v11  ;;  %v1690_v10 = vpop.f32.mrb[27].mxu1  ;;  %2645 = vmatpush1.bf16.msra.mxu1 %v2099_v42  ;;  %v2027_v63 = vmax.f32 %v1685_v51, 0.0  ;;  %v2026_v13 = vmax.f32 %v1574_v41, 0.0 }
 0x21e   : > { %v2033_v30 = vmax.f32 %v1576_v31, 0.0  ;;  %v1691_v29 = vadd.f32 %v1690_v10, %v6235_v11  ;;  %v2028_v58 = vmax.f32 %v1687_v12, 0.0 }
 0x21f   : > { %v2035_v59 = vmax.f32 %v1689_v62, 0.0  ;;  %v2034_v47 = vmax.f32 %v1578_v0, 0.0 }
 0x220   : > { %v2105_v38 = vpack.c.bf16 %v2033_v30, %v2025_v57  ;;  %v2036_v2 = vmax.f32 %v1691_v29, 0.0  ;;  %v6262_v29 = vld [vmem:[#allocation2] sm:$0xff]  }
 0x221   : > { %v2107_v15 = vpack.c.bf16 %v2035_v59, %v2027_v63  ;;  %v2106_v40 = vpack.c.bf16 %v2034_v47, %v2026_v13  ;;  %v1581_v45 = vpop.f32.mrb[28].mxu0 }
 0x222   : > { %v2108_v53 = vpack.c.bf16 %v2036_v2, %v2028_v58  ;;  %v1582_v14 = vadd.f32 %v1581_v45, %v6249_v56  ;;  %v1694_v25 = vpop.f32.mrb[28].mxu1  ;;  %v1583_v46 = vpop.f32.mrb[29].mxu0 }
 0x223   : > { %v1695_v17 = vadd.f32 %v1694_v25, %v6249_v56  ;;  %v1584_v18 = vadd.f32 %v1583_v46, %v6249_v56  ;;  %v1696_v52 = vpop.f32.mrb[29].mxu1  ;;  %v1585_v7 = vpop.f32.mrb[30].mxu0  ;;  %2453 = vmatprep.subr.bf16.mxu0 %v2106_v40 }
 0x224   : > { %v1697_v20 = vadd.f32 %v1696_v52, %v6249_v56  ;;  %v1586_v1 = vadd.f32 %v1585_v7, %v6247_v54  ;;  %v1698_v19 = vpop.f32.mrb[30].mxu1  ;;  %2646 = vmatprep.subr.bf16.mxu1 %v2108_v53  ;;  %v1587_v50 = vpop.f32.mrb[31].mxu0  ;;  %2454 = vmatpush1.bf16.msra.mxu0 %v2105_v38  ;;  %v2041_v9 = vmax.f32 %v1582_v14, 0.0 }
 0x225   : > { %v1699_v23 = vadd.f32 %v1698_v19, %v6247_v54  ;;  %v1588_v44 = vadd.f32 %v1587_v50, %v6247_v54  ;;  %v1700_v48 = vpop.f32.mrb[31].mxu1  ;;  %2647 = vmatpush1.bf16.msra.mxu1 %v2107_v15  ;;  %v2043_v49 = vmax.f32 %v1695_v17, 0.0  ;;  %v2042_v21 = vmax.f32 %v1584_v18, 0.0 }
 0x226   : > { %v2049_v42 = vmax.f32 %v1586_v1, 0.0  ;;  %v1701_v32 = vadd.f32 %v1700_v48, %v6247_v54  ;;  %v2044_v24 = vmax.f32 %v1697_v20, 0.0 }
 0x227   : > { %v2051_v6 = vmax.f32 %v1699_v23, 0.0  ;;  %v2050_v16 = vmax.f32 %v1588_v44, 0.0 }
 0x228   : > { %v2113_v51 = vpack.c.bf16 %v2049_v42, %v2041_v9  ;;  %v2052_v41 = vmax.f32 %v1701_v32, 0.0  ;;  %v6276_v42 = vld [vmem:[#allocation2 + $0x8] sm:$0xff]  }
 0x229   : > { %v2115_v26 = vpack.c.bf16 %v2051_v6, %v2043_v49  ;;  %v2114_v27 = vpack.c.bf16 %v2050_v16, %v2042_v21  ;;  %v1737_v12 = vpop.f32.mrb[32].mxu0 }
 0x22a   : > { %v2116_v31 = vpack.c.bf16 %v2052_v41, %v2044_v24  ;;  %v1738_v61 = vadd.f32 %v1737_v12, %v6165_v33  ;;  %v1850_v60 = vpop.f32.mrb[32].mxu1  ;;  %v1739_v62 = vpop.f32.mrb[33].mxu0 }
 0x22b   : > { %v1851_v0 = vadd.f32 %v1850_v60, %v6165_v33  ;;  %v1740_v10 = vadd.f32 %v1739_v62, %v6165_v33  ;;  %v1852_v57 = vpop.f32.mrb[33].mxu1  ;;  %v1741_v30 = vpop.f32.mrb[34].mxu0  ;;  %2455 = vmatprep.subr.bf16.mxu0 %v2114_v27 }
 0x22c   : > { %v1853_v63 = vadd.f32 %v1852_v57, %v6165_v33  ;;  %v1742_v13 = vadd.f32 %v1741_v30, %v6163_v55  ;;  %v1854_v59 = vpop.f32.mrb[34].mxu1  ;;  %2648 = vmatprep.subr.bf16.mxu1 %v2116_v31  ;;  %v1743_v47 = vpop.f32.mrb[35].mxu0  ;;  %2456 = vmatpush1.bf16.msra.mxu0 %v2113_v51  ;;  %v1933_v15 = vmax.f32 %v1738_v61, 0.0 }
 0x22d   : > { %v1855_v58 = vadd.f32 %v1854_v59, %v6163_v55  ;;  %v1744_v38 = vadd.f32 %v1743_v47, %v6163_v55  ;;  %v1856_v2 = vpop.f32.mrb[35].mxu1  ;;  %2649 = vmatpush1.bf16.msra.mxu1 %v2115_v26  ;;  %v1935_v53 = vmax.f32 %v1851_v0, 0.0  ;;  %v1934_v14 = vmax.f32 %v1740_v10, 0.0 }
 0x22e   : > { %v1941_v40 = vmax.f32 %v1742_v13, 0.0  ;;  %v1857_v45 = vadd.f32 %v1856_v2, %v6163_v55  ;;  %v1936_v46 = vmax.f32 %v1853_v63, 0.0 }
 0x22f   : > { %v1943_v25 = vmax.f32 %v1855_v58, 0.0  ;;  %v1942_v33 = vmax.f32 %v1744_v38, 0.0  ;;  %2474 = vmatmul.mubr.bf16.vlgmr.msra.gmra.mrb[64].mxu0 %v6262_v29 }
 0x230   : > { %v2061_v17 = vpack.c.bf16 %v1941_v40, %v1933_v15  ;;  %v1944_v18 = vmax.f32 %v1857_v45, 0.0  ;;  %2667 = vmatmul.mubr.bf16.vlgmr.msra.gmra.mrb[64].mxu1 %v6262_v29  ;;  %2483 = vmatprep.mubr.bf16.mxu0 %v7327_v39  ;;  %v6290_v15 = vld [vmem:[#allocation2 + $0x10] sm:$0xff]  }
 0x231   : > { %v2063_v52 = vpack.c.bf16 %v1943_v25, %v1935_v53  ;;  %v2062_v7 = vpack.c.bf16 %v1942_v33, %v1934_v14  ;;  %v1747_v20 = vpop.f32.mrb[36].mxu0  ;;  %2676 = vmatprep.mubr.bf16.mxu1 %v7327_v39 }
 0x232   : > { %v2064_v1 = vpack.c.bf16 %v1944_v18, %v1936_v46  ;;  %v1748_v55 = vadd.f32 %v1747_v20, %v6177_v35  ;;  %v1860_v19 = vpop.f32.mrb[36].mxu1  ;;  %v1749_v50 = vpop.f32.mrb[37].mxu0 }
 0x233   : > { %v1861_v23 = vadd.f32 %v1860_v19, %v6177_v35  ;;  %v1750_v44 = vadd.f32 %v1749_v50, %v6177_v35  ;;  %v1862_v48 = vpop.f32.mrb[37].mxu1  ;;  %v1751_v9 = vpop.f32.mrb[38].mxu0  ;;  %2827 = vmatprep.subr.bf16.mxu0 %v2062_v7 }
 0x234   : > { %v1863_v32 = vadd.f32 %v1862_v48, %v6177_v35  ;;  %v1752_v49 = vadd.f32 %v1751_v9, %v6175_v37  ;;  %v1864_v21 = vpop.f32.mrb[38].mxu1  ;;  %3020 = vmatprep.subr.bf16.mxu1 %v2064_v1  ;;  %v1753_v6 = vpop.f32.mrb[39].mxu0  ;;  %2828 = vmatpush1.bf16.msra.mxu0 %v2061_v17  ;;  %v1949_v41 = vmax.f32 %v1748_v55, 0.0 }
 0x235   : > { %v1865_v16 = vadd.f32 %v1864_v21, %v6175_v37  ;;  %v1754_v24 = vadd.f32 %v1753_v6, %v6175_v37  ;;  %v1866_v51 = vpop.f32.mrb[39].mxu1  ;;  %3021 = vmatpush1.bf16.msra.mxu1 %v2063_v52  ;;  %v1951_v12 = vmax.f32 %v1861_v23, 0.0  ;;  %v1950_v31 = vmax.f32 %v1750_v44, 0.0 }
 0x236   : > { %v1957_v26 = vmax.f32 %v1752_v49, 0.0  ;;  %v1867_v27 = vadd.f32 %v1866_v51, %v6175_v37  ;;  %v1952_v60 = vmax.f32 %v1863_v32, 0.0  ;;  %v6304_v51 = vld [vmem:[#allocation2 + $0x18] sm:$0xff]  }
 0x237   : > { %v1959_v61 = vmax.f32 %v1865_v16, 0.0  ;;  %v1958_v35 = vmax.f32 %v1754_v24, 0.0  ;;  %2484 = vmatmul.mubr.bf16.gmra.mrb[68].mxu0 %v6276_v42 }
 0x238   : > { %v2069_v62 = vpack.c.bf16 %v1957_v26, %v1949_v41  ;;  %v1960_v0 = vmax.f32 %v1867_v27, 0.0  ;;  %2677 = vmatmul.mubr.bf16.gmra.mrb[68].mxu1 %v6276_v42  ;;  %2493 = vmatprep.mubr.bf16.mxu0 %v7327_v39 }
 0x239   : > { %v2071_v10 = vpack.c.bf16 %v1959_v61, %v1951_v12  ;;  %v2070_v57 = vpack.c.bf16 %v1958_v35, %v1950_v31  ;;  %v1757_v30 = vpop.f32.mrb[40].mxu0  ;;  %2686 = vmatprep.mubr.bf16.mxu1 %v7327_v39 }
 0x23a   : > { %v2072_v63 = vpack.c.bf16 %v1960_v0, %v1952_v60  ;;  %v1758_v37 = vadd.f32 %v1757_v30, %v6189_v8  ;;  %v1870_v13 = vpop.f32.mrb[40].mxu1  ;;  %v1759_v59 = vpop.f32.mrb[41].mxu0 }
 0x23b   : > { %v1871_v47 = vadd.f32 %v1870_v13, %v6189_v8  ;;  %v1760_v58 = vadd.f32 %v1759_v59, %v6189_v8  ;;  %v1872_v38 = vpop.f32.mrb[41].mxu1  ;;  %v1761_v2 = vpop.f32.mrb[42].mxu0  ;;  %2829 = vmatprep.subr.bf16.mxu0 %v2070_v57 }
 0x23c   : > { %v1873_v40 = vadd.f32 %v1872_v38, %v6189_v8  ;;  %v1762_v45 = vadd.f32 %v1761_v2, %v6187_v5  ;;  %v1874_v53 = vpop.f32.mrb[42].mxu1  ;;  %3022 = vmatprep.subr.bf16.mxu1 %v2072_v63  ;;  %v1763_v14 = vpop.f32.mrb[43].mxu0  ;;  %2830 = vmatpush1.bf16.msra.mxu0 %v2069_v62  ;;  %v1965_v17 = vmax.f32 %v1758_v37, 0.0 }
 0x23d   : > { %v1875_v25 = vadd.f32 %v1874_v53, %v6187_v5  ;;  %v1764_v33 = vadd.f32 %v1763_v14, %v6187_v5  ;;  %v1876_v46 = vpop.f32.mrb[43].mxu1  ;;  %3023 = vmatpush1.bf16.msra.mxu1 %v2071_v10  ;;  %v1967_v7 = vmax.f32 %v1871_v47, 0.0  ;;  %v1966_v20 = vmax.f32 %v1760_v58, 0.0 }
 0x23e   : > { %v1973_v18 = vmax.f32 %v1762_v45, 0.0  ;;  %v1877_v52 = vadd.f32 %v1876_v46, %v6187_v5  ;;  %v1968_v55 = vmax.f32 %v1873_v40, 0.0 }
 0x23f   : > { %v1975_v1 = vmax.f32 %v1875_v25, 0.0  ;;  %v1974_v8 = vmax.f32 %v1764_v33, 0.0  ;;  %2494 = vmatmul.mubr.bf16.gmra.mrb[72].mxu0 %v6290_v15  ;;  %v6318_v33 = vld [vmem:[#allocation2 + $0x20] sm:$0xff]  }
 0x240   : > { %v2077_v19 = vpack.c.bf16 %v1973_v18, %v1965_v17  ;;  %v1976_v50 = vmax.f32 %v1877_v52, 0.0  ;;  %2687 = vmatmul.mubr.bf16.gmra.mrb[72].mxu1 %v6290_v15  ;;  %2503 = vmatprep.mubr.bf16.mxu0 %v7327_v39 }
 0x241   : > { %v2079_v23 = vpack.c.bf16 %v1975_v1, %v1967_v7  ;;  %v2078_v44 = vpack.c.bf16 %v1974_v8, %v1966_v20  ;;  %v1767_v48 = vpop.f32.mrb[44].mxu0  ;;  %2696 = vmatprep.mubr.bf16.mxu1 %v7327_v39 }
 0x242   : > { %v2080_v9 = vpack.c.bf16 %v1976_v50, %v1968_v55  ;;  %v1768_v5 = vadd.f32 %v1767_v48, %v6201_v36  ;;  %v1880_v32 = vpop.f32.mrb[44].mxu1  ;;  %v1769_v49 = vpop.f32.mrb[45].mxu0 }
 0x243   : > { %v1881_v21 = vadd.f32 %v1880_v32, %v6201_v36  ;;  %v1770_v6 = vadd.f32 %v1769_v49, %v6201_v36  ;;  %v1882_v16 = vpop.f32.mrb[45].mxu1  ;;  %v1771_v24 = vpop.f32.mrb[46].mxu0  ;;  %2831 = vmatprep.subr.bf16.mxu0 %v2078_v44 }
 0x244   : > { %v1883_v41 = vadd.f32 %v1882_v16, %v6201_v36  ;;  %v1772_v26 = vadd.f32 %v1771_v24, %v6199_v34  ;;  %v1884_v27 = vpop.f32.mrb[46].mxu1  ;;  %3024 = vmatprep.subr.bf16.mxu1 %v2080_v9  ;;  %v1773_v12 = vpop.f32.mrb[47].mxu0  ;;  %2832 = vmatpush1.bf16.msra.mxu0 %v2077_v19  ;;  %v1981_v60 = vmax.f32 %v1768_v5, 0.0 }
 0x245   : > { %v1885_v31 = vadd.f32 %v1884_v27, %v6199_v34  ;;  %v1774_v61 = vadd.f32 %v1773_v12, %v6199_v34  ;;  %v1886_v35 = vpop.f32.mrb[47].mxu1  ;;  %3025 = vmatpush1.bf16.msra.mxu1 %v2079_v23  ;;  %v1983_v10 = vmax.f32 %v1881_v21, 0.0  ;;  %v1982_v57 = vmax.f32 %v1770_v6, 0.0 }
 0x246   : > { %v1989_v62 = vmax.f32 %v1772_v26, 0.0  ;;  %v1887_v0 = vadd.f32 %v1886_v35, %v6199_v34  ;;  %v1984_v63 = vmax.f32 %v1883_v41, 0.0 }
 0x247   : > { %v1991_v30 = vmax.f32 %v1885_v31, 0.0  ;;  %v1990_v36 = vmax.f32 %v1774_v61, 0.0  ;;  %2504 = vmatmul.mubr.bf16.gmra.mrb[76].mxu0 %v6304_v51  ;;  %v6332_v31 = vld [vmem:[#allocation2 + $0x28] sm:$0xff]  }
 0x248   : > { %v2085_v37 = vpack.c.bf16 %v1989_v62, %v1981_v60  ;;  %v1992_v13 = vmax.f32 %v1887_v0, 0.0  ;;  %2697 = vmatmul.mubr.bf16.gmra.mrb[76].mxu1 %v6304_v51  ;;  %2513 = vmatprep.mubr.bf16.mxu0 %v7327_v39 }
 0x249   : > { %v2087_v59 = vpack.c.bf16 %v1991_v30, %v1983_v10  ;;  %v2086_v47 = vpack.c.bf16 %v1990_v36, %v1982_v57  ;;  %v1777_v58 = vpop.f32.mrb[48].mxu0  ;;  %2706 = vmatprep.mubr.bf16.mxu1 %v7327_v39 }
 0x24a   : > { %v2088_v38 = vpack.c.bf16 %v1992_v13, %v1984_v63  ;;  %v1778_v34 = vadd.f32 %v1777_v58, %v6213_v22  ;;  %v1890_v2 = vpop.f32.mrb[48].mxu1  ;;  %v1779_v40 = vpop.f32.mrb[49].mxu0 }
 0x24b   : > { %v1891_v45 = vadd.f32 %v1890_v2, %v6213_v22  ;;  %v1780_v53 = vadd.f32 %v1779_v40, %v6213_v22  ;;  %v1892_v14 = vpop.f32.mrb[49].mxu1  ;;  %v1781_v25 = vpop.f32.mrb[50].mxu0  ;;  %2833 = vmatprep.subr.bf16.mxu0 %v2086_v47 }
 0x24c   : > { %v1893_v46 = vadd.f32 %v1892_v14, %v6213_v22  ;;  %v1782_v17 = vadd.f32 %v1781_v25, %v6211_v4  ;;  %v1894_v18 = vpop.f32.mrb[50].mxu1  ;;  %3026 = vmatprep.subr.bf16.mxu1 %v2088_v38  ;;  %v1783_v52 = vpop.f32.mrb[51].mxu0  ;;  %2834 = vmatpush1.bf16.msra.mxu0 %v2085_v37  ;;  %v1997_v8 = vmax.f32 %v1778_v34, 0.0 }
 0x24d   : > { %v1895_v7 = vadd.f32 %v1894_v18, %v6211_v4  ;;  %v1784_v20 = vadd.f32 %v1783_v52, %v6211_v4  ;;  %v1896_v1 = vpop.f32.mrb[51].mxu1  ;;  %3027 = vmatpush1.bf16.msra.mxu1 %v2087_v59  ;;  %v1999_v50 = vmax.f32 %v1891_v45, 0.0  ;;  %v1998_v23 = vmax.f32 %v1780_v53, 0.0  ;;  %v6346_v52 = vld [vmem:[#allocation2 + $0x30] sm:$0xff]  }
 0x24e   : > { %v2005_v55 = vmax.f32 %v1782_v17, 0.0  ;;  %v1897_v19 = vadd.f32 %v1896_v1, %v6211_v4  ;;  %v2000_v48 = vmax.f32 %v1893_v46, 0.0 }
 0x24f   : > { %v2007_v44 = vmax.f32 %v1895_v7, 0.0  ;;  %v2006_v22 = vmax.f32 %v1784_v20, 0.0  ;;  %2514 = vmatmul.mubr.bf16.gmra.mrb[80].mxu0 %v6318_v33 }
 0x250   : > { %v2093_v9 = vpack.c.bf16 %v2005_v55, %v1997_v8  ;;  %v2008_v5 = vmax.f32 %v1897_v19, 0.0  ;;  %2707 = vmatmul.mubr.bf16.gmra.mrb[80].mxu1 %v6318_v33  ;;  %2523 = vmatprep.mubr.bf16.mxu0 %v7327_v39 }
 0x251   : > { %v2095_v32 = vpack.c.bf16 %v2007_v44, %v1999_v50  ;;  %v2094_v49 = vpack.c.bf16 %v2006_v22, %v1998_v23  ;;  %v1787_v21 = vpop.f32.mrb[52].mxu0  ;;  %2716 = vmatprep.mubr.bf16.mxu1 %v7327_v39 }
 0x252   : > { %v2096_v6 = vpack.c.bf16 %v2008_v5, %v2000_v48  ;;  %v1788_v4 = vadd.f32 %v1787_v21, %v6225_v28  ;;  %v1900_v16 = vpop.f32.mrb[52].mxu1  ;;  %v1789_v24 = vpop.f32.mrb[53].mxu0 }
 0x253   : > { %v1901_v41 = vadd.f32 %v1900_v16, %v6225_v28  ;;  %v1790_v26 = vadd.f32 %v1789_v24, %v6225_v28  ;;  %v1902_v27 = vpop.f32.mrb[53].mxu1  ;;  %v1791_v12 = vpop.f32.mrb[54].mxu0  ;;  %2835 = vmatprep.subr.bf16.mxu0 %v2094_v49 }
 0x254   : > { %v1903_v61 = vadd.f32 %v1902_v27, %v6225_v28  ;;  %v1792_v35 = vadd.f32 %v1791_v12, %v6223_v3  ;;  %v1904_v60 = vpop.f32.mrb[54].mxu1  ;;  %3028 = vmatprep.subr.bf16.mxu1 %v2096_v6  ;;  %v1793_v62 = vpop.f32.mrb[55].mxu0  ;;  %2836 = vmatpush1.bf16.msra.mxu0 %v2093_v9  ;;  %v2013_v30 = vmax.f32 %v1788_v4, 0.0 }
 0x255   : > { %v1905_v0 = vadd.f32 %v1904_v60, %v6223_v3  ;;  %v1794_v10 = vadd.f32 %v1793_v62, %v6223_v3  ;;  %v1906_v57 = vpop.f32.mrb[55].mxu1  ;;  %3029 = vmatpush1.bf16.msra.mxu1 %v2095_v32  ;;  %v2015_v37 = vmax.f32 %v1901_v41, 0.0  ;;  %v2014_v13 = vmax.f32 %v1790_v26, 0.0  ;;  %v6360_v60 = vld [vmem:[#allocation2 + $0x38] sm:$0xff]  }
 0x256   : > { %v2021_v36 = vmax.f32 %v1792_v35, 0.0  ;;  %v1907_v63 = vadd.f32 %v1906_v57, %v6223_v3  ;;  %v2016_v47 = vmax.f32 %v1903_v61, 0.0 }
 0x257   : > { %v2023_v59 = vmax.f32 %v1905_v0, 0.0  ;;  %v2022_v28 = vmax.f32 %v1794_v10, 0.0  ;;  %2524 = vmatmul.mubr.bf16.gmra.mrb[84].mxu0 %v6332_v31 }
 0x258   : > { %v2101_v58 = vpack.c.bf16 %v2021_v36, %v2013_v30  ;;  %v2024_v38 = vmax.f32 %v1907_v63, 0.0  ;;  %2717 = vmatmul.mubr.bf16.gmra.mrb[84].mxu1 %v6332_v31  ;;  %2533 = vmatprep.mubr.bf16.mxu0 %v7327_v39 }
 0x259   : > { %v2103_v34 = vpack.c.bf16 %v2023_v59, %v2015_v37  ;;  %v2102_v2 = vpack.c.bf16 %v2022_v28, %v2014_v13  ;;  %v1797_v40 = vpop.f32.mrb[56].mxu0  ;;  %2726 = vmatprep.mubr.bf16.mxu1 %v7327_v39 }
 0x25a   : > { %v2104_v45 = vpack.c.bf16 %v2024_v38, %v2016_v47  ;;  %v1798_v3 = vadd.f32 %v1797_v40, %v6237_v43  ;;  %v1910_v53 = vpop.f32.mrb[56].mxu1  ;;  %v1799_v14 = vpop.f32.mrb[57].mxu0 }
 0x25b   : > { %v1911_v25 = vadd.f32 %v1910_v53, %v6237_v43  ;;  %v1800_v46 = vadd.f32 %v1799_v14, %v6237_v43  ;;  %v1912_v17 = vpop.f32.mrb[57].mxu1  ;;  %v1801_v18 = vpop.f32.mrb[58].mxu0  ;;  %2837 = vmatprep.subr.bf16.mxu0 %v2102_v2  ;;  %v6377_v53 = vld [vmem:[#allocation2 + $0x48] sm:$0xff]   ;;  %v6383_v14 = vld [vmem:[#allocation2 + $0x50] sm:$0xff]  }
 0x25c   : > { %v1913_v7 = vadd.f32 %v1912_v17, %v6237_v43  ;;  %v1802_v20 = vadd.f32 %v1801_v18, %v6235_v11  ;;  %v1914_v1 = vpop.f32.mrb[58].mxu1  ;;  %3030 = vmatprep.subr.bf16.mxu1 %v2104_v45  ;;  %v1803_v8 = vpop.f32.mrb[59].mxu0  ;;  %2838 = vmatpush1.bf16.msra.mxu0 %v2101_v58  ;;  %v2029_v23 = vmax.f32 %v1798_v3, 0.0  ;;  %v6401_v17 = vld [vmem:[#allocation2 + $0x68] sm:$0xff]   ;;  %v6407_v18 = vld [vmem:[#allocation2 + $0x70] sm:$0xff]  }
 0x25d   : > { %v1915_v55 = vadd.f32 %v1914_v1, %v6235_v11  ;;  %v1804_v19 = vadd.f32 %v1803_v8, %v6235_v11  ;;  %v1916_v50 = vpop.f32.mrb[59].mxu1  ;;  %3031 = vmatpush1.bf16.msra.mxu1 %v2103_v34  ;;  %v2031_v48 = vmax.f32 %v1911_v25, 0.0  ;;  %v2030_v9 = vmax.f32 %v1800_v46, 0.0  ;;  %v6389_v25 = vld [vmem:[#allocation2 + $0x58] sm:$0xff]   ;;  %v6395_v46 = vld [vmem:[#allocation2 + $0x60] sm:$0xff]  }
 0x25e   : > { %v2037_v44 = vmax.f32 %v1802_v20, 0.0  ;;  %v1917_v22 = vadd.f32 %v1916_v50, %v6235_v11  ;;  %v2032_v32 = vmax.f32 %v1913_v7, 0.0  ;;  %v6413_v7 = vld [vmem:[#allocation2 + $0x78] sm:$0xff]  }
 0x25f   : > { %v2039_v5 = vmax.f32 %v1915_v55, 0.0  ;;  %v2038_v43 = vmax.f32 %v1804_v19, 0.0  ;;  %2534 = vmatmul.mubr.bf16.gmra.mrb[88].mxu0 %v6346_v52 }
 0x260   : > { %v2109_v49 = vpack.c.bf16 %v2037_v44, %v2029_v23  ;;  %v2040_v21 = vmax.f32 %v1917_v22, 0.0  ;;  %2727 = vmatmul.mubr.bf16.gmra.mrb[88].mxu1 %v6346_v52  ;;  %2543 = vmatprep.mubr.bf16.mxu0 %v7327_v39 }
 0x261   : > { %v2111_v6 = vpack.c.bf16 %v2039_v5, %v2031_v48  ;;  %v2110_v4 = vpack.c.bf16 %v2038_v43, %v2030_v9  ;;  %v1807_v16 = vpop.f32.mrb[60].mxu0  ;;  %2736 = vmatprep.mubr.bf16.mxu1 %v7327_v39 }
 0x262   : > { %v2112_v24 = vpack.c.bf16 %v2040_v21, %v2032_v32  ;;  %v1808_v11 = vadd.f32 %v1807_v16, %v6249_v56  ;;  %v1920_v41 = vpop.f32.mrb[60].mxu1  ;;  %v1809_v26 = vpop.f32.mrb[61].mxu0 }
 0x263   : > { %v1921_v27 = vadd.f32 %v1920_v41, %v6249_v56  ;;  %v1810_v12 = vadd.f32 %v1809_v26, %v6249_v56  ;;  %v1922_v61 = vpop.f32.mrb[61].mxu1  ;;  %v1811_v35 = vpop.f32.mrb[62].mxu0  ;;  %2839 = vmatprep.subr.bf16.mxu0 %v2110_v4 }
 0x264   : > { %v1923_v62 = vadd.f32 %v1922_v61, %v6249_v56  ;;  %v1812_v0 = vadd.f32 %v1811_v35, %v6247_v54  ;;  %v1924_v10 = vpop.f32.mrb[62].mxu1  ;;  %3032 = vmatprep.subr.bf16.mxu1 %v2112_v24  ;;  %v1813_v57 = vpop.f32.mrb[63].mxu0  ;;  %2840 = vmatpush1.bf16.msra.mxu0 %v2109_v49  ;;  %v2045_v37 = vmax.f32 %v1808_v11, 0.0 }
 0x265   : > { %v1925_v30 = vadd.f32 %v1924_v10, %v6247_v54  ;;  %v1814_v36 = vadd.f32 %v1813_v57, %v6247_v54  ;;  %v1926_v63 = vpop.f32.mrb[63].mxu1  ;;  %3033 = vmatpush1.bf16.msra.mxu1 %v2111_v6  ;;  %v2047_v28 = vmax.f32 %v1921_v27, 0.0  ;;  %v2046_v47 = vmax.f32 %v1810_v12, 0.0 }
 0x266   : > { %v2053_v13 = vmax.f32 %v1812_v0, 0.0  ;;  %v1927_v59 = vadd.f32 %v1926_v63, %v6247_v54  ;;  %v2048_v38 = vmax.f32 %v1923_v62, 0.0  ;;  %v6371_v54 = vld [vmem:[#allocation2 + $0x40] sm:$0xff]  }
 0x267   : > { %v2055_v58 = vmax.f32 %v1925_v30, 0.0  ;;  %v2054_v56 = vmax.f32 %v1814_v36, 0.0  ;;  %2544 = vmatmul.mubr.bf16.gmra.mrb[92].mxu0 %v6360_v60 }
 0x268   : > { %v2117_v34 = vpack.c.bf16 %v2053_v13, %v2045_v37  ;;  %v2056_v2 = vmax.f32 %v1927_v59, 0.0  ;;  %2737 = vmatmul.mubr.bf16.gmra.mrb[92].mxu1 %v6360_v60  ;;  %2553 = vmatprep.mubr.bf16.mxu0 %v7327_v39 }
 0x269   : > { %v2119_v40 = vpack.c.bf16 %v2055_v58, %v2047_v28  ;;  %v2118_v45 = vpack.c.bf16 %v2054_v56, %v2046_v47  ;;  %2746 = vmatprep.mubr.bf16.mxu1 %v7327_v39 }
 0x26a   : > { %v2120_v3 = vpack.c.bf16 %v2056_v2, %v2048_v38 }
 0x26b   : > { %2841 = vmatprep.subr.bf16.mxu0 %v2118_v45 }
 0x26c   : > { %3034 = vmatprep.subr.bf16.mxu1 %v2120_v3  ;;  %2842 = vmatpush1.bf16.msra.mxu0 %v2117_v34 }
 0x26d   : > { %3035 = vmatpush1.bf16.msra.mxu1 %v2119_v40 }
 0x26f   : > { %2554 = vmatmul.mubr.bf16.gmra.mrb[96].mxu0 %v6371_v54 }
 0x270   : > { %2747 = vmatmul.mubr.bf16.gmra.mrb[96].mxu1 %v6371_v54  ;;  %2563 = vmatprep.mubr.bf16.mxu0 %v7327_v39 }
 0x271   : > { %2756 = vmatprep.mubr.bf16.mxu1 %v7327_v39 }
 0x277   : > { %2564 = vmatmul.mubr.bf16.gmra.mrb[100].mxu0 %v6377_v53 }
 0x278   : > { %2757 = vmatmul.mubr.bf16.gmra.mrb[100].mxu1 %v6377_v53  ;;  %2573 = vmatprep.mubr.bf16.mxu0 %v7327_v39 }
 0x279   : > { %2766 = vmatprep.mubr.bf16.mxu1 %v7327_v39 }
 0x27f   : > { %2574 = vmatmul.mubr.bf16.gmra.mrb[104].mxu0 %v6383_v14 }
 0x280   : > { %2767 = vmatmul.mubr.bf16.gmra.mrb[104].mxu1 %v6383_v14  ;;  %2583 = vmatprep.mubr.bf16.mxu0 %v7327_v39 }
 0x281   : > { %2776 = vmatprep.mubr.bf16.mxu1 %v7327_v39 }
 0x287   : > { %2584 = vmatmul.mubr.bf16.gmra.mrb[108].mxu0 %v6389_v25 }
 0x288   : > { %2777 = vmatmul.mubr.bf16.gmra.mrb[108].mxu1 %v6389_v25  ;;  %2593 = vmatprep.mubr.bf16.mxu0 %v7327_v39 }
 0x289   : > { %2786 = vmatprep.mubr.bf16.mxu1 %v7327_v39 }
 0x28f   : > { %2594 = vmatmul.mubr.bf16.gmra.mrb[112].mxu0 %v6395_v46 }
 0x290   : > { %2787 = vmatmul.mubr.bf16.gmra.mrb[112].mxu1 %v6395_v46  ;;  %2603 = vmatprep.mubr.bf16.mxu0 %v7327_v39 }
 0x291   : > { %2796 = vmatprep.mubr.bf16.mxu1 %v7327_v39 }
 0x297   : > { %2604 = vmatmul.mubr.bf16.gmra.mrb[116].mxu0 %v6401_v17 }
 0x298   : > { %2797 = vmatmul.mubr.bf16.gmra.mrb[116].mxu1 %v6401_v17  ;;  %2613 = vmatprep.mubr.bf16.mxu0 %v7327_v39 }
 0x299   : > { %2806 = vmatprep.mubr.bf16.mxu1 %v7327_v39 }
 0x29f   : > { %2614 = vmatmul.mubr.bf16.gmra.mrb[120].mxu0 %v6407_v18 }
 0x2a0   : > { %2807 = vmatmul.mubr.bf16.gmra.mrb[120].mxu1 %v6407_v18  ;;  %2623 = vmatprep.mubr.bf16.mxu0 %v7327_v39 }
 0x2a1   : > { %2816 = vmatprep.mubr.bf16.mxu1 %v7327_v39 }
 0x2a7   : > { %2624 = vmatmul.mubr.bf16.gmra.mrb[124].mxu0 %v6413_v7 }
 0x2a8   : > { %2817 = vmatmul.mubr.bf16.gmra.mrb[124].mxu1 %v6413_v7  ;;  %2859 = vmatprep.mubr.bf16.mxu0 %v7327_v39 }
 0x2a9   : > { %3052 = vmatprep.mubr.bf16.mxu1 %v7327_v39 }
 0x2af   : > { %2860 = vmatmul.mubr.bf16.vlgmr.msra.gmra.mrb[128].mxu0 %v6262_v29 }
 0x2b0   : > { %3053 = vmatmul.mubr.bf16.vlgmr.msra.gmra.mrb[128].mxu1 %v6262_v29  ;;  %2869 = vmatprep.mubr.bf16.mxu0 %v7327_v39  ;;  %v6462_v29 = vpop.permute.xlu1 %2192 }
 0x2b1   : > { %3062 = vmatprep.mubr.bf16.mxu1 %v7327_v39 }
 0x2b4   : > { %v6478_v4 = vpop.permute.xlu1 %2202 }
 0x2b7   : > { %2870 = vmatmul.mubr.bf16.gmra.mrb[132].mxu0 %v6276_v42 }
 0x2b8   : > { %3063 = vmatmul.mubr.bf16.gmra.mrb[132].mxu1 %v6276_v42  ;;  %2879 = vmatprep.mubr.bf16.mxu0 %v7327_v39  ;;  %v6465_v42 = vpop.permute.xlu0 %2187  ;;  %v6494_v3 = vpop.permute.xlu1 %2212 }
 0x2b9   : > { %3072 = vmatprep.mubr.bf16.mxu1 %v7327_v39 }
 0x2bc   : > { %v6481_v41 = vpop.permute.xlu0 %2197 }
 0x2bf   : > { %2880 = vmatmul.mubr.bf16.gmra.mrb[136].mxu0 %v6290_v15 }
 0x2c0   : > { %3073 = vmatmul.mubr.bf16.gmra.mrb[136].mxu1 %v6290_v15  ;;  %2889 = vmatprep.mubr.bf16.mxu0 %v7327_v39 }
 0x2c1   : > { %3082 = vmatprep.mubr.bf16.mxu1 %v7327_v39 }
 0x2c7   : > { %2890 = vmatmul.mubr.bf16.gmra.mrb[140].mxu0 %v6304_v51 }
 0x2c8   : > { %3083 = vmatmul.mubr.bf16.gmra.mrb[140].mxu1 %v6304_v51  ;;  %2899 = vmatprep.mubr.bf16.mxu0 %v7327_v39 }
 0x2c9   : > { %3092 = vmatprep.mubr.bf16.mxu1 %v7327_v39 }
 0x2cf   : > { %2900 = vmatmul.mubr.bf16.gmra.mrb[144].mxu0 %v6318_v33 }
 0x2d0   : > { %3093 = vmatmul.mubr.bf16.gmra.mrb[144].mxu1 %v6318_v33  ;;  %2909 = vmatprep.mubr.bf16.mxu0 %v7327_v39 }
 0x2d1   : > { %3102 = vmatprep.mubr.bf16.mxu1 %v7327_v39 }
 0x2d7   : > { %2910 = vmatmul.mubr.bf16.gmra.mrb[148].mxu0 %v6332_v31 }
 0x2d8   : > { %3103 = vmatmul.mubr.bf16.gmra.mrb[148].mxu1 %v6332_v31  ;;  %2919 = vmatprep.mubr.bf16.mxu0 %v7327_v39 }
 0x2d9   : > { %3112 = vmatprep.mubr.bf16.mxu1 %v7327_v39 }
 0x2df   : > { %2920 = vmatmul.mubr.bf16.gmra.mrb[152].mxu0 %v6346_v52 }
 0x2e0   : > { %3113 = vmatmul.mubr.bf16.gmra.mrb[152].mxu1 %v6346_v52  ;;  %2929 = vmatprep.mubr.bf16.mxu0 %v7327_v39 }
 0x2e1   : > { %3122 = vmatprep.mubr.bf16.mxu1 %v7327_v39 }
 0x2e7   : > { %2930 = vmatmul.mubr.bf16.gmra.mrb[156].mxu0 %v6360_v60 }
 0x2e8   : > { %3123 = vmatmul.mubr.bf16.gmra.mrb[156].mxu1 %v6360_v60  ;;  %2939 = vmatprep.mubr.bf16.mxu0 %v7327_v39 }
 0x2e9   : > { %3132 = vmatprep.mubr.bf16.mxu1 %v7327_v39 }
 0x2ef   : > { %2940 = vmatmul.mubr.bf16.gmra.mrb[160].mxu0 %v6371_v54 }
 0x2f0   : > { %3133 = vmatmul.mubr.bf16.gmra.mrb[160].mxu1 %v6371_v54  ;;  %2949 = vmatprep.mubr.bf16.mxu0 %v7327_v39 }
 0x2f1   : > { %3142 = vmatprep.mubr.bf16.mxu1 %v7327_v39 }
 0x2f7   : > { %2950 = vmatmul.mubr.bf16.gmra.mrb[164].mxu0 %v6377_v53 }
 0x2f8   : > { %3143 = vmatmul.mubr.bf16.gmra.mrb[164].mxu1 %v6377_v53  ;;  %2959 = vmatprep.mubr.bf16.mxu0 %v7327_v39 }
 0x2f9   : > { %3152 = vmatprep.mubr.bf16.mxu1 %v7327_v39 }
 0x2ff   : > { %2960 = vmatmul.mubr.bf16.gmra.mrb[168].mxu0 %v6383_v14 }
 0x300   : > { %3153 = vmatmul.mubr.bf16.gmra.mrb[168].mxu1 %v6383_v14  ;;  %2969 = vmatprep.mubr.bf16.mxu0 %v7327_v39 }
 0x301   : > { %3162 = vmatprep.mubr.bf16.mxu1 %v7327_v39 }
 0x302   : > { %v2475_v15 = vpop.f32.mrb[64].mxu0 }
 0x303   : > { %v2476_v51 = vadd.f32 %v2475_v15, %v6465_v42  ;;  %v2668_v33 = vpop.f32.mrb[64].mxu1  ;;  %v2477_v31 = vpop.f32.mrb[65].mxu0 }
 0x304   : > { %v2669_v52 = vadd.f32 %v2668_v33, %v6465_v42  ;;  %v2478_v20 = vadd.f32 %v2477_v31, %v6465_v42  ;;  %v2670_v1 = vpop.f32.mrb[65].mxu1  ;;  %v2479_v8 = vpop.f32.mrb[66].mxu0 }
 0x305   : > { %v2671_v55 = vadd.f32 %v2670_v1, %v6465_v42  ;;  %v2480_v19 = vadd.f32 %v2479_v8, %v6462_v29  ;;  %v2672_v50 = vpop.f32.mrb[66].mxu1  ;;  %v2481_v23 = vpop.f32.mrb[67].mxu0  ;;  %v3213_v9 = vmax.f32 %v2476_v51, 0.0 }
 0x306   : > { %v2673_v44 = vadd.f32 %v2672_v50, %v6462_v29  ;;  %v2482_v22 = vadd.f32 %v2481_v23, %v6462_v29  ;;  %v2674_v48 = vpop.f32.mrb[67].mxu1  ;;  %v3215_v32 = vmax.f32 %v2669_v52, 0.0  ;;  %v3214_v49 = vmax.f32 %v2478_v20, 0.0 }
 0x307   : > { %v3221_v5 = vmax.f32 %v2480_v19, 0.0  ;;  %v2675_v43 = vadd.f32 %v2674_v48, %v6462_v29  ;;  %2970 = vmatmul.mubr.bf16.gmra.mrb[172].mxu0 %v6389_v25  ;;  %v3216_v16 = vmax.f32 %v2671_v55, 0.0 }
 0x308   : > { %v3223_v21 = vmax.f32 %v2673_v44, 0.0  ;;  %v3222_v6 = vmax.f32 %v2482_v22, 0.0  ;;  %3163 = vmatmul.mubr.bf16.gmra.mrb[172].mxu1 %v6389_v25  ;;  %2979 = vmatprep.mubr.bf16.mxu0 %v7327_v39  ;;  %v6497_v25 = vpop.permute.xlu0 %2207 }
 0x309   : > { %v3469_v24 = vpack.c.bf16 %v3221_v5, %v3213_v9  ;;  %v3224_v11 = vmax.f32 %v2675_v43, 0.0  ;;  %3172 = vmatprep.mubr.bf16.mxu1 %v7327_v39 }
 0x30a   : > { %v3471_v26 = vpack.c.bf16 %v3223_v21, %v3215_v32  ;;  %v3470_v27 = vpack.c.bf16 %v3222_v6, %v3214_v49  ;;  %v2485_v12 = vpop.f32.mrb[68].mxu0 }
 0x30b   : > { %v3472_v61 = vpack.c.bf16 %v3224_v11, %v3216_v16  ;;  %v2486_v35 = vadd.f32 %v2485_v12, %v6481_v41  ;;  %v2678_v60 = vpop.f32.mrb[68].mxu1  ;;  %v2487_v62 = vpop.f32.mrb[69].mxu0 }
 0x30c   : > { %v2679_v0 = vadd.f32 %v2678_v60, %v6481_v41  ;;  %v2488_v10 = vadd.f32 %v2487_v62, %v6481_v41  ;;  %v2680_v57 = vpop.f32.mrb[69].mxu1  ;;  %v2489_v30 = vpop.f32.mrb[70].mxu0  ;;  %3789 = vmatprep.subr.bf16.mxu0 %v3470_v27 }
 0x30d   : > { %v2681_v36 = vadd.f32 %v2680_v57, %v6481_v41  ;;  %v2490_v63 = vadd.f32 %v2489_v30, %v6478_v4  ;;  %v2682_v37 = vpop.f32.mrb[70].mxu1  ;;  %3902 = vmatprep.subr.bf16.mxu1 %v3472_v61  ;;  %v2491_v13 = vpop.f32.mrb[71].mxu0  ;;  %3790 = vmatpush1.bf16.msra.mxu0 %v3469_v24  ;;  %v3229_v58 = vmax.f32 %v2486_v35, 0.0 }
 0x30e   : > { %v2683_v59 = vadd.f32 %v2682_v37, %v6478_v4  ;;  %v2492_v28 = vadd.f32 %v2491_v13, %v6478_v4  ;;  %v2684_v47 = vpop.f32.mrb[71].mxu1  ;;  %3903 = vmatpush1.bf16.msra.mxu1 %v3471_v26  ;;  %v3231_v34 = vmax.f32 %v2679_v0, 0.0  ;;  %v3230_v2 = vmax.f32 %v2488_v10, 0.0  ;;  %v6510_v11 = vpop.permute.xlu1 %2222 }
 0x30f   : > { %v3237_v56 = vmax.f32 %v2490_v63, 0.0  ;;  %v2685_v38 = vadd.f32 %v2684_v47, %v6478_v4  ;;  %2980 = vmatmul.mubr.bf16.gmra.mrb[176].mxu0 %v6395_v46  ;;  %v3232_v54 = vmax.f32 %v2681_v36, 0.0  ;;  %v6513_v61 = vpop.permute.xlu0 %2217 }
 0x310   : > { %v3239_v40 = vmax.f32 %v2683_v59, 0.0  ;;  %v3238_v45 = vmax.f32 %v2492_v28, 0.0  ;;  %3173 = vmatmul.mubr.bf16.gmra.mrb[176].mxu1 %v6395_v46  ;;  %2989 = vmatprep.mubr.bf16.mxu0 %v7327_v39 }
 0x311   : > { %v3477_v53 = vpack.c.bf16 %v3237_v56, %v3229_v58  ;;  %v3240_v14 = vmax.f32 %v2685_v38, 0.0  ;;  %3182 = vmatprep.mubr.bf16.mxu1 %v7327_v39 }
 0x312   : > { %v3479_v15 = vpack.c.bf16 %v3239_v40, %v3231_v34  ;;  %v3478_v51 = vpack.c.bf16 %v3238_v45, %v3230_v2  ;;  %v2495_v33 = vpop.f32.mrb[72].mxu0 }
 0x313   : > { %v3480_v31 = vpack.c.bf16 %v3240_v14, %v3232_v54  ;;  %v2496_v52 = vadd.f32 %v2495_v33, %v6497_v25  ;;  %v2688_v20 = vpop.f32.mrb[72].mxu1  ;;  %v2497_v1 = vpop.f32.mrb[73].mxu0 }
 0x314   : > { %v2689_v46 = vadd.f32 %v2688_v20, %v6497_v25  ;;  %v2498_v8 = vadd.f32 %v2497_v1, %v6497_v25  ;;  %v2690_v55 = vpop.f32.mrb[73].mxu1  ;;  %v2499_v19 = vpop.f32.mrb[74].mxu0  ;;  %3791 = vmatprep.subr.bf16.mxu0 %v3478_v51 }
 0x315   : > { %v2691_v50 = vadd.f32 %v2690_v55, %v6497_v25  ;;  %v2500_v23 = vadd.f32 %v2499_v19, %v6494_v3  ;;  %v2692_v44 = vpop.f32.mrb[74].mxu1  ;;  %3904 = vmatprep.subr.bf16.mxu1 %v3480_v31  ;;  %v2501_v22 = vpop.f32.mrb[75].mxu0  ;;  %3792 = vmatpush1.bf16.msra.mxu0 %v3477_v53  ;;  %v3245_v43 = vmax.f32 %v2496_v52, 0.0 }
 0x316   : > { %v2693_v48 = vadd.f32 %v2692_v44, %v6494_v3  ;;  %v2502_v9 = vadd.f32 %v2501_v22, %v6494_v3  ;;  %v2694_v5 = vpop.f32.mrb[75].mxu1  ;;  %3905 = vmatpush1.bf16.msra.mxu1 %v3479_v15  ;;  %v3247_v21 = vmax.f32 %v2689_v46, 0.0  ;;  %v3246_v6 = vmax.f32 %v2498_v8, 0.0  ;;  %v6526_v15 = vpop.permute.xlu1 %2232 }
 0x317   : > { %v3253_v32 = vmax.f32 %v2500_v23, 0.0  ;;  %v2695_v49 = vadd.f32 %v2694_v5, %v6494_v3  ;;  %2990 = vmatmul.mubr.bf16.gmra.mrb[180].mxu0 %v6401_v17  ;;  %v3248_v26 = vmax.f32 %v2691_v50, 0.0  ;;  %v6529_v52 = vpop.permute.xlu0 %2227 }
 0x318   : > { %v3255_v16 = vmax.f32 %v2693_v48, 0.0  ;;  %v3254_v24 = vmax.f32 %v2502_v9, 0.0  ;;  %3183 = vmatmul.mubr.bf16.gmra.mrb[180].mxu1 %v6401_v17  ;;  %2999 = vmatprep.mubr.bf16.mxu0 %v7327_v39  ;;  %v4716_v48 = vld [vmem:[#allocation4 + $0x4] ss:$8 sps:$4 sm:$0xff]  }
 0x319   : > { %v3485_v27 = vpack.c.bf16 %v3253_v32, %v3245_v43  ;;  %v3256_v12 = vmax.f32 %v2695_v49, 0.0  ;;  %3192 = vmatprep.mubr.bf16.mxu1 %v7327_v39 }
 0x31a   : > { %v3487_v35 = vpack.c.bf16 %v3255_v16, %v3247_v21  ;;  %v3486_v60 = vpack.c.bf16 %v3254_v24, %v3246_v6  ;;  %v2505_v62 = vpop.f32.mrb[76].mxu0 }
 0x31b   : > { %v3488_v0 = vpack.c.bf16 %v3256_v12, %v3248_v26  ;;  %v2506_v10 = vadd.f32 %v2505_v62, %v6513_v61  ;;  %v2698_v57 = vpop.f32.mrb[76].mxu1  ;;  %v2507_v30 = vpop.f32.mrb[77].mxu0 }
 0x31c   : > { %v2699_v17 = vadd.f32 %v2698_v57, %v6513_v61  ;;  %v2508_v36 = vadd.f32 %v2507_v30, %v6513_v61  ;;  %v2700_v63 = vpop.f32.mrb[77].mxu1  ;;  %v2509_v37 = vpop.f32.mrb[78].mxu0  ;;  %3793 = vmatprep.subr.bf16.mxu0 %v3486_v60 }
 0x31d   : > { %v2701_v13 = vadd.f32 %v2700_v63, %v6513_v61  ;;  %v2510_v59 = vadd.f32 %v2509_v37, %v6510_v11  ;;  %v2702_v28 = vpop.f32.mrb[78].mxu1  ;;  %3906 = vmatprep.subr.bf16.mxu1 %v3488_v0  ;;  %v2511_v47 = vpop.f32.mrb[79].mxu0  ;;  %3794 = vmatpush1.bf16.msra.mxu0 %v3485_v27  ;;  %v3261_v34 = vmax.f32 %v2506_v10, 0.0 }
 0x31e   : > { %v2703_v58 = vadd.f32 %v2702_v28, %v6510_v11  ;;  %v2512_v56 = vadd.f32 %v2511_v47, %v6510_v11  ;;  %v2704_v38 = vpop.f32.mrb[79].mxu1  ;;  %3907 = vmatpush1.bf16.msra.mxu1 %v3487_v35  ;;  %v3263_v45 = vmax.f32 %v2699_v17, 0.0  ;;  %v3262_v54 = vmax.f32 %v2508_v36, 0.0  ;;  %v6541_v60 = vpop.permute.xlu1 %2242 }
 0x31f   : > { %v3269_v2 = vmax.f32 %v2510_v59, 0.0  ;;  %v2705_v40 = vadd.f32 %v2704_v38, %v6510_v11  ;;  %3000 = vmatmul.mubr.bf16.gmra.mrb[184].mxu0 %v6407_v18  ;;  %v3264_v51 = vmax.f32 %v2701_v13, 0.0  ;;  %v6543_v57 = vpop.permute.xlu0 %2237 }
 0x320   : > { %v3271_v53 = vmax.f32 %v2703_v58, 0.0  ;;  %v3270_v14 = vmax.f32 %v2512_v56, 0.0  ;;  %3193 = vmatmul.mubr.bf16.gmra.mrb[184].mxu1 %v6407_v18  ;;  %3009 = vmatprep.mubr.bf16.mxu0 %v7327_v39 }
 0x321   : > { %v3493_v33 = vpack.c.bf16 %v3269_v2, %v3261_v34  ;;  %v3272_v31 = vmax.f32 %v2705_v40, 0.0  ;;  %3202 = vmatprep.mubr.bf16.mxu1 %v7327_v39 }
 0x322   : > { %v3495_v20 = vpack.c.bf16 %v3271_v53, %v3263_v45  ;;  %v3494_v1 = vpack.c.bf16 %v3270_v14, %v3262_v54  ;;  %v2515_v46 = vpop.f32.mrb[80].mxu0 }
 0x323   : > { %v3496_v8 = vpack.c.bf16 %v3272_v31, %v3264_v51  ;;  %v2516_v55 = vadd.f32 %v2515_v46, %v6529_v52  ;;  %v2708_v19 = vpop.f32.mrb[80].mxu1  ;;  %v2517_v50 = vpop.f32.mrb[81].mxu0 }
 0x324   : > { %v2709_v18 = vadd.f32 %v2708_v19, %v6529_v52  ;;  %v2518_v23 = vadd.f32 %v2517_v50, %v6529_v52  ;;  %v2710_v44 = vpop.f32.mrb[81].mxu1  ;;  %v2519_v22 = vpop.f32.mrb[82].mxu0  ;;  %3795 = vmatprep.subr.bf16.mxu0 %v3494_v1 }
 0x325   : > { %v2711_v39 = vadd.f32 %v2710_v44, %v6529_v52  ;;  %v2520_v9 = vadd.f32 %v2519_v22, %v6526_v15  ;;  %v2712_v5 = vpop.f32.mrb[82].mxu1  ;;  %3908 = vmatprep.subr.bf16.mxu1 %v3496_v8  ;;  %v2521_v43 = vpop.f32.mrb[83].mxu0  ;;  %3796 = vmatpush1.bf16.msra.mxu0 %v3493_v33  ;;  %v3277_v6 = vmax.f32 %v2516_v55, 0.0 }
 0x326   : > { %v2713_v32 = vadd.f32 %v2712_v5, %v6526_v15  ;;  %v2522_v49 = vadd.f32 %v2521_v43, %v6526_v15  ;;  %v2714_v21 = vpop.f32.mrb[83].mxu1  ;;  %3909 = vmatpush1.bf16.msra.mxu1 %v3495_v20  ;;  %v3279_v26 = vmax.f32 %v2709_v18, 0.0  ;;  %v3278_v27 = vmax.f32 %v2518_v23, 0.0  ;;  %v6553_v46 = vpop.permute.xlu1 %2252 }
 0x327   : > { %v3285_v16 = vmax.f32 %v2520_v9, 0.0  ;;  %v2715_v24 = vadd.f32 %v2714_v21, %v6526_v15  ;;  %3010 = vmatmul.mubr.bf16.gmra.mrb[188].mxu0 %v6413_v7  ;;  %v3280_v62 = vmax.f32 %v2711_v39, 0.0  ;;  %v6555_v50 = vpop.permute.xlu0 %2247 }
 0x328   : > { %v3287_v12 = vmax.f32 %v2713_v32, 0.0  ;;  %v3286_v35 = vmax.f32 %v2522_v49, 0.0  ;;  %3203 = vmatmul.mubr.bf16.gmra.mrb[188].mxu1 %v6413_v7  ;;  %3821 = vmatprep.mubr.bf16.mxu0 %v4716_v48 }
 0x329   : > { %v3501_v0 = vpack.c.bf16 %v3285_v16, %v3277_v6  ;;  %v3288_v10 = vmax.f32 %v2715_v24, 0.0  ;;  %3934 = vmatprep.mubr.bf16.mxu1 %v4716_v48 }
 0x32a   : > { %v3503_v30 = vpack.c.bf16 %v3287_v12, %v3279_v26  ;;  %v3502_v17 = vpack.c.bf16 %v3286_v35, %v3278_v27  ;;  %v2525_v36 = vpop.f32.mrb[84].mxu0 }
 0x32b   : > { %v3504_v63 = vpack.c.bf16 %v3288_v10, %v3280_v62  ;;  %v2526_v37 = vadd.f32 %v2525_v36, %v6543_v57  ;;  %v2718_v13 = vpop.f32.mrb[84].mxu1  ;;  %v2527_v59 = vpop.f32.mrb[85].mxu0 }
 0x32c   : > { %v2719_v28 = vadd.f32 %v2718_v13, %v6543_v57  ;;  %v2528_v7 = vadd.f32 %v2527_v59, %v6543_v57  ;;  %v2720_v47 = vpop.f32.mrb[85].mxu1  ;;  %v2529_v58 = vpop.f32.mrb[86].mxu0  ;;  %3797 = vmatprep.subr.bf16.mxu0 %v3502_v17 }
 0x32d   : > { %v2721_v56 = vadd.f32 %v2720_v47, %v6543_v57  ;;  %v2530_v38 = vadd.f32 %v2529_v58, %v6541_v60  ;;  %v2722_v34 = vpop.f32.mrb[86].mxu1  ;;  %3910 = vmatprep.subr.bf16.mxu1 %v3504_v63  ;;  %v2531_v2 = vpop.f32.mrb[87].mxu0  ;;  %3798 = vmatpush1.bf16.msra.mxu0 %v3501_v0  ;;  %v3293_v53 = vmax.f32 %v2526_v37, 0.0 }
 0x32e   : > { %v2723_v40 = vadd.f32 %v2722_v34, %v6541_v60  ;;  %v2532_v45 = vadd.f32 %v2531_v2, %v6541_v60  ;;  %v2724_v54 = vpop.f32.mrb[87].mxu1  ;;  %3911 = vmatpush1.bf16.msra.mxu1 %v3503_v30  ;;  %v3295_v33 = vmax.f32 %v2719_v28, 0.0  ;;  %v3294_v31 = vmax.f32 %v2528_v7, 0.0  ;;  %v6565_v63 = vpop.permute.xlu1 %2262 }
 0x32f   : > { %v3301_v14 = vmax.f32 %v2530_v38, 0.0  ;;  %v2725_v51 = vadd.f32 %v2724_v54, %v6541_v60  ;;  %v3296_v8 = vmax.f32 %v2721_v56, 0.0  ;;  %v6567_v28 = vpop.permute.xlu0 %2257 }
 0x330   : > { %v3303_v20 = vmax.f32 %v2723_v40, 0.0  ;;  %v3302_v1 = vmax.f32 %v2532_v45, 0.0 }
 0x331   : > { %v3509_v55 = vpack.c.bf16 %v3301_v14, %v3293_v53  ;;  %v3304_v19 = vmax.f32 %v2725_v51, 0.0 }
 0x332   : > { %v3511_v18 = vpack.c.bf16 %v3303_v20, %v3295_v33  ;;  %v3510_v23 = vpack.c.bf16 %v3302_v1, %v3294_v31  ;;  %v2535_v44 = vpop.f32.mrb[88].mxu0 }
 0x333   : > { %v3512_v22 = vpack.c.bf16 %v3304_v19, %v3296_v8  ;;  %v2536_v48 = vadd.f32 %v2535_v44, %v6555_v50  ;;  %v2728_v39 = vpop.f32.mrb[88].mxu1  ;;  %v2537_v9 = vpop.f32.mrb[89].mxu0 }
 0x334   : > { %v2729_v5 = vadd.f32 %v2728_v39, %v6555_v50  ;;  %v2538_v43 = vadd.f32 %v2537_v9, %v6555_v50  ;;  %v2730_v32 = vpop.f32.mrb[89].mxu1  ;;  %v2539_v49 = vpop.f32.mrb[90].mxu0  ;;  %3799 = vmatprep.subr.bf16.mxu0 %v3510_v23 }
 0x335   : > { %v2731_v21 = vadd.f32 %v2730_v32, %v6555_v50  ;;  %v2540_v6 = vadd.f32 %v2539_v49, %v6553_v46  ;;  %v2732_v16 = vpop.f32.mrb[90].mxu1  ;;  %3912 = vmatprep.subr.bf16.mxu1 %v3512_v22  ;;  %v2541_v24 = vpop.f32.mrb[91].mxu0  ;;  %3800 = vmatpush1.bf16.msra.mxu0 %v3509_v55  ;;  %v3309_v35 = vmax.f32 %v2536_v48, 0.0 }
 0x336   : > { %v2733_v26 = vadd.f32 %v2732_v16, %v6553_v46  ;;  %v2542_v27 = vadd.f32 %v2541_v24, %v6553_v46  ;;  %v2734_v12 = vpop.f32.mrb[91].mxu1  ;;  %3913 = vmatpush1.bf16.msra.mxu1 %v3511_v18  ;;  %v3311_v10 = vmax.f32 %v2729_v5, 0.0  ;;  %v3310_v30 = vmax.f32 %v2538_v43, 0.0  ;;  %v6577_v39 = vpop.permute.xlu1 %2272 }
 0x337   : > { %v3317_v62 = vmax.f32 %v2540_v6, 0.0  ;;  %v2735_v0 = vadd.f32 %v2734_v12, %v6553_v46  ;;  %v3312_v37 = vmax.f32 %v2731_v21, 0.0  ;;  %v6579_v32 = vpop.permute.xlu0 %2267 }
 0x338   : > { %v3319_v17 = vmax.f32 %v2733_v26, 0.0  ;;  %v3318_v36 = vmax.f32 %v2542_v27, 0.0 }
 0x339   : > { %v3517_v13 = vpack.c.bf16 %v3317_v62, %v3309_v35  ;;  %v3320_v59 = vmax.f32 %v2735_v0, 0.0 }
 0x33a   : > { %v3519_v7 = vpack.c.bf16 %v3319_v17, %v3311_v10  ;;  %v3518_v47 = vpack.c.bf16 %v3318_v36, %v3310_v30  ;;  %v2545_v58 = vpop.f32.mrb[92].mxu0 }
 0x33b   : > { %v3520_v56 = vpack.c.bf16 %v3320_v59, %v3312_v37  ;;  %v2546_v38 = vadd.f32 %v2545_v58, %v6567_v28  ;;  %v2738_v34 = vpop.f32.mrb[92].mxu1  ;;  %v2547_v2 = vpop.f32.mrb[93].mxu0 }
 0x33c   : > { %v2739_v40 = vadd.f32 %v2738_v34, %v6567_v28  ;;  %v2548_v45 = vadd.f32 %v2547_v2, %v6567_v28  ;;  %v2740_v54 = vpop.f32.mrb[93].mxu1  ;;  %v2549_v53 = vpop.f32.mrb[94].mxu0  ;;  %3801 = vmatprep.subr.bf16.mxu0 %v3518_v47 }
 0x33d   : > { %v2741_v14 = vadd.f32 %v2740_v54, %v6567_v28  ;;  %v2550_v51 = vadd.f32 %v2549_v53, %v6565_v63  ;;  %v2742_v33 = vpop.f32.mrb[94].mxu1  ;;  %3914 = vmatprep.subr.bf16.mxu1 %v3520_v56  ;;  %v2551_v31 = vpop.f32.mrb[95].mxu0  ;;  %3802 = vmatpush1.bf16.msra.mxu0 %v3517_v13  ;;  %v3325_v55 = vmax.f32 %v2546_v38, 0.0 }
 0x33e   : > { %v2743_v20 = vadd.f32 %v2742_v33, %v6565_v63  ;;  %v2552_v1 = vadd.f32 %v2551_v31, %v6565_v63  ;;  %v2744_v8 = vpop.f32.mrb[95].mxu1  ;;  %3915 = vmatpush1.bf16.msra.mxu1 %v3519_v7  ;;  %v3327_v23 = vmax.f32 %v2739_v40, 0.0  ;;  %v3326_v44 = vmax.f32 %v2548_v45, 0.0  ;;  %v6589_v40 = vpop.permute.xlu1 %2282 }
 0x33f   : > { %v3333_v19 = vmax.f32 %v2550_v51, 0.0  ;;  %v2745_v18 = vadd.f32 %v2744_v8, %v6565_v63  ;;  %v3328_v9 = vmax.f32 %v2741_v14, 0.0  ;;  %v6591_v14 = vpop.permute.xlu0 %2277 }
 0x340   : > { %v3335_v22 = vmax.f32 %v2743_v20, 0.0  ;;  %v3334_v48 = vmax.f32 %v2552_v1, 0.0 }
 0x341   : > { %v3525_v5 = vpack.c.bf16 %v3333_v19, %v3325_v55  ;;  %v3336_v43 = vmax.f32 %v2745_v18, 0.0 }
 0x342   : > { %v3527_v49 = vpack.c.bf16 %v3335_v22, %v3327_v23  ;;  %v3526_v21 = vpack.c.bf16 %v3334_v48, %v3326_v44  ;;  %v2555_v6 = vpop.f32.mrb[96].mxu0 }
 0x343   : > { %v3528_v16 = vpack.c.bf16 %v3336_v43, %v3328_v9  ;;  %v2556_v24 = vadd.f32 %v2555_v6, %v6579_v32  ;;  %v2748_v26 = vpop.f32.mrb[96].mxu1  ;;  %v2557_v27 = vpop.f32.mrb[97].mxu0 }
 0x344   : > { %v2749_v12 = vadd.f32 %v2748_v26, %v6579_v32  ;;  %v2558_v35 = vadd.f32 %v2557_v27, %v6579_v32  ;;  %v2750_v62 = vpop.f32.mrb[97].mxu1  ;;  %v2559_v0 = vpop.f32.mrb[98].mxu0  ;;  %3803 = vmatprep.subr.bf16.mxu0 %v3526_v21 }
 0x345   : > { %v2751_v10 = vadd.f32 %v2750_v62, %v6579_v32  ;;  %v2560_v30 = vadd.f32 %v2559_v0, %v6577_v39  ;;  %v2752_v17 = vpop.f32.mrb[98].mxu1  ;;  %3916 = vmatprep.subr.bf16.mxu1 %v3528_v16  ;;  %v2561_v36 = vpop.f32.mrb[99].mxu0  ;;  %3804 = vmatpush1.bf16.msra.mxu0 %v3525_v5  ;;  %v3341_v7 = vmax.f32 %v2556_v24, 0.0 }
 0x346   : > { %v2753_v37 = vadd.f32 %v2752_v17, %v6577_v39  ;;  %v2562_v13 = vadd.f32 %v2561_v36, %v6577_v39  ;;  %v2754_v59 = vpop.f32.mrb[99].mxu1  ;;  %3917 = vmatpush1.bf16.msra.mxu1 %v3527_v49  ;;  %v3343_v56 = vmax.f32 %v2749_v12, 0.0  ;;  %v3342_v38 = vmax.f32 %v2558_v35, 0.0  ;;  %v6601_v62 = vpop.permute.xlu1 %2292 }
 0x347   : > { %v3349_v47 = vmax.f32 %v2560_v30, 0.0  ;;  %v2755_v58 = vadd.f32 %v2754_v59, %v6577_v39  ;;  %v3344_v45 = vmax.f32 %v2751_v10, 0.0  ;;  %v6603_v17 = vpop.permute.xlu0 %2287 }
 0x348   : > { %v3351_v34 = vmax.f32 %v2753_v37, 0.0  ;;  %v3350_v2 = vmax.f32 %v2562_v13, 0.0 }
 0x349   : > { %v3533_v54 = vpack.c.bf16 %v3349_v47, %v3341_v7  ;;  %v3352_v53 = vmax.f32 %v2755_v58, 0.0 }
 0x34a   : > { %v3535_v51 = vpack.c.bf16 %v3351_v34, %v3343_v56  ;;  %v3534_v33 = vpack.c.bf16 %v3350_v2, %v3342_v38  ;;  %v2565_v31 = vpop.f32.mrb[100].mxu0 }
 0x34b   : > { %v3536_v20 = vpack.c.bf16 %v3352_v53, %v3344_v45  ;;  %v2566_v1 = vadd.f32 %v2565_v31, %v6591_v14  ;;  %v2758_v8 = vpop.f32.mrb[100].mxu1  ;;  %v2567_v55 = vpop.f32.mrb[101].mxu0 }
 0x34c   : > { %v2759_v19 = vadd.f32 %v2758_v8, %v6591_v14  ;;  %v2568_v18 = vadd.f32 %v2567_v55, %v6591_v14  ;;  %v2760_v23 = vpop.f32.mrb[101].mxu1  ;;  %v2569_v44 = vpop.f32.mrb[102].mxu0  ;;  %3805 = vmatprep.subr.bf16.mxu0 %v3534_v33 }
 0x34d   : > { %v2761_v22 = vadd.f32 %v2760_v23, %v6591_v14  ;;  %v2570_v48 = vadd.f32 %v2569_v44, %v6589_v40  ;;  %v2762_v9 = vpop.f32.mrb[102].mxu1  ;;  %3918 = vmatprep.subr.bf16.mxu1 %v3536_v20  ;;  %v2571_v5 = vpop.f32.mrb[103].mxu0  ;;  %3806 = vmatpush1.bf16.msra.mxu0 %v3533_v54  ;;  %v3357_v6 = vmax.f32 %v2566_v1, 0.0 }
 0x34e   : > { %v2763_v43 = vadd.f32 %v2762_v9, %v6589_v40  ;;  %v2572_v49 = vadd.f32 %v2571_v5, %v6589_v40  ;;  %v2764_v21 = vpop.f32.mrb[103].mxu1  ;;  %3919 = vmatpush1.bf16.msra.mxu1 %v3535_v51  ;;  %v3359_v26 = vmax.f32 %v2759_v19, 0.0  ;;  %v3358_v27 = vmax.f32 %v2568_v18, 0.0 }
 0x34f   : > { %v3365_v16 = vmax.f32 %v2570_v48, 0.0  ;;  %v2765_v24 = vadd.f32 %v2764_v21, %v6589_v40  ;;  %v3360_v0 = vmax.f32 %v2761_v22, 0.0  ;;  %v6613_v22 = vpop.permute.xlu1 %2302 }
 0x350   : > { %v3367_v12 = vmax.f32 %v2763_v43, 0.0  ;;  %v3366_v35 = vmax.f32 %v2572_v49, 0.0  ;;  %v6615_v43 = vpop.permute.xlu0 %2297 }
 0x351   : > { %v3541_v10 = vpack.c.bf16 %v3365_v16, %v3357_v6  ;;  %v3368_v30 = vmax.f32 %v2765_v24, 0.0 }
 0x352   : > { %v3543_v36 = vpack.c.bf16 %v3367_v12, %v3359_v26  ;;  %v3542_v37 = vpack.c.bf16 %v3366_v35, %v3358_v27  ;;  %v2575_v13 = vpop.f32.mrb[104].mxu0 }
 0x353   : > { %v3544_v59 = vpack.c.bf16 %v3368_v30, %v3360_v0  ;;  %v2576_v7 = vadd.f32 %v2575_v13, %v6603_v17  ;;  %v2768_v47 = vpop.f32.mrb[104].mxu1  ;;  %v2577_v58 = vpop.f32.mrb[105].mxu0 }
 0x354   : > { %v2769_v56 = vadd.f32 %v2768_v47, %v6603_v17  ;;  %v2578_v38 = vadd.f32 %v2577_v58, %v6603_v17  ;;  %v2770_v34 = vpop.f32.mrb[105].mxu1  ;;  %v2579_v2 = vpop.f32.mrb[106].mxu0  ;;  %3807 = vmatprep.subr.bf16.mxu0 %v3542_v37 }
 0x355   : > { %v2771_v45 = vadd.f32 %v2770_v34, %v6603_v17  ;;  %v2580_v54 = vadd.f32 %v2579_v2, %v6601_v62  ;;  %v2772_v53 = vpop.f32.mrb[106].mxu1  ;;  %3920 = vmatprep.subr.bf16.mxu1 %v3544_v59  ;;  %v2581_v51 = vpop.f32.mrb[107].mxu0  ;;  %3808 = vmatpush1.bf16.msra.mxu0 %v3541_v10  ;;  %v3373_v1 = vmax.f32 %v2576_v7, 0.0 }
 0x356   : > { %v2773_v33 = vadd.f32 %v2772_v53, %v6601_v62  ;;  %v2582_v31 = vadd.f32 %v2581_v51, %v6601_v62  ;;  %v2774_v20 = vpop.f32.mrb[107].mxu1  ;;  %3921 = vmatpush1.bf16.msra.mxu1 %v3543_v36  ;;  %v3375_v19 = vmax.f32 %v2769_v56, 0.0  ;;  %v3374_v18 = vmax.f32 %v2578_v38, 0.0  ;;  %v6625_v53 = vpop.permute.xlu1 %2312 }
 0x357   : > { %v3381_v8 = vmax.f32 %v2580_v54, 0.0  ;;  %v2775_v55 = vadd.f32 %v2774_v20, %v6601_v62  ;;  %v3376_v48 = vmax.f32 %v2771_v45, 0.0  ;;  %v6627_v20 = vpop.permute.xlu0 %2307 }
 0x358   : > { %v3383_v23 = vmax.f32 %v2773_v33, 0.0  ;;  %v3382_v44 = vmax.f32 %v2582_v31, 0.0 }
 0x359   : > { %v3549_v9 = vpack.c.bf16 %v3381_v8, %v3373_v1  ;;  %v3384_v5 = vmax.f32 %v2775_v55, 0.0 }
 0x35a   : > { %v3551_v49 = vpack.c.bf16 %v3383_v23, %v3375_v19  ;;  %v3550_v21 = vpack.c.bf16 %v3382_v44, %v3374_v18  ;;  %v2585_v6 = vpop.f32.mrb[108].mxu0 }
 0x35b   : > { %v3552_v16 = vpack.c.bf16 %v3384_v5, %v3376_v48  ;;  %v2586_v24 = vadd.f32 %v2585_v6, %v6615_v43  ;;  %v2778_v26 = vpop.f32.mrb[108].mxu1  ;;  %v2587_v27 = vpop.f32.mrb[109].mxu0 }
 0x35c   : > { %v2779_v12 = vadd.f32 %v2778_v26, %v6615_v43  ;;  %v2588_v35 = vadd.f32 %v2587_v27, %v6615_v43  ;;  %v2780_v0 = vpop.f32.mrb[109].mxu1  ;;  %v2589_v10 = vpop.f32.mrb[110].mxu0  ;;  %3809 = vmatprep.subr.bf16.mxu0 %v3550_v21 }
 0x35d   : > { %v2781_v30 = vadd.f32 %v2780_v0, %v6615_v43  ;;  %v2590_v36 = vadd.f32 %v2589_v10, %v6613_v22  ;;  %v2782_v37 = vpop.f32.mrb[110].mxu1  ;;  %3922 = vmatprep.subr.bf16.mxu1 %v3552_v16  ;;  %v2591_v13 = vpop.f32.mrb[111].mxu0  ;;  %3810 = vmatpush1.bf16.msra.mxu0 %v3549_v9  ;;  %v3389_v58 = vmax.f32 %v2586_v24, 0.0 }
 0x35e   : > { %v2783_v59 = vadd.f32 %v2782_v37, %v6613_v22  ;;  %v2592_v7 = vadd.f32 %v2591_v13, %v6613_v22  ;;  %v2784_v47 = vpop.f32.mrb[111].mxu1  ;;  %3923 = vmatpush1.bf16.msra.mxu1 %v3551_v49  ;;  %v3391_v34 = vmax.f32 %v2779_v12, 0.0  ;;  %v3390_v2 = vmax.f32 %v2588_v35, 0.0 }
 0x35f   : > { %v3397_v56 = vmax.f32 %v2590_v36, 0.0  ;;  %v2785_v38 = vadd.f32 %v2784_v47, %v6613_v22  ;;  %v3392_v51 = vmax.f32 %v2781_v30, 0.0 }
 0x360   : > { %v3399_v45 = vmax.f32 %v2783_v59, 0.0  ;;  %v3398_v54 = vmax.f32 %v2592_v7, 0.0  ;;  %v6637_v59 = vpop.permute.xlu1 %2322 }
 0x361   : > { %v3557_v33 = vpack.c.bf16 %v3397_v56, %v3389_v58  ;;  %v3400_v31 = vmax.f32 %v2785_v38, 0.0  ;;  %v6639_v56 = vpop.permute.xlu0 %2317 }
 0x362   : > { %v3559_v1 = vpack.c.bf16 %v3399_v45, %v3391_v34  ;;  %v3558_v8 = vpack.c.bf16 %v3398_v54, %v3390_v2  ;;  %v2595_v55 = vpop.f32.mrb[112].mxu0 }
 0x363   : > { %v3560_v19 = vpack.c.bf16 %v3400_v31, %v3392_v51  ;;  %v2596_v18 = vadd.f32 %v2595_v55, %v6627_v20  ;;  %v2788_v23 = vpop.f32.mrb[112].mxu1  ;;  %v2597_v44 = vpop.f32.mrb[113].mxu0 }
 0x364   : > { %v2789_v48 = vadd.f32 %v2788_v23, %v6627_v20  ;;  %v2598_v9 = vadd.f32 %v2597_v44, %v6627_v20  ;;  %v2790_v5 = vpop.f32.mrb[113].mxu1  ;;  %v2599_v49 = vpop.f32.mrb[114].mxu0  ;;  %3811 = vmatprep.subr.bf16.mxu0 %v3558_v8 }
 0x365   : > { %v2791_v21 = vadd.f32 %v2790_v5, %v6627_v20  ;;  %v2600_v6 = vadd.f32 %v2599_v49, %v6625_v53  ;;  %v2792_v16 = vpop.f32.mrb[114].mxu1  ;;  %3924 = vmatprep.subr.bf16.mxu1 %v3560_v19  ;;  %v2601_v24 = vpop.f32.mrb[115].mxu0  ;;  %3812 = vmatpush1.bf16.msra.mxu0 %v3557_v33  ;;  %v3405_v35 = vmax.f32 %v2596_v18, 0.0 }
 0x366   : > { %v2793_v26 = vadd.f32 %v2792_v16, %v6625_v53  ;;  %v2602_v27 = vadd.f32 %v2601_v24, %v6625_v53  ;;  %v2794_v12 = vpop.f32.mrb[115].mxu1  ;;  %3925 = vmatpush1.bf16.msra.mxu1 %v3559_v1  ;;  %v3407_v30 = vmax.f32 %v2789_v48, 0.0  ;;  %v3406_v36 = vmax.f32 %v2598_v9, 0.0 }
 0x367   : > { %v3413_v0 = vmax.f32 %v2600_v6, 0.0  ;;  %v2795_v10 = vadd.f32 %v2794_v12, %v6625_v53  ;;  %v3408_v7 = vmax.f32 %v2791_v21, 0.0  ;;  %v6649_v12 = vpop.permute.xlu1 %2332 }
 0x368   : > { %v3415_v37 = vmax.f32 %v2793_v26, 0.0  ;;  %v3414_v13 = vmax.f32 %v2602_v27, 0.0 }
 0x369   : > { %v3565_v47 = vpack.c.bf16 %v3413_v0, %v3405_v35  ;;  %v3416_v58 = vmax.f32 %v2795_v10, 0.0 }
 0x36a   : > { %v3567_v38 = vpack.c.bf16 %v3415_v37, %v3407_v30  ;;  %v3566_v34 = vpack.c.bf16 %v3414_v13, %v3406_v36  ;;  %v2605_v2 = vpop.f32.mrb[116].mxu0  ;;  %v6651_v30 = vpop.permute.xlu0 %2327 }
 0x36b   : > { %v3568_v45 = vpack.c.bf16 %v3416_v58, %v3408_v7  ;;  %v2606_v54 = vadd.f32 %v2605_v2, %v6639_v56  ;;  %v2798_v51 = vpop.f32.mrb[116].mxu1  ;;  %v2607_v33 = vpop.f32.mrb[117].mxu0 }
 0x36c   : > { %v2799_v31 = vadd.f32 %v2798_v51, %v6639_v56  ;;  %v2608_v1 = vadd.f32 %v2607_v33, %v6639_v56  ;;  %v2800_v8 = vpop.f32.mrb[117].mxu1  ;;  %v2609_v55 = vpop.f32.mrb[118].mxu0  ;;  %3813 = vmatprep.subr.bf16.mxu0 %v3566_v34 }
 0x36d   : > { %v2801_v19 = vadd.f32 %v2800_v8, %v6639_v56  ;;  %v2610_v18 = vadd.f32 %v2609_v55, %v6637_v59  ;;  %v2802_v23 = vpop.f32.mrb[118].mxu1  ;;  %3926 = vmatprep.subr.bf16.mxu1 %v3568_v45  ;;  %v2611_v44 = vpop.f32.mrb[119].mxu0  ;;  %3814 = vmatpush1.bf16.msra.mxu0 %v3565_v47  ;;  %v3421_v49 = vmax.f32 %v2606_v54, 0.0 }
 0x36e   : > { %v2803_v48 = vadd.f32 %v2802_v23, %v6637_v59  ;;  %v2612_v9 = vadd.f32 %v2611_v44, %v6637_v59  ;;  %v2804_v5 = vpop.f32.mrb[119].mxu1  ;;  %3927 = vmatpush1.bf16.msra.mxu1 %v3567_v38  ;;  %v3423_v16 = vmax.f32 %v2799_v31, 0.0  ;;  %v3422_v24 = vmax.f32 %v2608_v1, 0.0 }
 0x36f   : > { %v3429_v21 = vmax.f32 %v2610_v18, 0.0  ;;  %v2805_v6 = vadd.f32 %v2804_v5, %v6637_v59  ;;  %v3424_v35 = vmax.f32 %v2801_v19, 0.0 }
 0x370   : > { %v3431_v26 = vmax.f32 %v2803_v48, 0.0  ;;  %v3430_v27 = vmax.f32 %v2612_v9, 0.0 }
 0x371   : > { %v3573_v0 = vpack.c.bf16 %v3429_v21, %v3421_v49  ;;  %v3432_v10 = vmax.f32 %v2805_v6, 0.0  ;;  %v6661_v21 = vpop.permute.xlu1 %2342 }
 0x372   : > { %v3575_v36 = vpack.c.bf16 %v3431_v26, %v3423_v16  ;;  %v3574_v37 = vpack.c.bf16 %v3430_v27, %v3422_v24  ;;  %v2615_v13 = vpop.f32.mrb[120].mxu0  ;;  %v6663_v26 = vpop.permute.xlu0 %2337 }
 0x373   : > { %v3576_v7 = vpack.c.bf16 %v3432_v10, %v3424_v35  ;;  %v2616_v47 = vadd.f32 %v2615_v13, %v6651_v30  ;;  %v2808_v58 = vpop.f32.mrb[120].mxu1  ;;  %v2617_v38 = vpop.f32.mrb[121].mxu0 }
 0x374   : > { %v2809_v34 = vadd.f32 %v2808_v58, %v6651_v30  ;;  %v2618_v2 = vadd.f32 %v2617_v38, %v6651_v30  ;;  %v2810_v45 = vpop.f32.mrb[121].mxu1  ;;  %v2619_v54 = vpop.f32.mrb[122].mxu0  ;;  %3815 = vmatprep.subr.bf16.mxu0 %v3574_v37 }
 0x375   : > { %v2811_v51 = vadd.f32 %v2810_v45, %v6651_v30  ;;  %v2620_v33 = vadd.f32 %v2619_v54, %v6649_v12  ;;  %v2812_v31 = vpop.f32.mrb[122].mxu1  ;;  %3928 = vmatprep.subr.bf16.mxu1 %v3576_v7  ;;  %v2621_v1 = vpop.f32.mrb[123].mxu0  ;;  %3816 = vmatpush1.bf16.msra.mxu0 %v3573_v0  ;;  %v3437_v18 = vmax.f32 %v2616_v47, 0.0 }
 0x376   : > { %v2813_v8 = vadd.f32 %v2812_v31, %v6649_v12  ;;  %v2622_v55 = vadd.f32 %v2621_v1, %v6649_v12  ;;  %v2814_v19 = vpop.f32.mrb[123].mxu1  ;;  %3929 = vmatpush1.bf16.msra.mxu1 %v3575_v36  ;;  %v3439_v48 = vmax.f32 %v2809_v34, 0.0  ;;  %v3438_v9 = vmax.f32 %v2618_v2, 0.0 }
 0x377   : > { %v3445_v23 = vmax.f32 %v2620_v33, 0.0  ;;  %v2815_v44 = vadd.f32 %v2814_v19, %v6649_v12  ;;  %v3440_v6 = vmax.f32 %v2811_v51, 0.0 }
 0x378   : > { %v3447_v5 = vmax.f32 %v2813_v8, 0.0  ;;  %v3446_v49 = vmax.f32 %v2622_v55, 0.0 }
 0x379   : > { %v3581_v16 = vpack.c.bf16 %v3445_v23, %v3437_v18  ;;  %v3448_v24 = vmax.f32 %v2815_v44, 0.0 }
 0x37a   : > { %v3583_v27 = vpack.c.bf16 %v3447_v5, %v3439_v48  ;;  %v3582_v35 = vpack.c.bf16 %v3446_v49, %v3438_v9  ;;  %v2625_v0 = vpop.f32.mrb[124].mxu0 }
 0x37b   : > { %v3584_v10 = vpack.c.bf16 %v3448_v24, %v3440_v6  ;;  %v2626_v36 = vadd.f32 %v2625_v0, %v6663_v26  ;;  %v2818_v37 = vpop.f32.mrb[124].mxu1  ;;  %v2627_v13 = vpop.f32.mrb[125].mxu0 }
 0x37c   : > { %v2819_v7 = vadd.f32 %v2818_v37, %v6663_v26  ;;  %v2628_v47 = vadd.f32 %v2627_v13, %v6663_v26  ;;  %v2820_v58 = vpop.f32.mrb[125].mxu1  ;;  %v2629_v38 = vpop.f32.mrb[126].mxu0  ;;  %3817 = vmatprep.subr.bf16.mxu0 %v3582_v35 }
 0x37d   : > { %v2821_v34 = vadd.f32 %v2820_v58, %v6663_v26  ;;  %v2630_v2 = vadd.f32 %v2629_v38, %v6661_v21  ;;  %v2822_v45 = vpop.f32.mrb[126].mxu1  ;;  %3930 = vmatprep.subr.bf16.mxu1 %v3584_v10  ;;  %v2631_v54 = vpop.f32.mrb[127].mxu0  ;;  %3818 = vmatpush1.bf16.msra.mxu0 %v3581_v16  ;;  %v3453_v1 = vmax.f32 %v2626_v36, 0.0 }
 0x37e   : > { %v2823_v51 = vadd.f32 %v2822_v45, %v6661_v21  ;;  %v2632_v33 = vadd.f32 %v2631_v54, %v6661_v21  ;;  %v2824_v31 = vpop.f32.mrb[127].mxu1  ;;  %3931 = vmatpush1.bf16.msra.mxu1 %v3583_v27  ;;  %v3455_v19 = vmax.f32 %v2819_v7, 0.0  ;;  %v3454_v18 = vmax.f32 %v2628_v47, 0.0  ;;  %v4714_v7 = vld [vmem:[#allocation4] ss:$8 sps:$4 sm:$0xff]  }
 0x37f   : > { %v3461_v8 = vmax.f32 %v2630_v2, 0.0  ;;  %v2825_v55 = vadd.f32 %v2824_v31, %v6661_v21  ;;  %v3456_v48 = vmax.f32 %v2821_v34, 0.0  ;;  %v4717_v2 = vld [vmem:[#allocation4 + $0x14] ss:$8 sps:$4 sm:$0xff]  }
 0x380   : > { %v3463_v23 = vmax.f32 %v2823_v51, 0.0  ;;  %v3462_v44 = vmax.f32 %v2632_v33, 0.0 }
 0x381   : > { %v3589_v9 = vpack.c.bf16 %v3461_v8, %v3453_v1  ;;  %v3464_v5 = vmax.f32 %v2825_v55, 0.0 }
 0x382   : > { %v3591_v49 = vpack.c.bf16 %v3463_v23, %v3455_v19  ;;  %v3590_v6 = vpack.c.bf16 %v3462_v44, %v3454_v18  ;;  %v2861_v16 = vpop.f32.mrb[128].mxu0 }
 0x383   : > { %v3592_v24 = vpack.c.bf16 %v3464_v5, %v3456_v48  ;;  %v2862_v35 = vadd.f32 %v2861_v16, %v6465_v42  ;;  %v3054_v0 = vpop.f32.mrb[128].mxu1  ;;  %v2863_v10 = vpop.f32.mrb[129].mxu0 }
 0x384   : > { %v3055_v27 = vadd.f32 %v3054_v0, %v6465_v42  ;;  %v2864_v36 = vadd.f32 %v2863_v10, %v6465_v42  ;;  %v3056_v37 = vpop.f32.mrb[129].mxu1  ;;  %v2865_v13 = vpop.f32.mrb[130].mxu0  ;;  %3819 = vmatprep.subr.bf16.mxu0 %v3590_v6 }
 0x385   : > { %v3057_v47 = vadd.f32 %v3056_v37, %v6465_v42  ;;  %v2866_v58 = vadd.f32 %v2865_v13, %v6462_v29  ;;  %v3058_v38 = vpop.f32.mrb[130].mxu1  ;;  %3932 = vmatprep.subr.bf16.mxu1 %v3592_v24  ;;  %v2867_v34 = vpop.f32.mrb[131].mxu0  ;;  %3820 = vmatpush1.bf16.msra.mxu0 %v3589_v9  ;;  %v3217_v33 = vmax.f32 %v2862_v35, 0.0 }
 0x386   : > { %v3059_v45 = vadd.f32 %v3058_v38, %v6462_v29  ;;  %v2868_v54 = vadd.f32 %v2867_v34, %v6462_v29  ;;  %v3060_v51 = vpop.f32.mrb[131].mxu1  ;;  %3933 = vmatpush1.bf16.msra.mxu1 %v3591_v49  ;;  %v3219_v8 = vmax.f32 %v3055_v27, 0.0  ;;  %v3218_v55 = vmax.f32 %v2864_v36, 0.0  ;;  %v4719_v27 = vld [vmem:[#allocation4 + $0x10] ss:$8 sps:$4 sm:$0xff]  }
 0x387   : > { %v3225_v31 = vmax.f32 %v2866_v58, 0.0  ;;  %v3061_v1 = vadd.f32 %v3060_v51, %v6462_v29  ;;  %v3220_v18 = vmax.f32 %v3057_v47, 0.0  ;;  %v4720_v47 = vld [vmem:[#allocation4 + $0x24] ss:$8 sps:$4 sm:$0xff]  }
 0x388   : > { %v3227_v42 = vmax.f32 %v3059_v45, 0.0  ;;  %v3226_v19 = vmax.f32 %v2868_v54, 0.0  ;;  %3822 = vmatmul.mubr.bf16.vlgmr.msra.gmra.mrb[192].mxu0 %v4714_v7 }
 0x389   : > { %v3473_v23 = vpack.c.bf16 %v3225_v31, %v3217_v33  ;;  %v3228_v44 = vmax.f32 %v3061_v1, 0.0  ;;  %3935 = vmatmul.mubr.bf16.vlgmr.msra.gmra.mrb[192].mxu1 %v4714_v7  ;;  %3831 = vmatprep.mubr.bf16.mxu0 %v4717_v2 }
 0x38a   : > { %v3475_v48 = vpack.c.bf16 %v3227_v42, %v3219_v8  ;;  %v3474_v9 = vpack.c.bf16 %v3226_v19, %v3218_v55  ;;  %v2871_v5 = vpop.f32.mrb[132].mxu0  ;;  %3944 = vmatprep.mubr.bf16.mxu1 %v4717_v2 }
 0x38b   : > { %v3476_v6 = vpack.c.bf16 %v3228_v44, %v3220_v18  ;;  %v2872_v49 = vadd.f32 %v2871_v5, %v6481_v41  ;;  %v3064_v16 = vpop.f32.mrb[132].mxu1  ;;  %v2873_v24 = vpop.f32.mrb[133].mxu0 }
 0x38c   : > { %v3065_v29 = vadd.f32 %v3064_v16, %v6481_v41  ;;  %v2874_v35 = vadd.f32 %v2873_v24, %v6481_v41  ;;  %v3066_v0 = vpop.f32.mrb[133].mxu1  ;;  %v2875_v10 = vpop.f32.mrb[134].mxu0  ;;  %4015 = vmatprep.subr.bf16.mxu0 %v3474_v9  ;;  %v6692_v16 = vld [vmem:[#allocation4 + $0x20] ss:$8 sps:$4 sm:$0xff]  }
 0x38d   : > { %v3067_v36 = vadd.f32 %v3066_v0, %v6481_v41  ;;  %v2876_v37 = vadd.f32 %v2875_v10, %v6478_v4  ;;  %v3068_v13 = vpop.f32.mrb[134].mxu1  ;;  %4128 = vmatprep.subr.bf16.mxu1 %v3476_v6  ;;  %v2877_v7 = vpop.f32.mrb[135].mxu0  ;;  %4016 = vmatpush1.bf16.msra.mxu0 %v3473_v23  ;;  %v3233_v2 = vmax.f32 %v2872_v49, 0.0  ;;  %v6696_v10 = vld [vmem:[#allocation4 + $0x34] ss:$8 sps:$4 sm:$0xff]  }
 0x38e   : > { %v3069_v58 = vadd.f32 %v3068_v13, %v6478_v4  ;;  %v2878_v38 = vadd.f32 %v2877_v7, %v6478_v4  ;;  %v3070_v34 = vpop.f32.mrb[135].mxu1  ;;  %4129 = vmatpush1.bf16.msra.mxu1 %v3475_v48  ;;  %v3235_v51 = vmax.f32 %v3065_v29, 0.0  ;;  %v3234_v33 = vmax.f32 %v2874_v35, 0.0 }
 0x38f   : > { %v3241_v45 = vmax.f32 %v2876_v37, 0.0  ;;  %v3071_v54 = vadd.f32 %v3070_v34, %v6478_v4  ;;  %v3236_v1 = vmax.f32 %v3067_v36, 0.0 }
 0x390   : > { %v3243_v41 = vmax.f32 %v3069_v58, 0.0  ;;  %v3242_v31 = vmax.f32 %v2878_v38, 0.0  ;;  %3832 = vmatmul.mubr.bf16.gmra.mrb[196].mxu0 %v4719_v27 }
 0x391   : > { %v3481_v8 = vpack.c.bf16 %v3241_v45, %v3233_v2  ;;  %v3244_v55 = vmax.f32 %v3071_v54, 0.0  ;;  %3945 = vmatmul.mubr.bf16.gmra.mrb[196].mxu1 %v4719_v27  ;;  %3841 = vmatprep.mubr.bf16.mxu0 %v4720_v47 }
 0x392   : > { %v3483_v42 = vpack.c.bf16 %v3243_v41, %v3235_v51  ;;  %v3482_v19 = vpack.c.bf16 %v3242_v31, %v3234_v33  ;;  %v2881_v18 = vpop.f32.mrb[136].mxu0  ;;  %3954 = vmatprep.mubr.bf16.mxu1 %v4720_v47 }
 0x393   : > { %v3484_v23 = vpack.c.bf16 %v3244_v55, %v3236_v1  ;;  %v2882_v44 = vadd.f32 %v2881_v18, %v6497_v25  ;;  %v3074_v48 = vpop.f32.mrb[136].mxu1  ;;  %v2883_v9 = vpop.f32.mrb[137].mxu0 }
 0x394   : > { %v3075_v4 = vadd.f32 %v3074_v48, %v6497_v25  ;;  %v2884_v5 = vadd.f32 %v2883_v9, %v6497_v25  ;;  %v3076_v6 = vpop.f32.mrb[137].mxu1  ;;  %v2885_v49 = vpop.f32.mrb[138].mxu0  ;;  %4017 = vmatprep.subr.bf16.mxu0 %v3482_v19 }
 0x395   : > { %v3077_v24 = vadd.f32 %v3076_v6, %v6497_v25  ;;  %v2886_v29 = vadd.f32 %v2885_v49, %v6494_v3  ;;  %v3078_v35 = vpop.f32.mrb[138].mxu1  ;;  %4130 = vmatprep.subr.bf16.mxu1 %v3484_v23  ;;  %v2887_v0 = vpop.f32.mrb[139].mxu0  ;;  %4018 = vmatpush1.bf16.msra.mxu0 %v3481_v8  ;;  %v3249_v13 = vmax.f32 %v2882_v44, 0.0  ;;  %v6708_v23 = vld [vmem:[#allocation4 + $0x30] ss:$8 sps:$4 sm:$0xff]  }
 0x396   : > { %v3079_v27 = vadd.f32 %v3078_v35, %v6494_v3  ;;  %v2888_v36 = vadd.f32 %v2887_v0, %v6494_v3  ;;  %v3080_v37 = vpop.f32.mrb[139].mxu1  ;;  %4131 = vmatpush1.bf16.msra.mxu1 %v3483_v42  ;;  %v3251_v58 = vmax.f32 %v3075_v4, 0.0  ;;  %v3250_v25 = vmax.f32 %v2884_v5, 0.0  ;;  %v6712_v5 = vld [vmem:[#allocation4 + $0x44] ss:$8 sps:$4 sm:$0xff]  }
 0x397   : > { %v3257_v7 = vmax.f32 %v2886_v29, 0.0  ;;  %v3081_v47 = vadd.f32 %v3080_v37, %v6494_v3  ;;  %v3252_v2 = vmax.f32 %v3077_v24, 0.0 }
 0x398   : > { %v3259_v38 = vmax.f32 %v3079_v27, 0.0  ;;  %v3258_v34 = vmax.f32 %v2888_v36, 0.0  ;;  %3842 = vmatmul.mubr.bf16.gmra.mrb[200].mxu0 %v6692_v16 }
 0x399   : > { %v3489_v45 = vpack.c.bf16 %v3257_v7, %v3249_v13  ;;  %v3260_v54 = vmax.f32 %v3081_v47, 0.0  ;;  %3955 = vmatmul.mubr.bf16.gmra.mrb[200].mxu1 %v6692_v16  ;;  %3851 = vmatprep.mubr.bf16.mxu0 %v6696_v10 }
 0x39a   : > { %v3491_v51 = vpack.c.bf16 %v3259_v38, %v3251_v58  ;;  %v3490_v33 = vpack.c.bf16 %v3258_v34, %v3250_v25  ;;  %v2891_v41 = vpop.f32.mrb[140].mxu0  ;;  %3964 = vmatprep.mubr.bf16.mxu1 %v6696_v10 }
 0x39b   : > { %v3492_v31 = vpack.c.bf16 %v3260_v54, %v3252_v2  ;;  %v2892_v3 = vadd.f32 %v2891_v41, %v6513_v61  ;;  %v3084_v1 = vpop.f32.mrb[140].mxu1  ;;  %v2893_v8 = vpop.f32.mrb[141].mxu0 }
 0x39c   : > { %v3085_v55 = vadd.f32 %v3084_v1, %v6513_v61  ;;  %v2894_v42 = vadd.f32 %v2893_v8, %v6513_v61  ;;  %v3086_v19 = vpop.f32.mrb[141].mxu1  ;;  %v2895_v18 = vpop.f32.mrb[142].mxu0  ;;  %4019 = vmatprep.subr.bf16.mxu0 %v3490_v33 }
 0x39d   : > { %v3087_v44 = vadd.f32 %v3086_v19, %v6513_v61  ;;  %v2896_v48 = vadd.f32 %v2895_v18, %v6510_v11  ;;  %v3088_v9 = vpop.f32.mrb[142].mxu1  ;;  %4132 = vmatprep.subr.bf16.mxu1 %v3492_v31  ;;  %v2897_v4 = vpop.f32.mrb[143].mxu0  ;;  %4020 = vmatpush1.bf16.msra.mxu0 %v3489_v45  ;;  %v3265_v29 = vmax.f32 %v2892_v3, 0.0  ;;  %v6724_v31 = vld [vmem:[#allocation4 + $0x40] ss:$8 sps:$4 sm:$0xff]  }
 0x39e   : > { %v3089_v6 = vadd.f32 %v3088_v9, %v6510_v11  ;;  %v2898_v49 = vadd.f32 %v2897_v4, %v6510_v11  ;;  %v3090_v24 = vpop.f32.mrb[143].mxu1  ;;  %4133 = vmatpush1.bf16.msra.mxu1 %v3491_v51  ;;  %v3267_v27 = vmax.f32 %v3085_v55, 0.0  ;;  %v3266_v61 = vmax.f32 %v2894_v42, 0.0  ;;  %v6728_v42 = vld [vmem:[#allocation4 + $0x54] ss:$8 sps:$4 sm:$0xff]  }
 0x39f   : > { %v3273_v35 = vmax.f32 %v2896_v48, 0.0  ;;  %v3091_v0 = vadd.f32 %v3090_v24, %v6510_v11  ;;  %v3268_v13 = vmax.f32 %v3087_v44, 0.0 }
 0x3a0   : > { %v3275_v36 = vmax.f32 %v3089_v6, 0.0  ;;  %v3274_v37 = vmax.f32 %v2898_v49, 0.0  ;;  %3852 = vmatmul.mubr.bf16.gmra.mrb[204].mxu0 %v6708_v23 }
 0x3a1   : > { %v3497_v7 = vpack.c.bf16 %v3273_v35, %v3265_v29  ;;  %v3276_v47 = vmax.f32 %v3091_v0, 0.0  ;;  %3965 = vmatmul.mubr.bf16.gmra.mrb[204].mxu1 %v6708_v23  ;;  %3861 = vmatprep.mubr.bf16.mxu0 %v6712_v5 }
 0x3a2   : > { %v3499_v58 = vpack.c.bf16 %v3275_v36, %v3267_v27  ;;  %v3498_v25 = vpack.c.bf16 %v3274_v37, %v3266_v61  ;;  %v2901_v38 = vpop.f32.mrb[144].mxu0  ;;  %3974 = vmatprep.mubr.bf16.mxu1 %v6712_v5 }
 0x3a3   : > { %v3500_v34 = vpack.c.bf16 %v3276_v47, %v3268_v13  ;;  %v2902_v11 = vadd.f32 %v2901_v38, %v6529_v52  ;;  %v3094_v2 = vpop.f32.mrb[144].mxu1  ;;  %v2903_v45 = vpop.f32.mrb[145].mxu0 }
 0x3a4   : > { %v3095_v54 = vadd.f32 %v3094_v2, %v6529_v52  ;;  %v2904_v51 = vadd.f32 %v2903_v45, %v6529_v52  ;;  %v3096_v33 = vpop.f32.mrb[145].mxu1  ;;  %v2905_v41 = vpop.f32.mrb[146].mxu0  ;;  %4021 = vmatprep.subr.bf16.mxu0 %v3498_v25 }
 0x3a5   : > { %v3097_v3 = vadd.f32 %v3096_v33, %v6529_v52  ;;  %v2906_v1 = vadd.f32 %v2905_v41, %v6526_v15  ;;  %v3098_v8 = vpop.f32.mrb[146].mxu1  ;;  %4134 = vmatprep.subr.bf16.mxu1 %v3500_v34  ;;  %v2907_v55 = vpop.f32.mrb[147].mxu0  ;;  %4022 = vmatpush1.bf16.msra.mxu0 %v3497_v7  ;;  %v3281_v48 = vmax.f32 %v2902_v11, 0.0  ;;  %v6740_v34 = vld [vmem:[#allocation4 + $0x50] ss:$8 sps:$4 sm:$0xff]  }
 0x3a6   : > { %v3099_v19 = vadd.f32 %v3098_v8, %v6526_v15  ;;  %v2908_v18 = vadd.f32 %v2907_v55, %v6526_v15  ;;  %v3100_v44 = vpop.f32.mrb[147].mxu1  ;;  %4135 = vmatpush1.bf16.msra.mxu1 %v3499_v58  ;;  %v3283_v6 = vmax.f32 %v3095_v54, 0.0  ;;  %v3282_v52 = vmax.f32 %v2904_v51, 0.0  ;;  %v6744_v51 = vld [vmem:[#allocation4 + $0x64] ss:$8 sps:$4 sm:$0xff]  }
 0x3a7   : > { %v3289_v9 = vmax.f32 %v2906_v1, 0.0  ;;  %v3101_v4 = vadd.f32 %v3100_v44, %v6526_v15  ;;  %v3284_v29 = vmax.f32 %v3097_v3, 0.0 }
 0x3a8   : > { %v3291_v49 = vmax.f32 %v3099_v19, 0.0  ;;  %v3290_v24 = vmax.f32 %v2908_v18, 0.0  ;;  %3862 = vmatmul.mubr.bf16.gmra.mrb[208].mxu0 %v6724_v31 }
 0x3a9   : > { %v3505_v35 = vpack.c.bf16 %v3289_v9, %v3281_v48  ;;  %v3292_v0 = vmax.f32 %v3101_v4, 0.0  ;;  %3975 = vmatmul.mubr.bf16.gmra.mrb[208].mxu1 %v6724_v31  ;;  %3871 = vmatprep.mubr.bf16.mxu0 %v6728_v42 }
 0x3aa   : > { %v3507_v27 = vpack.c.bf16 %v3291_v49, %v3283_v6  ;;  %v3506_v61 = vpack.c.bf16 %v3290_v24, %v3282_v52  ;;  %v2911_v36 = vpop.f32.mrb[148].mxu0  ;;  %3984 = vmatprep.mubr.bf16.mxu1 %v6728_v42 }
 0x3ab   : > { %v3508_v37 = vpack.c.bf16 %v3292_v0, %v3284_v29  ;;  %v2912_v15 = vadd.f32 %v2911_v36, %v6543_v57  ;;  %v3104_v13 = vpop.f32.mrb[148].mxu1  ;;  %v2913_v7 = vpop.f32.mrb[149].mxu0 }
 0x3ac   : > { %v3105_v47 = vadd.f32 %v3104_v13, %v6543_v57  ;;  %v2914_v58 = vadd.f32 %v2913_v7, %v6543_v57  ;;  %v3106_v25 = vpop.f32.mrb[149].mxu1  ;;  %v2915_v38 = vpop.f32.mrb[150].mxu0  ;;  %4023 = vmatprep.subr.bf16.mxu0 %v3506_v61 }
 0x3ad   : > { %v3107_v11 = vadd.f32 %v3106_v25, %v6543_v57  ;;  %v2916_v2 = vadd.f32 %v2915_v38, %v6541_v60  ;;  %v3108_v45 = vpop.f32.mrb[150].mxu1  ;;  %4136 = vmatprep.subr.bf16.mxu1 %v3508_v37  ;;  %v2917_v54 = vpop.f32.mrb[151].mxu0  ;;  %4024 = vmatpush1.bf16.msra.mxu0 %v3505_v35  ;;  %v3297_v1 = vmax.f32 %v2912_v15, 0.0  ;;  %v6756_v37 = vld [vmem:[#allocation4 + $0x60] ss:$8 sps:$4 sm:$0xff]  }
 0x3ae   : > { %v3109_v33 = vadd.f32 %v3108_v45, %v6541_v60  ;;  %v2918_v41 = vadd.f32 %v2917_v54, %v6541_v60  ;;  %v3110_v3 = vpop.f32.mrb[151].mxu1  ;;  %4137 = vmatpush1.bf16.msra.mxu1 %v3507_v27  ;;  %v3299_v19 = vmax.f32 %v3105_v47, 0.0  ;;  %v3298_v57 = vmax.f32 %v2914_v58, 0.0  ;;  %v6760_v58 = vld [vmem:[#allocation4 + $0x74] ss:$8 sps:$4 sm:$0xff]  }
 0x3af   : > { %v3305_v8 = vmax.f32 %v2916_v2, 0.0  ;;  %v3111_v55 = vadd.f32 %v3110_v3, %v6541_v60  ;;  %v3300_v48 = vmax.f32 %v3107_v11, 0.0 }
 0x3b0   : > { %v3307_v18 = vmax.f32 %v3109_v33, 0.0  ;;  %v3306_v44 = vmax.f32 %v2918_v41, 0.0  ;;  %3872 = vmatmul.mubr.bf16.gmra.mrb[212].mxu0 %v6740_v34 }
 0x3b1   : > { %v3513_v9 = vpack.c.bf16 %v3305_v8, %v3297_v1  ;;  %v3308_v4 = vmax.f32 %v3111_v55, 0.0  ;;  %3985 = vmatmul.mubr.bf16.gmra.mrb[212].mxu1 %v6740_v34  ;;  %3881 = vmatprep.mubr.bf16.mxu0 %v6744_v51 }
 0x3b2   : > { %v3515_v6 = vpack.c.bf16 %v3307_v18, %v3299_v19  ;;  %v3514_v52 = vpack.c.bf16 %v3306_v44, %v3298_v57  ;;  %v2921_v49 = vpop.f32.mrb[152].mxu0  ;;  %3994 = vmatprep.mubr.bf16.mxu1 %v6744_v51 }
 0x3b3   : > { %v3516_v24 = vpack.c.bf16 %v3308_v4, %v3300_v48  ;;  %v2922_v60 = vadd.f32 %v2921_v49, %v6555_v50  ;;  %v3114_v29 = vpop.f32.mrb[152].mxu1  ;;  %v2923_v35 = vpop.f32.mrb[153].mxu0 }
 0x3b4   : > { %v3115_v0 = vadd.f32 %v3114_v29, %v6555_v50  ;;  %v2924_v27 = vadd.f32 %v2923_v35, %v6555_v50  ;;  %v3116_v61 = vpop.f32.mrb[153].mxu1  ;;  %v2925_v36 = vpop.f32.mrb[154].mxu0  ;;  %4025 = vmatprep.subr.bf16.mxu0 %v3514_v52 }
 0x3b5   : > { %v3117_v15 = vadd.f32 %v3116_v61, %v6555_v50  ;;  %v2926_v13 = vadd.f32 %v2925_v36, %v6553_v46  ;;  %v3118_v7 = vpop.f32.mrb[154].mxu1  ;;  %4138 = vmatprep.subr.bf16.mxu1 %v3516_v24  ;;  %v2927_v47 = vpop.f32.mrb[155].mxu0  ;;  %4026 = vmatpush1.bf16.msra.mxu0 %v3513_v9  ;;  %v3313_v2 = vmax.f32 %v2922_v60, 0.0  ;;  %v6772_v24 = vld [vmem:[#allocation4 + $0x70] ss:$8 sps:$4 sm:$0xff]  }
 0x3b6   : > { %v3119_v25 = vadd.f32 %v3118_v7, %v6553_v46  ;;  %v2928_v38 = vadd.f32 %v2927_v47, %v6553_v46  ;;  %v3120_v11 = vpop.f32.mrb[155].mxu1  ;;  %4139 = vmatpush1.bf16.msra.mxu1 %v3515_v6  ;;  %v3315_v33 = vmax.f32 %v3115_v0, 0.0  ;;  %v3314_v50 = vmax.f32 %v2924_v27, 0.0 }
 0x3b7   : > { %v3321_v45 = vmax.f32 %v2926_v13, 0.0  ;;  %v3121_v54 = vadd.f32 %v3120_v11, %v6553_v46  ;;  %v3316_v1 = vmax.f32 %v3117_v15, 0.0 }
 0x3b8   : > { %v3323_v41 = vmax.f32 %v3119_v25, 0.0  ;;  %v3322_v3 = vmax.f32 %v2928_v38, 0.0  ;;  %3882 = vmatmul.mubr.bf16.gmra.mrb[216].mxu0 %v6756_v37 }
 0x3b9   : > { %v3521_v8 = vpack.c.bf16 %v3321_v45, %v3313_v2  ;;  %v3324_v55 = vmax.f32 %v3121_v54, 0.0  ;;  %3995 = vmatmul.mubr.bf16.gmra.mrb[216].mxu1 %v6756_v37  ;;  %3891 = vmatprep.mubr.bf16.mxu0 %v6760_v58  ;;  %v4738_v54 = vld [vmem:[#allocation4 + $0x4] ss:$8 sps:$4 sm:$0xff]  }
 0x3ba   : > { %v3523_v19 = vpack.c.bf16 %v3323_v41, %v3315_v33  ;;  %v3522_v57 = vpack.c.bf16 %v3322_v3, %v3314_v50  ;;  %v2931_v18 = vpop.f32.mrb[156].mxu0  ;;  %4004 = vmatprep.mubr.bf16.mxu1 %v6760_v58 }
 0x3bb   : > { %v3524_v44 = vpack.c.bf16 %v3324_v55, %v3316_v1  ;;  %v2932_v46 = vadd.f32 %v2931_v18, %v6567_v28  ;;  %v3124_v48 = vpop.f32.mrb[156].mxu1  ;;  %v2933_v9 = vpop.f32.mrb[157].mxu0 }
 0x3bc   : > { %v3125_v4 = vadd.f32 %v3124_v48, %v6567_v28  ;;  %v2934_v6 = vadd.f32 %v2933_v9, %v6567_v28  ;;  %v3126_v52 = vpop.f32.mrb[157].mxu1  ;;  %v2935_v49 = vpop.f32.mrb[158].mxu0  ;;  %4027 = vmatprep.subr.bf16.mxu0 %v3522_v57 }
 0x3bd   : > { %v3127_v60 = vadd.f32 %v3126_v52, %v6567_v28  ;;  %v2936_v29 = vadd.f32 %v2935_v49, %v6565_v63  ;;  %v3128_v35 = vpop.f32.mrb[158].mxu1  ;;  %4140 = vmatprep.subr.bf16.mxu1 %v3524_v44  ;;  %v2937_v0 = vpop.f32.mrb[159].mxu0  ;;  %4028 = vmatpush1.bf16.msra.mxu0 %v3521_v8  ;;  %v3329_v15 = vmax.f32 %v2932_v46, 0.0 }
 0x3be   : > { %v3129_v27 = vadd.f32 %v3128_v35, %v6565_v63  ;;  %v2938_v61 = vadd.f32 %v2937_v0, %v6565_v63  ;;  %v3130_v36 = vpop.f32.mrb[159].mxu1  ;;  %4141 = vmatpush1.bf16.msra.mxu1 %v3523_v19  ;;  %v3331_v47 = vmax.f32 %v3125_v4, 0.0  ;;  %v3330_v25 = vmax.f32 %v2934_v6, 0.0 }
 0x3bf   : > { %v3337_v13 = vmax.f32 %v2936_v29, 0.0  ;;  %v3131_v7 = vadd.f32 %v3130_v36, %v6565_v63  ;;  %v3332_v11 = vmax.f32 %v3127_v60, 0.0 }
 0x3c0   : > { %v3339_v38 = vmax.f32 %v3129_v27, 0.0  ;;  %v3338_v28 = vmax.f32 %v2938_v61, 0.0  ;;  %3892 = vmatmul.mubr.bf16.gmra.mrb[220].mxu0 %v6772_v24 }
 0x3c1   : > { %v3529_v2 = vpack.c.bf16 %v3337_v13, %v3329_v15  ;;  %v3340_v45 = vmax.f32 %v3131_v7, 0.0  ;;  %4005 = vmatmul.mubr.bf16.gmra.mrb[220].mxu1 %v6772_v24  ;;  %4047 = vmatprep.mubr.bf16.mxu0 %v4738_v54 }
 0x3c2   : > { %v3531_v33 = vpack.c.bf16 %v3339_v38, %v3331_v47  ;;  %v3530_v50 = vpack.c.bf16 %v3338_v28, %v3330_v25  ;;  %v2941_v41 = vpop.f32.mrb[160].mxu0  ;;  %4160 = vmatprep.mubr.bf16.mxu1 %v4738_v54 }
 0x3c3   : > { %v3532_v3 = vpack.c.bf16 %v3340_v45, %v3332_v11  ;;  %v2942_v63 = vadd.f32 %v2941_v41, %v6579_v32  ;;  %v3134_v1 = vpop.f32.mrb[160].mxu1  ;;  %v2943_v8 = vpop.f32.mrb[161].mxu0 }
 0x3c4   : > { %v3135_v55 = vadd.f32 %v3134_v1, %v6579_v32  ;;  %v2944_v19 = vadd.f32 %v2943_v8, %v6579_v32  ;;  %v3136_v57 = vpop.f32.mrb[161].mxu1  ;;  %v2945_v18 = vpop.f32.mrb[162].mxu0  ;;  %4029 = vmatprep.subr.bf16.mxu0 %v3530_v50 }
 0x3c5   : > { %v3137_v44 = vadd.f32 %v3136_v57, %v6579_v32  ;;  %v2946_v46 = vadd.f32 %v2945_v18, %v6577_v39  ;;  %v3138_v48 = vpop.f32.mrb[162].mxu1  ;;  %4142 = vmatprep.subr.bf16.mxu1 %v3532_v3  ;;  %v2947_v9 = vpop.f32.mrb[163].mxu0  ;;  %4030 = vmatpush1.bf16.msra.mxu0 %v3529_v2  ;;  %v3345_v49 = vmax.f32 %v2942_v63, 0.0 }
 0x3c6   : > { %v3139_v4 = vadd.f32 %v3138_v48, %v6577_v39  ;;  %v2948_v6 = vadd.f32 %v2947_v9, %v6577_v39  ;;  %v3140_v52 = vpop.f32.mrb[163].mxu1  ;;  %4143 = vmatpush1.bf16.msra.mxu1 %v3531_v33  ;;  %v3347_v35 = vmax.f32 %v3135_v55, 0.0  ;;  %v3346_v0 = vmax.f32 %v2944_v19, 0.0 }
 0x3c7   : > { %v3353_v60 = vmax.f32 %v2946_v46, 0.0  ;;  %v3141_v29 = vadd.f32 %v3140_v52, %v6577_v39  ;;  %v3348_v61 = vmax.f32 %v3137_v44, 0.0 }
 0x3c8   : > { %v3355_v27 = vmax.f32 %v3139_v4, 0.0  ;;  %v3354_v32 = vmax.f32 %v2948_v6, 0.0 }
 0x3c9   : > { %v3537_v36 = vpack.c.bf16 %v3353_v60, %v3345_v49  ;;  %v3356_v15 = vmax.f32 %v3141_v29, 0.0 }
 0x3ca   : > { %v3539_v13 = vpack.c.bf16 %v3355_v27, %v3347_v35  ;;  %v3538_v7 = vpack.c.bf16 %v3354_v32, %v3346_v0  ;;  %v2951_v47 = vpop.f32.mrb[164].mxu0 }
 0x3cb   : > { %v3540_v25 = vpack.c.bf16 %v3356_v15, %v3348_v61  ;;  %v2952_v38 = vadd.f32 %v2951_v47, %v6591_v14  ;;  %v3144_v28 = vpop.f32.mrb[164].mxu1  ;;  %v2953_v11 = vpop.f32.mrb[165].mxu0 }
 0x3cc   : > { %v3145_v2 = vadd.f32 %v3144_v28, %v6591_v14  ;;  %v2954_v45 = vadd.f32 %v2953_v11, %v6591_v14  ;;  %v3146_v39 = vpop.f32.mrb[165].mxu1  ;;  %v2955_v54 = vpop.f32.mrb[166].mxu0  ;;  %4031 = vmatprep.subr.bf16.mxu0 %v3538_v7 }
 0x3cd   : > { %v3147_v33 = vadd.f32 %v3146_v39, %v6591_v14  ;;  %v2956_v50 = vadd.f32 %v2955_v54, %v6589_v40  ;;  %v3148_v41 = vpop.f32.mrb[166].mxu1  ;;  %4144 = vmatprep.subr.bf16.mxu1 %v3540_v25  ;;  %v2957_v3 = vpop.f32.mrb[167].mxu0  ;;  %4032 = vmatpush1.bf16.msra.mxu0 %v3537_v36  ;;  %v3361_v55 = vmax.f32 %v2952_v38, 0.0 }
 0x3ce   : > { %v3149_v63 = vadd.f32 %v3148_v41, %v6589_v40  ;;  %v2958_v1 = vadd.f32 %v2957_v3, %v6589_v40  ;;  %v3150_v8 = vpop.f32.mrb[167].mxu1  ;;  %4145 = vmatpush1.bf16.msra.mxu1 %v3539_v13  ;;  %v3363_v18 = vmax.f32 %v3145_v2, 0.0  ;;  %v3362_v44 = vmax.f32 %v2954_v45, 0.0 }
 0x3cf   : > { %v3369_v19 = vmax.f32 %v2956_v50, 0.0  ;;  %v3151_v57 = vadd.f32 %v3150_v8, %v6589_v40  ;;  %v3364_v48 = vmax.f32 %v3147_v33, 0.0 }
 0x3d0   : > { %v3371_v46 = vmax.f32 %v3149_v63, 0.0  ;;  %v3370_v14 = vmax.f32 %v2958_v1, 0.0 }
 0x3d1   : > { %v3545_v9 = vpack.c.bf16 %v3369_v19, %v3361_v55  ;;  %v3372_v4 = vmax.f32 %v3151_v57, 0.0 }
 0x3d2   : > { %v3547_v6 = vpack.c.bf16 %v3371_v46, %v3363_v18  ;;  %v3546_v52 = vpack.c.bf16 %v3370_v14, %v3362_v44  ;;  %v2961_v49 = vpop.f32.mrb[168].mxu0 }
 0x3d3   : > { %v3548_v60 = vpack.c.bf16 %v3372_v4, %v3364_v48  ;;  %v2962_v29 = vadd.f32 %v2961_v49, %v6603_v17  ;;  %v3154_v35 = vpop.f32.mrb[168].mxu1  ;;  %v2963_v0 = vpop.f32.mrb[169].mxu0 }
 0x3d4   : > { %v3155_v27 = vadd.f32 %v3154_v35, %v6603_v17  ;;  %v2964_v32 = vadd.f32 %v2963_v0, %v6603_v17  ;;  %v3156_v40 = vpop.f32.mrb[169].mxu1  ;;  %v2965_v61 = vpop.f32.mrb[170].mxu0  ;;  %4033 = vmatprep.subr.bf16.mxu0 %v3546_v52 }
 0x3d5   : > { %v3157_v36 = vadd.f32 %v3156_v40, %v6603_v17  ;;  %v2966_v15 = vadd.f32 %v2965_v61, %v6601_v62  ;;  %v3158_v13 = vpop.f32.mrb[170].mxu1  ;;  %4146 = vmatprep.subr.bf16.mxu1 %v3548_v60  ;;  %v2967_v7 = vpop.f32.mrb[171].mxu0  ;;  %4034 = vmatpush1.bf16.msra.mxu0 %v3545_v9  ;;  %v3377_v28 = vmax.f32 %v2962_v29, 0.0 }
 0x3d6   : > { %v3159_v47 = vadd.f32 %v3158_v13, %v6601_v62  ;;  %v2968_v25 = vadd.f32 %v2967_v7, %v6601_v62  ;;  %v3160_v38 = vpop.f32.mrb[171].mxu1  ;;  %4147 = vmatpush1.bf16.msra.mxu1 %v3547_v6  ;;  %v3379_v45 = vmax.f32 %v3155_v27, 0.0  ;;  %v3378_v39 = vmax.f32 %v2964_v32, 0.0 }
 0x3d7   : > { %v3385_v11 = vmax.f32 %v2966_v15, 0.0  ;;  %v3161_v2 = vadd.f32 %v3160_v38, %v6601_v62  ;;  %v3380_v33 = vmax.f32 %v3157_v36, 0.0 }
 0x3d8   : > { %v3387_v54 = vmax.f32 %v3159_v47, 0.0  ;;  %v3386_v17 = vmax.f32 %v2968_v25, 0.0 }
 0x3d9   : > { %v3553_v50 = vpack.c.bf16 %v3385_v11, %v3377_v28  ;;  %v3388_v41 = vmax.f32 %v3161_v2, 0.0 }
 0x3da   : > { %v3555_v3 = vpack.c.bf16 %v3387_v54, %v3379_v45  ;;  %v3554_v63 = vpack.c.bf16 %v3386_v17, %v3378_v39  ;;  %v2971_v1 = vpop.f32.mrb[172].mxu0 }
 0x3db   : > { %v3556_v8 = vpack.c.bf16 %v3388_v41, %v3380_v33  ;;  %v2972_v55 = vadd.f32 %v2971_v1, %v6615_v43  ;;  %v3164_v19 = vpop.f32.mrb[172].mxu1  ;;  %v2973_v57 = vpop.f32.mrb[173].mxu0 }
 0x3dc   : > { %v3165_v18 = vadd.f32 %v3164_v19, %v6615_v43  ;;  %v2974_v44 = vadd.f32 %v2973_v57, %v6615_v43  ;;  %v3166_v62 = vpop.f32.mrb[173].mxu1  ;;  %v2975_v46 = vpop.f32.mrb[174].mxu0  ;;  %4035 = vmatprep.subr.bf16.mxu0 %v3554_v63 }
 0x3dd   : > { %v3167_v14 = vadd.f32 %v3166_v62, %v6615_v43  ;;  %v2976_v48 = vadd.f32 %v2975_v46, %v6613_v22  ;;  %v3168_v9 = vpop.f32.mrb[174].mxu1  ;;  %4148 = vmatprep.subr.bf16.mxu1 %v3556_v8  ;;  %v2977_v4 = vpop.f32.mrb[175].mxu0  ;;  %4036 = vmatpush1.bf16.msra.mxu0 %v3553_v50  ;;  %v3393_v60 = vmax.f32 %v2972_v55, 0.0 }
 0x3de   : > { %v3169_v6 = vadd.f32 %v3168_v9, %v6613_v22  ;;  %v2978_v52 = vadd.f32 %v2977_v4, %v6613_v22  ;;  %v3170_v49 = vpop.f32.mrb[175].mxu1  ;;  %4149 = vmatpush1.bf16.msra.mxu1 %v3555_v3  ;;  %v3395_v0 = vmax.f32 %v3165_v18, 0.0  ;;  %v3394_v27 = vmax.f32 %v2974_v44, 0.0 }
 0x3df   : > { %v3401_v29 = vmax.f32 %v2976_v48, 0.0  ;;  %v3171_v35 = vadd.f32 %v3170_v49, %v6613_v22  ;;  %v3396_v40 = vmax.f32 %v3167_v14, 0.0 }
 0x3e0   : > { %v3403_v32 = vmax.f32 %v3169_v6, 0.0  ;;  %v3402_v43 = vmax.f32 %v2978_v52, 0.0 }
 0x3e1   : > { %v3561_v61 = vpack.c.bf16 %v3401_v29, %v3393_v60  ;;  %v3404_v36 = vmax.f32 %v3171_v35, 0.0 }
 0x3e2   : > { %v3563_v15 = vpack.c.bf16 %v3403_v32, %v3395_v0  ;;  %v3562_v13 = vpack.c.bf16 %v3402_v43, %v3394_v27  ;;  %v2981_v7 = vpop.f32.mrb[176].mxu0 }
 0x3e3   : > { %v3564_v47 = vpack.c.bf16 %v3404_v36, %v3396_v40  ;;  %v2982_v25 = vadd.f32 %v2981_v7, %v6627_v20  ;;  %v3174_v38 = vpop.f32.mrb[176].mxu1  ;;  %v2983_v28 = vpop.f32.mrb[177].mxu0 }
 0x3e4   : > { %v3175_v11 = vadd.f32 %v3174_v38, %v6627_v20  ;;  %v2984_v2 = vadd.f32 %v2983_v28, %v6627_v20  ;;  %v3176_v22 = vpop.f32.mrb[177].mxu1  ;;  %v2985_v45 = vpop.f32.mrb[178].mxu0  ;;  %4037 = vmatprep.subr.bf16.mxu0 %v3562_v13 }
 0x3e5   : > { %v3177_v39 = vadd.f32 %v3176_v22, %v6627_v20  ;;  %v2986_v54 = vadd.f32 %v2985_v45, %v6625_v53  ;;  %v3178_v17 = vpop.f32.mrb[178].mxu1  ;;  %4150 = vmatprep.subr.bf16.mxu1 %v3564_v47  ;;  %v2987_v33 = vpop.f32.mrb[179].mxu0  ;;  %4038 = vmatpush1.bf16.msra.mxu0 %v3561_v61  ;;  %v3409_v63 = vmax.f32 %v2982_v25, 0.0 }
 0x3e6   : > { %v3179_v50 = vadd.f32 %v3178_v17, %v6625_v53  ;;  %v2988_v41 = vadd.f32 %v2987_v33, %v6625_v53  ;;  %v3180_v3 = vpop.f32.mrb[179].mxu1  ;;  %4151 = vmatpush1.bf16.msra.mxu1 %v3563_v15  ;;  %v3411_v55 = vmax.f32 %v3175_v11, 0.0  ;;  %v3410_v19 = vmax.f32 %v2984_v2, 0.0 }
 0x3e7   : > { %v3417_v1 = vmax.f32 %v2986_v54, 0.0  ;;  %v3181_v8 = vadd.f32 %v3180_v3, %v6625_v53  ;;  %v3412_v18 = vmax.f32 %v3177_v39, 0.0 }
 0x3e8   : > { %v3419_v57 = vmax.f32 %v3179_v50, 0.0  ;;  %v3418_v20 = vmax.f32 %v2988_v41, 0.0 }
 0x3e9   : > { %v3569_v44 = vpack.c.bf16 %v3417_v1, %v3409_v63  ;;  %v3420_v62 = vmax.f32 %v3181_v8, 0.0 }
 0x3ea   : > { %v3571_v46 = vpack.c.bf16 %v3419_v57, %v3411_v55  ;;  %v3570_v14 = vpack.c.bf16 %v3418_v20, %v3410_v19  ;;  %v2991_v48 = vpop.f32.mrb[180].mxu0 }
 0x3eb   : > { %v3572_v9 = vpack.c.bf16 %v3420_v62, %v3412_v18  ;;  %v2992_v4 = vadd.f32 %v2991_v48, %v6639_v56  ;;  %v3184_v6 = vpop.f32.mrb[180].mxu1  ;;  %v2993_v52 = vpop.f32.mrb[181].mxu0 }
 0x3ec   : > { %v3185_v49 = vadd.f32 %v3184_v6, %v6639_v56  ;;  %v2994_v60 = vadd.f32 %v2993_v52, %v6639_v56  ;;  %v3186_v53 = vpop.f32.mrb[181].mxu1  ;;  %v2995_v29 = vpop.f32.mrb[182].mxu0  ;;  %4039 = vmatprep.subr.bf16.mxu0 %v3570_v14 }
 0x3ed   : > { %v3187_v35 = vadd.f32 %v3186_v53, %v6639_v56  ;;  %v2996_v0 = vadd.f32 %v2995_v29, %v6637_v59  ;;  %v3188_v27 = vpop.f32.mrb[182].mxu1  ;;  %4152 = vmatprep.subr.bf16.mxu1 %v3572_v9  ;;  %v2997_v32 = vpop.f32.mrb[183].mxu0  ;;  %4040 = vmatpush1.bf16.msra.mxu0 %v3569_v44  ;;  %v3425_v36 = vmax.f32 %v2992_v4, 0.0 }
 0x3ee   : > { %v3189_v43 = vadd.f32 %v3188_v27, %v6637_v59  ;;  %v2998_v40 = vadd.f32 %v2997_v32, %v6637_v59  ;;  %v3190_v61 = vpop.f32.mrb[183].mxu1  ;;  %4153 = vmatpush1.bf16.msra.mxu1 %v3571_v46  ;;  %v3427_v7 = vmax.f32 %v3185_v49, 0.0  ;;  %v3426_v47 = vmax.f32 %v2994_v60, 0.0 }
 0x3ef   : > { %v3433_v15 = vmax.f32 %v2996_v0, 0.0  ;;  %v3191_v13 = vadd.f32 %v3190_v61, %v6637_v59  ;;  %v3428_v38 = vmax.f32 %v3187_v35, 0.0 }
 0x3f0   : > { %v3435_v25 = vmax.f32 %v3189_v43, 0.0  ;;  %v3434_v56 = vmax.f32 %v2998_v40, 0.0 }
 0x3f1   : > { %v3577_v28 = vpack.c.bf16 %v3433_v15, %v3425_v36  ;;  %v3436_v11 = vmax.f32 %v3191_v13, 0.0 }
 0x3f2   : > { %v3579_v2 = vpack.c.bf16 %v3435_v25, %v3427_v7  ;;  %v3578_v22 = vpack.c.bf16 %v3434_v56, %v3426_v47  ;;  %v3001_v45 = vpop.f32.mrb[184].mxu0 }
 0x3f3   : > { %v3580_v39 = vpack.c.bf16 %v3436_v11, %v3428_v38  ;;  %v3002_v54 = vadd.f32 %v3001_v45, %v6651_v30  ;;  %v3194_v17 = vpop.f32.mrb[184].mxu1  ;;  %v3003_v33 = vpop.f32.mrb[185].mxu0 }
 0x3f4   : > { %v3195_v50 = vadd.f32 %v3194_v17, %v6651_v30  ;;  %v3004_v41 = vadd.f32 %v3003_v33, %v6651_v30  ;;  %v3196_v59 = vpop.f32.mrb[185].mxu1  ;;  %v3005_v3 = vpop.f32.mrb[186].mxu0  ;;  %4041 = vmatprep.subr.bf16.mxu0 %v3578_v22 }
 0x3f5   : > { %v3197_v63 = vadd.f32 %v3196_v59, %v6651_v30  ;;  %v3006_v1 = vadd.f32 %v3005_v3, %v6649_v12  ;;  %v3198_v8 = vpop.f32.mrb[186].mxu1  ;;  %4154 = vmatprep.subr.bf16.mxu1 %v3580_v39  ;;  %v3007_v55 = vpop.f32.mrb[187].mxu0  ;;  %4042 = vmatpush1.bf16.msra.mxu0 %v3577_v28  ;;  %v3441_v18 = vmax.f32 %v3002_v54, 0.0  ;;  %v4742_v59 = vld [vmem:[#allocation4 + $0x24] ss:$8 sps:$4 sm:$0xff]  }
 0x3f6   : > { %v3199_v19 = vadd.f32 %v3198_v8, %v6649_v12  ;;  %v3008_v57 = vadd.f32 %v3007_v55, %v6649_v12  ;;  %v3200_v20 = vpop.f32.mrb[187].mxu1  ;;  %4155 = vmatpush1.bf16.msra.mxu1 %v3579_v2  ;;  %v3443_v46 = vmax.f32 %v3195_v50, 0.0  ;;  %v3442_v14 = vmax.f32 %v3004_v41, 0.0  ;;  %v4739_v50 = vld [vmem:[#allocation4] ss:$8 sps:$4 sm:$0xff]  }
 0x3f7   : > { %v3449_v44 = vmax.f32 %v3006_v1, 0.0  ;;  %v3201_v62 = vadd.f32 %v3200_v20, %v6649_v12  ;;  %v3444_v9 = vmax.f32 %v3197_v63, 0.0  ;;  %v4740_v41 = vld [vmem:[#allocation4 + $0x14] ss:$8 sps:$4 sm:$0xff]  }
 0x3f8   : > { %v3451_v48 = vmax.f32 %v3199_v19, 0.0  ;;  %v3450_v30 = vmax.f32 %v3008_v57, 0.0 }
 0x3f9   : > { %v3585_v4 = vpack.c.bf16 %v3449_v44, %v3441_v18  ;;  %v3452_v6 = vmax.f32 %v3201_v62, 0.0 }
 0x3fa   : > { %v3587_v52 = vpack.c.bf16 %v3451_v48, %v3443_v46  ;;  %v3586_v49 = vpack.c.bf16 %v3450_v30, %v3442_v14  ;;  %v3011_v60 = vpop.f32.mrb[188].mxu0 }
 0x3fb   : > { %v3588_v53 = vpack.c.bf16 %v3452_v6, %v3444_v9  ;;  %v3012_v29 = vadd.f32 %v3011_v60, %v6663_v26  ;;  %v3204_v35 = vpop.f32.mrb[188].mxu1  ;;  %v3013_v0 = vpop.f32.mrb[189].mxu0 }
 0x3fc   : > { %v3205_v27 = vadd.f32 %v3204_v35, %v6663_v26  ;;  %v3014_v32 = vadd.f32 %v3013_v0, %v6663_v26  ;;  %v3206_v12 = vpop.f32.mrb[189].mxu1  ;;  %v3015_v43 = vpop.f32.mrb[190].mxu0  ;;  %4043 = vmatprep.subr.bf16.mxu0 %v3586_v49 }
 0x3fd   : > { %v3207_v40 = vadd.f32 %v3206_v12, %v6663_v26  ;;  %v3016_v61 = vadd.f32 %v3015_v43, %v6661_v21  ;;  %v3208_v36 = vpop.f32.mrb[190].mxu1  ;;  %4156 = vmatprep.subr.bf16.mxu1 %v3588_v53  ;;  %v3017_v15 = vpop.f32.mrb[191].mxu0  ;;  %4044 = vmatpush1.bf16.msra.mxu0 %v3585_v4  ;;  %v3457_v25 = vmax.f32 %v3012_v29, 0.0 }
 0x3fe   : > { %v3209_v13 = vadd.f32 %v3208_v36, %v6661_v21  ;;  %v3018_v7 = vadd.f32 %v3017_v15, %v6661_v21  ;;  %v3210_v47 = vpop.f32.mrb[191].mxu1  ;;  %4157 = vmatpush1.bf16.msra.mxu1 %v3587_v52  ;;  %v3459_v28 = vmax.f32 %v3205_v27, 0.0  ;;  %v3458_v11 = vmax.f32 %v3014_v32, 0.0 }
 0x3ff   : > { %v3465_v56 = vmax.f32 %v3016_v61, 0.0  ;;  %v3211_v38 = vadd.f32 %v3210_v47, %v6661_v21  ;;  %v3460_v22 = vmax.f32 %v3207_v40, 0.0  ;;  %v4741_v21 = vld [vmem:[#allocation4 + $0x10] ss:$8 sps:$4 sm:$0xff]  }
 0x400   : > { %v3467_v2 = vmax.f32 %v3209_v13, 0.0  ;;  %v3466_v26 = vmax.f32 %v3018_v7, 0.0 }
 0x401   : > { %v3593_v45 = vpack.c.bf16 %v3465_v56, %v3457_v25  ;;  %v3468_v39 = vmax.f32 %v3211_v38, 0.0 }
 0x402   : > { %v3595_v54 = vpack.c.bf16 %v3467_v2, %v3459_v28  ;;  %v3594_v17 = vpack.c.bf16 %v3466_v26, %v3458_v11 }
 0x403   : > { %v3596_v33 = vpack.c.bf16 %v3468_v39, %v3460_v22 }
 0x404   : > { %4045 = vmatprep.subr.bf16.mxu0 %v3594_v17 }
 0x405   : > { %4158 = vmatprep.subr.bf16.mxu1 %v3596_v33  ;;  %4046 = vmatpush1.bf16.msra.mxu0 %v3593_v45 }
 0x406   : > { %4159 = vmatpush1.bf16.msra.mxu1 %v3595_v54 }
 0x408   : > { %4048 = vmatmul.mubr.bf16.vlgmr.msra.gmra.mrb[224].mxu0 %v4739_v50 }
 0x409   : > { %4161 = vmatmul.mubr.bf16.vlgmr.msra.gmra.mrb[224].mxu1 %v4739_v50  ;;  %4057 = vmatprep.mubr.bf16.mxu0 %v4740_v41 }
 0x40a   : > { %4170 = vmatprep.mubr.bf16.mxu1 %v4740_v41 }
 0x410   : > { %4058 = vmatmul.mubr.bf16.gmra.mrb[228].mxu0 %v4741_v21 }
 0x411   : > { %4171 = vmatmul.mubr.bf16.gmra.mrb[228].mxu1 %v4741_v21  ;;  %4067 = vmatprep.mubr.bf16.mxu0 %v4742_v59 }
 0x412   : > { %4180 = vmatprep.mubr.bf16.mxu1 %v4742_v59 }
 0x418   : > { %4068 = vmatmul.mubr.bf16.gmra.mrb[232].mxu0 %v6692_v16 }
 0x419   : > { %4181 = vmatmul.mubr.bf16.gmra.mrb[232].mxu1 %v6692_v16  ;;  %4077 = vmatprep.mubr.bf16.mxu0 %v6696_v10  ;;  %v6867_v16 = vpop.permute.xlu1 %3636 }
 0x41a   : > { %4190 = vmatprep.mubr.bf16.mxu1 %v6696_v10  ;;  %v6869_v10 = vpop.permute.xlu0 %3631 }
 0x41d   : > { %v6882_v44 = vpop.permute.xlu1 %3646 }
 0x41e   : > { %v6884_v62 = vpop.permute.xlu0 %3641 }
 0x420   : > { %4078 = vmatmul.mubr.bf16.gmra.mrb[236].mxu0 %v6708_v23 }
 0x421   : > { %4191 = vmatmul.mubr.bf16.gmra.mrb[236].mxu1 %v6708_v23  ;;  %4087 = vmatprep.mubr.bf16.mxu0 %v6712_v5  ;;  %v6906_v13 = vpop.permute.xlu1 %3656 }
 0x422   : > { %4200 = vmatprep.mubr.bf16.mxu1 %v6712_v5  ;;  %v6908_v7 = vpop.permute.xlu0 %3651 }
 0x428   : > { %4088 = vmatmul.mubr.bf16.gmra.mrb[240].mxu0 %v6724_v31 }
 0x429   : > { %4201 = vmatmul.mubr.bf16.gmra.mrb[240].mxu1 %v6724_v31  ;;  %4097 = vmatprep.mubr.bf16.mxu0 %v6728_v42 }
 0x42a   : > { %4210 = vmatprep.mubr.bf16.mxu1 %v6728_v42 }
 0x430   : > { %4098 = vmatmul.mubr.bf16.gmra.mrb[244].mxu0 %v6740_v34 }
 0x431   : > { %4211 = vmatmul.mubr.bf16.gmra.mrb[244].mxu1 %v6740_v34  ;;  %4107 = vmatprep.mubr.bf16.mxu0 %v6744_v51 }
 0x432   : > { %4220 = vmatprep.mubr.bf16.mxu1 %v6744_v51 }
 0x438   : > { %4108 = vmatmul.mubr.bf16.gmra.mrb[248].mxu0 %v6756_v37 }
 0x439   : > { %4221 = vmatmul.mubr.bf16.gmra.mrb[248].mxu1 %v6756_v37  ;;  %4117 = vmatprep.mubr.bf16.mxu0 %v6760_v58 }
 0x43a   : > { %4230 = vmatprep.mubr.bf16.mxu1 %v6760_v58 }
 0x440   : > { %4118 = vmatmul.mubr.bf16.gmra.mrb[252].mxu0 %v6772_v24 }
 0x441   : > { %4231 = vmatmul.mubr.bf16.gmra.mrb[252].mxu1 %v6772_v24 }
 0x45b   : > { %v3823_v23 = vpop.f32.mrb[192].mxu0 }
 0x45c   : > { %v3824_v5 = vadd.f32 %v3823_v23, %v6869_v10  ;;  %v3936_v31 = vpop.f32.mrb[192].mxu1  ;;  %v3825_v42 = vpop.f32.mrb[193].mxu0 }
 0x45d   : > { %v3826_v34 = vadd.f32 %v3825_v42, %v6869_v10  ;;  %v3938_v51 = vpop.f32.mrb[193].mxu1  ;;  %v3827_v37 = vpop.f32.mrb[194].mxu0  ;;  %v3937_v1 = vadd.f32 %v3936_v31, %v6869_v10 }
 0x45e   : > { %v3828_v3 = vadd.f32 %v3827_v37, %v6867_v16  ;;  %v3940_v58 = vpop.f32.mrb[194].mxu1  ;;  %v3829_v63 = vpop.f32.mrb[195].mxu0  ;;  %v6877_v19 = vadd.f32 %v3938_v51, %v6869_v10 }
 0x45f   : > { %v4241_v24 = vmax.f32 %v3824_v5, %v3826_v34  ;;  %v3830_v8 = vadd.f32 %v3829_v63, %v6867_v16  ;;  %v3942_v55 = vpop.f32.mrb[195].mxu1  ;;  %v3941_v20 = vadd.f32 %v3940_v58, %v6867_v16  ;;  %v6930_v34 = vpop.permute.xlu1 %3666 }
 0x460   : > { %v6889_v14 = vadd.f32 %v3942_v55, %v6867_v16  ;;  %v6932_v51 = vpop.permute.xlu0 %3661 }
 0x461   : > { %v6879_v57 = vmax.f32 %v4241_v24, %v3937_v1  ;;  %v4250_v18 = vmax.f32 %v3828_v3, %v3830_v8 }
 0x463   : > { %v4243_v46 = vmax.f32 %v6879_v57, %v6877_v19  ;;  %v6891_v48 = vmax.f32 %v4250_v18, %v3941_v20  ;;  %v3833_v30 = vpop.f32.mrb[196].mxu0 }
 0x464   : > { %v3834_v9 = vadd.f32 %v3833_v30, %v6884_v62  ;;  %v3946_v4 = vpop.f32.mrb[196].mxu1  ;;  %v3835_v6 = vpop.f32.mrb[197].mxu0 }
 0x465   : > { %v4252_v52 = vmax.f32 %v6891_v48, %v6889_v14  ;;  %v3836_v49 = vadd.f32 %v3835_v6, %v6884_v62  ;;  %v3948_v60 = vpop.f32.mrb[197].mxu1  ;;  %v3837_v53 = vpop.f32.mrb[198].mxu0  ;;  %v3947_v27 = vadd.f32 %v3946_v4, %v6884_v62 }
 0x466   : > { %v3838_v29 = vadd.f32 %v3837_v53, %v6882_v44  ;;  %v3950_v35 = vpop.f32.mrb[198].mxu1  ;;  %v3839_v0 = vpop.f32.mrb[199].mxu0  ;;  %v6901_v40 = vadd.f32 %v3948_v60, %v6884_v62 }
 0x467   : > { %v4259_v32 = vmax.f32 %v3834_v9, %v3836_v49  ;;  %v3840_v12 = vadd.f32 %v3839_v0, %v6882_v44  ;;  %v3952_v43 = vpop.f32.mrb[199].mxu1  ;;  %v3951_v36 = vadd.f32 %v3950_v35, %v6882_v44 }
 0x468   : > { %v6913_v25 = vadd.f32 %v3952_v43, %v6882_v44  ;;  %v6956_v43 = vpop.permute.xlu0 %3671 }
 0x469   : > { %v6903_v61 = vmax.f32 %v4259_v32, %v3947_v27  ;;  %v4268_v15 = vmax.f32 %v3838_v29, %v3840_v12  ;;  %v6954_v12 = vpop.permute.xlu1 %3676 }
 0x46b   : > { %v6915_v56 = vmax.f32 %v4268_v15, %v3951_v36  ;;  %v3843_v38 = vpop.f32.mrb[200].mxu0 }
 0x46c   : > { %v3844_v28 = vadd.f32 %v3843_v38, %v6908_v7  ;;  %v3956_v11 = vpop.f32.mrb[200].mxu1  ;;  %v3845_v2 = vpop.f32.mrb[201].mxu0 }
 0x46d   : > { %v3846_v22 = vadd.f32 %v3845_v2, %v6908_v7  ;;  %v3958_v45 = vpop.f32.mrb[201].mxu1  ;;  %v3847_v39 = vpop.f32.mrb[202].mxu0  ;;  %v3957_v50 = vadd.f32 %v3956_v11, %v6908_v7 }
 0x46e   : > { %v3848_v54 = vadd.f32 %v3847_v39, %v6906_v13  ;;  %v3960_v17 = vpop.f32.mrb[202].mxu1  ;;  %v3849_v33 = vpop.f32.mrb[203].mxu0  ;;  %v6925_v23 = vadd.f32 %v3958_v45, %v6908_v7 }
 0x46f   : > { %v4277_v41 = vmax.f32 %v3844_v28, %v3846_v22  ;;  %v3850_v21 = vadd.f32 %v3849_v33, %v6906_v13  ;;  %v3962_v59 = vpop.f32.mrb[203].mxu1  ;;  %v3961_v31 = vadd.f32 %v3960_v17, %v6906_v13 }
 0x470   : > { %v6937_v3 = vadd.f32 %v3962_v59, %v6906_v13 }
 0x471   : > { %v6927_v5 = vmax.f32 %v4277_v41, %v3957_v50  ;;  %v4286_v42 = vmax.f32 %v3848_v54, %v3850_v21 }
 0x473   : > { %v6939_v58 = vmax.f32 %v4286_v42, %v3961_v31  ;;  %v3853_v63 = vpop.f32.mrb[204].mxu0 }
 0x474   : > { %v3854_v1 = vadd.f32 %v3853_v63, %v6932_v51  ;;  %v3966_v24 = vpop.f32.mrb[204].mxu1  ;;  %v3855_v8 = vpop.f32.mrb[205].mxu0 }
 0x475   : > { %v3856_v20 = vadd.f32 %v3855_v8, %v6932_v51  ;;  %v3968_v18 = vpop.f32.mrb[205].mxu1  ;;  %v3857_v30 = vpop.f32.mrb[206].mxu0  ;;  %v3967_v49 = vadd.f32 %v3966_v24, %v6932_v51 }
 0x476   : > { %v3858_v9 = vadd.f32 %v3857_v30, %v6930_v34  ;;  %v3970_v4 = vpop.f32.mrb[206].mxu1  ;;  %v3859_v6 = vpop.f32.mrb[207].mxu0  ;;  %v6949_v35 = vadd.f32 %v3968_v18, %v6932_v51 }
 0x477   : > { %v4295_v60 = vmax.f32 %v3854_v1, %v3856_v20  ;;  %v3860_v53 = vadd.f32 %v3859_v6, %v6930_v34  ;;  %v3972_v29 = vpop.f32.mrb[207].mxu1  ;;  %v3971_v27 = vadd.f32 %v3970_v4, %v6930_v34  ;;  %v6978_v20 = vpop.permute.xlu1 %3686 }
 0x478   : > { %v6961_v15 = vadd.f32 %v3972_v29, %v6930_v34  ;;  %v6980_v18 = vpop.permute.xlu0 %3681 }
 0x479   : > { %v6951_v0 = vmax.f32 %v4295_v60, %v3967_v49  ;;  %v4304_v32 = vmax.f32 %v3858_v9, %v3860_v53 }
 0x47b   : > { %v6963_v38 = vmax.f32 %v4304_v32, %v3971_v27  ;;  %v3863_v28 = vpop.f32.mrb[208].mxu0 }
 0x47c   : > { %v3864_v11 = vadd.f32 %v3863_v28, %v6956_v43  ;;  %v3976_v2 = vpop.f32.mrb[208].mxu1  ;;  %v3865_v22 = vpop.f32.mrb[209].mxu0 }
 0x47d   : > { %v3866_v39 = vadd.f32 %v3865_v22, %v6956_v43  ;;  %v3978_v54 = vpop.f32.mrb[209].mxu1  ;;  %v3867_v17 = vpop.f32.mrb[210].mxu0  ;;  %v3977_v21 = vadd.f32 %v3976_v2, %v6956_v43 }
 0x47e   : > { %v3868_v33 = vadd.f32 %v3867_v17, %v6954_v12  ;;  %v3980_v50 = vpop.f32.mrb[210].mxu1  ;;  %v3869_v41 = vpop.f32.mrb[211].mxu0  ;;  %v6973_v63 = vadd.f32 %v3978_v54, %v6956_v43 }
 0x47f   : > { %v4313_v59 = vmax.f32 %v3864_v11, %v3866_v39  ;;  %v3870_v31 = vadd.f32 %v3869_v41, %v6954_v12  ;;  %v3982_v42 = vpop.f32.mrb[211].mxu1  ;;  %v3981_v24 = vadd.f32 %v3980_v50, %v6954_v12 }
 0x480   : > { %v6985_v9 = vadd.f32 %v3982_v42, %v6954_v12  ;;  %v7004_v42 = vpop.permute.xlu0 %3691 }
 0x481   : > { %v6975_v1 = vmax.f32 %v4313_v59, %v3977_v21  ;;  %v4322_v8 = vmax.f32 %v3868_v33, %v3870_v31  ;;  %v7002_v31 = vpop.permute.xlu1 %3696 }
 0x483   : > { %v6987_v4 = vmax.f32 %v4322_v8, %v3981_v24  ;;  %v3873_v6 = vpop.f32.mrb[212].mxu0 }
 0x484   : > { %v3874_v49 = vadd.f32 %v3873_v6, %v6980_v18  ;;  %v3986_v60 = vpop.f32.mrb[212].mxu1  ;;  %v3875_v53 = vpop.f32.mrb[213].mxu0 }
 0x485   : > { %v3876_v27 = vadd.f32 %v3875_v53, %v6980_v18  ;;  %v3988_v32 = vpop.f32.mrb[213].mxu1  ;;  %v3877_v28 = vpop.f32.mrb[214].mxu0  ;;  %v3987_v39 = vadd.f32 %v3986_v60, %v6980_v18 }
 0x486   : > { %v3878_v11 = vadd.f32 %v3877_v28, %v6978_v20  ;;  %v3990_v2 = vpop.f32.mrb[214].mxu1  ;;  %v3879_v22 = vpop.f32.mrb[215].mxu0  ;;  %v6997_v50 = vadd.f32 %v3988_v32, %v6980_v18 }
 0x487   : > { %v4331_v54 = vmax.f32 %v3874_v49, %v3876_v27  ;;  %v3880_v17 = vadd.f32 %v3879_v22, %v6978_v20  ;;  %v3992_v33 = vpop.f32.mrb[215].mxu1  ;;  %v3991_v21 = vadd.f32 %v3990_v2, %v6978_v20  ;;  %v7026_v29 = vpop.permute.xlu1 %3706 }
 0x488   : > { %v7009_v8 = vadd.f32 %v3992_v33, %v6978_v20  ;;  %7343 = vst [vmem:[#allocation23_spill] sm:$0xff] %v7026_v29  ;;  %v7028_v30 = vpop.permute.xlu0 %3701 }
 0x489   : > { %v6999_v41 = vmax.f32 %v4331_v54, %v3987_v39  ;;  %v4340_v59 = vmax.f32 %v3878_v11, %v3880_v17 }
 0x48b   : > { %v7011_v6 = vmax.f32 %v4340_v59, %v3991_v21  ;;  %v3883_v49 = vpop.f32.mrb[216].mxu0 }
 0x48c   : > { %v3884_v60 = vadd.f32 %v3883_v49, %v7004_v42  ;;  %v3996_v53 = vpop.f32.mrb[216].mxu1  ;;  %v3885_v27 = vpop.f32.mrb[217].mxu0 }
 0x48d   : > { %v3886_v28 = vadd.f32 %v3885_v27, %v7004_v42  ;;  %v3998_v11 = vpop.f32.mrb[217].mxu1  ;;  %v3887_v2 = vpop.f32.mrb[218].mxu0  ;;  %v3997_v17 = vadd.f32 %v3996_v53, %v7004_v42 }
 0x48e   : > { %v3888_v22 = vadd.f32 %v3887_v2, %v7002_v31  ;;  %v4000_v39 = vpop.f32.mrb[218].mxu1  ;;  %v3889_v54 = vpop.f32.mrb[219].mxu0  ;;  %v7021_v49 = vadd.f32 %v3998_v11, %v7004_v42 }
 0x48f   : > { %v4349_v33 = vmax.f32 %v3884_v60, %v3886_v28  ;;  %v3890_v21 = vadd.f32 %v3889_v54, %v7002_v31  ;;  %v4002_v59 = vpop.f32.mrb[219].mxu1  ;;  %v4001_v32 = vadd.f32 %v4000_v39, %v7002_v31 }
 0x490   : > { %v7033_v60 = vadd.f32 %v4002_v59, %v7002_v31 }
 0x491   : > { %v7023_v24 = vmax.f32 %v4349_v33, %v3997_v17  ;;  %v4358_v27 = vmax.f32 %v3888_v22, %v3890_v21 }
 0x493   : > { %v7035_v53 = vmax.f32 %v4358_v27, %v4001_v32  ;;  %v3893_v28 = vpop.f32.mrb[220].mxu0 }
 0x494   : > { %v3894_v11 = vadd.f32 %v3893_v28, %v7028_v30  ;;  %v4006_v54 = vpop.f32.mrb[220].mxu1  ;;  %v3895_v17 = vpop.f32.mrb[221].mxu0 }
 0x495   : > { %v3896_v39 = vadd.f32 %v3895_v17, %v7028_v30  ;;  %v4008_v33 = vpop.f32.mrb[221].mxu1  ;;  %v3897_v21 = vpop.f32.mrb[222].mxu0  ;;  %v4007_v59 = vadd.f32 %v4006_v54, %v7028_v30 }
 0x496   : > { %v3898_v45 = vadd.f32 %v3897_v21, %v7026_v29  ;;  %v4010_v2 = vpop.f32.mrb[222].mxu1  ;;  %v3899_v36 = vpop.f32.mrb[223].mxu0  ;;  %v7045_v28 = vadd.f32 %v4008_v33, %v7028_v30 }
 0x497   : > { %v4367_v32 = vmax.f32 %v3894_v11, %v3896_v39  ;;  %v3900_v27 = vadd.f32 %v3899_v36, %v7026_v29  ;;  %v4012_v55 = vpop.f32.mrb[223].mxu1  ;;  %v4011_v22 = vadd.f32 %v4010_v2, %v7026_v29 }
 0x498   : > { %7344 = vst [vmem:[#allocation18_spill] sm:$0xff] %v7045_v28  ;;  %v7053_v21 = vadd.f32 %v4012_v55, %v7026_v29 }
 0x499   : > { %v7047_v37 = vmax.f32 %v4367_v32, %v4007_v59  ;;  %v4376_v17 = vmax.f32 %v3898_v45, %v3900_v27 }
 0x49a   : > { %7345 = vst [vmem:[#allocation16_spill] sm:$0xff] %v7053_v21 }
 0x49b   : > { %v7055_v47 = vmax.f32 %v4376_v17, %v4011_v22 }
 0x49d   : > { %7346 = vst [vmem:[#allocation22_spill] sm:$0xff] %v7055_v47 }
 0x4db   : > { %v4049_v11 = vpop.f32.mrb[224].mxu0 }
 0x4dc   : > { %v4050_v54 = vadd.f32 %v4049_v11, %v6869_v10  ;;  %v4162_v39 = vpop.f32.mrb[224].mxu1  ;;  %v4051_v33 = vpop.f32.mrb[225].mxu0 }
 0x4dd   : > { %v4052_v59 = vadd.f32 %v4051_v33, %v6869_v10  ;;  %v4164_v2 = vpop.f32.mrb[225].mxu1  ;;  %v4053_v45 = vpop.f32.mrb[226].mxu0  ;;  %v4163_v26 = vadd.f32 %v4162_v39, %v6869_v10 }
 0x4de   : > { %v4244_v32 = vmax.f32 %v4243_v46, %v4050_v54  ;;  %v4054_v55 = vadd.f32 %v4053_v45, %v6867_v16  ;;  %v4166_v22 = vpop.f32.mrb[226].mxu1  ;;  %v4055_v27 = vpop.f32.mrb[227].mxu0  ;;  %v4165_v21 = vadd.f32 %v4164_v2, %v6869_v10  ;;  %v7347_v10 = vmax.f32 %v6903_v61, %v6901_v40 }
 0x4df   : > { %v4056_v17 = vadd.f32 %v4055_v27, %v6867_v16  ;;  %v4168_v36 = vpop.f32.mrb[227].mxu1  ;;  %v4167_v47 = vadd.f32 %v4166_v22, %v6867_v16 }
 0x4e0   : > { %v4245_v11 = vmax.f32 %v4244_v32, %v4052_v59  ;;  %v4253_v33 = vmax.f32 %v4252_v52, %v4054_v55  ;;  %v4169_v54 = vadd.f32 %v4168_v36, %v6867_v16 }
 0x4e2   : > { %v4254_v19 = vmax.f32 %v4253_v33, %v4056_v17  ;;  %v4246_v57 = vmax.f32 %v4245_v11, %v4163_v26 }
 0x4e3   : > { %v4059_v46 = vpop.f32.mrb[228].mxu0 }
 0x4e4   : > { %v4060_v45 = vadd.f32 %v4059_v46, %v6884_v62  ;;  %v4172_v27 = vpop.f32.mrb[228].mxu1  ;;  %v4061_v29 = vpop.f32.mrb[229].mxu0  ;;  %v4247_v28 = vmax.f32 %v4246_v57, %v4165_v21  ;;  %v4255_v39 = vmax.f32 %v4254_v19, %v4167_v47 }
 0x4e5   : > { %v4062_v59 = vadd.f32 %v4061_v29, %v6884_v62  ;;  %v4174_v32 = vpop.f32.mrb[229].mxu1  ;;  %v4063_v14 = vpop.f32.mrb[230].mxu0  ;;  %v4173_v21 = vadd.f32 %v4172_v27, %v6884_v62  ;;  %v7348_v29 = vmax.f32 %v6915_v56, %v6913_v25 }
 0x4e6   : > { %v4262_v48 = vmax.f32 %v7347_v10, %v4060_v45  ;;  %v4064_v52 = vadd.f32 %v4063_v14, %v6882_v44  ;;  %v4176_v26 = vpop.f32.mrb[230].mxu1  ;;  %v4065_v2 = vpop.f32.mrb[231].mxu0  ;;  %4248 = vmax.xlane.f32.xlu0 %v4247_v28  ;;  %v4256_v16 = vmax.f32 %v4255_v39, %v4169_v54  ;;  %v4175_v40 = vadd.f32 %v4174_v32, %v6884_v62 }
 0x4e7   : > { %v4066_v36 = vadd.f32 %v4065_v2, %v6882_v44  ;;  %v4178_v55 = vpop.f32.mrb[231].mxu1  ;;  %v4177_v17 = vadd.f32 %v4176_v26, %v6882_v44  ;;  %v7349_v62 = vmax.f32 %v6927_v5, %v6925_v23  ;;  %v7350_v2 = vmax.f32 %v6939_v58, %v6937_v3 }
 0x4e8   : > { %v4263_v47 = vmax.f32 %v4262_v48, %v4062_v59  ;;  %v4271_v22 = vmax.f32 %v7348_v29, %v4064_v52  ;;  %4257 = vmax.xlane.f32.xlu1 %v4256_v16  ;;  %v4179_v19 = vadd.f32 %v4178_v55, %v6882_v44 }
 0x4ea   : > { %v4264_v61 = vmax.f32 %v4263_v47, %v4173_v21  ;;  %v4272_v11 = vmax.f32 %v4271_v22, %v4066_v36 }
 0x4eb   : > { %v4069_v33 = vpop.f32.mrb[232].mxu0 }
 0x4ec   : > { %v4265_v28 = vmax.f32 %v4264_v61, %v4175_v40  ;;  %v4273_v57 = vmax.f32 %v4272_v11, %v4177_v17  ;;  %v4070_v46 = vadd.f32 %v4069_v33, %v6908_v7  ;;  %v4182_v54 = vpop.f32.mrb[232].mxu1  ;;  %v4071_v45 = vpop.f32.mrb[233].mxu0 }
 0x4ed   : > { %v4072_v27 = vadd.f32 %v4071_v45, %v6908_v7  ;;  %v4184_v25 = vpop.f32.mrb[233].mxu1  ;;  %v4073_v56 = vpop.f32.mrb[234].mxu0  ;;  %v4183_v52 = vadd.f32 %v4182_v54, %v6908_v7 }
 0x4ee   : > { %v4274_v39 = vmax.f32 %v4273_v57, %v4179_v19  ;;  %v4280_v59 = vmax.f32 %v7349_v62, %v4070_v46  ;;  %v4074_v32 = vadd.f32 %v4073_v56, %v6906_v13  ;;  %v4186_v14 = vpop.f32.mrb[234].mxu1  ;;  %v4075_v10 = vpop.f32.mrb[235].mxu0  ;;  %4266 = vmax.xlane.f32.xlu0 %v4265_v28  ;;  %v4185_v36 = vadd.f32 %v4184_v25, %v6908_v7 }
 0x4ef   : > { %v4076_v44 = vadd.f32 %v4075_v10, %v6906_v13  ;;  %v4188_v48 = vpop.f32.mrb[235].mxu1  ;;  %v4187_v23 = vadd.f32 %v4186_v14, %v6906_v13  ;;  %v7351_v7 = vmax.f32 %v6951_v0, %v6949_v35  ;;  %v7352_v25 = vmax.f32 %v6963_v38, %v6961_v15 }
 0x4f0   : > { %v4281_v26 = vmax.f32 %v4280_v59, %v4072_v27  ;;  %v4289_v16 = vmax.f32 %v7350_v2, %v4074_v32  ;;  %v4189_v29 = vadd.f32 %v4188_v48, %v6906_v13 }
 0x4f2   : > { %v4282_v55 = vmax.f32 %v4281_v26, %v4183_v52  ;;  %v4290_v5 = vmax.f32 %v4289_v16, %v4076_v44  ;;  %4275 = vmax.xlane.f32.xlu0 %v4274_v39 }
 0x4f3   : > { %v4079_v21 = vpop.f32.mrb[236].mxu0 }
 0x4f4   : > { %v4283_v47 = vmax.f32 %v4282_v55, %v4185_v36  ;;  %v4291_v22 = vmax.f32 %v4290_v5, %v4187_v23  ;;  %v4080_v40 = vadd.f32 %v4079_v21, %v6932_v51  ;;  %v4192_v61 = vpop.f32.mrb[236].mxu1  ;;  %v4081_v17 = vpop.f32.mrb[237].mxu0 }
 0x4f5   : > { %v4082_v11 = vadd.f32 %v4081_v17, %v6932_v51  ;;  %v4194_v3 = vpop.f32.mrb[237].mxu1  ;;  %v4083_v58 = vpop.f32.mrb[238].mxu0  ;;  %v4193_v45 = vadd.f32 %v4192_v61, %v6932_v51 }
 0x4f6   : > { %v4292_v33 = vmax.f32 %v4291_v22, %v4189_v29  ;;  %v4298_v28 = vmax.f32 %v7351_v7, %v4080_v40  ;;  %v4084_v19 = vadd.f32 %v4083_v58, %v6930_v34  ;;  %v4196_v57 = vpop.f32.mrb[238].mxu1  ;;  %v4085_v46 = vpop.f32.mrb[239].mxu0  ;;  %4284 = vmax.xlane.f32.xlu1 %v4283_v47  ;;  %v4195_v39 = vadd.f32 %v4194_v3, %v6932_v51 }
 0x4f7   : > { %v4086_v13 = vadd.f32 %v4085_v46, %v6930_v34  ;;  %v4198_v54 = vpop.f32.mrb[239].mxu1  ;;  %v4197_v0 = vadd.f32 %v4196_v57, %v6930_v34  ;;  %v7353_v51 = vmax.f32 %v6975_v1, %v6973_v63  ;;  %v7354_v29 = vmax.f32 %v6987_v4, %v6985_v9 }
 0x4f8   : > { %v4299_v27 = vmax.f32 %v4298_v28, %v4082_v11  ;;  %v4307_v56 = vmax.f32 %v7352_v25, %v4084_v19  ;;  %4293 = vmax.xlane.f32.xlu0 %v4292_v33  ;;  %v4199_v14 = vadd.f32 %v4198_v54, %v6930_v34 }
 0x4fa   : > { %v4300_v35 = vmax.f32 %v4299_v27, %v4193_v45  ;;  %v4308_v62 = vmax.f32 %v4307_v56, %v4086_v13 }
 0x4fb   : > { %v4089_v59 = vpop.f32.mrb[240].mxu0 }
 0x4fc   : > { %v4301_v32 = vmax.f32 %v4300_v35, %v4195_v39  ;;  %v4309_v10 = vmax.f32 %v4308_v62, %v4197_v0  ;;  %v4090_v44 = vadd.f32 %v4089_v59, %v6956_v43  ;;  %v4202_v48 = vpop.f32.mrb[240].mxu1  ;;  %v4091_v52 = vpop.f32.mrb[241].mxu0  ;;  %v7356_v39 = vmax.f32 %v7011_v6, %v7009_v8 }
 0x4fd   : > { %v4092_v26 = vadd.f32 %v4091_v52, %v6956_v43  ;;  %v4204_v15 = vpop.f32.mrb[241].mxu1  ;;  %v4093_v38 = vpop.f32.mrb[242].mxu0  ;;  %v4203_v21 = vadd.f32 %v4202_v48, %v6956_v43 }
 0x4fe   : > { %v4310_v2 = vmax.f32 %v4309_v10, %v4199_v14  ;;  %v4316_v16 = vmax.f32 %v7353_v51, %v4090_v44  ;;  %v4094_v36 = vadd.f32 %v4093_v38, %v6954_v12  ;;  %v4206_v55 = vpop.f32.mrb[242].mxu1  ;;  %v4095_v23 = vpop.f32.mrb[243].mxu0  ;;  %4302 = vmax.xlane.f32.xlu1 %v4301_v32  ;;  %v4205_v40 = vadd.f32 %v4204_v15, %v6956_v43 }
 0x4ff   : > { %v4096_v34 = vadd.f32 %v4095_v23, %v6954_v12  ;;  %v4208_v5 = vpop.f32.mrb[243].mxu1  ;;  %v4207_v1 = vadd.f32 %v4206_v55, %v6954_v12  ;;  %v7355_v43 = vmax.f32 %v6999_v41, %v6997_v50 }
 0x500   : > { %v4317_v47 = vmax.f32 %v4316_v16, %v4092_v26  ;;  %v4325_v22 = vmax.f32 %v7354_v29, %v4094_v36  ;;  %4311 = vmax.xlane.f32.xlu0 %v4310_v2  ;;  %v4209_v3 = vadd.f32 %v4208_v5, %v6954_v12 }
 0x502   : > { %v4318_v63 = vmax.f32 %v4317_v47, %v4203_v21  ;;  %v4326_v61 = vmax.f32 %v4325_v22, %v4096_v34  ;;  %v7358_v34 = vmax.f32 %v7035_v53, %v7033_v60 }
 0x503   : > { %v4099_v17 = vpop.f32.mrb[244].mxu0 }
 0x504   : > { %v4319_v11 = vmax.f32 %v4318_v63, %v4205_v40  ;;  %v4327_v58 = vmax.f32 %v4326_v61, %v4207_v1  ;;  %v4100_v33 = vadd.f32 %v4099_v17, %v6980_v18  ;;  %v4212_v7 = vpop.f32.mrb[244].mxu1  ;;  %v4101_v28 = vpop.f32.mrb[245].mxu0 }
 0x505   : > { %v4102_v19 = vadd.f32 %v4101_v28, %v6980_v18  ;;  %v4214_v9 = vpop.f32.mrb[245].mxu1  ;;  %v4103_v4 = vpop.f32.mrb[246].mxu0  ;;  %v4213_v25 = vadd.f32 %v4212_v7, %v6980_v18  ;;  %v7361_v7 = vld [vmem:[#allocation23_spill] sm:$0xff] }
 0x506   : > { %v4328_v57 = vmax.f32 %v4327_v58, %v4209_v3  ;;  %v4334_v46 = vmax.f32 %v7355_v43, %v4100_v33  ;;  %v4104_v13 = vadd.f32 %v4103_v4, %v6978_v20  ;;  %v4216_v54 = vpop.f32.mrb[246].mxu1  ;;  %v4105_v45 = vpop.f32.mrb[247].mxu0  ;;  %4320 = vmax.xlane.f32.xlu1 %v4319_v11  ;;  %v4215_v0 = vadd.f32 %v4214_v9, %v6980_v18 }
 0x507   : > { %v4106_v12 = vadd.f32 %v4105_v45, %v6978_v20  ;;  %v4218_v27 = vpop.f32.mrb[247].mxu1  ;;  %v4217_v41 = vadd.f32 %v4216_v54, %v6978_v20  ;;  %v7357_v18 = vmax.f32 %v7023_v24, %v7021_v49 }
 0x508   : > { %v4335_v56 = vmax.f32 %v4334_v46, %v4102_v19  ;;  %v4343_v35 = vmax.f32 %v7356_v39, %v4104_v13  ;;  %4329 = vmax.xlane.f32.xlu0 %v4328_v57  ;;  %v4219_v14 = vadd.f32 %v4218_v27, %v6978_v20  ;;  %v7362_v46 = vld [vmem:[#allocation22_spill] sm:$0xff]  ;;  %v7363_v13 = vld [vmem:[#allocation16_spill] sm:$0xff] }
 0x509   : > { %v7364_v54 = vmax.f32 %v7362_v46, %v7363_v13 }
 0x50a   : > { %v4336_v50 = vmax.f32 %v4335_v56, %v4213_v25  ;;  %v4344_v62 = vmax.f32 %v4343_v35, %v4106_v12 }
 0x50b   : > { %v4109_v59 = vpop.f32.mrb[248].mxu0 }
 0x50c   : > { %v4337_v32 = vmax.f32 %v4336_v50, %v4215_v0  ;;  %v4345_v10 = vmax.f32 %v4344_v62, %v4217_v41  ;;  %v4110_v44 = vadd.f32 %v4109_v59, %v7004_v42  ;;  %v4222_v48 = vpop.f32.mrb[248].mxu1  ;;  %v4111_v52 = vpop.f32.mrb[249].mxu0 }
 0x50d   : > { %v4112_v26 = vadd.f32 %v4111_v52, %v7004_v42  ;;  %v4224_v8 = vpop.f32.mrb[249].mxu1  ;;  %v4113_v6 = vpop.f32.mrb[250].mxu0  ;;  %v4223_v55 = vadd.f32 %v4222_v48, %v7004_v42 }
 0x50e   : > { %v4346_v15 = vmax.f32 %v4345_v10, %v4219_v14  ;;  %v4352_v38 = vmax.f32 %v7357_v18, %v4110_v44  ;;  %v4114_v2 = vadd.f32 %v4113_v6, %v7002_v31  ;;  %v4226_v51 = vpop.f32.mrb[250].mxu1  ;;  %v4115_v16 = vpop.f32.mrb[251].mxu0  ;;  %4338 = vmax.xlane.f32.xlu1 %v4337_v32  ;;  %v4225_v21 = vadd.f32 %v4224_v8, %v7004_v42  ;;  %v7359_v42 = vld [vmem:[#allocation18_spill] sm:$0xff] }
 0x50f   : > { %v4116_v20 = vadd.f32 %v4115_v16, %v7002_v31  ;;  %v4228_v36 = vpop.f32.mrb[251].mxu1  ;;  %v4227_v49 = vadd.f32 %v4226_v51, %v7002_v31  ;;  %v7360_v58 = vmax.f32 %v7047_v37, %v7359_v42 }
 0x510   : > { %v4353_v23 = vmax.f32 %v4352_v38, %v4112_v26  ;;  %v4361_v5 = vmax.f32 %v7358_v34, %v4114_v2  ;;  %4347 = vmax.xlane.f32.xlu0 %v4346_v15  ;;  %v4229_v40 = vadd.f32 %v4228_v36, %v7002_v31 }
 0x512   : > { %v4354_v24 = vmax.f32 %v4353_v23, %v4223_v55  ;;  %v4362_v47 = vmax.f32 %v4361_v5, %v4116_v20 }
 0x513   : > { %v4119_v29 = vpop.f32.mrb[252].mxu0 }
 0x514   : > { %v4355_v22 = vmax.f32 %v4354_v24, %v4225_v21  ;;  %v4363_v63 = vmax.f32 %v4362_v47, %v4227_v49  ;;  %v4120_v1 = vadd.f32 %v4119_v29, %v7028_v30  ;;  %v4232_v61 = vpop.f32.mrb[252].mxu1  ;;  %v4121_v17 = vpop.f32.mrb[253].mxu0 }
 0x515   : > { %v4122_v11 = vadd.f32 %v4121_v17, %v7028_v30  ;;  %v4234_v60 = vpop.f32.mrb[253].mxu1  ;;  %v4123_v53 = vpop.f32.mrb[254].mxu0  ;;  %v4233_v57 = vadd.f32 %v4232_v61, %v7028_v30 }
 0x516   : > { %v4364_v3 = vmax.f32 %v4363_v63, %v4229_v40  ;;  %v4370_v33 = vmax.f32 %v7360_v58, %v4120_v1  ;;  %v4124_v28 = vadd.f32 %v4123_v53, %v7361_v7  ;;  %v4236_v19 = vpop.f32.mrb[254].mxu1  ;;  %v4125_v9 = vpop.f32.mrb[255].mxu0  ;;  %4356 = vmax.xlane.f32.xlu1 %v4355_v22  ;;  %v4235_v37 = vadd.f32 %v4234_v60, %v7028_v30 }
 0x517   : > { %v4126_v31 = vadd.f32 %v4125_v9, %v7361_v7  ;;  %v4238_v4 = vpop.f32.mrb[255].mxu1  ;;  %v4237_v27 = vadd.f32 %v4236_v19, %v7361_v7 }
 0x518   : > { %v4371_v43 = vmax.f32 %v4370_v33, %v4122_v11  ;;  %v4379_v45 = vmax.f32 %v7364_v54, %v4124_v28  ;;  %4365 = vmax.xlane.f32.xlu0 %v4364_v3  ;;  %v4239_v39 = vadd.f32 %v4238_v4, %v7361_v7 }
 0x51a   : > { %v4372_v12 = vmax.f32 %v4371_v43, %v4233_v57  ;;  %v4380_v25 = vmax.f32 %v4379_v45, %v4126_v31 }
 0x51c   : > { %v4373_v56 = vmax.f32 %v4372_v12, %v4235_v37  ;;  %v4381_v35 = vmax.f32 %v4380_v25, %v4237_v27 }
 0x51e   : > { %v4382_v0 = vmax.f32 %v4381_v35, %v4239_v39  ;;  %4374 = vmax.xlane.f32.xlu1 %v4373_v56 }
 0x520   : > { %4383 = vmax.xlane.f32.xlu0 %v4382_v0 }
 0x573   : > { %v4249_v30 = vpop.xlane.xlu0 %4248 }
 0x574   : > { %4386 = vst.msk [vmem:[%s7177_s29] sm:$0xff] %vm4385_vm1, %v4249_v30 }
 0x575   : > { %v4258_v50 = vpop.xlane.xlu1 %4257 }
 0x576   : > { %4387 = vst.msk [vmem:[%s7177_s29 + $0x8] sm:$0xff] %vm4385_vm1, %v4258_v50 }
 0x57b   : > { %v4267_v41 = vpop.xlane.xlu0 %4266 }
 0x57c   : > { %4388 = vst.msk [vmem:[%s7177_s29 + $0x10] sm:$0xff] %vm4385_vm1, %v4267_v41 }
 0x57f   : > { %v4276_v62 = vpop.xlane.xlu0 %4275 }
 0x580   : > { %4389 = vst.msk [vmem:[%s7177_s29 + $0x18] sm:$0xff] %vm4385_vm1, %v4276_v62 }
 0x583   : > { %v4285_v59 = vpop.xlane.xlu1 %4284 }
 0x584   : > { %4390 = vst.msk [vmem:[%s7177_s29 + $0x20] sm:$0xff] %vm4385_vm1, %v4285_v59 }
 0x585   : > { %v4294_v32 = vpop.xlane.xlu0 %4293 }
 0x586   : > { %4391 = vst.msk [vmem:[%s7177_s29 + $0x28] sm:$0xff] %vm4385_vm1, %v4294_v32 }
 0x58b   : > { %v4303_v14 = vpop.xlane.xlu1 %4302 }
 0x58c   : > { %4392 = vst.msk [vmem:[%s7177_s29 + $0x30] sm:$0xff] %vm4385_vm1, %v4303_v14 }
 0x58d   : > { %v4312_v10 = vpop.xlane.xlu0 %4311 }
 0x58e   : > { %4393 = vst.msk [vmem:[%s7177_s29 + $0x38] sm:$0xff] %vm4385_vm1, %v4312_v10 }
 0x593   : > { %v4321_v44 = vpop.xlane.xlu1 %4320 }
 0x594   : > { %4394 = vst.msk [vmem:[%s7177_s29 + $0x40] sm:$0xff] %vm4385_vm1, %v4321_v44 }
 0x595   : > { %v4330_v48 = vpop.xlane.xlu0 %4329 }
 0x596   : > { %4395 = vst.msk [vmem:[%s7177_s29 + $0x48] sm:$0xff] %vm4385_vm1, %v4330_v48 }
 0x59b   : > { %v4339_v52 = vpop.xlane.xlu1 %4338 }
 0x59c   : > { %4396 = vst.msk [vmem:[%s7177_s29 + $0x50] sm:$0xff] %vm4385_vm1, %v4339_v52 }
 0x59d   : > { %v4348_v26 = vpop.xlane.xlu0 %4347 }
 0x59e   : > { %4397 = vst.msk [vmem:[%s7177_s29 + $0x58] sm:$0xff] %vm4385_vm1, %v4348_v26 }
 0x5a3   : > { %v4357_v8 = vpop.xlane.xlu1 %4356 }
 0x5a4   : > { %4398 = vst.msk [vmem:[%s7177_s29 + $0x60] sm:$0xff] %vm4385_vm1, %v4357_v8 }
 0x5a5   : > { %v4366_v6 = vpop.xlane.xlu0 %4365 }
 0x5a6   : > { %4399 = vst.msk [vmem:[%s7177_s29 + $0x68] sm:$0xff] %vm4385_vm1, %v4366_v6 }
 0x5ab   : > { %v4375_v15 = vpop.xlane.xlu1 %4374 }
 0x5ac   : > { %4400 = vst.msk [vmem:[%s7177_s29 + $0x70] sm:$0xff] %vm4385_vm1, %v4375_v15 }
 0x5ad   : > { %v4384_v18 = vpop.xlane.xlu0 %4383 }
 0x5ae   : > { %4401 = vst.msk [vmem:[%s7177_s29 + $0x78] sm:$0xff] %vm4385_vm1, %v4384_v18 }
 0x5af PF: > { %s21_s13 = sadd.s32 1, %s4845_s13   ;;  %s7365_s10 = sld [smem:[#allocation8_spill]] }
 0x5b0   : > { %p18_p10 = scmp.ge.s32.totalorder %s21_s13, 6   ;;  %s7366_s21 = sld [smem:[#allocation9_spill]] }
 0x5b1   : > { %s7367_s12 = sld [smem:[#allocation10_spill]]  ;;  %s7368_s30 = smov %s4837_s11 }
 0x5b2   :  { %20 = sbr.rel (!%p18_p10) target bundleno = 4 (0x4), region = 97 }
 0x5b6   : > { %s7369_s11 = smov %s7366_s21 }
 0x5b9   :  { %4431 = vsyncpa [#allocation3], 1 }
 0x5ba   :  { %4433 = vsyncpa [#allocation3 + $0x1], 1 }
 0x5bb   :  { %4434 = vsyncpa [#allocation5], 1 }

// kernel: autoencoder_forward.3
= control target key start
LH: loop header
LB: loop body
LE: loop exit
PB: predicated region body
PF: predicated region fallthrough
CT: control target
= control target key end

     0   :  { %s5774_s0 = inlined_call_operand.vmem [shape: f32[2,128], index: 0, kind: input, shape index: {}]   ;;  %s5775_s1 = inlined_call_operand.hbm [shape: bf16[128,256], index: 1, kind: input, shape index: {}]   ;;  %s5776_s2 = inlined_call_operand.hbm [shape: f32[1,256], index: 2, kind: input, shape index: {}]   ;;  %s5777_s3 = inlined_call_operand.hbm [shape: bf16[256,256], index: 3, kind: input, shape index: {}]   ;;  %s5778_s4 = inlined_call_operand.hbm [shape: f32[1,256], index: 4, kind: input, shape index: {}]   ;;  %s5779_s5 = inlined_call_operand.hbm [shape: bf16[256,6144], index: 5, kind: input, shape index: {}]   ;;  %s5780_s6 = inlined_call_operand.hbm [shape: f32[1,6144], index: 6, kind: input, shape index: {}]   ;;  %s5781_s7 = inlined_call_operand.hbm [shape: f32[2,6144], index: 7, kind: output, shape index: {}]  }
   0x1   :  { %5799 = sst [smem:[#allocation22_spill]] %s5775_s1 }
   0x2   :  { %5800 = sst [smem:[#allocation23_spill]] %s5776_s2 }
   0x3   :  { %5801 = sst [smem:[#allocation24_spill]] %s5779_s5 }
   0x4   :  { %5802 = sst [smem:[#allocation25_spill]] %s5781_s7 }
   0x5   :  { %12 = vsyncpa [#allocation3], 0 }
   0x6   :  { %13 = vsyncpa [#allocation6], 0 }
   0x7   :  { %14 = vsyncpa [#allocation9], 0 }
   0x8   :  { %15 = vsyncpa [#allocation4], 0 }
   0x9   :  { %17 = vsyncpa [#allocation4 + $0x1], 0  ;;  %s4953_s24 = smov 0   ;;  %s4955_s25 = smov 0  }
   0xa   :  { %s4957_s26 = smov 0   ;;  %s4959_s27 = smov 0  }
   0xb LB: > { %5803 = sst [smem:[#allocation18_spill]] %s4885_s24  ;;  %s4974_s28 = sadd.s32 4294967295, %s4897_s27   ;;  %s4897_s27 = sphi %s4959_s27, %s5842_s27   ;;  %s4893_s26 = sphi %s4957_s26, %s5846_s26   ;;  %s4889_s25 = sphi %s4955_s25, %s5845_s25   ;;  %s4885_s24 = sphi %s4953_s24, %s5844_s24  }
   0xc   : > { %s4019_s29 = sadd.s32 4294967294, %s4897_s27   ;;  %s4978_s30 = sadd.s32 1, %s4897_s27  }
   0xd   : > { %5804 = sst [smem:[#allocation19_spill]] %s4978_s30  ;;  %s135_s8 = sadd.s32 1, %s4893_s26 }
   0xe   : > { %s132_s9 = ssub.s32 %s4897_s27, %s4978_s30  ;;  %p142_p0 = scmp.ne.s32.totalorder %s4893_s26, %s4889_s25 }
   0xf   : > { %p133_p1 = scmp.eq.s32.totalorder %s132_s9, 0  ;;  %p143_p2 = scmp.eq.s32.totalorder %s4897_s27, 0 }
  0x10   : > { %p148_p3 = scmp.ne.s32.totalorder %s4889_s25, %s4885_s24  ;;  %p5782_p4 = scmp.eq.s32.totalorder %s4974_s28, 0 }
  0x11   : > { %s4990_s10 = scalar_select %p133_p1, %s4893_s26, %s135_s8  }
  0x12   : > { %p4992_p5 = por %p143_p2, %p142_p0  ;;  %p4998_p6 = por %p5782_p4, %p148_p3 }
  0x13   : > { %5805 = sst [smem:[#allocation20_spill]] %s4990_s10  ;;  %p198_p7 = scmp.eq.s32.totalorder %s4974_s28, 1 }
  0x14   : > { %s5806_s11 = scalar_select %p4992_p5, 1, 0 }
  0x15   : > { %s5807_s12 = scalar_select %p4998_p6, 1, 0 }
  0x16   : > { %p204_p8 = scmp.eq.s32.totalorder %s4019_s29, 1  ;;  %p4020_p9 = scmp.ge.s32.totalorder %s4897_s27, 1 }
  0x17   : > { %p211_p10 = scmp.lt.s32.totalorder %s4897_s27, 3  ;;  %p5005_p11 = por %p198_p7, %p142_p0 }
  0x18   : > { %p5009_p12 = por %p204_p8, %p148_p3  ;;  %s4899_s16 = smov [#allocation2]  }
  0x19   : > { %s5808_s13 = scalar_select %p5005_p11, 1, 0 }
  0x1a   : > { %s5809_s14 = scalar_select %p5009_p12, 1, 0 }
  0x1b   : > { %p5013_p13 = pnand %p4020_p9, %p211_p10  ;;  %s226_s17 = sshll.u32 %s4899_s16, 4  ;;  %s227_s17 = int_to_ptr.vmem [resolvable:$true] %s226_s17 }
  0x1c   : > { %5810 = sst [smem:[#allocation21_spill]] %s5809_s14  ;;  %s4900_s19 = smov [#allocation5]  }
  0x1d   : > { %s5811_s15 = scalar_select %p5013_p13, 1, 0 }
  0x1e   : > { %p4498_p1 = pneg %p5013_p13  ;;  %s240_s20 = sshll.u32 %s4900_s19, 4  ;;  %s241_s20 = int_to_ptr.vmem [resolvable:$true] %s240_s20 }
  0x1f   : > { %s5813_s1 = sld [smem:[#allocation22_spill]] }
  0x20   : > { %p5021_p2 = pnand %p4498_p1, %p5782_p4 }
  0x22   : > { %s5812_s18 = scalar_select %p5021_p2, 1, 0 }
  0x23   : > { %p5035_p8 = pneg %p5021_p2 }
  0x25   : > { %s4647_s23 = scalar_lea.hbm %s5813_s1, 2048 }
  0x26   : > { %p4648_p7 = scmp.ne.s32.totalorder %s5813_s1, %s4647_s23  ;;  %p4654_p1 = scmp.lt.u32.totalorder %s4647_s23, %s5813_s1 }
  0x28   : > { %p4650_p9 = pnand %p5035_p8, %p4648_p7 }
  0x2a   : > { %p4651_p10 = pneg %p4650_p9 }
  0x2c   : > { %p4656_p0 = pnand %p4654_p1, %p4651_p10 }
  0x2e   : > { %4659 = shalt.err (!%p4656_p0)
}
  0x2f   : > { %s4660_s19 = scalar_lea.vmem %s227_s17, 2048  ;;  %p4668_p11 = scmp.lt.s32.totalorder %s227_s17, %s227_s17 }
  0x30   : > { %p4661_p4 = scmp.ne.s32.totalorder %s227_s17, %s4660_s19  ;;  %p4669_p6 = scmp.lt.s32.totalorder %s4660_s19, %s4660_s19 }
  0x32   : > { %p4663_p3 = pnand %p4661_p4, %p5035_p8  ;;  %p4670_p13 = por %p4669_p6, %p4668_p11 }
  0x34   : > { %p4664_p12 = pneg %p4663_p3 }
  0x36   : > { %p4671_p5 = pnand %p4670_p13, %p4664_p12 }
  0x38   : > { %4674 = shalt.err (!%p4671_p5)
}
  0x39   : > { %s5790_s21 = smov 128   ;;  %s5792_s10 = smov 8  }
  0x3a   : > { %4501 = dma.hbm_to_vmem [thread:$0]  (!%p5021_p2), %s5813_s1, 2048, %s227_s17, [#allocation3], %s5790_s21, %s5790_s21, %s5792_s10  }
  0x3b   : > { %p5815_p4 = scmp.ne.s32.totalorder %s5806_s11, 0  ;;  %p5816_p0 = scmp.lt.s32.totalorder %s4897_s27, 2 }
  0x3c   : > { %s5818_s2 = sld [smem:[#allocation23_spill]] }
  0x3d   : > { %p5058_p3 = pnand %p5816_p0, %p5815_p4 }
  0x3f   : > { %s5817_s29 = scalar_select %p5058_p3, 1, 0 }
  0x42   : > { %s4675_s19 = scalar_lea.hbm %s5818_s2, 32 }
  0x43   : > { %p4676_p5 = scmp.ne.s32.totalorder %s5818_s2, %s4675_s19  ;;  %p4682_p12 = scmp.lt.u32.totalorder %s4675_s19, %s5818_s2 }
  0x45   : > { %p4678_p6 = pnand %p4676_p5, %p5035_p8 }
  0x47   : > { %p4679_p11 = pneg %p4678_p6 }
  0x49   : > { %p4684_p13 = pnand %p4682_p12, %p4679_p11 }
  0x4b   : > { %4687 = shalt.err (!%p4684_p13)
}
  0x4c   : > { %s4688_s11 = scalar_lea.vmem %s241_s20, 32  ;;  %p4696_p1 = scmp.lt.s32.totalorder %s241_s20, %s241_s20 }
  0x4d   : > { %p4689_p7 = scmp.ne.s32.totalorder %s241_s20, %s4688_s11  ;;  %p4697_p4 = scmp.lt.s32.totalorder %s4688_s11, %s4688_s11 }
  0x4f   : > { %p4691_p9 = pnand %p4689_p7, %p5035_p8  ;;  %p4698_p0 = por %p4697_p4, %p4696_p1 }
  0x51   : > { %p4692_p10 = pneg %p4691_p9 }
  0x53   : > { %p4699_p3 = pnand %p4698_p0, %p4692_p10 }
  0x55   : > { %4702 = shalt.err (!%p4699_p3)
}
  0x56   : > { %4504 = dma.hbm_to_vmem [thread:$0]  (!%p5021_p2), %s5818_s2, 32, %s241_s20, [#allocation6]  }
  0x57   : > { %s275_s23 = sand.u32 1, %s4897_s27   ;;  %s5791_s8 = sand.u32 1, %s4893_s26  }
  0x58   : > { %s4471_s16 = smul.u32 3072, %s5791_s8  ;;  %s5819_s5 = sld [smem:[#allocation24_spill]] }
  0x59   : > { %s4468_s19 = smul.u32 1536, %s4897_s27  ;;  %s5092_s21 = scalar_lea.sflag [#allocation3], %s275_s23 }
  0x5a   : > { %s279_s30 = scalar_lea.vmem [#allocation10], %s4471_s16  ;;  %p5820_p5 = scmp.ne.s32.totalorder %s5817_s29, 0 }
  0x5b   : > { %s286_s14 = sshll.u32 %s279_s30, 4  ;;  %s5090_s14 = int_to_ptr.vmem [resolvable:$true] %s286_s14 }
  0x5c   : > { %p5797_p6 = pneg %p5820_p5 }
  0x5e   : > { %s5088_s11 = scalar_lea.hbm %s5819_s5, %s4468_s19  ;;  %s4708_s17 = scalar_lea.hbm %s5819_s5, 98304 }
  0x5f   : > { %s4703_s20 = scalar_lea.hbm %s5088_s11, 49152  ;;  %p4709_p13 = scmp.lt.u32.totalorder %s5088_s11, %s5819_s5 }
  0x60   : > { %p4704_p3 = scmp.ne.s32.totalorder %s5088_s11, %s4703_s20  ;;  %p4710_p7 = scmp.lt.u32.totalorder %s4708_s17, %s4703_s20 }
  0x61   : > { %p4712_p10 = scmp.lt.u32.totalorder %s4703_s20, %s5088_s11 }
  0x62   : > { %p4706_p11 = pnand %p5797_p6, %p4704_p3  ;;  %p4711_p9 = por %p4710_p7, %p4709_p13 }
  0x64   : > { %p4707_p12 = pneg %p4706_p11  ;;  %p4713_p1 = por %p4712_p10, %p4711_p9 }
  0x66   : > { %p4714_p4 = pnand %p4713_p1, %p4707_p12 }
  0x68   : > { %4717 = shalt.err (!%p4714_p4)
}
  0x69   : > { %s4718_s23 = scalar_lea.vmem %s5090_s14, 49152  ;;  %s4903_s16 = smov [#allocation10]  }
  0x6a   : > { %p4719_p0 = scmp.ne.s32.totalorder %s5090_s14, %s4718_s23  ;;  %s4723_s30 = sshll.u32 %s4903_s16, 4  ;;  %s4724_s30 = int_to_ptr.vmem [resolvable:$false] %s4723_s30 }
  0x6b   : > { %s4725_s10 = scalar_lea.vmem %s4724_s30, 98304  ;;  %p4726_p2 = scmp.lt.s32.totalorder %s5090_s14, %s4724_s30 }
  0x6c   : > { %p4721_p3 = pnand %p4719_p0, %p5797_p6  ;;  %p4727_p13 = scmp.lt.s32.totalorder %s4725_s10, %s4718_s23 }
  0x6e   : > { %p4722_p11 = pneg %p4721_p3  ;;  %p4728_p7 = por %p4727_p13, %p4726_p2 }
  0x70   : > { %p4729_p9 = pnand %p4728_p7, %p4722_p11 }
  0x72   : > { %4732 = shalt.err (!%p4729_p9)
}
  0x73   : > { %s4904_s8 = smov 3072   ;;  %s4905_s20 = smov 1536  }
  0x74   : > { %s4906_s19 = smov 96   ;;  %s4907_s22 = smov [#allocation7]  }
  0x75   : > { %4514 = dma.hbm_to_vmem [thread:$0]  (!%p5820_p5), %s5088_s11, 49152, %s5090_s14, %s5092_s21, %s4904_s8, %s4905_s20, %s4906_s19  }
  0x76   : > { %s250_s17 = sshll.u32 %s4907_s22, 4  ;;  %s4908_s16 = smov [#allocation8]   ;;  %s251_s17 = int_to_ptr.vmem [resolvable:$true] %s250_s17 }
  0x77   : > { %s264_s1 = sshll.u32 %s4908_s16, 4  ;;  %s4733_s10 = scalar_lea.hbm %s5777_s3, 4096  ;;  %s265_s1 = int_to_ptr.vmem [resolvable:$true] %s264_s1 }
  0x78   : > { %p4734_p2 = scmp.ne.s32.totalorder %s5777_s3, %s4733_s10  ;;  %p4740_p1 = scmp.lt.u32.totalorder %s4733_s10, %s5777_s3 }
  0x7a   : > { %p4736_p12 = pnand %p4734_p2, %p5035_p8 }
  0x7c   : > { %p4737_p10 = pneg %p4736_p12 }
  0x7e   : > { %p4742_p4 = pnand %p4740_p1, %p4737_p10 }
  0x80   : > { %4745 = shalt.err (!%p4742_p4)
}
  0x81   : > { %s4746_s11 = scalar_lea.vmem %s251_s17, 4096  ;;  %p4754_p13 = scmp.lt.s32.totalorder %s251_s17, %s251_s17 }
  0x82   : > { %p4747_p0 = scmp.ne.s32.totalorder %s251_s17, %s4746_s11  ;;  %p4755_p7 = scmp.lt.s32.totalorder %s4746_s11, %s4746_s11 }
  0x84   : > { %p4749_p3 = pnand %p4747_p0, %p5035_p8  ;;  %p4756_p9 = por %p4755_p7, %p4754_p13 }
  0x86   : > { %p4750_p11 = pneg %p4749_p3 }
  0x88   : > { %p4757_p6 = pnand %p4756_p9, %p4750_p11 }
  0x8a   : > { %4760 = shalt.err (!%p4757_p6)
}
  0x8b   : > { %p5821_p2 = scmp.ne.s32.totalorder %s5812_s18, 0  ;;  %s5822_s2 = smov 8  }
  0x8c   : > { %s5823_s5 = smov 128   ;;  %s5824_s14 = sand.u32 1, %s4893_s26  }
  0x8d   : > { %4507 = dma.hbm_to_vmem [thread:$0]  (!%p5821_p2), %s5777_s3, 4096, %s251_s17, [#allocation6], %s5823_s5, %s5823_s5, %s5822_s2  }
  0x8e   : > { %s4472_s8 = smul.u32 24, %s5824_s14  ;;  %s4761_s22 = scalar_lea.hbm %s5778_s4, 32 }
  0x8f   : > { %p4762_p6 = scmp.ne.s32.totalorder %s5778_s4, %s4761_s22  ;;  %p4768_p1 = scmp.lt.u32.totalorder %s4761_s22, %s5778_s4 }
  0x91   : > { %p4764_p12 = pnand %p4762_p6, %p5035_p8 }
  0x93   : > { %p4765_p10 = pneg %p4764_p12 }
  0x95   : > { %p4770_p4 = pnand %p4768_p1, %p4765_p10 }
  0x97   : > { %4773 = shalt.err (!%p4770_p4)
}
  0x98   : > { %s4774_s17 = scalar_lea.vmem %s265_s1, 32  ;;  %p4782_p13 = scmp.lt.s32.totalorder %s265_s1, %s265_s1 }
  0x99   : > { %p4775_p0 = scmp.ne.s32.totalorder %s265_s1, %s4774_s17  ;;  %p4783_p7 = scmp.lt.s32.totalorder %s4774_s17, %s4774_s17 }
  0x9b   : > { %p4777_p3 = pnand %p4775_p0, %p5035_p8  ;;  %p4784_p9 = por %p4783_p7, %p4782_p13 }
  0x9d   : > { %p4778_p11 = pneg %p4777_p3 }
  0x9f   : > { %p4785_p5 = pnand %p4784_p9, %p4778_p11 }
  0xa1   : > { %4788 = shalt.err (!%p4785_p5)
}
  0xa2   : > { %4510 = dma.hbm_to_vmem [thread:$0]  (!%p5821_p2), %s5778_s4, 32, %s265_s1, [#allocation9]  }
  0xa3   : > { %s4469_s5 = smul.u32 384, %s4897_s27  ;;  %s300_s7 = scalar_lea.vmem [#allocation11], %s4472_s8 }
  0xa4   : > { %s308_s24 = sshll.u32 %s300_s7, 4  ;;  %p5825_p6 = scmp.ne.s32.totalorder %s5817_s29, 0  ;;  %s309_s24 = int_to_ptr.vmem [resolvable:$true] %s308_s24 }
  0xa5   : > { %s306_s20 = scalar_lea.hbm %s5780_s6, %s4469_s5  ;;  %s4794_s16 = scalar_lea.hbm %s5780_s6, 768 }
  0xa6   : > { %s4789_s19 = scalar_lea.hbm %s306_s20, 384  ;;  %p5826_p5 = pneg %p5825_p6 }
  0xa7   : > { %p4790_p8 = scmp.ne.s32.totalorder %s306_s20, %s4789_s19  ;;  %p4795_p2 = scmp.lt.u32.totalorder %s306_s20, %s5780_s6 }
  0xa8   : > { %p4796_p1 = scmp.lt.u32.totalorder %s4794_s16, %s4789_s19  ;;  %p4798_p0 = scmp.lt.u32.totalorder %s4789_s19, %s306_s20 }
  0xa9   : > { %p4792_p12 = pnand %p4790_p8, %p5826_p5 }
  0xaa   : > { %p4797_p4 = por %p4796_p1, %p4795_p2 }
  0xab   : > { %p4793_p10 = pneg %p4792_p12 }
  0xac   : > { %p4799_p3 = por %p4798_p0, %p4797_p4 }
  0xae   : > { %p4800_p11 = pnand %p4799_p3, %p4793_p10 }
  0xb0   : > { %4803 = shalt.err (!%p4800_p11)
}
  0xb1   : > { %s4804_s8 = scalar_lea.vmem %s309_s24, 384  ;;  %p5827_p7 = pmov %p5826_p5 }
  0xb2   : > { %p4805_p13 = scmp.ne.s32.totalorder %s309_s24, %s4804_s8  ;;  %s4909_s23 = smov [#allocation11]  }
  0xb3   : > { %s4809_s10 = sshll.u32 %s4909_s23, 4  ;;  %s4810_s10 = int_to_ptr.vmem [resolvable:$false] %s4809_s10 }
  0xb4   : > { %p4807_p9 = pnand %p4805_p13, %p5827_p7  ;;  %s4811_s17 = scalar_lea.vmem %s4810_s10, 768 }
  0xb5   : > { %p4812_p5 = scmp.lt.s32.totalorder %s309_s24, %s4810_s10  ;;  %p4813_p12 = scmp.lt.s32.totalorder %s4811_s17, %s4804_s8 }
  0xb6   : > { %p4808_p8 = pneg %p4807_p9 }
  0xb7   : > { %p4814_p1 = por %p4813_p12, %p4812_p5 }
  0xb9   : > { %p4815_p2 = pnand %p4814_p1, %p4808_p8 }
  0xbb   : > { %4818 = shalt.err (!%p4815_p2)
}
  0xbc   : > { %4517 = dma.hbm_to_vmem [thread:$0]  (!%p5825_p6), %s306_s20, 384, %s309_s24, %s5092_s21  }
  0xbd   : > { %p5828_p10 = scmp.ne.s32.totalorder %s5811_s15, 0 }
  0xbe   : > { %p5829_p4 = scmp.eq.s32.totalorder (!%p5828_p10), %s4974_s28, 0 }
  0xbf   : > { %317 = sbr.rel (%p5828_p10) target bundleno = 1242 (0x4da), region = 48 }
  0xc6   : > { %4864 = dma.done.wait (%p5829_p4), [#allocation3], 2048   ;;  %p5830_p0 = pmov %p5829_p4 }
  0xc8   : > { %4866 = vsyncadd (%p5830_p0), [#allocation3], 4294965248  ;;  %p5831_p3 = pmov %p5830_p0 }
  0xc9   : > { %p5832_p11 = pmov %p5830_p0 }
  0xca   : > { %4868 = dma.done.wait (%p5831_p3), [#allocation6], 4128  }
  0xcb   : > { %4870 = vsyncadd (%p5832_p11), [#allocation6], 4294963168  ;;  %p5833_p13 = pmov %p5830_p0 }
  0xcc   : > { %p5834_p6 = pmov %p5830_p0 }
  0xcd   : > { %4872 = dma.done.wait (%p5833_p13), [#allocation9], 32  }
  0xce   : > { %4874 = vsyncadd (%p5834_p6), [#allocation9], 4294967264  ;;  %s335_s15 = sand.u32 1, %s4974_s28   ;;  %s5196_s21 = sand.u32 1, %s4889_s25  }
  0xcf   : > { %s4473_s29 = smul.u32 3072, %s5196_s21  ;;  %s336_s11 = scalar_lea.sflag [#allocation3], %s335_s15 }
  0xd0   : > { %p5835_p7 = scmp.ne.s32.totalorder %s5807_s12, 0 }
  0xd1   : > { %s5199_s2 = scalar_lea.vmem [#allocation10], %s4473_s29 }
  0xd2   : > { %4876 = dma.done.wait (%p5835_p7), %s336_s11, 49536  }
  0xd3   : > { %4878 = vsyncadd (%p5835_p7), %s336_s11, 4294917760  ;;  %v4910_v0 = vmov 0   ;;  %v4575_v1 = vld [vmem:[#allocation2 + $0x4] ss:$8 sps:$4 sm:$0xff]   ;;  %v4577_v2 = vld [vmem:[#allocation2] ss:$8 sps:$4 sm:$0xff]  }
  0xd4   : > { %530 = vmatprep.mubr.bf16.mxu0 %v4910_v0  ;;  %498 = vmatprep.subr.bf16.mxu0 %v4575_v1  ;;  %v4578_v3 = vld [vmem:[#allocation2 + $0x14] ss:$8 sps:$4 sm:$0xff]   ;;  %v4580_v4 = vld [vmem:[#allocation2 + $0x10] ss:$8 sps:$4 sm:$0xff]   ;;  %v4581_v5 = vld [vmem:[#allocation2 + $0x24] ss:$8 sps:$4 sm:$0xff]  }
  0xd5   : > { %499 = vmatpush1.bf16.msra.mxu0 %v4577_v2  ;;  %v4583_v6 = vld [vmem:[#allocation2 + $0x20] ss:$8 sps:$4 sm:$0xff]   ;;  %v4584_v7 = vld [vmem:[#allocation2 + $0x34] ss:$8 sps:$4 sm:$0xff]   ;;  %v4586_v8 = vld [vmem:[#allocation2 + $0x30] ss:$8 sps:$4 sm:$0xff]  }
  0xd6   : > { %500 = vmatprep.subr.bf16.mxu0 %v4578_v3  ;;  %v4587_v9 = vld [vmem:[#allocation2 + $0x44] ss:$8 sps:$4 sm:$0xff]   ;;  %v4602_v12 = vld [vmem:[#allocation7 + $0x14] ss:$8 sps:$4 sm:$0xff]   ;;  %v4604_v14 = vld [vmem:[#allocation7 + $0x10] ss:$8 sps:$4 sm:$0xff]  }
  0xd7   : > { %v4599_v10 = vld [vmem:[#allocation7 + $0x4] ss:$8 sps:$4 sm:$0xff]   ;;  %v4601_v11 = vld [vmem:[#allocation7] ss:$8 sps:$4 sm:$0xff]   ;;  %v4590_v16 = vld [vmem:[#allocation2 + $0x54] ss:$8 sps:$4 sm:$0xff]  }
  0xd8   : > { %747 = vmatprep.subr.bf16.mxu1 %v4599_v10  ;;  %v4589_v13 = vld [vmem:[#allocation2 + $0x40] ss:$8 sps:$4 sm:$0xff]   ;;  %v4592_v17 = vld [vmem:[#allocation2 + $0x50] ss:$8 sps:$4 sm:$0xff]   ;;  %v4593_v20 = vld [vmem:[#allocation2 + $0x64] ss:$8 sps:$4 sm:$0xff]  }
  0xd9   : > { %501 = vmatpush1.bf16.msra.mxu0 %v4580_v4  ;;  %748 = vmatpush1.bf16.msra.mxu1 %v4601_v11  ;;  %v4605_v15 = vld [vmem:[#allocation7 + $0x24] ss:$8 sps:$4 sm:$0xff]   ;;  %v4607_v18 = vld [vmem:[#allocation7 + $0x20] ss:$8 sps:$4 sm:$0xff]   ;;  %v4608_v19 = vld [vmem:[#allocation7 + $0x34] ss:$8 sps:$4 sm:$0xff]  }
  0xda   : > { %502 = vmatprep.subr.bf16.mxu0 %v4581_v5  ;;  %749 = vmatprep.subr.bf16.mxu1 %v4602_v12  ;;  %v4595_v21 = vld [vmem:[#allocation2 + $0x60] ss:$8 sps:$4 sm:$0xff]   ;;  %v4610_v22 = vld [vmem:[#allocation7 + $0x30] ss:$8 sps:$4 sm:$0xff]   ;;  %s4474_s7 = smul.u32 24, %s5196_s21  ;;  %s5836_s16 = sld [smem:[#allocation25_spill]] }
  0xdb   : > { %v4611_v23 = vld [vmem:[#allocation7 + $0x44] ss:$8 sps:$4 sm:$0xff]   ;;  %v4596_v24 = vld [vmem:[#allocation2 + $0x74] ss:$8 sps:$4 sm:$0xff]   ;;  %v388_v26 = vld [vmem:[%s5774_s0] sm:$0x3] }
  0xdc   : > { %v4598_v25 = vld [vmem:[#allocation2 + $0x70] ss:$8 sps:$4 sm:$0xff]   ;;  %v4613_v27 = vld [vmem:[#allocation7 + $0x40] ss:$8 sps:$4 sm:$0xff]   ;;  %v389_v30 = vpack.c.bf16 %v388_v26, %v388_v26  ;;  %s5537_s24 = scalar_lea.vmem [#allocation11], %s4474_s7  ;;  %s4475_s14 = smul.u32 48, %s5196_s21 }
  0xdd   : > { %503 = vmatpush1.bf16.msra.mxu0 %v4583_v6  ;;  %750 = vmatpush1.bf16.msra.mxu1 %v4604_v14  ;;  %v4614_v28 = vld [vmem:[#allocation7 + $0x54] ss:$8 sps:$4 sm:$0xff]   ;;  %v4616_v29 = vld [vmem:[#allocation7 + $0x50] ss:$8 sps:$4 sm:$0xff]   ;;  %v4617_v31 = vld [vmem:[#allocation7 + $0x64] ss:$8 sps:$4 sm:$0xff]  }
  0xde   : > { %504 = vmatprep.subr.bf16.mxu0 %v4584_v7  ;;  %751 = vmatprep.subr.bf16.mxu1 %v4605_v15  ;;  %v4619_v32 = vld [vmem:[#allocation7 + $0x60] ss:$8 sps:$4 sm:$0xff]   ;;  %v4620_v33 = vld [vmem:[#allocation7 + $0x74] ss:$8 sps:$4 sm:$0xff]   ;;  %v4622_v34 = vld [vmem:[#allocation7 + $0x70] ss:$8 sps:$4 sm:$0xff]  }
  0xdf   : > { %v4623_v35 = vld [vmem:[#allocation7 + $0x84] ss:$8 sps:$4 sm:$0xff]   ;;  %v4625_v36 = vld [vmem:[#allocation7 + $0x80] ss:$8 sps:$4 sm:$0xff]   ;;  %v4626_v37 = vld [vmem:[#allocation7 + $0x94] ss:$8 sps:$4 sm:$0xff]  }
  0xe0   : > { %v4628_v38 = vld [vmem:[#allocation7 + $0x90] ss:$8 sps:$4 sm:$0xff]   ;;  %v4629_v39 = vld [vmem:[#allocation7 + $0xa4] ss:$8 sps:$4 sm:$0xff]   ;;  %v4631_v40 = vld [vmem:[#allocation7 + $0xa0] ss:$8 sps:$4 sm:$0xff]  }
  0xe1   : > { %505 = vmatpush1.bf16.msra.mxu0 %v4586_v8  ;;  %752 = vmatpush1.bf16.msra.mxu1 %v4607_v18  ;;  %v4632_v41 = vld [vmem:[#allocation7 + $0xb4] ss:$8 sps:$4 sm:$0xff]   ;;  %v4634_v42 = vld [vmem:[#allocation7 + $0xb0] ss:$8 sps:$4 sm:$0xff]   ;;  %v4635_v43 = vld [vmem:[#allocation7 + $0xc4] ss:$8 sps:$4 sm:$0xff]  }
  0xe2   : > { %506 = vmatprep.subr.bf16.mxu0 %v4587_v9  ;;  %753 = vmatprep.subr.bf16.mxu1 %v4608_v19  ;;  %v4637_v44 = vld [vmem:[#allocation7 + $0xc0] ss:$8 sps:$4 sm:$0xff]   ;;  %v4638_v45 = vld [vmem:[#allocation7 + $0xd4] ss:$8 sps:$4 sm:$0xff]   ;;  %v4640_v46 = vld [vmem:[#allocation7 + $0xd0] ss:$8 sps:$4 sm:$0xff]  }
  0xe3   : > { %v4641_v47 = vld [vmem:[#allocation7 + $0xe4] ss:$8 sps:$4 sm:$0xff]   ;;  %v4643_v48 = vld [vmem:[#allocation7 + $0xe0] ss:$8 sps:$4 sm:$0xff]   ;;  %v4644_v49 = vld [vmem:[#allocation7 + $0xf4] ss:$8 sps:$4 sm:$0xff]  }
  0xe4   : > { %v4646_v50 = vld [vmem:[#allocation7 + $0xf0] ss:$8 sps:$4 sm:$0xff]   ;;  %v792_v51 = vld [vmem:[%s5199_s2] sm:$0xff]  ;;  %s5575_s9 = scalar_lea.vmem [#allocation12], %s4475_s14  ;;  %s4470_s20 = smul.u32 768, %s4974_s28 }
  0xe5   : > { %507 = vmatpush1.bf16.msra.mxu0 %v4589_v13  ;;  %754 = vmatpush1.bf16.msra.mxu1 %v4610_v22  ;;  %v804_v52 = vld [vmem:[%s5199_s2 + $0x60] sm:$0xff]  ;;  %v5211_v53 = vld [vmem:[%s5199_s2 + $0x8] sm:$0xff]  ;;  %s3891_s19 = sshll.u32 %s5575_s9, 4  ;;  %s3877_s1 = scalar_lea.sflag [#allocation4], %s5196_s21  ;;  %s5731_s19 = int_to_ptr.vmem [resolvable:$true] %s3891_s19 }
  0xe6   : > { %508 = vmatprep.subr.bf16.mxu0 %v4590_v16  ;;  %755 = vmatprep.subr.bf16.mxu1 %v4611_v23  ;;  %v4081_v54 = vcombine.low %v792_v51, %v804_v52  ;;  %v4082_v55 = vcombine.high %v792_v51, %v804_v52  ;;  %v5214_v56 = vld [vmem:[%s5199_s2 + $0x68] sm:$0xff]  ;;  %v816_v57 = vld [vmem:[%s5199_s2 + $0xc0] sm:$0xff]  ;;  %s5729_s30 = scalar_lea.hbm %s5836_s16, %s4470_s20  ;;  %s4819_s8 = scalar_lea.vmem %s5731_s19, 768 }
  0xe7   : > { %v828_v58 = vld [vmem:[%s5199_s2 + $0x120] sm:$0xff]  ;;  %v4083_v59 = vcombine.low %v5211_v53, %v5214_v56  ;;  %v4084_v60 = vcombine.high %v5211_v53, %v5214_v56  ;;  %v913_v56 = vld [vmem:[%s5199_s2 + $0x3c8] sm:$0xff]  ;;  %p4820_p9 = scmp.ne.s32.totalorder %s5731_s19, %s4819_s8  ;;  %p5837_p8 = scmp.ne.s32.totalorder %s5808_s13, 0 }
  0xe8   : > { %v4106_v61 = vcombine.high %v816_v57, %v828_v58  ;;  %v4105_v62 = vcombine.low %v816_v57, %v828_v58  ;;  %v840_v63 = vld [vmem:[%s5199_s2 + $0x180] sm:$0xff]  ;;  %s4912_s28 = smov [#allocation12]  }
  0xe9   : > { %509 = vmatpush1.bf16.msra.mxu0 %v4592_v17  ;;  %756 = vmatpush1.bf16.msra.mxu1 %v4613_v27  ;;  %v852_v0 = vld [vmem:[%s5199_s2 + $0x1e0] sm:$0xff]  ;;  %p4821_p5 = pnand %p4820_p9, %p5837_p8  ;;  %s4823_s23 = sshll.u32 %s4912_s28, 4  ;;  %s4824_s23 = int_to_ptr.vmem [resolvable:$false] %s4823_s23 }
  0xea   : > { %510 = vmatprep.subr.bf16.mxu0 %v4593_v20  ;;  %757 = vmatprep.subr.bf16.mxu1 %v4614_v28  ;;  %v4130_v1 = vcombine.high %v840_v63, %v852_v0  ;;  %v4129_v2 = vcombine.low %v840_v63, %v852_v0  ;;  %v864_v3 = vld [vmem:[%s5199_s2 + $0x240] sm:$0xff]  ;;  %s4825_s10 = scalar_lea.vmem %s4824_s23, 1536  ;;  %p4826_p1 = scmp.lt.s32.totalorder %s5731_s19, %s4824_s23 }
  0xeb   : > { %v876_v4 = vld [vmem:[%s5199_s2 + $0x2a0] sm:$0xff]  ;;  %p4822_p12 = pneg %p4821_p5  ;;  %p4827_p2 = scmp.lt.s32.totalorder %s4825_s10, %s4819_s8 }
  0xec   : > { %v4154_v5 = vcombine.high %v864_v3, %v876_v4  ;;  %v4153_v6 = vcombine.low %v864_v3, %v876_v4  ;;  %v888_v7 = vld [vmem:[%s5199_s2 + $0x300] sm:$0xff] }
  0xed   : > { %511 = vmatpush1.bf16.msra.mxu0 %v4595_v21  ;;  %758 = vmatpush1.bf16.msra.mxu1 %v4616_v29  ;;  %v900_v8 = vld [vmem:[%s5199_s2 + $0x360] sm:$0xff]  ;;  %p4828_p10 = por %p4827_p2, %p4826_p1 }
  0xee   : > { %512 = vmatprep.subr.bf16.mxu0 %v4596_v24  ;;  %759 = vmatprep.subr.bf16.mxu1 %v4617_v31  ;;  %v4178_v9 = vcombine.high %v888_v7, %v900_v8  ;;  %v4177_v10 = vcombine.low %v888_v7, %v900_v8  ;;  %v912_v11 = vld [vmem:[%s5199_s2 + $0x3c0] sm:$0xff]  ;;  %v853_v7 = vld [vmem:[%s5199_s2 + $0x1e8] sm:$0xff] }
  0xef   : > { %v924_v12 = vld [vmem:[%s5199_s2 + $0x420] sm:$0xff]  ;;  %p4829_p4 = pnand %p4828_p10, %p4822_p12 }
  0xf0   : > { %v4202_v13 = vcombine.high %v912_v11, %v924_v12  ;;  %v4201_v14 = vcombine.low %v912_v11, %v924_v12  ;;  %v936_v15 = vld [vmem:[%s5199_s2 + $0x480] sm:$0xff]  ;;  %v877_v11 = vld [vmem:[%s5199_s2 + $0x2a8] sm:$0xff] }
  0xf1   : > { %513 = vmatpush1.bf16.msra.mxu0 %v4598_v25  ;;  %760 = vmatpush1.bf16.msra.mxu1 %v4619_v32  ;;  %v948_v16 = vld [vmem:[%s5199_s2 + $0x4e0] sm:$0xff] }
  0xf2   : > { %761 = vmatprep.subr.bf16.mxu1 %v4620_v33  ;;  %3222 = vmatprep.subr.bf16.mxu0 %v4082_v55  ;;  %v4226_v17 = vcombine.high %v936_v15, %v948_v16  ;;  %v4225_v18 = vcombine.low %v936_v15, %v948_v16  ;;  %v960_v19 = vld [vmem:[%s5199_s2 + $0x540] sm:$0xff]  ;;  %v901_v15 = vld [vmem:[%s5199_s2 + $0x368] sm:$0xff] }
  0xf3   : > { %v972_v20 = vld [vmem:[%s5199_s2 + $0x5a0] sm:$0xff] }
  0xf4   : > { %531 = vmatmul.mubr.bf16.vlgmr.msra.gmra.mrb[0].mxu0 %v389_v30  ;;  %v4250_v21 = vcombine.high %v960_v19, %v972_v20  ;;  %v4249_v22 = vcombine.low %v960_v19, %v972_v20  ;;  %v984_v23 = vld [vmem:[%s5199_s2 + $0x600] sm:$0xff]  ;;  %v937_v19 = vld [vmem:[%s5199_s2 + $0x488] sm:$0xff] }
  0xf5   : > { %762 = vmatpush1.bf16.msra.mxu1 %v4622_v34  ;;  %3223 = vmatpush1.bf16.msra.mxu0 %v4081_v54  ;;  %v996_v24 = vld [vmem:[%s5199_s2 + $0x660] sm:$0xff]  ;;  %v949_v20 = vld [vmem:[%s5199_s2 + $0x4e8] sm:$0xff] }
  0xf6   : > { %763 = vmatprep.subr.bf16.mxu1 %v4623_v35  ;;  %3224 = vmatprep.subr.bf16.mxu0 %v4106_v61  ;;  %v4274_v25 = vcombine.high %v984_v23, %v996_v24  ;;  %v4273_v26 = vcombine.low %v984_v23, %v996_v24  ;;  %v1008_v27 = vld [vmem:[%s5199_s2 + $0x6c0] sm:$0xff]  ;;  %v961_v23 = vld [vmem:[%s5199_s2 + $0x548] sm:$0xff] }
  0xf7   : > { %v1020_v28 = vld [vmem:[%s5199_s2 + $0x720] sm:$0xff]  ;;  %v973_v24 = vld [vmem:[%s5199_s2 + $0x5a8] sm:$0xff] }
  0xf8   : > { %v4298_v29 = vcombine.high %v1008_v27, %v1020_v28  ;;  %v4297_v30 = vcombine.low %v1008_v27, %v1020_v28  ;;  %v1032_v31 = vld [vmem:[%s5199_s2 + $0x780] sm:$0xff]  ;;  %v985_v27 = vld [vmem:[%s5199_s2 + $0x608] sm:$0xff] }
  0xf9   : > { %764 = vmatpush1.bf16.msra.mxu1 %v4625_v36  ;;  %3225 = vmatpush1.bf16.msra.mxu0 %v4105_v62  ;;  %v1044_v32 = vld [vmem:[%s5199_s2 + $0x7e0] sm:$0xff]  ;;  %v997_v28 = vld [vmem:[%s5199_s2 + $0x668] sm:$0xff] }
  0xfa   : > { %765 = vmatprep.subr.bf16.mxu1 %v4626_v37  ;;  %3226 = vmatprep.subr.bf16.mxu0 %v4130_v1  ;;  %v4322_v33 = vcombine.high %v1032_v31, %v1044_v32  ;;  %v4321_v34 = vcombine.low %v1032_v31, %v1044_v32  ;;  %v1056_v35 = vld [vmem:[%s5199_s2 + $0x840] sm:$0xff]  ;;  %v817_v1 = vld [vmem:[%s5199_s2 + $0xc8] sm:$0xff] }
  0xfb   : > { %v1068_v36 = vld [vmem:[%s5199_s2 + $0x8a0] sm:$0xff]  ;;  %v1009_v31 = vld [vmem:[%s5199_s2 + $0x6c8] sm:$0xff] }
  0xfc   : > { %v4346_v37 = vcombine.high %v1056_v35, %v1068_v36  ;;  %v1021_v32 = vld [vmem:[%s5199_s2 + $0x728] sm:$0xff] }
  0xfd   : > { %766 = vmatpush1.bf16.msra.mxu1 %v4628_v38  ;;  %3227 = vmatpush1.bf16.msra.mxu0 %v4129_v2  ;;  %v4345_v38 = vcombine.low %v1056_v35, %v1068_v36  ;;  %v829_v2 = vld [vmem:[%s5199_s2 + $0x128] sm:$0xff] }
  0xfe   : > { %767 = vmatprep.subr.bf16.mxu1 %v4629_v39  ;;  %3228 = vmatprep.subr.bf16.mxu0 %v4154_v5  ;;  %v1080_v39 = vld [vmem:[%s5199_s2 + $0x900] sm:$0xff]  ;;  %v4108_v5 = vcombine.high %v817_v1, %v829_v2  ;;  %v4107_v8 = vcombine.low %v817_v1, %v829_v2  ;;  %v1033_v35 = vld [vmem:[%s5199_s2 + $0x788] sm:$0xff] }
  0xff   : > { %v1045_v36 = vld [vmem:[%s5199_s2 + $0x7e8] sm:$0xff]  ;;  %v1152_v2 = vld [vmem:[%s5199_s2 + $0xb40] sm:$0xff] }
 0x101   : > { %768 = vmatpush1.bf16.msra.mxu1 %v4631_v40  ;;  %3229 = vmatpush1.bf16.msra.mxu0 %v4153_v6  ;;  %v1092_v40 = vld [vmem:[%s5199_s2 + $0x960] sm:$0xff]  ;;  %v841_v6 = vld [vmem:[%s5199_s2 + $0x188] sm:$0xff] }
 0x102   : > { %769 = vmatprep.subr.bf16.mxu1 %v4632_v41  ;;  %3230 = vmatprep.subr.bf16.mxu0 %v4178_v9  ;;  %v4370_v41 = vcombine.high %v1080_v39, %v1092_v40  ;;  %v4132_v9 = vcombine.high %v841_v6, %v853_v7  ;;  %v4131_v12 = vcombine.low %v841_v6, %v853_v7  ;;  %v1165_v6 = vld [vmem:[%s5199_s2 + $0xba8] sm:$0xff] }
 0x105   : > { %770 = vmatpush1.bf16.msra.mxu1 %v4634_v42  ;;  %3231 = vmatpush1.bf16.msra.mxu0 %v4177_v10  ;;  %v4369_v42 = vcombine.low %v1080_v39, %v1092_v40  ;;  %v865_v10 = vld [vmem:[%s5199_s2 + $0x248] sm:$0xff] }
 0x106   : > { %771 = vmatprep.subr.bf16.mxu1 %v4635_v43  ;;  %3232 = vmatprep.subr.bf16.mxu0 %v4202_v13  ;;  %v1104_v43 = vld [vmem:[%s5199_s2 + $0x9c0] sm:$0xff]  ;;  %v4156_v13 = vcombine.high %v865_v10, %v877_v11  ;;  %v4155_v16 = vcombine.low %v865_v10, %v877_v11  ;;  %v1057_v39 = vld [vmem:[%s5199_s2 + $0x848] sm:$0xff]  ;;  %v794_v10 = vld [vmem:[%s5199_s2 + $0x10] sm:$0xff] }
 0x107   : > { %v1069_v40 = vld [vmem:[%s5199_s2 + $0x8a8] sm:$0xff]  ;;  %v806_v11 = vld [vmem:[%s5199_s2 + $0x70] sm:$0xff] }
 0x109   : > { %772 = vmatpush1.bf16.msra.mxu1 %v4637_v44  ;;  %3233 = vmatpush1.bf16.msra.mxu0 %v4201_v14  ;;  %v1116_v44 = vld [vmem:[%s5199_s2 + $0xa20] sm:$0xff]  ;;  %v889_v14 = vld [vmem:[%s5199_s2 + $0x308] sm:$0xff] }
 0x10a   : > { %773 = vmatprep.subr.bf16.mxu1 %v4638_v45  ;;  %3234 = vmatprep.subr.bf16.mxu0 %v4226_v17  ;;  %v4394_v45 = vcombine.high %v1104_v43, %v1116_v44  ;;  %v4180_v53 = vcombine.high %v889_v14, %v901_v15  ;;  %v4179_v17 = vcombine.low %v889_v14, %v901_v15  ;;  %v807_v14 = vld [vmem:[%s5199_s2 + $0x78] sm:$0xff] }
 0x10b   : > { %v4085_v15 = vcombine.low %v794_v10, %v806_v11 }
 0x10d   : > { %774 = vmatpush1.bf16.msra.mxu1 %v4640_v46  ;;  %3235 = vmatpush1.bf16.msra.mxu0 %v4225_v18  ;;  %v4393_v46 = vcombine.low %v1104_v43, %v1116_v44  ;;  %v1081_v43 = vld [vmem:[%s5199_s2 + $0x908] sm:$0xff] }
 0x10e   : > { %775 = vmatprep.subr.bf16.mxu1 %v4641_v47  ;;  %3236 = vmatprep.subr.bf16.mxu0 %v4250_v21  ;;  %v408_v47 = vlaneseq  ;;  %v1093_v44 = vld [vmem:[%s5199_s2 + $0x968] sm:$0xff] }
 0x111   : > { %776 = vmatpush1.bf16.msra.mxu1 %v4643_v48  ;;  %3237 = vmatpush1.bf16.msra.mxu0 %v4249_v22  ;;  %v5246_v48 = vshrl.u32 %v408_v47, 7  ;;  %v4228_v22 = vcombine.high %v937_v19, %v949_v20  ;;  %v1105_v47 = vld [vmem:[%s5199_s2 + $0x9c8] sm:$0xff] }
 0x112   : > { %777 = vmatprep.subr.bf16.mxu1 %v4644_v49  ;;  %3238 = vmatprep.subr.bf16.mxu0 %v4274_v25  ;;  %v4227_v25 = vcombine.low %v937_v19, %v949_v20 }
 0x113   : > { %v5249_v49 = vsub.s32 0, %v5246_v48  ;;  %v5252_v51 = vsub.s32 1, %v5246_v48 }
 0x115   : > { %778 = vmatpush1.bf16.msra.mxu1 %v4646_v50  ;;  %3239 = vmatpush1.bf16.msra.mxu0 %v4273_v26  ;;  %v406_v50 = vld [vmem:[#allocation5] sm:$0x3]  ;;  %v4252_v26 = vcombine.high %v961_v23, %v973_v24 }
 0x116   : > { %3263 = vmatprep.subr.bf16.mxu1 %v4084_v60  ;;  %3240 = vmatprep.subr.bf16.mxu0 %v4298_v29  ;;  %v411_v52 = vrot.slane %v406_v50, %v5249_v49  ;;  %v415_v54 = vrot.slane %v406_v50, %v5252_v51  ;;  %v4251_v29 = vcombine.low %v961_v23, %v973_v24  ;;  %v1117_v50 = vld [vmem:[%s5199_s2 + $0xa28] sm:$0xff] }
 0x119   : > { %3241 = vmatpush1.bf16.msra.mxu0 %v4297_v30  ;;  %v4276_v30 = vcombine.high %v985_v27, %v997_v28 }
 0x11a   : > { %3242 = vmatprep.subr.bf16.mxu0 %v4322_v33  ;;  %v4275_v33 = vcombine.low %v985_v27, %v997_v28  ;;  %v830_v27 = vld [vmem:[%s5199_s2 + $0x130] sm:$0xff]  ;;  %v819_v28 = vld [vmem:[%s5199_s2 + $0xd8] sm:$0xff] }
 0x11d   : > { %3243 = vmatpush1.bf16.msra.mxu0 %v4321_v34  ;;  %v4300_v34 = vcombine.high %v1009_v31, %v1021_v32 }
 0x11e   : > { %3244 = vmatprep.subr.bf16.mxu0 %v4346_v37  ;;  %v4299_v37 = vcombine.low %v1009_v31, %v1021_v32  ;;  %v842_v32 = vld [vmem:[%s5199_s2 + $0x190] sm:$0xff] }
 0x121   : > { %3245 = vmatpush1.bf16.msra.mxu0 %v4345_v38  ;;  %v4324_v38 = vcombine.high %v1033_v35, %v1045_v36 }
 0x122   : > { %3246 = vmatprep.subr.bf16.mxu0 %v4370_v41  ;;  %v4323_v41 = vcombine.low %v1033_v35, %v1045_v36  ;;  %v854_v35 = vld [vmem:[%s5199_s2 + $0x1f0] sm:$0xff]  ;;  %v843_v36 = vld [vmem:[%s5199_s2 + $0x198] sm:$0xff] }
 0x125   : > { %3247 = vmatpush1.bf16.msra.mxu0 %v4369_v42  ;;  %v4348_v42 = vcombine.high %v1057_v39, %v1069_v40 }
 0x126   : > { %3248 = vmatprep.subr.bf16.mxu0 %v4394_v45  ;;  %v4347_v45 = vcombine.low %v1057_v39, %v1069_v40  ;;  %v4134_v40 = vcombine.high %v842_v32, %v854_v35 }
 0x129   : > { %3249 = vmatpush1.bf16.msra.mxu0 %v4393_v46  ;;  %v4372_v46 = vcombine.high %v1081_v43, %v1093_v44 }
 0x1c7   : > { %v532_v55 = vpop.f32.mrb[0].mxu0 }
 0x1c8   : > { %v533_v57 = vadd.f32 %v532_v55, %v411_v52  ;;  %v534_v58 = vpop.f32.mrb[1].mxu0  ;;  %v4371_v52 = vcombine.low %v1081_v43, %v1093_v44  ;;  %v4395_v55 = vcombine.low %v1105_v47, %v1117_v50  ;;  %v878_v43 = vld [vmem:[%s5199_s2 + $0x2b0] sm:$0xff]  ;;  %v867_v44 = vld [vmem:[%s5199_s2 + $0x258] sm:$0xff] }
 0x1c9   : > { %v535_v60 = vadd.f32 %v534_v58, %v415_v54  ;;  %v536_v61 = vpop.f32.mrb[2].mxu0  ;;  %v4396_v54 = vcombine.high %v1105_v47, %v1117_v50  ;;  %v1140_v58 = vld [vmem:[%s5199_s2 + $0xae0] sm:$0xff] }
 0x1ca   : > { %v539_v62 = vmax.f32 %v533_v57, 0.0  ;;  %v537_v63 = vpop.f32.mrb[3].mxu0  ;;  %v1128_v57 = vld [vmem:[%s5199_s2 + $0xa80] sm:$0xff] }
 0x1cb   : > { %v540_v0 = vmax.f32 %v535_v60, 0.0  ;;  %v1129_v60 = vld [vmem:[%s5199_s2 + $0xa88] sm:$0xff]  ;;  %v4418_v61 = vcombine.high %v1128_v57, %v1140_v58  ;;  %v4417_v63 = vcombine.low %v1128_v57, %v1140_v58  ;;  %v891_v57 = vld [vmem:[%s5199_s2 + $0x318] sm:$0xff] }
 0x1cc   : > { %v541_v4 = vpack.c.bf16 %v539_v62, %v539_v62  ;;  %v1141_v62 = vld [vmem:[%s5199_s2 + $0xae8] sm:$0xff]  ;;  %v903_v58 = vld [vmem:[%s5199_s2 + $0x378] sm:$0xff] }
 0x1cd   : > { %v542_v3 = vpack.c.bf16 %v540_v0, %v540_v0  ;;  %v4419_v0 = vcombine.low %v1129_v60, %v1141_v62  ;;  %v4420_v1 = vcombine.high %v1129_v60, %v1141_v62  ;;  %3250 = vmatprep.subr.bf16.mxu0 %v4418_v61 }
 0x1ce   : > { %3251 = vmatpush1.bf16.msra.mxu0 %v4417_v63  ;;  %v4184_v63 = vcombine.high %v891_v57, %v903_v58 }
 0x1cf   : > { %779 = vmatprep.mubr.bf16.mxu1 %v542_v3  ;;  %v1164_v3 = vld [vmem:[%s5199_s2 + $0xba0] sm:$0xff] }
 0x1d0   : > { %780 = vmatmul.mubr.bf16.vlgmr.msra.gmra.mrb[0].mxu1 %v541_v4  ;;  %v1153_v4 = vld [vmem:[%s5199_s2 + $0xb48] sm:$0xff]  ;;  %v4441_v7 = vcombine.low %v1152_v2, %v1164_v3 }
 0x1d1   : > { %3264 = vmatpush1.bf16.msra.mxu1 %v4083_v59  ;;  %v925_v59 = vld [vmem:[%s5199_s2 + $0x428] sm:$0xff] }
 0x1d2   : > { %3265 = vmatprep.subr.bf16.mxu1 %v4108_v5  ;;  %v4204_v18 = vcombine.high %v913_v56, %v925_v59  ;;  %v4203_v21 = vcombine.low %v913_v56, %v925_v59  ;;  %v4442_v5 = vcombine.high %v1152_v2, %v1164_v3  ;;  %v575_v56 = vld [vmem:[#allocation8] sm:$0x3] }
 0x1d3   : > { %v580_v59 = vrot.slane %v575_v56, %v5249_v49  ;;  %v915_v2 = vld [vmem:[%s5199_s2 + $0x3d8] sm:$0xff] }
 0x1d4   : > { %3252 = vmatprep.subr.bf16.mxu0 %v4442_v5  ;;  %v927_v3 = vld [vmem:[%s5199_s2 + $0x438] sm:$0xff]  ;;  %v4183_v5 = vcombine.low %v891_v57, %v903_v58 }
 0x1d5   : > { %3266 = vmatpush1.bf16.msra.mxu1 %v4107_v8  ;;  %v4443_v8 = vcombine.low %v1153_v4, %v1165_v6  ;;  %3253 = vmatpush1.bf16.msra.mxu0 %v4441_v7  ;;  %v4208_v7 = vcombine.high %v915_v2, %v927_v3 }
 0x1d6   : > { %3267 = vmatprep.subr.bf16.mxu1 %v4132_v9  ;;  %v4444_v9 = vcombine.high %v1153_v4, %v1165_v6 }
 0x1d9   : > { %3268 = vmatpush1.bf16.msra.mxu1 %v4131_v12  ;;  %v795_v12 = vld [vmem:[%s5199_s2 + $0x18] sm:$0xff] }
 0x1da   : > { %3269 = vmatprep.subr.bf16.mxu1 %v4156_v13  ;;  %v4086_v13 = vcombine.high %v794_v10, %v806_v11  ;;  %v939_v10 = vld [vmem:[%s5199_s2 + $0x498] sm:$0xff] }
 0x1db   : > { %v951_v11 = vld [vmem:[%s5199_s2 + $0x4f8] sm:$0xff] }
 0x1dc   : > { %3304 = vmatprep.subr.bf16.mxu0 %v4086_v13  ;;  %v4207_v13 = vcombine.low %v915_v2, %v927_v3 }
 0x1dd   : > { %3270 = vmatpush1.bf16.msra.mxu1 %v4155_v16  ;;  %v4087_v16 = vcombine.low %v795_v12, %v807_v14 }
 0x1de   : > { %3271 = vmatprep.subr.bf16.mxu1 %v4180_v53  ;;  %v4088_v53 = vcombine.high %v795_v12, %v807_v14 }
 0x1e1   : > { %3272 = vmatpush1.bf16.msra.mxu1 %v4179_v17  ;;  %v584_v17 = vrot.slane %v575_v56, %v5252_v51  ;;  %v963_v56 = vld [vmem:[%s5199_s2 + $0x558] sm:$0xff] }
 0x1e2   : > { %3273 = vmatprep.subr.bf16.mxu1 %v4204_v18 }
 0x1e5   : > { %3274 = vmatpush1.bf16.msra.mxu1 %v4203_v21 }
 0x1e6   : > { %3275 = vmatprep.subr.bf16.mxu1 %v4228_v22 }
 0x1e9   : > { %3276 = vmatpush1.bf16.msra.mxu1 %v4227_v25 }
 0x1ea   : > { %3277 = vmatprep.subr.bf16.mxu1 %v4252_v26  ;;  %v818_v26 = vld [vmem:[%s5199_s2 + $0xd0] sm:$0xff] }
 0x1ed   : > { %3278 = vmatpush1.bf16.msra.mxu1 %v4251_v29  ;;  %v831_v29 = vld [vmem:[%s5199_s2 + $0x138] sm:$0xff] }
 0x1ee   : > { %3279 = vmatprep.subr.bf16.mxu1 %v4276_v30  ;;  %v4111_v39 = vcombine.low %v819_v28, %v831_v29 }
 0x1f1   : > { %3280 = vmatpush1.bf16.msra.mxu1 %v4275_v33  ;;  %v4110_v33 = vcombine.high %v818_v26, %v830_v27 }
 0x1f2   : > { %3281 = vmatprep.subr.bf16.mxu1 %v4300_v34  ;;  %v4112_v34 = vcombine.high %v819_v28, %v831_v29  ;;  %v1010_v29 = vld [vmem:[%s5199_s2 + $0x6d0] sm:$0xff] }
 0x1f5   : > { %3282 = vmatpush1.bf16.msra.mxu1 %v4299_v37  ;;  %v855_v37 = vld [vmem:[%s5199_s2 + $0x1f8] sm:$0xff] }
 0x1f6   : > { %3283 = vmatprep.subr.bf16.mxu1 %v4324_v38  ;;  %v4109_v38 = vcombine.low %v818_v26, %v830_v27  ;;  %v4135_v47 = vcombine.low %v843_v36, %v855_v37 }
 0x1f9   : > { %3284 = vmatpush1.bf16.msra.mxu1 %v4323_v41  ;;  %v4136_v41 = vcombine.high %v843_v36, %v855_v37 }
 0x1fa   : > { %3285 = vmatprep.subr.bf16.mxu1 %v4348_v42  ;;  %v866_v42 = vld [vmem:[%s5199_s2 + $0x250] sm:$0xff] }
 0x1fb   : > { %v4158_v50 = vcombine.high %v866_v42, %v878_v43  ;;  %v4157_v60 = vcombine.low %v866_v42, %v878_v43  ;;  %v1047_v42 = vld [vmem:[%s5199_s2 + $0x7f8] sm:$0xff] }
 0x1fd   : > { %3286 = vmatpush1.bf16.msra.mxu1 %v4347_v45  ;;  %v879_v45 = vld [vmem:[%s5199_s2 + $0x2b8] sm:$0xff] }
 0x1fe   : > { %3287 = vmatprep.subr.bf16.mxu1 %v4372_v46  ;;  %v4133_v46 = vcombine.low %v842_v32, %v854_v35  ;;  %v4159_v61 = vcombine.low %v867_v44, %v879_v45  ;;  %v1022_v32 = vld [vmem:[%s5199_s2 + $0x730] sm:$0xff] }
 0x1ff   : > { %v4302_v37 = vcombine.high %v1010_v29, %v1022_v32  ;;  %v4301_v43 = vcombine.low %v1010_v29, %v1022_v32  ;;  %v809_v29 = vld [vmem:[%s5199_s2 + $0x88] sm:$0xff] }
 0x201   : > { %3288 = vmatpush1.bf16.msra.mxu1 %v4371_v52  ;;  %v4160_v52 = vcombine.high %v867_v44, %v879_v45 }
 0x202   : > { %3289 = vmatprep.subr.bf16.mxu1 %v4396_v54  ;;  %v890_v54 = vld [vmem:[%s5199_s2 + $0x310] sm:$0xff] }
 0x205   : > { %3290 = vmatpush1.bf16.msra.mxu1 %v4395_v55  ;;  %v902_v55 = vld [vmem:[%s5199_s2 + $0x370] sm:$0xff] }
 0x206   : > { %3291 = vmatprep.subr.bf16.mxu1 %v4420_v1  ;;  %v4182_v62 = vcombine.high %v890_v54, %v902_v55  ;;  %v926_v1 = vld [vmem:[%s5199_s2 + $0x430] sm:$0xff]  ;;  %v4181_v4 = vcombine.low %v890_v54, %v902_v55  ;;  %v1071_v54 = vld [vmem:[%s5199_s2 + $0x8b8] sm:$0xff] }
 0x209   : > { %3292 = vmatpush1.bf16.msra.mxu1 %v4419_v0  ;;  %v914_v0 = vld [vmem:[%s5199_s2 + $0x3d0] sm:$0xff] }
 0x20a   : > { %3293 = vmatprep.subr.bf16.mxu1 %v4444_v9  ;;  %v4206_v6 = vcombine.high %v914_v0, %v926_v1  ;;  %v950_v9 = vld [vmem:[%s5199_s2 + $0x4f0] sm:$0xff]  ;;  %v4205_v12 = vcombine.low %v914_v0, %v926_v1  ;;  %v1095_v0 = vld [vmem:[%s5199_s2 + $0x978] sm:$0xff] }
 0x20d   : > { %3294 = vmatpush1.bf16.msra.mxu1 %v4443_v8  ;;  %v938_v8 = vld [vmem:[%s5199_s2 + $0x490] sm:$0xff] }
 0x20e   : > { %3345 = vmatprep.subr.bf16.mxu1 %v4088_v53  ;;  %v4230_v14 = vcombine.high %v938_v8, %v950_v9  ;;  %v974_v53 = vld [vmem:[%s5199_s2 + $0x5b0] sm:$0xff] }
 0x2a3   : > { %v781_v18 = vpop.f32.mrb[0].mxu1 }
 0x2a4   : > { %v782_v19 = vadd.f32 %v781_v18, %v580_v59  ;;  %v783_v20 = vpop.f32.mrb[1].mxu1  ;;  %v975_v59 = vld [vmem:[%s5199_s2 + $0x5b8] sm:$0xff]  ;;  %v4231_v18 = vcombine.low %v939_v10, %v951_v11 }
 0x2a5   : > { %v784_v21 = vadd.f32 %v783_v20, %v584_v17  ;;  %v785_v22 = vpop.f32.mrb[2].mxu1  ;;  %v4229_v17 = vcombine.low %v938_v8, %v950_v9  ;;  %v4256_v20 = vcombine.high %v963_v56, %v975_v59  ;;  %v4255_v26 = vcombine.low %v963_v56, %v975_v59  ;;  %v1119_v8 = vld [vmem:[%s5199_s2 + $0xa38] sm:$0xff] }
 0x2a6   : > { %v788_v23 = vmax.f32 %v782_v19, 0.0  ;;  %v786_v24 = vpop.f32.mrb[3].mxu1  ;;  %v998_v22 = vld [vmem:[%s5199_s2 + $0x670] sm:$0xff] }
 0x2a7   : > { %v789_v25 = vmax.f32 %v784_v21, 0.0  ;;  %v986_v21 = vld [vmem:[%s5199_s2 + $0x610] sm:$0xff]  ;;  %v999_v24 = vld [vmem:[%s5199_s2 + $0x678] sm:$0xff] }
 0x2a8   : > { %v5305_v31 = vpack.c.bf16 %v788_v23, %v788_v23  ;;  %v987_v23 = vld [vmem:[%s5199_s2 + $0x618] sm:$0xff]  ;;  %v4278_v27 = vcombine.high %v986_v21, %v998_v22  ;;  %v4277_v35 = vcombine.low %v986_v21, %v998_v22 }
 0x2a9   : > { %v5303_v30 = vpack.c.bf16 %v789_v25, %v789_v25  ;;  %v4280_v28 = vcombine.high %v987_v23, %v999_v24  ;;  %v4279_v36 = vcombine.low %v987_v23, %v999_v24  ;;  %v1167_v21 = vld [vmem:[%s5199_s2 + $0xbb8] sm:$0xff] }
 0x2ab   : > { %3254 = vmatprep.mubr.bf16.mxu0 %v5303_v30  ;;  %3295 = vmatprep.mubr.bf16.mxu1 %v5303_v30 }
 0x2ac   : > { %3255 = vmatmul.mubr.bf16.vlgmr.msra.gmra.mrb[4].mxu0 %v5305_v31  ;;  %3296 = vmatmul.mubr.bf16.vlgmr.msra.gmra.mrb[4].mxu1 %v5305_v31 }
 0x2ad   : > { %3305 = vmatpush1.bf16.msra.mxu0 %v4085_v15  ;;  %3346 = vmatpush1.bf16.msra.mxu1 %v4087_v16  ;;  %v4232_v15 = vcombine.high %v939_v10, %v951_v11  ;;  %v962_v16 = vld [vmem:[%s5199_s2 + $0x550] sm:$0xff] }
 0x2ae   : > { %3336 = vmatprep.mubr.bf16.mxu0 %v5303_v30  ;;  %3377 = vmatprep.mubr.bf16.mxu1 %v5303_v30  ;;  %v4254_v19 = vcombine.high %v962_v16, %v974_v53  ;;  %v4253_v25 = vcombine.low %v962_v16, %v974_v53  ;;  %v1143_v16 = vld [vmem:[%s5199_s2 + $0xaf8] sm:$0xff] }
 0x2af   : > { %3306 = vmatprep.subr.bf16.mxu0 %v4110_v33  ;;  %3347 = vmatprep.subr.bf16.mxu1 %v4112_v34  ;;  %v1011_v33 = vld [vmem:[%s5199_s2 + $0x6d8] sm:$0xff] }
 0x2b0   : > { %v1023_v34 = vld [vmem:[%s5199_s2 + $0x738] sm:$0xff] }
 0x2b1   : > { %3307 = vmatpush1.bf16.msra.mxu0 %v4109_v38  ;;  %3348 = vmatpush1.bf16.msra.mxu1 %v4111_v39  ;;  %v4304_v38 = vcombine.high %v1011_v33, %v1023_v34  ;;  %v1034_v39 = vld [vmem:[%s5199_s2 + $0x790] sm:$0xff]  ;;  %v4303_v44 = vcombine.low %v1011_v33, %v1023_v34 }
 0x2b2   : > { %3308 = vmatprep.subr.bf16.mxu0 %v4134_v40  ;;  %3349 = vmatprep.subr.bf16.mxu1 %v4136_v41  ;;  %v1046_v40 = vld [vmem:[%s5199_s2 + $0x7f0] sm:$0xff]  ;;  %v1035_v41 = vld [vmem:[%s5199_s2 + $0x798] sm:$0xff] }
 0x2b3   : > { %v4326_v45 = vcombine.high %v1034_v39, %v1046_v40  ;;  %v4325_v55 = vcombine.low %v1034_v39, %v1046_v40  ;;  %v4327_v57 = vcombine.low %v1035_v41, %v1047_v42  ;;  %v833_v39 = vld [vmem:[%s5199_s2 + $0x148] sm:$0xff] }
 0x2b5   : > { %3309 = vmatpush1.bf16.msra.mxu0 %v4133_v46  ;;  %3350 = vmatpush1.bf16.msra.mxu1 %v4135_v47  ;;  %v4328_v46 = vcombine.high %v1035_v41, %v1047_v42  ;;  %v1058_v47 = vld [vmem:[%s5199_s2 + $0x850] sm:$0xff] }
 0x2b6   : > { %3310 = vmatprep.subr.bf16.mxu0 %v4158_v50  ;;  %3351 = vmatprep.subr.bf16.mxu1 %v4160_v52  ;;  %v1070_v50 = vld [vmem:[%s5199_s2 + $0x8b0] sm:$0xff]  ;;  %v1059_v52 = vld [vmem:[%s5199_s2 + $0x858] sm:$0xff] }
 0x2b7   : > { %v4350_v58 = vcombine.high %v1058_v47, %v1070_v50  ;;  %v4349_v1 = vcombine.low %v1058_v47, %v1070_v50  ;;  %v4351_v2 = vcombine.low %v1059_v52, %v1071_v54  ;;  %v857_v47 = vld [vmem:[%s5199_s2 + $0x208] sm:$0xff] }
 0x2b9   : > { %3311 = vmatpush1.bf16.msra.mxu0 %v4157_v60  ;;  %3352 = vmatpush1.bf16.msra.mxu1 %v4159_v61  ;;  %v4352_v60 = vcombine.high %v1059_v52, %v1071_v54  ;;  %v1082_v61 = vld [vmem:[%s5199_s2 + $0x910] sm:$0xff] }
 0x2ba   : > { %3312 = vmatprep.subr.bf16.mxu0 %v4182_v62  ;;  %3353 = vmatprep.subr.bf16.mxu1 %v4184_v63  ;;  %v1094_v62 = vld [vmem:[%s5199_s2 + $0x970] sm:$0xff]  ;;  %v1083_v63 = vld [vmem:[%s5199_s2 + $0x918] sm:$0xff] }
 0x2bb   : > { %v4374_v3 = vcombine.high %v1082_v61, %v1094_v62  ;;  %v4373_v9 = vcombine.low %v1082_v61, %v1094_v62  ;;  %v4375_v10 = vcombine.low %v1083_v63, %v1095_v0  ;;  %v881_v61 = vld [vmem:[%s5199_s2 + $0x2c8] sm:$0xff] }
 0x2bd   : > { %3313 = vmatpush1.bf16.msra.mxu0 %v4181_v4  ;;  %3354 = vmatpush1.bf16.msra.mxu1 %v4183_v5  ;;  %v4376_v4 = vcombine.high %v1083_v63, %v1095_v0  ;;  %v1106_v5 = vld [vmem:[%s5199_s2 + $0x9d0] sm:$0xff] }
 0x2be   : > { %3314 = vmatprep.subr.bf16.mxu0 %v4206_v6  ;;  %3355 = vmatprep.subr.bf16.mxu1 %v4208_v7  ;;  %v1118_v6 = vld [vmem:[%s5199_s2 + $0xa30] sm:$0xff]  ;;  %v1107_v7 = vld [vmem:[%s5199_s2 + $0x9d8] sm:$0xff] }
 0x2bf   : > { %v4398_v11 = vcombine.high %v1106_v5, %v1118_v6  ;;  %v4397_v53 = vcombine.low %v1106_v5, %v1118_v6  ;;  %v4399_v56 = vcombine.low %v1107_v7, %v1119_v8  ;;  %v905_v5 = vld [vmem:[%s5199_s2 + $0x388] sm:$0xff] }
 0x2c1   : > { %3315 = vmatpush1.bf16.msra.mxu0 %v4205_v12  ;;  %3356 = vmatpush1.bf16.msra.mxu1 %v4207_v13  ;;  %v4400_v12 = vcombine.high %v1107_v7, %v1119_v8  ;;  %v1130_v13 = vld [vmem:[%s5199_s2 + $0xa90] sm:$0xff] }
 0x2c2   : > { %3316 = vmatprep.subr.bf16.mxu0 %v4230_v14  ;;  %3357 = vmatprep.subr.bf16.mxu1 %v4232_v15  ;;  %v1142_v14 = vld [vmem:[%s5199_s2 + $0xaf0] sm:$0xff]  ;;  %v1131_v15 = vld [vmem:[%s5199_s2 + $0xa98] sm:$0xff] }
 0x2c3   : > { %v4422_v59 = vcombine.high %v1130_v13, %v1142_v14  ;;  %v4421_v22 = vcombine.low %v1130_v13, %v1142_v14  ;;  %v4423_v23 = vcombine.low %v1131_v15, %v1143_v16  ;;  %v929_v13 = vld [vmem:[%s5199_s2 + $0x448] sm:$0xff] }
 0x2c5   : > { %3317 = vmatpush1.bf16.msra.mxu0 %v4229_v17  ;;  %3358 = vmatpush1.bf16.msra.mxu1 %v4231_v18  ;;  %v4424_v17 = vcombine.high %v1131_v15, %v1143_v16  ;;  %v1154_v18 = vld [vmem:[%s5199_s2 + $0xb50] sm:$0xff] }
 0x2c6   : > { %3318 = vmatprep.subr.bf16.mxu0 %v4254_v19  ;;  %3359 = vmatprep.subr.bf16.mxu1 %v4256_v20  ;;  %v1166_v19 = vld [vmem:[%s5199_s2 + $0xbb0] sm:$0xff]  ;;  %v1155_v20 = vld [vmem:[%s5199_s2 + $0xb58] sm:$0xff] }
 0x2c7   : > { %v4446_v24 = vcombine.high %v1154_v18, %v1166_v19  ;;  %v4445_v32 = vcombine.low %v1154_v18, %v1166_v19  ;;  %v4447_v33 = vcombine.low %v1155_v20, %v1167_v21  ;;  %v953_v18 = vld [vmem:[%s5199_s2 + $0x508] sm:$0xff] }
 0x2c9   : > { %3319 = vmatpush1.bf16.msra.mxu0 %v4253_v25  ;;  %3360 = vmatpush1.bf16.msra.mxu1 %v4255_v26  ;;  %v4448_v25 = vcombine.high %v1155_v20, %v1167_v21  ;;  %v796_v26 = vld [vmem:[%s5199_s2 + $0x20] sm:$0xff] }
 0x2ca   : > { %3320 = vmatprep.subr.bf16.mxu0 %v4278_v27  ;;  %3361 = vmatprep.subr.bf16.mxu1 %v4280_v28  ;;  %v808_v27 = vld [vmem:[%s5199_s2 + $0x80] sm:$0xff]  ;;  %v797_v28 = vld [vmem:[%s5199_s2 + $0x28] sm:$0xff] }
 0x2cb   : > { %v4090_v34 = vcombine.high %v796_v26, %v808_v27  ;;  %v4089_v40 = vcombine.low %v796_v26, %v808_v27  ;;  %v4091_v41 = vcombine.low %v797_v28, %v809_v29  ;;  %v977_v26 = vld [vmem:[%s5199_s2 + $0x5c8] sm:$0xff] }
 0x2cd   : > { %3321 = vmatpush1.bf16.msra.mxu0 %v4277_v35  ;;  %3362 = vmatpush1.bf16.msra.mxu1 %v4279_v36  ;;  %v4092_v35 = vcombine.high %v797_v28, %v809_v29  ;;  %v820_v36 = vld [vmem:[%s5199_s2 + $0xe0] sm:$0xff] }
 0x2ce   : > { %3322 = vmatprep.subr.bf16.mxu0 %v4302_v37  ;;  %3363 = vmatprep.subr.bf16.mxu1 %v4304_v38  ;;  %v832_v37 = vld [vmem:[%s5199_s2 + $0x140] sm:$0xff]  ;;  %v821_v38 = vld [vmem:[%s5199_s2 + $0xe8] sm:$0xff] }
 0x2cf   : > { %v4114_v42 = vcombine.high %v820_v36, %v832_v37  ;;  %v4113_v50 = vcombine.low %v820_v36, %v832_v37  ;;  %v4115_v52 = vcombine.low %v821_v38, %v833_v39  ;;  %v1001_v36 = vld [vmem:[%s5199_s2 + $0x688] sm:$0xff] }
 0x2d1   : > { %3323 = vmatpush1.bf16.msra.mxu0 %v4301_v43  ;;  %3364 = vmatpush1.bf16.msra.mxu1 %v4303_v44  ;;  %v4116_v43 = vcombine.high %v821_v38, %v833_v39  ;;  %v844_v44 = vld [vmem:[%s5199_s2 + $0x1a0] sm:$0xff] }
 0x2d2   : > { %3324 = vmatprep.subr.bf16.mxu0 %v4326_v45  ;;  %3365 = vmatprep.subr.bf16.mxu1 %v4328_v46  ;;  %v856_v45 = vld [vmem:[%s5199_s2 + $0x200] sm:$0xff]  ;;  %v845_v46 = vld [vmem:[%s5199_s2 + $0x1a8] sm:$0xff] }
 0x2d3   : > { %v4138_v54 = vcombine.high %v844_v44, %v856_v45  ;;  %v4137_v62 = vcombine.low %v844_v44, %v856_v45  ;;  %v4139_v63 = vcombine.low %v845_v46, %v857_v47  ;;  %v1025_v44 = vld [vmem:[%s5199_s2 + $0x748] sm:$0xff] }
 0x2d5   : > { %3325 = vmatpush1.bf16.msra.mxu0 %v4325_v55  ;;  %3366 = vmatpush1.bf16.msra.mxu1 %v4327_v57  ;;  %v4140_v55 = vcombine.high %v845_v46, %v857_v47  ;;  %v868_v57 = vld [vmem:[%s5199_s2 + $0x260] sm:$0xff] }
 0x2d6   : > { %3326 = vmatprep.subr.bf16.mxu0 %v4350_v58  ;;  %3367 = vmatprep.subr.bf16.mxu1 %v4352_v60  ;;  %v880_v58 = vld [vmem:[%s5199_s2 + $0x2c0] sm:$0xff]  ;;  %v869_v60 = vld [vmem:[%s5199_s2 + $0x268] sm:$0xff] }
 0x2d7   : > { %v4162_v0 = vcombine.high %v868_v57, %v880_v58  ;;  %v4161_v6 = vcombine.low %v868_v57, %v880_v58  ;;  %v4163_v7 = vcombine.low %v869_v60, %v881_v61  ;;  %v1049_v57 = vld [vmem:[%s5199_s2 + $0x808] sm:$0xff] }
 0x2d9   : > { %3327 = vmatpush1.bf16.msra.mxu0 %v4349_v1  ;;  %3368 = vmatpush1.bf16.msra.mxu1 %v4351_v2  ;;  %v4164_v1 = vcombine.high %v869_v60, %v881_v61  ;;  %v892_v2 = vld [vmem:[%s5199_s2 + $0x320] sm:$0xff] }
 0x2da   : > { %3328 = vmatprep.subr.bf16.mxu0 %v4374_v3  ;;  %3369 = vmatprep.subr.bf16.mxu1 %v4376_v4  ;;  %v904_v3 = vld [vmem:[%s5199_s2 + $0x380] sm:$0xff]  ;;  %v893_v4 = vld [vmem:[%s5199_s2 + $0x328] sm:$0xff] }
 0x2db   : > { %v4186_v8 = vcombine.high %v892_v2, %v904_v3  ;;  %v4185_v14 = vcombine.low %v892_v2, %v904_v3  ;;  %v4187_v15 = vcombine.low %v893_v4, %v905_v5  ;;  %v1073_v2 = vld [vmem:[%s5199_s2 + $0x8c8] sm:$0xff] }
 0x2dd   : > { %3329 = vmatpush1.bf16.msra.mxu0 %v4373_v9  ;;  %3370 = vmatpush1.bf16.msra.mxu1 %v4375_v10  ;;  %v4188_v9 = vcombine.high %v893_v4, %v905_v5  ;;  %v916_v10 = vld [vmem:[%s5199_s2 + $0x3e0] sm:$0xff] }
 0x2de   : > { %3330 = vmatprep.subr.bf16.mxu0 %v4398_v11  ;;  %3371 = vmatprep.subr.bf16.mxu1 %v4400_v12  ;;  %v928_v11 = vld [vmem:[%s5199_s2 + $0x440] sm:$0xff]  ;;  %v917_v12 = vld [vmem:[%s5199_s2 + $0x3e8] sm:$0xff] }
 0x2df   : > { %v4210_v16 = vcombine.high %v916_v10, %v928_v11  ;;  %v4209_v19 = vcombine.low %v916_v10, %v928_v11  ;;  %v4211_v20 = vcombine.low %v917_v12, %v929_v13  ;;  %v1097_v10 = vld [vmem:[%s5199_s2 + $0x988] sm:$0xff] }
 0x2e1   : > { %3331 = vmatpush1.bf16.msra.mxu0 %v4397_v53  ;;  %3372 = vmatpush1.bf16.msra.mxu1 %v4399_v56  ;;  %v4212_v53 = vcombine.high %v917_v12, %v929_v13  ;;  %v940_v56 = vld [vmem:[%s5199_s2 + $0x4a0] sm:$0xff] }
 0x2e2   : > { %3332 = vmatprep.subr.bf16.mxu0 %v4422_v59  ;;  %3373 = vmatprep.subr.bf16.mxu1 %v4424_v17  ;;  %v952_v59 = vld [vmem:[%s5199_s2 + $0x500] sm:$0xff]  ;;  %v941_v17 = vld [vmem:[%s5199_s2 + $0x4a8] sm:$0xff] }
 0x2e3   : > { %v4234_v21 = vcombine.high %v940_v56, %v952_v59  ;;  %v4233_v27 = vcombine.low %v940_v56, %v952_v59  ;;  %v4235_v28 = vcombine.low %v941_v17, %v953_v18  ;;  %v1121_v56 = vld [vmem:[%s5199_s2 + $0xa48] sm:$0xff] }
 0x2e5   : > { %3333 = vmatpush1.bf16.msra.mxu0 %v4421_v22  ;;  %3374 = vmatpush1.bf16.msra.mxu1 %v4423_v23  ;;  %v4236_v22 = vcombine.high %v941_v17, %v953_v18  ;;  %v964_v23 = vld [vmem:[%s5199_s2 + $0x560] sm:$0xff] }
 0x2e6   : > { %3334 = vmatprep.subr.bf16.mxu0 %v4446_v24  ;;  %3375 = vmatprep.subr.bf16.mxu1 %v4448_v25  ;;  %v976_v24 = vld [vmem:[%s5199_s2 + $0x5c0] sm:$0xff]  ;;  %v965_v25 = vld [vmem:[%s5199_s2 + $0x568] sm:$0xff] }
 0x2e7   : > { %v4258_v29 = vcombine.high %v964_v23, %v976_v24  ;;  %v4257_v37 = vcombine.low %v964_v23, %v976_v24  ;;  %v4259_v38 = vcombine.low %v965_v25, %v977_v26  ;;  %v1145_v23 = vld [vmem:[%s5199_s2 + $0xb08] sm:$0xff] }
 0x2e9   : > { %3335 = vmatpush1.bf16.msra.mxu0 %v4445_v32  ;;  %3376 = vmatpush1.bf16.msra.mxu1 %v4447_v33  ;;  %v4260_v32 = vcombine.high %v965_v25, %v977_v26  ;;  %v988_v33 = vld [vmem:[%s5199_s2 + $0x620] sm:$0xff] }
 0x2ea   : > { %3386 = vmatprep.subr.bf16.mxu0 %v4090_v34  ;;  %3427 = vmatprep.subr.bf16.mxu1 %v4092_v35  ;;  %v1000_v34 = vld [vmem:[%s5199_s2 + $0x680] sm:$0xff]  ;;  %v989_v35 = vld [vmem:[%s5199_s2 + $0x628] sm:$0xff] }
 0x2eb   : > { %v4282_v39 = vcombine.high %v988_v33, %v1000_v34  ;;  %v4281_v45 = vcombine.low %v988_v33, %v1000_v34  ;;  %v4283_v46 = vcombine.low %v989_v35, %v1001_v36  ;;  %v1169_v33 = vld [vmem:[%s5199_s2 + $0xbc8] sm:$0xff] }
 0x2ec   : > { %3337 = vmatmul.mubr.bf16.vlgmr.msra.gmra.mrb[8].mxu0 %v5305_v31  ;;  %3378 = vmatmul.mubr.bf16.vlgmr.msra.gmra.mrb[8].mxu1 %v5305_v31 }
 0x2ed   : > { %3387 = vmatpush1.bf16.msra.mxu0 %v4089_v40  ;;  %3418 = vmatprep.mubr.bf16.mxu0 %v5303_v30  ;;  %v4284_v40 = vcombine.high %v989_v35, %v1001_v36 }
 0x2ee   : > { %3428 = vmatpush1.bf16.msra.mxu1 %v4091_v41  ;;  %3459 = vmatprep.mubr.bf16.mxu1 %v5303_v30  ;;  %v1012_v41 = vld [vmem:[%s5199_s2 + $0x6e0] sm:$0xff] }
 0x2ef   : > { %3388 = vmatprep.subr.bf16.mxu0 %v4114_v42  ;;  %3429 = vmatprep.subr.bf16.mxu1 %v4116_v43  ;;  %v1024_v42 = vld [vmem:[%s5199_s2 + $0x740] sm:$0xff]  ;;  %v1013_v43 = vld [vmem:[%s5199_s2 + $0x6e8] sm:$0xff] }
 0x2f0   : > { %v4306_v47 = vcombine.high %v1012_v41, %v1024_v42  ;;  %v4305_v58 = vcombine.low %v1012_v41, %v1024_v42  ;;  %v4307_v60 = vcombine.low %v1013_v43, %v1025_v44  ;;  %v811_v41 = vld [vmem:[%s5199_s2 + $0x98] sm:$0xff] }
 0x2f1   : > { %3389 = vmatpush1.bf16.msra.mxu0 %v4113_v50  ;;  %v4308_v50 = vcombine.high %v1013_v43, %v1025_v44 }
 0x2f2   : > { %3430 = vmatpush1.bf16.msra.mxu1 %v4115_v52  ;;  %3390 = vmatprep.subr.bf16.mxu0 %v4138_v54  ;;  %v1036_v52 = vld [vmem:[%s5199_s2 + $0x7a0] sm:$0xff] }
 0x2f3   : > { %3431 = vmatprep.subr.bf16.mxu1 %v4140_v55  ;;  %v1048_v54 = vld [vmem:[%s5199_s2 + $0x800] sm:$0xff]  ;;  %v1037_v55 = vld [vmem:[%s5199_s2 + $0x7a8] sm:$0xff] }
 0x2f4   : > { %v4330_v61 = vcombine.high %v1036_v52, %v1048_v54  ;;  %v4329_v3 = vcombine.low %v1036_v52, %v1048_v54  ;;  %v4331_v4 = vcombine.low %v1037_v55, %v1049_v57  ;;  %v823_v52 = vld [vmem:[%s5199_s2 + $0xf8] sm:$0xff] }
 0x2f5   : > { %3391 = vmatpush1.bf16.msra.mxu0 %v4137_v62  ;;  %v4332_v62 = vcombine.high %v1037_v55, %v1049_v57  ;;  %v835_v54 = vld [vmem:[%s5199_s2 + $0x158] sm:$0xff] }
 0x2f6   : > { %3432 = vmatpush1.bf16.msra.mxu1 %v4139_v63  ;;  %3392 = vmatprep.subr.bf16.mxu0 %v4162_v0  ;;  %v1060_v63 = vld [vmem:[%s5199_s2 + $0x860] sm:$0xff] }
 0x2f7   : > { %3433 = vmatprep.subr.bf16.mxu1 %v4164_v1  ;;  %v1072_v0 = vld [vmem:[%s5199_s2 + $0x8c0] sm:$0xff]  ;;  %v1061_v1 = vld [vmem:[%s5199_s2 + $0x868] sm:$0xff] }
 0x2f8   : > { %v4354_v5 = vcombine.high %v1060_v63, %v1072_v0  ;;  %v4353_v11 = vcombine.low %v1060_v63, %v1072_v0  ;;  %v4355_v12 = vcombine.low %v1061_v1, %v1073_v2  ;;  %v859_v63 = vld [vmem:[%s5199_s2 + $0x218] sm:$0xff] }
 0x2f9   : > { %3393 = vmatpush1.bf16.msra.mxu0 %v4161_v6  ;;  %v4356_v6 = vcombine.high %v1061_v1, %v1073_v2  ;;  %v4119_v1 = vcombine.low %v823_v52, %v835_v54 }
 0x2fa   : > { %3434 = vmatpush1.bf16.msra.mxu1 %v4163_v7  ;;  %3394 = vmatprep.subr.bf16.mxu0 %v4186_v8  ;;  %v1084_v7 = vld [vmem:[%s5199_s2 + $0x920] sm:$0xff] }
 0x2fb   : > { %3435 = vmatprep.subr.bf16.mxu1 %v4188_v9  ;;  %v1096_v8 = vld [vmem:[%s5199_s2 + $0x980] sm:$0xff]  ;;  %v1085_v9 = vld [vmem:[%s5199_s2 + $0x928] sm:$0xff] }
 0x2fc   : > { %v4378_v13 = vcombine.high %v1084_v7, %v1096_v8  ;;  %v4377_v59 = vcombine.low %v1084_v7, %v1096_v8  ;;  %v4379_v17 = vcombine.low %v1085_v9, %v1097_v10  ;;  %v883_v7 = vld [vmem:[%s5199_s2 + $0x2d8] sm:$0xff] }
 0x2fd   : > { %3395 = vmatpush1.bf16.msra.mxu0 %v4185_v14  ;;  %v4380_v14 = vcombine.high %v1085_v9, %v1097_v10 }
 0x2fe   : > { %3436 = vmatpush1.bf16.msra.mxu1 %v4187_v15  ;;  %3396 = vmatprep.subr.bf16.mxu0 %v4210_v16  ;;  %v1108_v15 = vld [vmem:[%s5199_s2 + $0x9e0] sm:$0xff] }
 0x2ff   : > { %3437 = vmatprep.subr.bf16.mxu1 %v4212_v53  ;;  %v1120_v16 = vld [vmem:[%s5199_s2 + $0xa40] sm:$0xff]  ;;  %v1109_v53 = vld [vmem:[%s5199_s2 + $0x9e8] sm:$0xff] }
 0x300   : > { %v4402_v18 = vcombine.high %v1108_v15, %v1120_v16  ;;  %v4401_v24 = vcombine.low %v1108_v15, %v1120_v16  ;;  %v4403_v25 = vcombine.low %v1109_v53, %v1121_v56  ;;  %v907_v15 = vld [vmem:[%s5199_s2 + $0x398] sm:$0xff] }
 0x301   : > { %3397 = vmatpush1.bf16.msra.mxu0 %v4209_v19  ;;  %v4404_v19 = vcombine.high %v1109_v53, %v1121_v56 }
 0x302   : > { %3438 = vmatpush1.bf16.msra.mxu1 %v4211_v20  ;;  %3398 = vmatprep.subr.bf16.mxu0 %v4234_v21  ;;  %v1132_v20 = vld [vmem:[%s5199_s2 + $0xaa0] sm:$0xff] }
 0x303   : > { %3439 = vmatprep.subr.bf16.mxu1 %v4236_v22  ;;  %v1144_v21 = vld [vmem:[%s5199_s2 + $0xb00] sm:$0xff]  ;;  %v1133_v22 = vld [vmem:[%s5199_s2 + $0xaa8] sm:$0xff] }
 0x304   : > { %v4426_v26 = vcombine.high %v1132_v20, %v1144_v21  ;;  %v4425_v34 = vcombine.low %v1132_v20, %v1144_v21  ;;  %v4427_v35 = vcombine.low %v1133_v22, %v1145_v23  ;;  %v931_v20 = vld [vmem:[%s5199_s2 + $0x458] sm:$0xff] }
 0x305   : > { %3399 = vmatpush1.bf16.msra.mxu0 %v4233_v27  ;;  %v4428_v27 = vcombine.high %v1133_v22, %v1145_v23 }
 0x306   : > { %3440 = vmatpush1.bf16.msra.mxu1 %v4235_v28  ;;  %3400 = vmatprep.subr.bf16.mxu0 %v4258_v29  ;;  %v1156_v28 = vld [vmem:[%s5199_s2 + $0xb60] sm:$0xff] }
 0x307   : > { %3441 = vmatprep.subr.bf16.mxu1 %v4260_v32  ;;  %v1168_v29 = vld [vmem:[%s5199_s2 + $0xbc0] sm:$0xff]  ;;  %v1157_v32 = vld [vmem:[%s5199_s2 + $0xb68] sm:$0xff] }
 0x308   : > { %v4450_v36 = vcombine.high %v1156_v28, %v1168_v29  ;;  %v4449_v42 = vcombine.low %v1156_v28, %v1168_v29  ;;  %v4451_v43 = vcombine.low %v1157_v32, %v1169_v33  ;;  %v955_v28 = vld [vmem:[%s5199_s2 + $0x518] sm:$0xff] }
 0x309   : > { %3401 = vmatpush1.bf16.msra.mxu0 %v4257_v37  ;;  %v4452_v37 = vcombine.high %v1157_v32, %v1169_v33 }
 0x30a   : > { %3442 = vmatpush1.bf16.msra.mxu1 %v4259_v38  ;;  %3402 = vmatprep.subr.bf16.mxu0 %v4282_v39  ;;  %v798_v38 = vld [vmem:[%s5199_s2 + $0x30] sm:$0xff] }
 0x30b   : > { %3443 = vmatprep.subr.bf16.mxu1 %v4284_v40  ;;  %v810_v39 = vld [vmem:[%s5199_s2 + $0x90] sm:$0xff]  ;;  %v799_v40 = vld [vmem:[%s5199_s2 + $0x38] sm:$0xff] }
 0x30c   : > { %v4094_v44 = vcombine.high %v798_v38, %v810_v39  ;;  %v4095_v55 = vcombine.low %v799_v40, %v811_v41 }
 0x30d   : > { %3403 = vmatpush1.bf16.msra.mxu0 %v4281_v45  ;;  %v4096_v45 = vcombine.high %v799_v40, %v811_v41 }
 0x30e   : > { %3444 = vmatpush1.bf16.msra.mxu1 %v4283_v46  ;;  %3404 = vmatprep.subr.bf16.mxu0 %v4306_v47  ;;  %v822_v46 = vld [vmem:[%s5199_s2 + $0xf0] sm:$0xff] }
 0x30f   : > { %3445 = vmatprep.subr.bf16.mxu1 %v4308_v50  ;;  %v834_v47 = vld [vmem:[%s5199_s2 + $0x150] sm:$0xff]  ;;  %v4093_v50 = vcombine.low %v798_v38, %v810_v39  ;;  %v979_v38 = vld [vmem:[%s5199_s2 + $0x5d8] sm:$0xff] }
 0x310   : > { %v4118_v57 = vcombine.high %v822_v46, %v834_v47  ;;  %v4117_v0 = vcombine.low %v822_v46, %v834_v47  ;;  %v1003_v46 = vld [vmem:[%s5199_s2 + $0x698] sm:$0xff] }
 0x311   : > { %3405 = vmatpush1.bf16.msra.mxu0 %v4305_v58  ;;  %v846_v58 = vld [vmem:[%s5199_s2 + $0x1b0] sm:$0xff] }
 0x312   : > { %3446 = vmatpush1.bf16.msra.mxu1 %v4307_v60  ;;  %3406 = vmatprep.subr.bf16.mxu0 %v4330_v61  ;;  %v858_v60 = vld [vmem:[%s5199_s2 + $0x210] sm:$0xff]  ;;  %v4120_v61 = vcombine.high %v823_v52, %v835_v54 }
 0x313   : > { %3447 = vmatprep.subr.bf16.mxu1 %v4332_v62  ;;  %v847_v62 = vld [vmem:[%s5199_s2 + $0x1b8] sm:$0xff]  ;;  %v4142_v2 = vcombine.high %v846_v58, %v858_v60  ;;  %v4141_v8 = vcombine.low %v846_v58, %v858_v60 }
 0x314   : > { %v4143_v9 = vcombine.low %v847_v62, %v859_v63  ;;  %v1015_v58 = vld [vmem:[%s5199_s2 + $0x6f8] sm:$0xff] }
 0x315   : > { %3407 = vmatpush1.bf16.msra.mxu0 %v4329_v3  ;;  %v4144_v3 = vcombine.high %v847_v62, %v859_v63  ;;  %v1027_v60 = vld [vmem:[%s5199_s2 + $0x758] sm:$0xff] }
 0x316   : > { %3448 = vmatpush1.bf16.msra.mxu1 %v4331_v4  ;;  %3408 = vmatprep.subr.bf16.mxu0 %v4354_v5  ;;  %v870_v4 = vld [vmem:[%s5199_s2 + $0x270] sm:$0xff] }
 0x317   : > { %3449 = vmatprep.subr.bf16.mxu1 %v4356_v6  ;;  %v882_v5 = vld [vmem:[%s5199_s2 + $0x2d0] sm:$0xff]  ;;  %v871_v6 = vld [vmem:[%s5199_s2 + $0x278] sm:$0xff] }
 0x318   : > { %v4166_v10 = vcombine.high %v870_v4, %v882_v5  ;;  %v4165_v16 = vcombine.low %v870_v4, %v882_v5  ;;  %v4167_v53 = vcombine.low %v871_v6, %v883_v7  ;;  %v1051_v4 = vld [vmem:[%s5199_s2 + $0x818] sm:$0xff] }
 0x319   : > { %3409 = vmatpush1.bf16.msra.mxu0 %v4353_v11  ;;  %v4168_v11 = vcombine.high %v871_v6, %v883_v7  ;;  %v4311_v6 = vcombine.low %v1015_v58, %v1027_v60 }
 0x31a   : > { %3450 = vmatpush1.bf16.msra.mxu1 %v4355_v12  ;;  %3410 = vmatprep.subr.bf16.mxu0 %v4378_v13  ;;  %v894_v12 = vld [vmem:[%s5199_s2 + $0x330] sm:$0xff] }
 0x31b   : > { %3451 = vmatprep.subr.bf16.mxu1 %v4380_v14  ;;  %v906_v13 = vld [vmem:[%s5199_s2 + $0x390] sm:$0xff]  ;;  %v895_v14 = vld [vmem:[%s5199_s2 + $0x338] sm:$0xff] }
 0x31c   : > { %v4190_v56 = vcombine.high %v894_v12, %v906_v13  ;;  %v4189_v21 = vcombine.low %v894_v12, %v906_v13  ;;  %v4191_v22 = vcombine.low %v895_v14, %v907_v15  ;;  %v1075_v12 = vld [vmem:[%s5199_s2 + $0x8d8] sm:$0xff] }
 0x31d   : > { %3411 = vmatpush1.bf16.msra.mxu0 %v4377_v59  ;;  %v4192_v59 = vcombine.high %v895_v14, %v907_v15 }
 0x31e   : > { %3452 = vmatpush1.bf16.msra.mxu1 %v4379_v17  ;;  %3412 = vmatprep.subr.bf16.mxu0 %v4402_v18  ;;  %v918_v17 = vld [vmem:[%s5199_s2 + $0x3f0] sm:$0xff] }
 0x31f   : > { %3453 = vmatprep.subr.bf16.mxu1 %v4404_v19  ;;  %v930_v18 = vld [vmem:[%s5199_s2 + $0x450] sm:$0xff]  ;;  %v919_v19 = vld [vmem:[%s5199_s2 + $0x3f8] sm:$0xff] }
 0x320   : > { %v4214_v23 = vcombine.high %v918_v17, %v930_v18  ;;  %v4213_v29 = vcombine.low %v918_v17, %v930_v18  ;;  %v4215_v32 = vcombine.low %v919_v19, %v931_v20  ;;  %v1099_v17 = vld [vmem:[%s5199_s2 + $0x998] sm:$0xff] }
 0x321   : > { %3413 = vmatpush1.bf16.msra.mxu0 %v4401_v24  ;;  %v4216_v24 = vcombine.high %v919_v19, %v931_v20 }
 0x322   : > { %3454 = vmatpush1.bf16.msra.mxu1 %v4403_v25  ;;  %3414 = vmatprep.subr.bf16.mxu0 %v4426_v26  ;;  %v942_v25 = vld [vmem:[%s5199_s2 + $0x4b0] sm:$0xff] }
 0x323   : > { %3455 = vmatprep.subr.bf16.mxu1 %v4428_v27  ;;  %v954_v26 = vld [vmem:[%s5199_s2 + $0x510] sm:$0xff]  ;;  %v943_v27 = vld [vmem:[%s5199_s2 + $0x4b8] sm:$0xff] }
 0x324   : > { %v4238_v33 = vcombine.high %v942_v25, %v954_v26  ;;  %v4237_v39 = vcombine.low %v942_v25, %v954_v26  ;;  %v4239_v40 = vcombine.low %v943_v27, %v955_v28  ;;  %v1123_v25 = vld [vmem:[%s5199_s2 + $0xa58] sm:$0xff] }
 0x325   : > { %3415 = vmatpush1.bf16.msra.mxu0 %v4425_v34  ;;  %v4240_v34 = vcombine.high %v943_v27, %v955_v28 }
 0x326   : > { %3456 = vmatpush1.bf16.msra.mxu1 %v4427_v35  ;;  %3416 = vmatprep.subr.bf16.mxu0 %v4450_v36  ;;  %v966_v35 = vld [vmem:[%s5199_s2 + $0x570] sm:$0xff] }
 0x327   : > { %3457 = vmatprep.subr.bf16.mxu1 %v4452_v37  ;;  %v978_v36 = vld [vmem:[%s5199_s2 + $0x5d0] sm:$0xff]  ;;  %v967_v37 = vld [vmem:[%s5199_s2 + $0x578] sm:$0xff] }
 0x328   : > { %v4262_v41 = vcombine.high %v966_v35, %v978_v36  ;;  %v4261_v47 = vcombine.low %v966_v35, %v978_v36  ;;  %v1147_v35 = vld [vmem:[%s5199_s2 + $0xb18] sm:$0xff] }
 0x329   : > { %3417 = vmatpush1.bf16.msra.mxu0 %v4449_v42  ;;  %v4264_v42 = vcombine.high %v967_v37, %v979_v38 }
 0x32a   : > { %3458 = vmatpush1.bf16.msra.mxu1 %v4451_v43  ;;  %3468 = vmatprep.subr.bf16.mxu0 %v4094_v44  ;;  %v990_v43 = vld [vmem:[%s5199_s2 + $0x630] sm:$0xff] }
 0x32b   : > { %3509 = vmatprep.subr.bf16.mxu1 %v4096_v45  ;;  %v1002_v44 = vld [vmem:[%s5199_s2 + $0x690] sm:$0xff]  ;;  %v991_v45 = vld [vmem:[%s5199_s2 + $0x638] sm:$0xff] }
 0x32c   : > { %3419 = vmatmul.mubr.bf16.vlgmr.msra.gmra.mrb[12].mxu0 %v5305_v31  ;;  %v4286_v52 = vcombine.high %v990_v43, %v1002_v44  ;;  %v4288_v54 = vcombine.high %v991_v45, %v1003_v46  ;;  %v4287_v62 = vcombine.low %v991_v45, %v1003_v46 }
 0x32d   : > { %3460 = vmatmul.mubr.bf16.vlgmr.msra.gmra.mrb[12].mxu1 %v5305_v31  ;;  %3469 = vmatpush1.bf16.msra.mxu0 %v4093_v50  ;;  %v4263_v50 = vcombine.low %v967_v37, %v979_v38 }
 0x32e   : > { %3500 = vmatprep.mubr.bf16.mxu0 %v5303_v30  ;;  %3510 = vmatpush1.bf16.msra.mxu1 %v4095_v55  ;;  %v1014_v55 = vld [vmem:[%s5199_s2 + $0x6f0] sm:$0xff] }
 0x32f   : > { %3541 = vmatprep.mubr.bf16.mxu1 %v5303_v30  ;;  %3470 = vmatprep.subr.bf16.mxu0 %v4118_v57  ;;  %v1026_v57 = vld [vmem:[%s5199_s2 + $0x750] sm:$0xff] }
 0x330   : > { %3511 = vmatprep.subr.bf16.mxu1 %v4120_v61  ;;  %v4285_v61 = vcombine.low %v990_v43, %v1002_v44  ;;  %v4310_v63 = vcombine.high %v1014_v55, %v1026_v57  ;;  %v4309_v5 = vcombine.low %v1014_v55, %v1026_v57  ;;  %v1171_v43 = vld [vmem:[%s5199_s2 + $0xbd8] sm:$0xff]  ;;  %v813_v55 = vld [vmem:[%s5199_s2 + $0xa8] sm:$0xff] }
 0x331   : > { %3471 = vmatpush1.bf16.msra.mxu0 %v4117_v0  ;;  %v4312_v0 = vcombine.high %v1015_v58, %v1027_v60 }
 0x332   : > { %3512 = vmatpush1.bf16.msra.mxu1 %v4119_v1  ;;  %3472 = vmatprep.subr.bf16.mxu0 %v4142_v2  ;;  %v1038_v1 = vld [vmem:[%s5199_s2 + $0x7b0] sm:$0xff] }
 0x333   : > { %3513 = vmatprep.subr.bf16.mxu1 %v4144_v3  ;;  %v1050_v2 = vld [vmem:[%s5199_s2 + $0x810] sm:$0xff]  ;;  %v1039_v3 = vld [vmem:[%s5199_s2 + $0x7b8] sm:$0xff] }
 0x334   : > { %v4334_v7 = vcombine.high %v1038_v1, %v1050_v2  ;;  %v4333_v13 = vcombine.low %v1038_v1, %v1050_v2  ;;  %v4335_v14 = vcombine.low %v1039_v3, %v1051_v4  ;;  %v825_v1 = vld [vmem:[%s5199_s2 + $0x108] sm:$0xff] }
 0x335   : > { %3473 = vmatpush1.bf16.msra.mxu0 %v4141_v8  ;;  %v4336_v8 = vcombine.high %v1039_v3, %v1051_v4  ;;  %v837_v2 = vld [vmem:[%s5199_s2 + $0x168] sm:$0xff] }
 0x336   : > { %3514 = vmatpush1.bf16.msra.mxu1 %v4143_v9  ;;  %3474 = vmatprep.subr.bf16.mxu0 %v4166_v10  ;;  %v1062_v9 = vld [vmem:[%s5199_s2 + $0x870] sm:$0xff] }
 0x337   : > { %3515 = vmatprep.subr.bf16.mxu1 %v4168_v11  ;;  %v1074_v10 = vld [vmem:[%s5199_s2 + $0x8d0] sm:$0xff]  ;;  %v1063_v11 = vld [vmem:[%s5199_s2 + $0x878] sm:$0xff] }
 0x338   : > { %v4358_v15 = vcombine.high %v1062_v9, %v1074_v10  ;;  %v4357_v18 = vcombine.low %v1062_v9, %v1074_v10  ;;  %v4359_v19 = vcombine.low %v1063_v11, %v1075_v12  ;;  %v861_v9 = vld [vmem:[%s5199_s2 + $0x228] sm:$0xff] }
 0x339   : > { %3475 = vmatpush1.bf16.msra.mxu0 %v4165_v16  ;;  %v4360_v16 = vcombine.high %v1063_v11, %v1075_v12  ;;  %v4123_v11 = vcombine.low %v825_v1, %v837_v2 }
 0x33a   : > { %3516 = vmatpush1.bf16.msra.mxu1 %v4167_v53  ;;  %3476 = vmatprep.subr.bf16.mxu0 %v4190_v56  ;;  %v1086_v53 = vld [vmem:[%s5199_s2 + $0x930] sm:$0xff] }
 0x33b   : > { %3517 = vmatprep.subr.bf16.mxu1 %v4192_v59  ;;  %v1098_v56 = vld [vmem:[%s5199_s2 + $0x990] sm:$0xff]  ;;  %v1087_v59 = vld [vmem:[%s5199_s2 + $0x938] sm:$0xff] }
 0x33c   : > { %v4382_v20 = vcombine.high %v1086_v53, %v1098_v56  ;;  %v4381_v26 = vcombine.low %v1086_v53, %v1098_v56  ;;  %v4383_v27 = vcombine.low %v1087_v59, %v1099_v17  ;;  %v885_v53 = vld [vmem:[%s5199_s2 + $0x2e8] sm:$0xff] }
 0x33d   : > { %3477 = vmatpush1.bf16.msra.mxu0 %v4189_v21  ;;  %v4384_v21 = vcombine.high %v1087_v59, %v1099_v17 }
 0x33e   : > { %3518 = vmatpush1.bf16.msra.mxu1 %v4191_v22  ;;  %3478 = vmatprep.subr.bf16.mxu0 %v4214_v23  ;;  %v1110_v22 = vld [vmem:[%s5199_s2 + $0x9f0] sm:$0xff] }
 0x33f   : > { %3519 = vmatprep.subr.bf16.mxu1 %v4216_v24  ;;  %v1122_v23 = vld [vmem:[%s5199_s2 + $0xa50] sm:$0xff]  ;;  %v1111_v24 = vld [vmem:[%s5199_s2 + $0x9f8] sm:$0xff] }
 0x340   : > { %v4406_v28 = vcombine.high %v1110_v22, %v1122_v23  ;;  %v4405_v36 = vcombine.low %v1110_v22, %v1122_v23  ;;  %v4407_v37 = vcombine.low %v1111_v24, %v1123_v25  ;;  %v909_v22 = vld [vmem:[%s5199_s2 + $0x3a8] sm:$0xff] }
 0x341   : > { %3479 = vmatpush1.bf16.msra.mxu0 %v4213_v29  ;;  %v4408_v29 = vcombine.high %v1111_v24, %v1123_v25 }
 0x342   : > { %3520 = vmatpush1.bf16.msra.mxu1 %v4215_v32  ;;  %3480 = vmatprep.subr.bf16.mxu0 %v4238_v33  ;;  %v1134_v32 = vld [vmem:[%s5199_s2 + $0xab0] sm:$0xff] }
 0x343   : > { %3521 = vmatprep.subr.bf16.mxu1 %v4240_v34  ;;  %v1146_v33 = vld [vmem:[%s5199_s2 + $0xb10] sm:$0xff]  ;;  %v1135_v34 = vld [vmem:[%s5199_s2 + $0xab8] sm:$0xff] }
 0x344   : > { %v4430_v38 = vcombine.high %v1134_v32, %v1146_v33  ;;  %v4429_v44 = vcombine.low %v1134_v32, %v1146_v33  ;;  %v4431_v45 = vcombine.low %v1135_v34, %v1147_v35  ;;  %v921_v32 = vld [vmem:[%s5199_s2 + $0x408] sm:$0xff] }
 0x345   : > { %3481 = vmatpush1.bf16.msra.mxu0 %v4237_v39  ;;  %v4432_v39 = vcombine.high %v1135_v34, %v1147_v35  ;;  %v933_v33 = vld [vmem:[%s5199_s2 + $0x468] sm:$0xff]  ;;  %v5540_v35 = vld [vmem:[%s5537_s24] sm:$0xff] }
 0x346   : > { %3522 = vmatpush1.bf16.msra.mxu1 %v4239_v40  ;;  %3482 = vmatprep.subr.bf16.mxu0 %v4262_v41  ;;  %v1158_v40 = vld [vmem:[%s5199_s2 + $0xb70] sm:$0xff] }
 0x347   : > { %3523 = vmatprep.subr.bf16.mxu1 %v4264_v42  ;;  %v1170_v41 = vld [vmem:[%s5199_s2 + $0xbd0] sm:$0xff]  ;;  %v1159_v42 = vld [vmem:[%s5199_s2 + $0xb78] sm:$0xff] }
 0x348   : > { %v4454_v46 = vcombine.high %v1158_v40, %v1170_v41  ;;  %v4453_v57 = vcombine.low %v1158_v40, %v1170_v41  ;;  %v4455_v58 = vcombine.low %v1159_v42, %v1171_v43  ;;  %v4911_v40 = vmov 1983009808  }
 0x349   : > { %3483 = vmatpush1.bf16.msra.mxu0 %v4261_v47  ;;  %v4456_v47 = vcombine.high %v1159_v42, %v1171_v43  ;;  %v3765_v41 = vunpack.c.l.s4 %v4911_v40  ;;  %v944_v42 = vld [vmem:[%s5199_s2 + $0x4c0] sm:$0xff] }
 0x34a   : > { %3524 = vmatpush1.bf16.msra.mxu1 %v4263_v50  ;;  %3484 = vmatprep.subr.bf16.mxu0 %v4286_v52  ;;  %v800_v50 = vld [vmem:[%s5199_s2 + $0x40] sm:$0xff] }
 0x34b   : > { %3525 = vmatprep.subr.bf16.mxu1 %v4288_v54  ;;  %v812_v52 = vld [vmem:[%s5199_s2 + $0xa0] sm:$0xff]  ;;  %v801_v54 = vld [vmem:[%s5199_s2 + $0x48] sm:$0xff] }
 0x34c   : > { %v4098_v60 = vcombine.high %v800_v50, %v812_v52  ;;  %v4099_v3 = vcombine.low %v801_v54, %v813_v55  ;;  %v956_v43 = vld [vmem:[%s5199_s2 + $0x520] sm:$0xff] }
 0x34d   : > { %3485 = vmatpush1.bf16.msra.mxu0 %v4285_v61  ;;  %v4100_v61 = vcombine.high %v801_v54, %v813_v55  ;;  %v4219_v55 = vcombine.low %v921_v32, %v933_v33 }
 0x34e   : > { %3526 = vmatpush1.bf16.msra.mxu1 %v4287_v62  ;;  %3486 = vmatprep.subr.bf16.mxu0 %v4310_v63  ;;  %v824_v62 = vld [vmem:[%s5199_s2 + $0x100] sm:$0xff] }
 0x34f   : > { %3527 = vmatprep.subr.bf16.mxu1 %v4312_v0  ;;  %v836_v63 = vld [vmem:[%s5199_s2 + $0x160] sm:$0xff]  ;;  %v4097_v0 = vcombine.low %v800_v50, %v812_v52  ;;  %v1189_v52 = vrot.slane %v5540_v35, %v5252_v51 }
 0x350   : > { %v4122_v4 = vcombine.high %v824_v62, %v836_v63  ;;  %v4121_v10 = vcombine.low %v824_v62, %v836_v63  ;;  %v968_v63 = vld [vmem:[%s5199_s2 + $0x580] sm:$0xff] }
 0x351   : > { %3487 = vmatpush1.bf16.msra.mxu0 %v4309_v5  ;;  %v848_v5 = vld [vmem:[%s5199_s2 + $0x1c0] sm:$0xff] }
 0x352   : > { %3528 = vmatpush1.bf16.msra.mxu1 %v4311_v6  ;;  %3488 = vmatprep.subr.bf16.mxu0 %v4334_v7  ;;  %v860_v6 = vld [vmem:[%s5199_s2 + $0x220] sm:$0xff]  ;;  %v4124_v7 = vcombine.high %v825_v1, %v837_v2 }
 0x353   : > { %3529 = vmatprep.subr.bf16.mxu1 %v4336_v8  ;;  %v849_v8 = vld [vmem:[%s5199_s2 + $0x1c8] sm:$0xff]  ;;  %v4146_v12 = vcombine.high %v848_v5, %v860_v6  ;;  %v4145_v56 = vcombine.low %v848_v5, %v860_v6 }
 0x354   : > { %v4147_v59 = vcombine.low %v849_v8, %v861_v9  ;;  %v969_v5 = vld [vmem:[%s5199_s2 + $0x588] sm:$0xff] }
 0x355   : > { %3489 = vmatpush1.bf16.msra.mxu0 %v4333_v13  ;;  %v4148_v13 = vcombine.high %v849_v8, %v861_v9  ;;  %v981_v6 = vld [vmem:[%s5199_s2 + $0x5e8] sm:$0xff] }
 0x356   : > { %3530 = vmatpush1.bf16.msra.mxu1 %v4335_v14  ;;  %3490 = vmatprep.subr.bf16.mxu0 %v4358_v15  ;;  %v872_v14 = vld [vmem:[%s5199_s2 + $0x280] sm:$0xff] }
 0x357   : > { %3531 = vmatprep.subr.bf16.mxu1 %v4360_v16  ;;  %v884_v15 = vld [vmem:[%s5199_s2 + $0x2e0] sm:$0xff]  ;;  %v873_v16 = vld [vmem:[%s5199_s2 + $0x288] sm:$0xff] }
 0x358   : > { %v4170_v17 = vcombine.high %v872_v14, %v884_v15  ;;  %v4169_v23 = vcombine.low %v872_v14, %v884_v15  ;;  %v4171_v24 = vcombine.low %v873_v16, %v885_v53 }
 0x359   : > { %3491 = vmatpush1.bf16.msra.mxu0 %v4357_v18  ;;  %v4172_v18 = vcombine.high %v873_v16, %v885_v53 }
 0x35a   : > { %3532 = vmatpush1.bf16.msra.mxu1 %v4359_v19  ;;  %3492 = vmatprep.subr.bf16.mxu0 %v4382_v20  ;;  %v896_v19 = vld [vmem:[%s5199_s2 + $0x340] sm:$0xff] }
 0x35b   : > { %3533 = vmatprep.subr.bf16.mxu1 %v4384_v21  ;;  %v908_v20 = vld [vmem:[%s5199_s2 + $0x3a0] sm:$0xff]  ;;  %v897_v21 = vld [vmem:[%s5199_s2 + $0x348] sm:$0xff] }
 0x35c   : > { %v4194_v25 = vcombine.high %v896_v19, %v908_v20  ;;  %v4193_v34 = vcombine.low %v896_v19, %v908_v20  ;;  %v992_v19 = vld [vmem:[%s5199_s2 + $0x640] sm:$0xff] }
 0x35d   : > { %3493 = vmatpush1.bf16.msra.mxu0 %v4381_v26  ;;  %v4196_v26 = vcombine.high %v897_v21, %v909_v22  ;;  %v1004_v20 = vld [vmem:[%s5199_s2 + $0x6a0] sm:$0xff] }
 0x35e   : > { %3534 = vmatpush1.bf16.msra.mxu1 %v4383_v27  ;;  %3494 = vmatprep.subr.bf16.mxu0 %v4406_v28  ;;  %v920_v27 = vld [vmem:[%s5199_s2 + $0x400] sm:$0xff] }
 0x35f   : > { %3535 = vmatprep.subr.bf16.mxu1 %v4408_v29  ;;  %v932_v28 = vld [vmem:[%s5199_s2 + $0x460] sm:$0xff]  ;;  %v5533_v29 = vsub.s32 2, %v5246_v48 }
 0x360   : > { %v4217_v50 = vcombine.low %v920_v27, %v932_v28 }
 0x361   : > { %3495 = vmatpush1.bf16.msra.mxu0 %v4405_v36  ;;  %v5543_v36 = vsub.s32 3, %v5246_v48 }
 0x362   : > { %3536 = vmatpush1.bf16.msra.mxu1 %v4407_v37  ;;  %3496 = vmatprep.subr.bf16.mxu0 %v4430_v38  ;;  %v4195_v37 = vcombine.low %v897_v21, %v909_v22  ;;  %v4218_v38 = vcombine.high %v920_v27, %v932_v28  ;;  %v993_v21 = vld [vmem:[%s5199_s2 + $0x648] sm:$0xff]  ;;  %v4290_v27 = vcombine.high %v992_v19, %v1004_v20 }
 0x363   : > { %3537 = vmatprep.subr.bf16.mxu1 %v4432_v39  ;;  %v4220_v39 = vcombine.high %v921_v32, %v933_v33  ;;  %v1197_v54 = vrot.slane %v5540_v35, %v5543_v36  ;;  %v1005_v22 = vld [vmem:[%s5199_s2 + $0x6a8] sm:$0xff] }
 0x364   : > { %v4292_v33 = vcombine.high %v993_v21, %v1005_v22 }
 0x365   : > { %3497 = vmatpush1.bf16.msra.mxu0 %v4429_v44  ;;  %v1185_v44 = vrot.slane %v5540_v35, %v5249_v49 }
 0x366   : > { %3538 = vmatpush1.bf16.msra.mxu1 %v4431_v45  ;;  %3498 = vmatprep.subr.bf16.mxu0 %v4454_v46  ;;  %v1193_v45 = vrot.slane %v5540_v35, %v5533_v29  ;;  %v945_v46 = vld [vmem:[%s5199_s2 + $0x4c8] sm:$0xff] }
 0x367   : > { %3539 = vmatprep.subr.bf16.mxu1 %v4456_v47  ;;  %v957_v47 = vld [vmem:[%s5199_s2 + $0x528] sm:$0xff] }
 0x368   : > { %v4244_v62 = vcombine.high %v945_v46, %v957_v47  ;;  %v4243_v16 = vcombine.low %v945_v46, %v957_v47  ;;  %v1052_v46 = vld [vmem:[%s5199_s2 + $0x820] sm:$0xff]  ;;  %v1041_v47 = vld [vmem:[%s5199_s2 + $0x7c8] sm:$0xff] }
 0x369   : > { %3499 = vmatpush1.bf16.msra.mxu0 %v4453_v57  ;;  %v4242_v57 = vcombine.high %v944_v42, %v956_v43 }
 0x36a   : > { %3540 = vmatpush1.bf16.msra.mxu1 %v4455_v58  ;;  %3550 = vmatprep.subr.bf16.mxu0 %v4098_v60 }
 0x36b   : > { %3591 = vmatprep.subr.bf16.mxu1 %v4100_v61  ;;  %v3766_v61 = vunpack.c.0.s8 %v3765_v41  ;;  %v4289_v41 = vcombine.low %v992_v19, %v1004_v20  ;;  %v1137_v19 = vld [vmem:[%s5199_s2 + $0xac8] sm:$0xff] }
 0x36c   : > { %3501 = vmatmul.mubr.bf16.vlgmr.msra.gmra.mrb[16].mxu0 %v5305_v31  ;;  %v1149_v20 = vld [vmem:[%s5199_s2 + $0xb28] sm:$0xff] }
 0x36d   : > { %3542 = vmatmul.mubr.bf16.vlgmr.msra.gmra.mrb[16].mxu1 %v5305_v31  ;;  %3551 = vmatpush1.bf16.msra.mxu0 %v4097_v0  ;;  %v980_v0 = vld [vmem:[%s5199_s2 + $0x5e0] sm:$0xff] }
 0x36e   : > { %3582 = vmatprep.mubr.bf16.mxu0 %v5303_v30  ;;  %3592 = vmatpush1.bf16.msra.mxu1 %v4099_v3  ;;  %v4266_v53 = vcombine.high %v968_v63, %v980_v0 }
 0x36f   : > { %3623 = vmatprep.mubr.bf16.mxu1 %v5303_v30  ;;  %3552 = vmatprep.subr.bf16.mxu0 %v4122_v4 }
 0x370   : > { %3593 = vmatprep.subr.bf16.mxu1 %v4124_v7 }
 0x371   : > { %3553 = vmatpush1.bf16.msra.mxu0 %v4121_v10 }
 0x372   : > { %3594 = vmatpush1.bf16.msra.mxu1 %v4123_v11  ;;  %3554 = vmatprep.subr.bf16.mxu0 %v4146_v12  ;;  %v4241_v11 = vcombine.low %v944_v42, %v956_v43  ;;  %v4291_v42 = vcombine.low %v993_v21, %v1005_v22 }
 0x373   : > { %3595 = vmatprep.subr.bf16.mxu1 %v4148_v13 }
 0x375   : > { %3555 = vmatpush1.bf16.msra.mxu0 %v4145_v56 }
 0x376   : > { %3596 = vmatpush1.bf16.msra.mxu1 %v4147_v59  ;;  %3556 = vmatprep.subr.bf16.mxu0 %v4170_v17  ;;  %v5562_v59 = vsub.s32 %v3766_v61, %v5246_v48  ;;  %v1065_v61 = vld [vmem:[%s5199_s2 + $0x888] sm:$0xff] }
 0x377   : > { %3597 = vmatprep.subr.bf16.mxu1 %v4172_v18  ;;  %v4268_v18 = vcombine.high %v969_v5, %v981_v6 }
 0x379   : > { %3557 = vmatpush1.bf16.msra.mxu0 %v4169_v23 }
 0x37a   : > { %3598 = vmatpush1.bf16.msra.mxu1 %v4171_v24  ;;  %3558 = vmatprep.subr.bf16.mxu0 %v4194_v25  ;;  %v4265_v25 = vcombine.low %v968_v63, %v980_v0 }
 0x37b   : > { %3599 = vmatprep.subr.bf16.mxu1 %v4196_v26  ;;  %v4267_v26 = vcombine.low %v969_v5, %v981_v6  ;;  %v1089_v5 = vld [vmem:[%s5199_s2 + $0x948] sm:$0xff] }
 0x37c   : > { %v1101_v6 = vld [vmem:[%s5199_s2 + $0x9a8] sm:$0xff] }
 0x37d   : > { %3559 = vmatpush1.bf16.msra.mxu0 %v4193_v34  ;;  %v1016_v34 = vld [vmem:[%s5199_s2 + $0x700] sm:$0xff] }
 0x37e   : > { %3600 = vmatpush1.bf16.msra.mxu1 %v4195_v37  ;;  %3560 = vmatprep.subr.bf16.mxu0 %v4218_v38  ;;  %v1028_v37 = vld [vmem:[%s5199_s2 + $0x760] sm:$0xff]  ;;  %v1017_v38 = vld [vmem:[%s5199_s2 + $0x708] sm:$0xff] }
 0x37f   : > { %v3256_v58 = vpop.f32.mrb[4].mxu0  ;;  %v3297_v60 = vpop.f32.mrb[4].mxu1  ;;  %3601 = vmatprep.subr.bf16.mxu1 %v4220_v39  ;;  %v1029_v39 = vld [vmem:[%s5199_s2 + $0x768] sm:$0xff]  ;;  %v4314_v43 = vcombine.high %v1016_v34, %v1028_v37 }
 0x380   : > { %v3257_v1 = vadd.f32 %v3256_v58, %v1185_v44  ;;  %v3298_v2 = vadd.f32 %v3297_v60, %v1193_v45  ;;  %v3258_v3 = vpop.f32.mrb[5].mxu0  ;;  %v3299_v4 = vpop.f32.mrb[5].mxu1  ;;  %v4316_v44 = vcombine.high %v1017_v38, %v1029_v39  ;;  %v1040_v45 = vld [vmem:[%s5199_s2 + $0x7c0] sm:$0xff] }
 0x381   : > { %v3259_v7 = vadd.f32 %v3258_v3, %v1189_v52  ;;  %v3300_v8 = vadd.f32 %v3299_v4, %v1197_v54  ;;  %3561 = vmatpush1.bf16.msra.mxu0 %v4217_v50  ;;  %v3260_v9 = vpop.f32.mrb[6].mxu0  ;;  %v3301_v10 = vpop.f32.mrb[6].mxu1  ;;  %v1053_v50 = vld [vmem:[%s5199_s2 + $0x828] sm:$0xff]  ;;  %v4313_v52 = vcombine.low %v1016_v34, %v1028_v37  ;;  %v4315_v54 = vcombine.low %v1017_v38, %v1029_v39  ;;  %v1064_v58 = vld [vmem:[%s5199_s2 + $0x880] sm:$0xff]  ;;  %v802_v38 = vld [vmem:[%s5199_s2 + $0x50] sm:$0xff] }
 0x382   : > { %v3714_v12 = vmax.f32 %v3257_v1, 0.0  ;;  %v3716_v13 = vmax.f32 %v3298_v2, 0.0  ;;  %3602 = vmatpush1.bf16.msra.mxu1 %v4219_v55  ;;  %v3261_v14 = vpop.f32.mrb[7].mxu0  ;;  %v3302_v15 = vpop.f32.mrb[7].mxu1  ;;  %3562 = vmatprep.subr.bf16.mxu0 %v4242_v57  ;;  %v4338_v55 = vcombine.high %v1040_v45, %v1052_v46  ;;  %v4340_v57 = vcombine.high %v1041_v47, %v1053_v50  ;;  %v1076_v60 = vld [vmem:[%s5199_s2 + $0x8e0] sm:$0xff]  ;;  %v814_v39 = vld [vmem:[%s5199_s2 + $0xb0] sm:$0xff] }
 0x383   : > { %v3715_v56 = vmax.f32 %v3259_v7, 0.0  ;;  %v3717_v17 = vmax.f32 %v3300_v8, 0.0  ;;  %3603 = vmatprep.subr.bf16.mxu1 %v4244_v62  ;;  %v1077_v62 = vld [vmem:[%s5199_s2 + $0x8e8] sm:$0xff]  ;;  %v4337_v63 = vcombine.low %v1040_v45, %v1052_v46  ;;  %v4339_v0 = vcombine.low %v1041_v47, %v1053_v50  ;;  %v1088_v3 = vld [vmem:[%s5199_s2 + $0x940] sm:$0xff]  ;;  %v826_v46 = vld [vmem:[%s5199_s2 + $0x110] sm:$0xff] }
 0x384   : > { %v4362_v1 = vcombine.high %v1064_v58, %v1076_v60  ;;  %v4364_v2 = vcombine.high %v1065_v61, %v1077_v62  ;;  %v1100_v4 = vld [vmem:[%s5199_s2 + $0x9a0] sm:$0xff]  ;;  %v4361_v7 = vcombine.low %v1064_v58, %v1076_v60  ;;  %v4363_v8 = vcombine.low %v1065_v61, %v1077_v62  ;;  %v1125_v14 = vld [vmem:[%s5199_s2 + $0xa68] sm:$0xff]  ;;  %v838_v47 = vld [vmem:[%s5199_s2 + $0x170] sm:$0xff] }
 0x385   : > { %v3762_v23 = vcombine.low %v3714_v12, %v3715_v56  ;;  %v3763_v24 = vcombine.low %v3716_v13, %v3717_v17  ;;  %3563 = vmatpush1.bf16.msra.mxu0 %v4241_v11  ;;  %v4386_v9 = vcombine.high %v1088_v3, %v1100_v4  ;;  %v4388_v10 = vcombine.high %v1089_v5, %v1101_v6  ;;  %v1112_v11 = vld [vmem:[%s5199_s2 + $0xa00] sm:$0xff]  ;;  %v1113_v13 = vld [vmem:[%s5199_s2 + $0xa08] sm:$0xff]  ;;  %v850_v58 = vld [vmem:[%s5199_s2 + $0x1d0] sm:$0xff] }
 0x386   : > { %3604 = vmatpush1.bf16.msra.mxu1 %v4243_v16  ;;  %3564 = vmatprep.subr.bf16.mxu0 %v4266_v53  ;;  %v1124_v12 = vld [vmem:[%s5199_s2 + $0xa60] sm:$0xff]  ;;  %v4385_v15 = vcombine.low %v1088_v3, %v1100_v4  ;;  %v4387_v16 = vcombine.low %v1089_v5, %v1101_v6  ;;  %v4412_v56 = vcombine.high %v1113_v13, %v1125_v14  ;;  %v862_v60 = vld [vmem:[%s5199_s2 + $0x230] sm:$0xff]  ;;  %v851_v62 = vld [vmem:[%s5199_s2 + $0x1d8] sm:$0xff] }
 0x387   : > { %v3770_v28 = vrot.slane %v3762_v23, %v5562_v59  ;;  %v3777_v32 = vrot.slane %v3763_v24, %v5562_v59  ;;  %3605 = vmatprep.subr.bf16.mxu1 %v4268_v18  ;;  %v4410_v53 = vcombine.high %v1112_v11, %v1124_v12  ;;  %v1136_v17 = vld [vmem:[%s5199_s2 + $0xac0] sm:$0xff]  ;;  %v4409_v21 = vcombine.low %v1112_v11, %v1124_v12  ;;  %v874_v4 = vld [vmem:[%s5199_s2 + $0x290] sm:$0xff]  ;;  %v875_v6 = vld [vmem:[%s5199_s2 + $0x298] sm:$0xff] }
 0x388   : > { %v1148_v18 = vld [vmem:[%s5199_s2 + $0xb20] sm:$0xff]  ;;  %v4411_v22 = vcombine.low %v1113_v13, %v1125_v14  ;;  %v4436_v24 = vcombine.high %v1137_v19, %v1149_v20  ;;  %v4101_v50 = vcombine.low %v802_v38, %v814_v39  ;;  %v886_v5 = vld [vmem:[%s5199_s2 + $0x2f0] sm:$0xff]  ;;  %v899_v13 = vld [vmem:[%s5199_s2 + $0x358] sm:$0xff] }
 0x389   : > { %v3778_v40 = vcombine.low %v3770_v28, %v3777_v32  ;;  %3565 = vmatpush1.bf16.msra.mxu0 %v4265_v25  ;;  %v4434_v23 = vcombine.high %v1136_v17, %v1148_v18  ;;  %v1160_v25 = vld [vmem:[%s5199_s2 + $0xb80] sm:$0xff]  ;;  %v1173_v28 = vld [vmem:[%s5199_s2 + $0xbe8] sm:$0xff]  ;;  %v4433_v32 = vcombine.low %v1136_v17, %v1148_v18  ;;  %v898_v11 = vld [vmem:[%s5199_s2 + $0x350] sm:$0xff] }
 0x38a   : > { %3606 = vmatpush1.bf16.msra.mxu1 %v4267_v26  ;;  %3566 = vmatprep.subr.bf16.mxu0 %v4290_v27  ;;  %v1172_v26 = vld [vmem:[%s5199_s2 + $0xbe0] sm:$0xff]  ;;  %v1161_v27 = vld [vmem:[%s5199_s2 + $0xb88] sm:$0xff]  ;;  %v910_v12 = vld [vmem:[%s5199_s2 + $0x3b0] sm:$0xff] }
 0x38b   : > { %3870 = vst [vmem:[%s5575_s9] sm:$0xff] %v3778_v40  ;;  %3607 = vmatprep.subr.bf16.mxu1 %v4292_v33  ;;  %v4435_v33 = vcombine.low %v1137_v19, %v1149_v20  ;;  %v4458_v34 = vcombine.high %v1160_v25, %v1172_v26  ;;  %v4460_v37 = vcombine.high %v1161_v27, %v1173_v28  ;;  %v803_v40 = vld [vmem:[%s5199_s2 + $0x58] sm:$0xff]  ;;  %v922_v17 = vld [vmem:[%s5199_s2 + $0x410] sm:$0xff]  ;;  %v5629_v19 = vsub.s32 4, %v5246_v48 }
 0x38c   : > { %v911_v14 = vld [vmem:[%s5199_s2 + $0x3b8] sm:$0xff]  ;;  %v934_v18 = vld [vmem:[%s5199_s2 + $0x470] sm:$0xff]  ;;  %v5632_v20 = vsub.s32 6, %v5246_v48 }
 0x38d   : > { %3567 = vmatpush1.bf16.msra.mxu0 %v4289_v41  ;;  %v815_v41 = vld [vmem:[%s5199_s2 + $0xb8] sm:$0xff] }
 0x38e   : > { %3608 = vmatpush1.bf16.msra.mxu1 %v4291_v42  ;;  %3568 = vmatprep.subr.bf16.mxu0 %v4314_v43  ;;  %v4457_v42 = vcombine.low %v1160_v25, %v1172_v26  ;;  %v4459_v43 = vcombine.low %v1161_v27, %v1173_v28  ;;  %v4104_v45 = vcombine.high %v803_v40, %v815_v41  ;;  %v5640_v25 = vsub.s32 7, %v5246_v48 }
 0x38f   : > { %3609 = vmatprep.subr.bf16.mxu1 %v4316_v44  ;;  %v4102_v44 = vcombine.high %v802_v38, %v814_v39  ;;  %v4199_v26 = vcombine.low %v899_v13, %v911_v14  ;;  %v4222_v27 = vcombine.high %v922_v17, %v934_v18  ;;  %v947_v38 = vld [vmem:[%s5199_s2 + $0x4d8] sm:$0xff] }
 0x390   : > { %v959_v39 = vld [vmem:[%s5199_s2 + $0x538] sm:$0xff] }
 0x391   : > { %3569 = vmatpush1.bf16.msra.mxu0 %v4313_v52  ;;  %v827_v52 = vld [vmem:[%s5199_s2 + $0x118] sm:$0xff] }
 0x392   : > { %3610 = vmatpush1.bf16.msra.mxu1 %v4315_v54  ;;  %3570 = vmatprep.subr.bf16.mxu0 %v4338_v55  ;;  %v839_v54 = vld [vmem:[%s5199_s2 + $0x178] sm:$0xff]  ;;  %v4103_v55 = vcombine.low %v803_v40, %v815_v41  ;;  %v1213_v40 = vrot.slane %v5540_v35, %v5640_v25  ;;  %v4221_v41 = vcombine.low %v922_v17, %v934_v18 }
 0x393   : > { %3611 = vmatprep.subr.bf16.mxu1 %v4340_v57  ;;  %v4126_v57 = vcombine.high %v826_v46, %v838_v47  ;;  %v4128_v61 = vcombine.high %v827_v52, %v839_v54 }
 0x395   : > { %3571 = vmatpush1.bf16.msra.mxu0 %v4337_v63  ;;  %v863_v63 = vld [vmem:[%s5199_s2 + $0x238] sm:$0xff] }
 0x396   : > { %3612 = vmatpush1.bf16.msra.mxu1 %v4339_v0  ;;  %3572 = vmatprep.subr.bf16.mxu0 %v4362_v1  ;;  %v4125_v0 = vcombine.low %v826_v46, %v838_v47  ;;  %v4127_v1 = vcombine.low %v827_v52, %v839_v54  ;;  %v4152_v3 = vcombine.high %v851_v62, %v863_v63  ;;  %v970_v47 = vld [vmem:[%s5199_s2 + $0x590] sm:$0xff] }
 0x397   : > { %3613 = vmatprep.subr.bf16.mxu1 %v4364_v2  ;;  %v4150_v2 = vcombine.high %v850_v58, %v862_v60  ;;  %v4248_v46 = vcombine.high %v947_v38, %v959_v39 }
 0x399   : > { %3573 = vmatpush1.bf16.msra.mxu0 %v4361_v7  ;;  %v887_v7 = vld [vmem:[%s5199_s2 + $0x2f8] sm:$0xff] }
 0x39a   : > { %3614 = vmatpush1.bf16.msra.mxu1 %v4363_v8  ;;  %3574 = vmatprep.subr.bf16.mxu0 %v4386_v9  ;;  %v4149_v8 = vcombine.low %v850_v58, %v862_v60  ;;  %v4151_v9 = vcombine.low %v851_v62, %v863_v63  ;;  %v971_v58 = vld [vmem:[%s5199_s2 + $0x598] sm:$0xff] }
 0x39b   : > { %3615 = vmatprep.subr.bf16.mxu1 %v4388_v10  ;;  %v4174_v10 = vcombine.high %v874_v4, %v886_v5  ;;  %v983_v60 = vld [vmem:[%s5199_s2 + $0x5f8] sm:$0xff] }
 0x39d   : > { %3575 = vmatpush1.bf16.msra.mxu0 %v4385_v15  ;;  %v4173_v15 = vcombine.low %v874_v4, %v886_v5  ;;  %v4247_v5 = vcombine.low %v947_v38, %v959_v39  ;;  %v1054_v38 = vld [vmem:[%s5199_s2 + $0x830] sm:$0xff]  ;;  %v1043_v39 = vld [vmem:[%s5199_s2 + $0x7d8] sm:$0xff] }
 0x39e   : > { %3616 = vmatpush1.bf16.msra.mxu1 %v4387_v16  ;;  %3576 = vmatprep.subr.bf16.mxu0 %v4410_v53  ;;  %v4175_v16 = vcombine.low %v875_v6, %v887_v7  ;;  %v4198_v53 = vcombine.high %v898_v11, %v910_v12 }
 0x39f   : > { %3617 = vmatprep.subr.bf16.mxu1 %v4412_v56  ;;  %v4200_v56 = vcombine.high %v899_v13, %v911_v14 }
 0x3a1   : > { %3577 = vmatpush1.bf16.msra.mxu0 %v4409_v21  ;;  %v923_v21 = vld [vmem:[%s5199_s2 + $0x418] sm:$0xff] }
 0x3a2   : > { %3618 = vmatpush1.bf16.msra.mxu1 %v4411_v22  ;;  %3578 = vmatprep.subr.bf16.mxu0 %v4434_v23  ;;  %v935_v22 = vld [vmem:[%s5199_s2 + $0x478] sm:$0xff]  ;;  %v4197_v23 = vcombine.low %v898_v11, %v910_v12 }
 0x3a3   : > { %3619 = vmatprep.subr.bf16.mxu1 %v4436_v24  ;;  %v5637_v24 = vsub.s32 5, %v5246_v48  ;;  %v4224_v28 = vcombine.high %v923_v21, %v935_v22  ;;  %v995_v11 = vld [vmem:[%s5199_s2 + $0x658] sm:$0xff] }
 0x3a4   : > { %v1007_v12 = vld [vmem:[%s5199_s2 + $0x6b8] sm:$0xff] }
 0x3a5   : > { %3579 = vmatpush1.bf16.msra.mxu0 %v4433_v32  ;;  %v946_v32 = vld [vmem:[%s5199_s2 + $0x4d0] sm:$0xff]  ;;  %v1205_v48 = vrot.slane %v5540_v35, %v5637_v24  ;;  %v4296_v18 = vcombine.high %v995_v11, %v1007_v12 }
 0x3a6   : > { %3620 = vmatpush1.bf16.msra.mxu1 %v4435_v33  ;;  %3580 = vmatprep.subr.bf16.mxu0 %v4458_v34  ;;  %v958_v33 = vld [vmem:[%s5199_s2 + $0x530] sm:$0xff]  ;;  %v1201_v34 = vrot.slane %v5540_v35, %v5629_v19 }
 0x3a7   : > { %3621 = vmatprep.subr.bf16.mxu1 %v4460_v37  ;;  %v1209_v37 = vrot.slane %v5540_v35, %v5632_v20 }
 0x3a9   : > { %3581 = vmatpush1.bf16.msra.mxu0 %v4457_v42  ;;  %v4223_v42 = vcombine.low %v923_v21, %v935_v22  ;;  %v1018_v21 = vld [vmem:[%s5199_s2 + $0x710] sm:$0xff] }
 0x3aa   : > { %3622 = vmatpush1.bf16.msra.mxu1 %v4459_v43  ;;  %3632 = vmatprep.subr.bf16.mxu0 %v4102_v44  ;;  %v4246_v43 = vcombine.high %v946_v32, %v958_v33  ;;  %v1030_v22 = vld [vmem:[%s5199_s2 + $0x770] sm:$0xff] }
 0x3ab   : > { %3673 = vmatprep.subr.bf16.mxu1 %v4104_v45 }
 0x3ac   : > { %3583 = vmatmul.mubr.bf16.vlgmr.msra.gmra.mrb[20].mxu0 %v5305_v31 }
 0x3ad   : > { %3624 = vmatmul.mubr.bf16.vlgmr.msra.gmra.mrb[20].mxu1 %v5305_v31  ;;  %3633 = vmatpush1.bf16.msra.mxu0 %v4101_v50  ;;  %v982_v50 = vld [vmem:[%s5199_s2 + $0x5f0] sm:$0xff] }
 0x3ae   : > { %3664 = vmatprep.mubr.bf16.mxu0 %v5303_v30  ;;  %3674 = vmatpush1.bf16.msra.mxu1 %v4103_v55 }
 0x3af   : > { %3705 = vmatprep.mubr.bf16.mxu1 %v5303_v30  ;;  %3634 = vmatprep.subr.bf16.mxu0 %v4126_v57  ;;  %v4176_v30 = vcombine.high %v875_v6, %v887_v7  ;;  %v4270_v6 = vcombine.high %v970_v47, %v982_v50 }
 0x3b0   : > { %3675 = vmatprep.subr.bf16.mxu1 %v4128_v61 }
 0x3b1   : > { %3635 = vmatpush1.bf16.msra.mxu0 %v4125_v0  ;;  %v4245_v0 = vcombine.low %v946_v32, %v958_v33  ;;  %v4295_v32 = vcombine.low %v995_v11, %v1007_v12  ;;  %v4318_v33 = vcombine.high %v1018_v21, %v1030_v22  ;;  %v1151_v11 = vld [vmem:[%s5199_s2 + $0xb38] sm:$0xff] }
 0x3b2   : > { %3676 = vmatpush1.bf16.msra.mxu1 %v4127_v1  ;;  %3636 = vmatprep.subr.bf16.mxu0 %v4150_v2 }
 0x3b3   : > { %3677 = vmatprep.subr.bf16.mxu1 %v4152_v3 }
 0x3b5   : > { %3637 = vmatpush1.bf16.msra.mxu0 %v4149_v8 }
 0x3b6   : > { %3678 = vmatpush1.bf16.msra.mxu1 %v4151_v9  ;;  %3638 = vmatprep.subr.bf16.mxu0 %v4174_v10  ;;  %v4272_v9 = vcombine.high %v971_v58, %v983_v60  ;;  %v994_v10 = vld [vmem:[%s5199_s2 + $0x650] sm:$0xff] }
 0x3b7   : > { %3679 = vmatprep.subr.bf16.mxu1 %v4176_v30  ;;  %v1006_v30 = vld [vmem:[%s5199_s2 + $0x6b0] sm:$0xff] }
 0x3b9   : > { %3639 = vmatpush1.bf16.msra.mxu0 %v4173_v15  ;;  %v4269_v15 = vcombine.low %v970_v47, %v982_v50  ;;  %v1079_v47 = vld [vmem:[%s5199_s2 + $0x8f8] sm:$0xff] }
 0x3ba   : > { %3680 = vmatpush1.bf16.msra.mxu1 %v4175_v16  ;;  %3640 = vmatprep.subr.bf16.mxu0 %v4198_v53  ;;  %v4271_v16 = vcombine.low %v971_v58, %v983_v60  ;;  %v4294_v53 = vcombine.high %v994_v10, %v1006_v30  ;;  %v1102_v58 = vld [vmem:[%s5199_s2 + $0x9b0] sm:$0xff]  ;;  %v1091_v60 = vld [vmem:[%s5199_s2 + $0x958] sm:$0xff] }
 0x3bb   : > { %3681 = vmatprep.subr.bf16.mxu1 %v4200_v56 }
 0x3bd   : > { %3641 = vmatpush1.bf16.msra.mxu0 %v4197_v23  ;;  %v1019_v23 = vld [vmem:[%s5199_s2 + $0x718] sm:$0xff] }
 0x3be   : > { %3682 = vmatpush1.bf16.msra.mxu1 %v4199_v26  ;;  %3642 = vmatprep.subr.bf16.mxu0 %v4222_v27  ;;  %v1031_v26 = vld [vmem:[%s5199_s2 + $0x778] sm:$0xff] }
 0x3bf   : > { %v3338_v44 = vpop.f32.mrb[8].mxu0  ;;  %v3379_v45 = vpop.f32.mrb[8].mxu1  ;;  %3683 = vmatprep.subr.bf16.mxu1 %v4224_v28  ;;  %v4293_v28 = vcombine.low %v994_v10, %v1006_v30  ;;  %v1150_v10 = vld [vmem:[%s5199_s2 + $0xb30] sm:$0xff]  ;;  %v1139_v30 = vld [vmem:[%s5199_s2 + $0xad8] sm:$0xff] }
 0x3c0   : > { %v3339_v52 = vadd.f32 %v3338_v44, %v1201_v34  ;;  %v3380_v54 = vadd.f32 %v3379_v45, %v1209_v37  ;;  %v3340_v55 = vpop.f32.mrb[9].mxu0  ;;  %v3381_v57 = vpop.f32.mrb[9].mxu1  ;;  %v4320_v34 = vcombine.high %v1019_v23, %v1031_v26  ;;  %v1042_v37 = vld [vmem:[%s5199_s2 + $0x7d0] sm:$0xff] }
 0x3c1   : > { %v3341_v35 = vadd.f32 %v3340_v55, %v1205_v48  ;;  %v3382_v61 = vadd.f32 %v3381_v57, %v1213_v40  ;;  %v3342_v62 = vpop.f32.mrb[10].mxu0  ;;  %v3383_v63 = vpop.f32.mrb[10].mxu1  ;;  %3643 = vmatpush1.bf16.msra.mxu0 %v4221_v41  ;;  %v1055_v48 = vld [vmem:[%s5199_s2 + $0x838] sm:$0xff]  ;;  %v4317_v40 = vcombine.low %v1018_v21, %v1030_v22  ;;  %v4319_v41 = vcombine.low %v1019_v23, %v1031_v26  ;;  %v1066_v44 = vld [vmem:[%s5199_s2 + $0x890] sm:$0xff] }
 0x3c2   : > { %v3718_v1 = vmax.f32 %v3339_v52, 0.0  ;;  %v3720_v2 = vmax.f32 %v3380_v54, 0.0  ;;  %3684 = vmatpush1.bf16.msra.mxu1 %v4223_v42  ;;  %v3343_v3 = vpop.f32.mrb[11].mxu0  ;;  %v3384_v4 = vpop.f32.mrb[11].mxu1  ;;  %3644 = vmatprep.subr.bf16.mxu0 %v4246_v43  ;;  %v4342_v42 = vcombine.high %v1042_v37, %v1054_v38  ;;  %v4344_v43 = vcombine.high %v1043_v39, %v1055_v48  ;;  %v1078_v45 = vld [vmem:[%s5199_s2 + $0x8f0] sm:$0xff] }
 0x3c3   : > { %v3719_v7 = vmax.f32 %v3341_v35, 0.0  ;;  %v3721_v8 = vmax.f32 %v3382_v61, 0.0  ;;  %3685 = vmatprep.subr.bf16.mxu1 %v4248_v46  ;;  %v1067_v46 = vld [vmem:[%s5199_s2 + $0x898] sm:$0xff]  ;;  %v4341_v50 = vcombine.low %v1042_v37, %v1054_v38  ;;  %v4343_v52 = vcombine.low %v1043_v39, %v1055_v48  ;;  %v1090_v57 = vld [vmem:[%s5199_s2 + $0x950] sm:$0xff] }
 0x3c4   : > { %v4366_v54 = vcombine.high %v1066_v44, %v1078_v45  ;;  %v4368_v55 = vcombine.high %v1067_v46, %v1079_v47  ;;  %v1103_v35 = vld [vmem:[%s5199_s2 + $0x9b8] sm:$0xff]  ;;  %v4365_v61 = vcombine.low %v1066_v44, %v1078_v45  ;;  %v4367_v62 = vcombine.low %v1067_v46, %v1079_v47 }
 0x3c5   : > { %v3779_v13 = vcombine.low %v3718_v1, %v3719_v7  ;;  %v3780_v14 = vcombine.low %v3720_v2, %v3721_v8  ;;  %3645 = vmatpush1.bf16.msra.mxu0 %v4245_v0  ;;  %v4390_v63 = vcombine.high %v1090_v57, %v1102_v58  ;;  %v4392_v0 = vcombine.high %v1091_v60, %v1103_v35  ;;  %v1114_v1 = vld [vmem:[%s5199_s2 + $0xa10] sm:$0xff]  ;;  %v1115_v3 = vld [vmem:[%s5199_s2 + $0xa18] sm:$0xff] }
 0x3c6   : > { %3686 = vmatpush1.bf16.msra.mxu1 %v4247_v5  ;;  %3646 = vmatprep.subr.bf16.mxu0 %v4270_v6  ;;  %v1126_v2 = vld [vmem:[%s5199_s2 + $0xa70] sm:$0xff]  ;;  %v1127_v4 = vld [vmem:[%s5199_s2 + $0xa78] sm:$0xff]  ;;  %v4389_v5 = vcombine.low %v1090_v57, %v1102_v58  ;;  %v4391_v6 = vcombine.low %v1091_v60, %v1103_v35  ;;  %v4439_v21 = vcombine.low %v1139_v30, %v1151_v11 }
 0x3c7   : > { %v3787_v56 = vrot.slane %v3779_v13, %v5562_v59  ;;  %v3794_v17 = vrot.slane %v3780_v14, %v5562_v59  ;;  %3687 = vmatprep.subr.bf16.mxu1 %v4272_v9  ;;  %v4414_v7 = vcombine.high %v1114_v1, %v1126_v2  ;;  %v4416_v8 = vcombine.high %v1115_v3, %v1127_v4  ;;  %v1138_v9 = vld [vmem:[%s5199_s2 + $0xad0] sm:$0xff] }
 0x3c8   : > { %v4413_v12 = vcombine.low %v1114_v1, %v1126_v2  ;;  %v4415_v13 = vcombine.low %v1115_v3, %v1127_v4  ;;  %v4438_v14 = vcombine.high %v1138_v9, %v1150_v10 }
 0x3c9   : > { %v3795_v27 = vcombine.low %v3787_v56, %v3794_v17  ;;  %3647 = vmatpush1.bf16.msra.mxu0 %v4269_v15  ;;  %v4440_v15 = vcombine.high %v1139_v30, %v1151_v11  ;;  %v1163_v56 = vld [vmem:[%s5199_s2 + $0xb98] sm:$0xff] }
 0x3ca   : > { %3688 = vmatpush1.bf16.msra.mxu1 %v4271_v16  ;;  %3648 = vmatprep.subr.bf16.mxu0 %v4294_v53  ;;  %v1162_v16 = vld [vmem:[%s5199_s2 + $0xb90] sm:$0xff]  ;;  %v1175_v17 = vld [vmem:[%s5199_s2 + $0xbf8] sm:$0xff] }
 0x3cb   : > { %3871 = vst [vmem:[%s5575_s9 + $0x8] sm:$0xff] %v3795_v27  ;;  %3689 = vmatprep.subr.bf16.mxu1 %v4296_v18  ;;  %v1174_v53 = vld [vmem:[%s5199_s2 + $0xbf0] sm:$0xff]  ;;  %v4437_v18 = vcombine.low %v1138_v9, %v1150_v10  ;;  %v4464_v23 = vcombine.high %v1163_v56, %v1175_v17  ;;  %v4463_v27 = vcombine.low %v1163_v56, %v1175_v17 }
 0x3cc   : > { %v4462_v22 = vcombine.high %v1162_v16, %v1174_v53  ;;  %v4461_v26 = vcombine.low %v1162_v16, %v1174_v53 }
 0x3cd   : > { %3649 = vmatpush1.bf16.msra.mxu0 %v4293_v28  ;;  %v1177_v28 = vld [vmem:[%s5537_s24 + $0x8] sm:$0xff] }
 0x3ce   : > { %3690 = vmatpush1.bf16.msra.mxu1 %v4295_v32  ;;  %3650 = vmatprep.subr.bf16.mxu0 %v4318_v33  ;;  %v1217_v32 = vrot.slane %v1177_v28, %v5249_v49  ;;  %v1225_v33 = vrot.slane %v1177_v28, %v5533_v29  ;;  %v1229_v37 = vrot.slane %v1177_v28, %v5543_v36 }
 0x3cf   : > { %3691 = vmatprep.subr.bf16.mxu1 %v4320_v34  ;;  %v1221_v34 = vrot.slane %v1177_v28, %v5252_v51  ;;  %v1245_v1 = vrot.slane %v1177_v28, %v5640_v25 }
 0x3d1   : > { %3651 = vmatpush1.bf16.msra.mxu0 %v4317_v40 }
 0x3d2   : > { %3692 = vmatpush1.bf16.msra.mxu1 %v4319_v41  ;;  %3652 = vmatprep.subr.bf16.mxu0 %v4342_v42 }
 0x3d3   : > { %3693 = vmatprep.subr.bf16.mxu1 %v4344_v43 }
 0x3d5   : > { %3653 = vmatpush1.bf16.msra.mxu0 %v4341_v50 }
 0x3d6   : > { %3694 = vmatpush1.bf16.msra.mxu1 %v4343_v52  ;;  %3654 = vmatprep.subr.bf16.mxu0 %v4366_v54 }
 0x3d7   : > { %3695 = vmatprep.subr.bf16.mxu1 %v4368_v55 }
 0x3d9   : > { %3655 = vmatpush1.bf16.msra.mxu0 %v4365_v61 }
 0x3da   : > { %3696 = vmatpush1.bf16.msra.mxu1 %v4367_v62  ;;  %3656 = vmatprep.subr.bf16.mxu0 %v4390_v63  ;;  %v1233_v62 = vrot.slane %v1177_v28, %v5629_v19  ;;  %v1241_v63 = vrot.slane %v1177_v28, %v5632_v20 }
 0x3db   : > { %3697 = vmatprep.subr.bf16.mxu1 %v4392_v0  ;;  %v1237_v0 = vrot.slane %v1177_v28, %v5637_v24 }
 0x3dd   : > { %3657 = vmatpush1.bf16.msra.mxu0 %v4389_v5 }
 0x3de   : > { %3698 = vmatpush1.bf16.msra.mxu1 %v4391_v6  ;;  %3658 = vmatprep.subr.bf16.mxu0 %v4414_v7 }
 0x3df   : > { %3699 = vmatprep.subr.bf16.mxu1 %v4416_v8 }
 0x3e1   : > { %3659 = vmatpush1.bf16.msra.mxu0 %v4413_v12 }
 0x3e2   : > { %3700 = vmatpush1.bf16.msra.mxu1 %v4415_v13  ;;  %3660 = vmatprep.subr.bf16.mxu0 %v4438_v14 }
 0x3e3   : > { %3701 = vmatprep.subr.bf16.mxu1 %v4440_v15 }
 0x3e5   : > { %3661 = vmatpush1.bf16.msra.mxu0 %v4437_v18 }
 0x3e6   : > { %3702 = vmatpush1.bf16.msra.mxu1 %v4439_v21  ;;  %3662 = vmatprep.subr.bf16.mxu0 %v4462_v22  ;;  %v1178_v22 = vld [vmem:[%s5537_s24 + $0x10] sm:$0xff] }
 0x3e7   : > { %3703 = vmatprep.subr.bf16.mxu1 %v4464_v23  ;;  %v1249_v23 = vrot.slane %v1178_v22, %v5249_v49  ;;  %v1261_v28 = vrot.slane %v1178_v22, %v5543_v36 }
 0x3e9   : > { %3663 = vmatpush1.bf16.msra.mxu0 %v4461_v26  ;;  %v1257_v26 = vrot.slane %v1178_v22, %v5533_v29 }
 0x3ea   : > { %3704 = vmatpush1.bf16.msra.mxu1 %v4463_v27  ;;  %v1253_v27 = vrot.slane %v1178_v22, %v5252_v51 }
 0x3ec   : > { %3665 = vmatmul.mubr.bf16.vlgmr.msra.gmra.mrb[24].mxu0 %v5305_v31 }
 0x3ed   : > { %3706 = vmatmul.mubr.bf16.vlgmr.msra.gmra.mrb[24].mxu1 %v5305_v31 }
 0x3ff   : > { %v3420_v38 = vpop.f32.mrb[12].mxu0 }
 0x400   : > { %v3421_v39 = vadd.f32 %v3420_v38, %v1217_v32  ;;  %v3461_v48 = vpop.f32.mrb[12].mxu1  ;;  %v3422_v40 = vpop.f32.mrb[13].mxu0 }
 0x401   : > { %v3462_v41 = vadd.f32 %v3461_v48, %v1225_v33  ;;  %v3423_v42 = vadd.f32 %v3422_v40, %v1221_v34  ;;  %v3463_v43 = vpop.f32.mrb[13].mxu1  ;;  %v3424_v44 = vpop.f32.mrb[14].mxu0 }
 0x402   : > { %v3722_v45 = vmax.f32 %v3421_v39, 0.0  ;;  %v3464_v31 = vadd.f32 %v3463_v43, %v1229_v37  ;;  %v3465_v46 = vpop.f32.mrb[14].mxu1  ;;  %v3425_v47 = vpop.f32.mrb[15].mxu0 }
 0x403   : > { %v3724_v50 = vmax.f32 %v3462_v41, 0.0  ;;  %v3723_v52 = vmax.f32 %v3423_v42, 0.0  ;;  %v3466_v54 = vpop.f32.mrb[15].mxu1 }
 0x404   : > { %v3725_v55 = vmax.f32 %v3464_v31, 0.0  ;;  %v1273_v54 = vrot.slane %v1178_v22, %v5632_v20 }
 0x405   : > { %v3796_v57 = vcombine.low %v3722_v45, %v3723_v52  ;;  %v1265_v52 = vrot.slane %v1178_v22, %v5629_v19 }
 0x406   : > { %v3797_v58 = vcombine.low %v3724_v50, %v3725_v55  ;;  %v1269_v55 = vrot.slane %v1178_v22, %v5637_v24 }
 0x407   : > { %v3804_v60 = vrot.slane %v3796_v57, %v5562_v59  ;;  %v1277_v57 = vrot.slane %v1178_v22, %v5640_v25 }
 0x408   : > { %v3811_v35 = vrot.slane %v3797_v58, %v5562_v59 }
 0x40a   : > { %v3812_v61 = vcombine.low %v3804_v60, %v3811_v35 }
 0x40c   : > { %3872 = vst [vmem:[%s5575_s9 + $0x10] sm:$0xff] %v3812_v61 }
 0x43f   : > { %v3502_v2 = vpop.f32.mrb[16].mxu0 }
 0x440   : > { %v3503_v3 = vadd.f32 %v3502_v2, %v1233_v62  ;;  %v3543_v4 = vpop.f32.mrb[16].mxu1  ;;  %v3504_v5 = vpop.f32.mrb[17].mxu0 }
 0x441   : > { %v3544_v6 = vadd.f32 %v3543_v4, %v1241_v63  ;;  %v3505_v7 = vadd.f32 %v3504_v5, %v1237_v0  ;;  %v3545_v8 = vpop.f32.mrb[17].mxu1  ;;  %v3506_v9 = vpop.f32.mrb[18].mxu0 }
 0x442   : > { %v3726_v10 = vmax.f32 %v3503_v3, 0.0  ;;  %v3546_v30 = vadd.f32 %v3545_v8, %v1245_v1  ;;  %v3547_v11 = vpop.f32.mrb[18].mxu1  ;;  %v3507_v12 = vpop.f32.mrb[19].mxu0 }
 0x443   : > { %v3728_v13 = vmax.f32 %v3544_v6, 0.0  ;;  %v3727_v14 = vmax.f32 %v3505_v7, 0.0  ;;  %v3548_v15 = vpop.f32.mrb[19].mxu1 }
 0x444   : > { %v3729_v16 = vmax.f32 %v3546_v30, 0.0 }
 0x445   : > { %v3813_v53 = vcombine.low %v3726_v10, %v3727_v14 }
 0x446   : > { %v3814_v56 = vcombine.low %v3728_v13, %v3729_v16 }
 0x447   : > { %v3821_v17 = vrot.slane %v3813_v53, %v5562_v59 }
 0x448   : > { %v3828_v18 = vrot.slane %v3814_v56, %v5562_v59 }
 0x44a   : > { %v3829_v21 = vcombine.low %v3821_v17, %v3828_v18 }
 0x44c   : > { %3873 = vst [vmem:[%s5575_s9 + $0x18] sm:$0xff] %v3829_v21 }
 0x47f   : > { %v3584_v32 = vpop.f32.mrb[20].mxu0 }
 0x480   : > { %v3585_v33 = vadd.f32 %v3584_v32, %v1249_v23  ;;  %v3625_v34 = vpop.f32.mrb[20].mxu1  ;;  %v3586_v37 = vpop.f32.mrb[21].mxu0 }
 0x481   : > { %v3626_v38 = vadd.f32 %v3625_v34, %v1257_v26  ;;  %v3587_v39 = vadd.f32 %v3586_v37, %v1253_v27  ;;  %v3627_v48 = vpop.f32.mrb[21].mxu1  ;;  %v3588_v40 = vpop.f32.mrb[22].mxu0 }
 0x482   : > { %v3730_v41 = vmax.f32 %v3585_v33, 0.0  ;;  %v3628_v42 = vadd.f32 %v3627_v48, %v1261_v28  ;;  %v3629_v43 = vpop.f32.mrb[22].mxu1  ;;  %v3589_v44 = vpop.f32.mrb[23].mxu0 }
 0x483   : > { %v3732_v49 = vmax.f32 %v3626_v38, 0.0  ;;  %v3731_v45 = vmax.f32 %v3587_v39, 0.0  ;;  %v3630_v29 = vpop.f32.mrb[23].mxu1 }
 0x484   : > { %v3733_v31 = vmax.f32 %v3628_v42, 0.0 }
 0x485   : > { %v3830_v51 = vcombine.low %v3730_v41, %v3731_v45 }
 0x486   : > { %v3831_v46 = vcombine.low %v3732_v49, %v3733_v31 }
 0x487   : > { %v3838_v36 = vrot.slane %v3830_v51, %v5562_v59 }
 0x488   : > { %v3845_v47 = vrot.slane %v3831_v46, %v5562_v59 }
 0x48a   : > { %v3846_v50 = vcombine.low %v3838_v36, %v3845_v47 }
 0x48c   : > { %3874 = vst [vmem:[%s5575_s9 + $0x20] sm:$0xff] %v3846_v50 }
 0x4bf   : > { %v3666_v58 = vpop.f32.mrb[24].mxu0 }
 0x4c0   : > { %v3667_v60 = vadd.f32 %v3666_v58, %v1265_v52  ;;  %v3707_v35 = vpop.f32.mrb[24].mxu1  ;;  %v3668_v61 = vpop.f32.mrb[25].mxu0 }
 0x4c1   : > { %v3708_v62 = vadd.f32 %v3707_v35, %v1273_v54  ;;  %v3669_v63 = vadd.f32 %v3668_v61, %v1269_v55  ;;  %v3709_v0 = vpop.f32.mrb[25].mxu1  ;;  %v3670_v1 = vpop.f32.mrb[26].mxu0 }
 0x4c2   : > { %v3734_v2 = vmax.f32 %v3667_v60, 0.0  ;;  %v3710_v3 = vadd.f32 %v3709_v0, %v1277_v57  ;;  %v3711_v19 = vpop.f32.mrb[26].mxu1  ;;  %v3671_v20 = vpop.f32.mrb[27].mxu0 }
 0x4c3   : > { %v3736_v4 = vmax.f32 %v3708_v62, 0.0  ;;  %v3735_v24 = vmax.f32 %v3669_v63, 0.0  ;;  %v3712_v25 = vpop.f32.mrb[27].mxu1 }
 0x4c4   : > { %v3737_v5 = vmax.f32 %v3710_v3, 0.0 }
 0x4c5   : > { %v3847_v6 = vcombine.low %v3734_v2, %v3735_v24 }
 0x4c6   : > { %v3848_v7 = vcombine.low %v3736_v4, %v3737_v5 }
 0x4c7   : > { %v3855_v8 = vrot.slane %v3847_v6, %v5562_v59 }
 0x4c8   : > { %v3862_v9 = vrot.slane %v3848_v7, %v5562_v59 }
 0x4ca   : > { %v3863_v10 = vcombine.low %v3855_v8, %v3862_v9 }
 0x4cc   : > { %3875 = vst [vmem:[%s5575_s9 + $0x28] sm:$0xff] %v3863_v10 }
 0x4cd   : > { %4832 = shalt.err (!%p4829_p4)
}
 0x4ce   : > { %s4833_s17 = scalar_lea.hbm %s5729_s30, 768  ;;  %s4837_s29 = scalar_lea.hbm %s5836_s16, 1536 }
 0x4cf   : > { %p4834_p0 = scmp.ne.s32.totalorder %s5729_s30, %s4833_s17  ;;  %p4838_p13 = scmp.lt.u32.totalorder %s5729_s30, %s5836_s16 }
 0x4d0   : > { %p4839_p6 = scmp.lt.u32.totalorder %s4837_s29, %s4833_s17  ;;  %p4841_p9 = scmp.lt.u32.totalorder %s4833_s17, %s5729_s30 }
 0x4d1   : > { %p4835_p3 = pnand %p4834_p0, %p5837_p8 }
 0x4d2   : > { %p4840_p7 = por %p4839_p6, %p4838_p13 }
 0x4d3   : > { %p4836_p11 = pneg %p4835_p3 }
 0x4d4   : > { %p4842_p5 = por %p4841_p9, %p4840_p7 }
 0x4d6   : > { %p4843_p12 = pnand %p4842_p5, %p4836_p11 }
 0x4d8   : > { %4846 = shalt.err (!%p4843_p12)
}
 0x4d9   : > { %4496 = dma.vmem_to_hbm [thread:$0]  (%p5837_p8), %s5731_s19, 768, %s5729_s30, %s3877_s1  }
 0x4da PF: > { %s5838_s12 = sld [smem:[#allocation18_spill]]  ;;  %s5839_s5 = sld [smem:[#allocation21_spill]] }
 0x4db   : > { %p5841_p2 = scmp.ge.s32.totalorder %s4897_s27, 2 }
 0x4e0   : > { %s3903_s7 = sand.u32 1, %s5838_s12   ;;  %p5840_p1 = scmp.ne.s32.totalorder %s5839_s5, 0 }
 0x4e1   : > { %s3904_s24 = scalar_lea.sflag [#allocation4], %s3903_s7 }
 0x4e2   : > { %p4519_p10 = pnand %p5841_p2, %p5840_p1 }
 0x4e4   : > { %4880 = dma.done.wait (!%p4519_p10), %s3904_s24, 768  }
 0x4e5   : > { %4882 = vsyncadd (!%p4519_p10), %s3904_s24, 4294966528  ;;  %s5842_s27 = sld [smem:[#allocation19_spill]]  ;;  %s5843_s14 = sld [smem:[#allocation20_spill]] }
 0x4e6   : > { %s5844_s24 = smov %s4889_s25  ;;  %s5845_s25 = smov %s4893_s26 }
 0x4eb   : > { %p20_p4 = scmp.ge.s32.totalorder %s5842_s27, 4   ;;  %s5846_s26 = smov %s5843_s14 }
 0x4ed   :  { %22 = sbr.rel (!%p20_p4) target bundleno = 11 (0xb), region = 119 }
 0x4f4   :  { %3909 = vsyncpa [#allocation3], 1 }
 0x4f5   :  { %3911 = vsyncpa [#allocation3 + $0x1], 1 }
 0x4f6   :  { %3912 = vsyncpa [#allocation6], 1 }
 0x4f7   :  { %3913 = vsyncpa [#allocation9], 1 }
 0x4f8   :  { %3914 = vsyncpa [#allocation4], 1 }
 0x4f9   :  { %3916 = vsyncpa [#allocation4 + $0x1], 1 }

</bundles_post_ra>
